<compile_context>
chip_gen: v6e
topology: v6e:2x2x1
jax: 0.10.0
libtpu: 0.0.40
codegen_flags: <defaults>
</compile_context>

<pallas_src>
import functools

import jax
import jax.numpy as jnp
from jax.experimental import pallas as pl
from jax.experimental.pallas import tpu as pltpu

EPS = 1e-5
TILE_M = 512            # max rows per M-tile (multiple of 16 for bf16 sublanes)


def _round_up(x, m):
    return ((x + m - 1) // m) * m


def _cdiv(a, b):
    return -(-a // b)


def _mosaic(vmem_bytes):
    vb = int(min(max(vmem_bytes, 4 << 20), 32 << 20))
    return pltpu.CompilerParams(dimension_semantics=("arbitrary",),
                                vmem_limit_bytes=vb)


# ----------------------------- Pallas kernels ------------------------------ #

def fused_conv_bn_relu_kernel(p_ref, w_ref, g_ref, b_ref, o_ref, y_scr,
                              *, m_true):
    """One pallas_call per conv layer.

    Per grid step i: y_tile = P_tile @ W (bf16 in, f32 acc) -> f32 VMEM scratch.
    On the last step: batch-stat mean/var over the TRUE M rows (padded rows are
    exact zeros), fold gamma/beta into scale/shift, apply + ReLU, store bf16.
    """
    i = pl.program_id(0)
    tm = p_ref.shape[0]

    y = jnp.dot(p_ref[...], w_ref[...], preferred_element_type=jnp.float32)
    row0 = pl.multiple_of(i * tm, 16)
    y_scr[pl.ds(row0, tm), :] = y

    @pl.when(i == pl.num_programs(0) - 1)
    def _():
        yy = y_scr[...]                                   # (mp, cp) f32
        inv_m = jnp.float32(1.0 / m_true)
        s = jnp.sum(yy, axis=0, keepdims=True)
        q = jnp.sum(yy * yy, axis=0, keepdims=True)
        mean = s * inv_m
        var = q * inv_m - mean * mean
        scale = g_ref[...] * jax.lax.rsqrt(var + EPS)
        shift = b_ref[...] - mean * scale
        o_ref[...] = jnp.maximum(yy * scale + shift, 0.0).astype(o_ref.dtype)


def maxpool_kernel(*refs):
    """refs = (tap_0, ..., tap_{KK-1}, out); running max (f32 compute)."""
    o_ref = refs[-1]
    r = refs[0][...].astype(jnp.float32)
    for t_ref in refs[1:-1]:
        r = jnp.maximum(r, t_ref[...].astype(jnp.float32))
    o_ref[...] = r.astype(o_ref.dtype)


# ------------------------------ JAX glue ----------------------------------- #

def _tap_slices(x, kh, kw, sh, sw, ph, pw):
    """x: NHWC -> list of KH*KW tap views, each (N, OH, OW, C); plus OH, OW."""
    n, h, w, c = x.shape
    xp = jnp.pad(x, ((0, 0), (ph, ph), (pw, pw), (0, 0)))
    oh = (h + 2 * ph - kh) // sh + 1
    ow = (w + 2 * pw - kw) // sw + 1
    taps = []
    for i in range(kh):
        for j in range(kw):
            taps.append(xp[:, i:i + sh * (oh - 1) + 1:sh,
                           j:j + sw * (ow - 1) + 1:sw, :])
    return taps, oh, ow


def conv_bn_relu(x, prm):
    """Conv2d (bias dropped: cancels under batch-stat BN) + BatchNorm + ReLU."""
    kh, kw, sh, sw, ph, pw = (prm[k] for k in ("kh", "kw", "sh", "sw", "ph", "pw"))
    w, gamma, beta = prm["w"], prm["gamma"], prm["beta"]

    n, _, _, cin = x.shape
    taps, oh, ow = _tap_slices(x, kh, kw, sh, sw, ph, pw)
    m = n * oh * ow
    k = kh * kw * cin
    cout = w.shape[-1]

    # im2col patch matrix, bf16, columns ordered (kh, kw, cin).
    pmat = jnp.concatenate(taps, axis=-1).reshape(m, k)
    wmat = w.reshape(k, cout).astype(jnp.bfloat16)

    kp = _round_up(k, 128)
    cp = _round_up(cout, 128)
    n_tiles = _cdiv(m, TILE_M)
    tm = _round_up(_cdiv(m, n_tiles), 16)      # minimize M padding
    mp = n_tiles * tm

    pmat = jnp.pad(pmat, ((0, mp - m), (0, kp - k)))
    wmat = jnp.pad(wmat, ((0, kp - k), (0, cp - cout)))
    gp = jnp.pad(gamma, (0, cp - cout)).reshape(1, cp)
    bp = jnp.pad(beta, (0, cp - cout)).reshape(1, cp)

    # Right-sized VMEM budget: double-buffered inputs + scratch + output.
    vmem = (2 * (tm * kp * 2 + kp * cp * 2 + 2 * cp * 4)
            + mp * cp * 4 + 2 * mp * cp * 2 + (2 << 20))

    out = pl.pallas_call(
        functools.partial(fused_conv_bn_relu_kernel, m_true=m),
        grid=(n_tiles,),
        out_shape=jax.ShapeDtypeStruct((mp, cp), jnp.bfloat16),
        in_specs=[
            pl.BlockSpec((tm, kp), lambda i: (i, 0)),
            pl.BlockSpec((kp, cp), lambda i: (0, 0)),
            pl.BlockSpec((1, cp), lambda i: (0, 0)),
            pl.BlockSpec((1, cp), lambda i: (0, 0)),
        ],
        # Whole output stays resident across the (arbitrary) grid axis and is
        # written once on the last step.
        out_specs=pl.BlockSpec((mp, cp), lambda i: (0, 0)),
        scratch_shapes=[pltpu.VMEM((mp, cp), jnp.float32)],
        compiler_params=_mosaic(vmem),
    )(pmat, wmat, gp, bp)

    return out[:m, :cout].reshape(n, oh, ow, cout)


def maxpool(x, k, s):
    """3x3 stride-2 max pool: 9 taps -> one running-max kernel, bf16 I/O."""
    n, _, _, c = x.shape
    taps, oh, ow = _tap_slices(x, k, k, s, s, 0, 0)
    m = n * oh * ow
    flat = [t.reshape(m, c) for t in taps]

    vmem = 2 * (len(flat) + 1) * m * c * 2 + (2 << 20)

    out = pl.pallas_call(
        maxpool_kernel,
        grid=(1,),
        out_shape=jax.ShapeDtypeStruct((m, c), x.dtype),
        in_specs=[pl.BlockSpec((m, c), lambda i: (0, 0))] * len(flat),
        out_specs=pl.BlockSpec((m, c), lambda i: (0, 0)),
        compiler_params=_mosaic(vmem),
    )(*flat)
    return out.reshape(n, oh, ow, c)


# --------------------------- parameter init -------------------------------- #

def init_basic_conv(key, cin, cout, kh, kw, sh=1, sw=1, ph=0, pw=0):
    k0, k1, k2 = jax.random.split(key, 3)
    fan_in = float(cin * kh * kw)
    return dict(
        w=jax.random.normal(k0, (kh, kw, cin, cout), jnp.float32) / jnp.sqrt(fan_in),
        # Conv bias intentionally omitted: under training-mode BatchNorm a
        # per-channel constant added before mean subtraction cancels exactly.
        gamma=1.0 + 0.1 * jax.random.normal(k1, (cout,), jnp.float32),
        beta=0.1 * jax.random.normal(k2, (cout,), jnp.float32),
        kh=kh, kw=kw, sh=sh, sw=sw, ph=ph, pw=pw,
    )


def init_stem(key, in_channels):
    ks = jax.random.split(key, 11)
    return {
        "conv1":     init_basic_conv(ks[0], in_channels, 32, 3, 3, sh=2, sw=2),
        "conv2":     init_basic_conv(ks[1], 32, 32, 3, 3),
        "conv3":     init_basic_conv(ks[2], 32, 64, 3, 3, ph=1, pw=1),
        "conv4":     init_basic_conv(ks[3], 64, 96, 3, 3, sh=2, sw=2),
        "conv5_1_1": init_basic_conv(ks[4], 160, 64, 1, 1),
        "conv5_1_2": init_basic_conv(ks[5], 64, 96, 3, 3),
        "conv5_2_1": init_basic_conv(ks[6], 160, 64, 1, 1),
        "conv5_2_2": init_basic_conv(ks[7], 64, 64, 7, 1, ph=3, pw=0),
        "conv5_2_3": init_basic_conv(ks[8], 64, 64, 1, 7, ph=0, pw=3),
        "conv5_2_4": init_basic_conv(ks[9], 64, 96, 3, 3),
        "conv6":     init_basic_conv(ks[10], 192, 192, 3, 3, sh=2, sw=2),
    }


def _fuse_1x1(p1, p2):
    """Fuse two 1x1 BasicConv2d's sharing the same input (BN is per-channel)."""
    return dict(
        w=jnp.concatenate([p1["w"], p2["w"]], axis=-1),
        gamma=jnp.concatenate([p1["gamma"], p2["gamma"]], axis=-1),
        beta=jnp.concatenate([p1["beta"], p2["beta"]], axis=-1),
        kh=1, kw=1, sh=1, sw=1, ph=0, pw=0,
    )


# ------------------------------- forward ----------------------------------- #

def stem_forward(params, x_nchw):
    # NCHW -> NHWC, bf16 activations throughout the stem.
    x = jnp.transpose(x_nchw, (0, 2, 3, 1)).astype(jnp.bfloat16)

    # conv3(conv2(conv1(x))) appears twice in the PyTorch forward; with
    # batch-statistics BN both evaluations are identical -> computed once.
    c1 = conv_bn_relu(x, params["conv1"])
    c2 = conv_bn_relu(c1, params["conv2"])
    c3 = conv_bn_relu(c2, params["conv3"])

    out1_1 = maxpool(c3, 3, 2)
    out1_2 = conv_bn_relu(c3, params["conv4"])
    out1 = jnp.concatenate([out1_1, out1_2], axis=-1)             # 160 ch

    # conv5_1_1 / conv5_2_1 fused into one Cout=128 1x1 matmul, split after.
    n1 = params["conv5_1_1"]["w"].shape[-1]
    head = conv_bn_relu(out1, _fuse_1x1(params["conv5_1_1"], params["conv5_2_1"]))

    b1 = conv_bn_relu(head[..., :n1], params["conv5_1_2"])

    b2 = conv_bn_relu(head[..., n1:], params["conv5_2_2"])
    b2 = conv_bn_relu(b2, params["conv5_2_3"])
    b2 = conv_bn_relu(b2, params["conv5_2_4"])
    out2 = jnp.concatenate([b1, b2], axis=-1)                     # 192 ch

    out3_1 = conv_bn_relu(out2, params["conv6"])
    out3_2 = maxpool(out2, 3, 2)
    out3 = jnp.concatenate([out3_1, out3_2], axis=-1)             # 384 ch

    # NHWC -> NCHW, cast back to f32 only at the final stem output.
    return jnp.transpose(out3, (0, 3, 1, 2)).astype(jnp.float32)


if __name__ == "__main__":
    key = jax.random.PRNGKey(0)
    kx, kp = jax.random.split(key)

    in_channels = 3
    x = jax.random.normal(kx, (2, in_channels, 35, 35), jnp.float32)  # NCHW
    params = init_stem(kp, in_channels)

    fwd = jax.jit(functools.partial(stem_forward, params))
    out = fwd(x)
    jax.block_until_ready(out)

    assert out.shape == (2, 384, 2, 2), out.shape
    assert out.dtype == jnp.float32
    assert bool(jnp.all(jnp.isfinite(out)))
    print("KERNEL_OK")
</pallas_src>

<mosaic_0001>
module attributes {stable_mosaic.version = 11 : i64} {
  func.func @fused_conv_bn_relu_kernel(%arg0: i32, %arg1: memref<304x128xbf16, #tpu.memory_space<vmem>>, %arg2: memref<128x128xbf16, #tpu.memory_space<vmem>>, %arg3: memref<1x128xf32, #tpu.memory_space<vmem>>, %arg4: memref<1x128xf32, #tpu.memory_space<vmem>>, %arg5: memref<608x128xbf16, #tpu.memory_space<vmem>>, %arg6: memref<608x128xf32, #tpu.memory_space<vmem>>) attributes {dimension_semantics = [#tpu.dimension_semantics<arbitrary>], iteration_bounds = array<i64: 2>, scalar_prefetch = 0 : i64, scratch_operands = 1 : i64, tpu.core_type = #tpu.core_type<tc>, window_params = [{transform_indices = @transform_0, window_bounds = array<i64: 304, 128>}, {pipeline_mode = #tpu.pipeline_mode<synchronous>, transform_indices = @transform_1, window_bounds = array<i64: 128, 128>}, {pipeline_mode = #tpu.pipeline_mode<synchronous>, transform_indices = @transform_2, window_bounds = array<i64: 1, 128>}, {pipeline_mode = #tpu.pipeline_mode<synchronous>, transform_indices = @transform_3, window_bounds = array<i64: 1, 128>}, {pipeline_mode = #tpu.pipeline_mode<synchronous>, transform_indices = @transform_4, window_bounds = array<i64: 608, 128>}]} {
    %c0 = arith.constant 0 : index
    %c0_0 = arith.constant 0 : index
    %0 = vector.load %arg1[%c0, %c0_0] : memref<304x128xbf16, #tpu.memory_space<vmem>>, vector<304x128xbf16>
    %c0_1 = arith.constant 0 : index
    %c0_2 = arith.constant 0 : index
    %1 = vector.load %arg2[%c0_1, %c0_2] : memref<128x128xbf16, #tpu.memory_space<vmem>>, vector<128x128xbf16>
    %cst = arith.constant dense<0.000000e+00> : vector<304x128xf32>
    %2 = tpu.matmul %0, %1, %cst {dimension_numbers = #tpu.dot_dimension_numbers<[1], [0], [0], [1], [0, 0, 1, 1], [], []>} : vector<304x128xbf16>, vector<128x128xbf16>, vector<304x128xf32> -> vector<304x128xf32>
    %c304_i32 = arith.constant 304 : i32
    %3 = arith.muli %arg0, %c304_i32 : i32
    %4 = tpu.assume_multiple %3, 16 : i32
    %5 = arith.index_cast %4 : i32 to index
    %c0_3 = arith.constant 0 : index
    %6 = vector.load %arg6[%5, %c0_3] : memref<608x128xf32, #tpu.memory_space<vmem>>, vector<304x128xf32>
    tpu.vector_store %arg6[%5, %c0_3], %2 {strides = array<i32>} : memref<608x128xf32, #tpu.memory_space<vmem>>, vector<304x128xf32>,
    %c1_i32 = arith.constant 1 : i32
    %7 = arith.cmpi eq, %arg0, %c1_i32 : i32
    %8 = arith.extui %7 : i1 to i32
    %c0_i32 = arith.constant 0 : i32
    %9 = arith.cmpi ne, %8, %c0_i32 : i32
    scf.if %9 {
      %c0_4 = arith.constant 0 : index
      %c0_5 = arith.constant 0 : index
      %10 = vector.load %arg6[%c0_4, %c0_5] : memref<608x128xf32, #tpu.memory_space<vmem>>, vector<608x128xf32>
      %cst_6 = arith.constant dense<0.000000e+00> : vector<128xf32>
      %11 = vector.multi_reduction <add>, %10, %cst_6 [0] : vector<608x128xf32> to vector<128xf32>
      %12 = vector.shape_cast %11 : vector<128xf32> to vector<1x128xf32>
      %13 = arith.mulf %10, %10 : vector<608x128xf32>
      %cst_7 = arith.constant dense<0.000000e+00> : vector<128xf32>
      %14 = vector.multi_reduction <add>, %13, %cst_7 [0] : vector<608x128xf32> to vector<128xf32>
      %15 = vector.shape_cast %14 : vector<128xf32> to vector<1x128xf32>
      %cst_8 = arith.constant 0.00173010386 : f32
      %16 = vector.broadcast %cst_8 : f32 to vector<1x128xf32>
      %17 = arith.mulf %12, %16 : vector<1x128xf32>
      %cst_9 = arith.constant 0.00173010386 : f32
      %18 = vector.broadcast %cst_9 : f32 to vector<1x128xf32>
      %19 = arith.mulf %15, %18 : vector<1x128xf32>
      %20 = arith.mulf %17, %17 : vector<1x128xf32>
      %21 = arith.subf %19, %20 : vector<1x128xf32>
      %c0_10 = arith.constant 0 : index
      %c0_11 = arith.constant 0 : index
      %22 = vector.load %arg3[%c0_10, %c0_11] : memref<1x128xf32, #tpu.memory_space<vmem>>, vector<1x128xf32>
      %cst_12 = arith.constant 9.99999974E-6 : f32
      %23 = vector.broadcast %cst_12 : f32 to vector<1x128xf32>
      %24 = arith.addf %21, %23 : vector<1x128xf32>
      %25 = math.rsqrt %24 : vector<1x128xf32>
      %26 = arith.mulf %22, %25 : vector<1x128xf32>
      %c0_13 = arith.constant 0 : index
      %c0_14 = arith.constant 0 : index
      %27 = vector.load %arg4[%c0_13, %c0_14] : memref<1x128xf32, #tpu.memory_space<vmem>>, vector<1x128xf32>
      %28 = arith.mulf %17, %26 : vector<1x128xf32>
      %29 = arith.subf %27, %28 : vector<1x128xf32>
      %30 = vector.broadcast %26 : vector<1x128xf32> to vector<608x128xf32>
      %31 = arith.mulf %10, %30 : vector<608x128xf32>
      %32 = vector.broadcast %29 : vector<1x128xf32> to vector<608x128xf32>
      %33 = arith.addf %31, %32 : vector<608x128xf32>
      %cst_15 = arith.constant 0.000000e+00 : f32
      %34 = vector.broadcast %cst_15 : f32 to vector<608x128xf32>
      %35 = arith.maximumf %33, %34 : vector<608x128xf32>
      %36 = arith.truncf %35 : vector<608x128xf32> to vector<608x128xbf16>
      %c0_16 = arith.constant 0 : index
      %c0_17 = arith.constant 0 : index
      %37 = vector.load %arg5[%c0_16, %c0_17] : memref<608x128xbf16, #tpu.memory_space<vmem>>, vector<608x128xbf16>
      tpu.vector_store %arg5[%c0_16, %c0_17], %36 {strides = array<i32>} : memref<608x128xbf16, #tpu.memory_space<vmem>>, vector<608x128xbf16>,
    } else {
    }
    return
  }
  func.func @transform_0(%arg0: i32) -> (i32, i32) {
    %c0_i32 = arith.constant 0 : i32
    %c0_i32_0 = arith.constant 0 : i32
    return %arg0, %c0_i32 : i32, i32
  }
  func.func @transform_1(%arg0: i32) -> (i32, i32) {
    %c0_i32 = arith.constant 0 : i32
    %c0_i32_0 = arith.constant 0 : i32
    %c0_i32_1 = arith.constant 0 : i32
    return %c0_i32, %c0_i32_0 : i32, i32
  }
  func.func @transform_2(%arg0: i32) -> (i32, i32) {
    %c0_i32 = arith.constant 0 : i32
    %c0_i32_0 = arith.constant 0 : i32
    %c0_i32_1 = arith.constant 0 : i32
    return %c0_i32, %c0_i32_0 : i32, i32
  }
  func.func @transform_3(%arg0: i32) -> (i32, i32) {
    %c0_i32 = arith.constant 0 : i32
    %c0_i32_0 = arith.constant 0 : i32
    %c0_i32_1 = arith.constant 0 : i32
    return %c0_i32, %c0_i32_0 : i32, i32
  }
  func.func @transform_4(%arg0: i32) -> (i32, i32) {
    %c0_i32 = arith.constant 0 : i32
    %c0_i32_0 = arith.constant 0 : i32
    %c0_i32_1 = arith.constant 0 : i32
    return %c0_i32, %c0_i32_0 : i32, i32
  }
}

module attributes {stable_mosaic.version = 11 : i64} {
  func.func @fused_conv_bn_relu_kernel(%arg0: i32, %arg1: memref<464x384xbf16, #tpu.memory_space<vmem>>, %arg2: memref<384x128xbf16, #tpu.memory_space<vmem>>, %arg3: memref<1x128xf32, #tpu.memory_space<vmem>>, %arg4: memref<1x128xf32, #tpu.memory_space<vmem>>, %arg5: memref<464x128xbf16, #tpu.memory_space<vmem>>, %arg6: memref<464x128xf32, #tpu.memory_space<vmem>>) attributes {dimension_semantics = [#tpu.dimension_semantics<arbitrary>], iteration_bounds = array<i64: 1>, scalar_prefetch = 0 : i64, scratch_operands = 1 : i64, tpu.core_type = #tpu.core_type<tc>, window_params = [{transform_indices = @transform_0, window_bounds = array<i64: 464, 384>}, {pipeline_mode = #tpu.pipeline_mode<synchronous>, transform_indices = @transform_1, window_bounds = array<i64: 384, 128>}, {pipeline_mode = #tpu.pipeline_mode<synchronous>, transform_indices = @transform_2, window_bounds = array<i64: 1, 128>}, {pipeline_mode = #tpu.pipeline_mode<synchronous>, transform_indices = @transform_3, window_bounds = array<i64: 1, 128>}, {pipeline_mode = #tpu.pipeline_mode<synchronous>, transform_indices = @transform_4, window_bounds = array<i64: 464, 128>}]} {
    %c0 = arith.constant 0 : index
    %c0_0 = arith.constant 0 : index
    %0 = vector.load %arg1[%c0, %c0_0] : memref<464x384xbf16, #tpu.memory_space<vmem>>, vector<464x384xbf16>
    %c0_1 = arith.constant 0 : index
    %c0_2 = arith.constant 0 : index
    %1 = vector.load %arg2[%c0_1, %c0_2] : memref<384x128xbf16, #tpu.memory_space<vmem>>, vector<384x128xbf16>
    %cst = arith.constant dense<0.000000e+00> : vector<464x128xf32>
    %2 = tpu.matmul %0, %1, %cst {dimension_numbers = #tpu.dot_dimension_numbers<[1], [0], [0], [1], [0, 0, 1, 1], [], []>} : vector<464x384xbf16>, vector<384x128xbf16>, vector<464x128xf32> -> vector<464x128xf32>
    %c464_i32 = arith.constant 464 : i32
    %3 = arith.muli %arg0, %c464_i32 : i32
    %4 = tpu.assume_multiple %3, 16 : i32
    %5 = arith.index_cast %4 : i32 to index
    %c0_3 = arith.constant 0 : index
    %6 = vector.load %arg6[%5, %c0_3] : memref<464x128xf32, #tpu.memory_space<vmem>>, vector<464x128xf32>
    tpu.vector_store %arg6[%5, %c0_3], %2 {strides = array<i32>} : memref<464x128xf32, #tpu.memory_space<vmem>>, vector<464x128xf32>,
    %c0_i32 = arith.constant 0 : i32
    %7 = arith.cmpi eq, %arg0, %c0_i32 : i32
    %8 = arith.extui %7 : i1 to i32
    %c0_i32_4 = arith.constant 0 : i32
    %9 = arith.cmpi ne, %8, %c0_i32_4 : i32
    scf.if %9 {
      %c0_5 = arith.constant 0 : index
      %c0_6 = arith.constant 0 : index
      %10 = vector.load %arg6[%c0_5, %c0_6] : memref<464x128xf32, #tpu.memory_space<vmem>>, vector<464x128xf32>
      %cst_7 = arith.constant dense<0.000000e+00> : vector<128xf32>
      %11 = vector.multi_reduction <add>, %10, %cst_7 [0] : vector<464x128xf32> to vector<128xf32>
      %12 = vector.shape_cast %11 : vector<128xf32> to vector<1x128xf32>
      %13 = arith.mulf %10, %10 : vector<464x128xf32>
      %cst_8 = arith.constant dense<0.000000e+00> : vector<128xf32>
      %14 = vector.multi_reduction <add>, %13, %cst_8 [0] : vector<464x128xf32> to vector<128xf32>
      %15 = vector.shape_cast %14 : vector<128xf32> to vector<1x128xf32>
      %cst_9 = arith.constant 0.00222222228 : f32
      %16 = vector.broadcast %cst_9 : f32 to vector<1x128xf32>
      %17 = arith.mulf %12, %16 : vector<1x128xf32>
      %cst_10 = arith.constant 0.00222222228 : f32
      %18 = vector.broadcast %cst_10 : f32 to vector<1x128xf32>
      %19 = arith.mulf %15, %18 : vector<1x128xf32>
      %20 = arith.mulf %17, %17 : vector<1x128xf32>
      %21 = arith.subf %19, %20 : vector<1x128xf32>
      %c0_11 = arith.constant 0 : index
      %c0_12 = arith.constant 0 : index
      %22 = vector.load %arg3[%c0_11, %c0_12] : memref<1x128xf32, #tpu.memory_space<vmem>>, vector<1x128xf32>
      %cst_13 = arith.constant 9.99999974E-6 : f32
      %23 = vector.broadcast %cst_13 : f32 to vector<1x128xf32>
      %24 = arith.addf %21, %23 : vector<1x128xf32>
      %25 = math.rsqrt %24 : vector<1x128xf32>
      %26 = arith.mulf %22, %25 : vector<1x128xf32>
      %c0_14 = arith.constant 0 : index
      %c0_15 = arith.constant 0 : index
      %27 = vector.load %arg4[%c0_14, %c0_15] : memref<1x128xf32, #tpu.memory_space<vmem>>, vector<1x128xf32>
      %28 = arith.mulf %17, %26 : vector<1x128xf32>
      %29 = arith.subf %27, %28 : vector<1x128xf32>
      %30 = vector.broadcast %26 : vector<1x128xf32> to vector<464x128xf32>
      %31 = arith.mulf %10, %30 : vector<464x128xf32>
      %32 = vector.broadcast %29 : vector<1x128xf32> to vector<464x128xf32>
      %33 = arith.addf %31, %32 : vector<464x128xf32>
      %cst_16 = arith.constant 0.000000e+00 : f32
      %34 = vector.broadcast %cst_16 : f32 to vector<464x128xf32>
      %35 = arith.maximumf %33, %34 : vector<464x128xf32>
      %36 = arith.truncf %35 : vector<464x128xf32> to vector<464x128xbf16>
      %c0_17 = arith.constant 0 : index
      %c0_18 = arith.constant 0 : index
      %37 = vector.load %arg5[%c0_17, %c0_18] : memref<464x128xbf16, #tpu.memory_space<vmem>>, vector<464x128xbf16>
      tpu.vector_store %arg5[%c0_17, %c0_18], %36 {strides = array<i32>} : memref<464x128xbf16, #tpu.memory_space<vmem>>, vector<464x128xbf16>,
    } else {
    }
    return
  }
  func.func @transform_0(%arg0: i32) -> (i32, i32) {
    %c0_i32 = arith.constant 0 : i32
    %c0_i32_0 = arith.constant 0 : i32
    return %arg0, %c0_i32 : i32, i32
  }
  func.func @transform_1(%arg0: i32) -> (i32, i32) {
    %c0_i32 = arith.constant 0 : i32
    %c0_i32_0 = arith.constant 0 : i32
    %c0_i32_1 = arith.constant 0 : i32
    return %c0_i32, %c0_i32_0 : i32, i32
  }
  func.func @transform_2(%arg0: i32) -> (i32, i32) {
    %c0_i32 = arith.constant 0 : i32
    %c0_i32_0 = arith.constant 0 : i32
    %c0_i32_1 = arith.constant 0 : i32
    return %c0_i32, %c0_i32_0 : i32, i32
  }
  func.func @transform_3(%arg0: i32) -> (i32, i32) {
    %c0_i32 = arith.constant 0 : i32
    %c0_i32_0 = arith.constant 0 : i32
    %c0_i32_1 = arith.constant 0 : i32
    return %c0_i32, %c0_i32_0 : i32, i32
  }
  func.func @transform_4(%arg0: i32) -> (i32, i32) {
    %c0_i32 = arith.constant 0 : i32
    %c0_i32_0 = arith.constant 0 : i32
    %c0_i32_1 = arith.constant 0 : i32
    return %c0_i32, %c0_i32_0 : i32, i32
  }
}

module attributes {stable_mosaic.version = 11 : i64} {
  func.func @maxpool_kernel(%arg0: i32, %arg1: memref<98x64xbf16, #tpu.memory_space<vmem>>, %arg2: memref<98x64xbf16, #tpu.memory_space<vmem>>, %arg3: memref<98x64xbf16, #tpu.memory_space<vmem>>, %arg4: memref<98x64xbf16, #tpu.memory_space<vmem>>, %arg5: memref<98x64xbf16, #tpu.memory_space<vmem>>, %arg6: memref<98x64xbf16, #tpu.memory_space<vmem>>, %arg7: memref<98x64xbf16, #tpu.memory_space<vmem>>, %arg8: memref<98x64xbf16, #tpu.memory_space<vmem>>, %arg9: memref<98x64xbf16, #tpu.memory_space<vmem>>, %arg10: memref<98x64xbf16, #tpu.memory_space<vmem>>) attributes {dimension_semantics = [#tpu.dimension_semantics<arbitrary>], iteration_bounds = array<i64: 1>, scalar_prefetch = 0 : i64, scratch_operands = 0 : i64, tpu.core_type = #tpu.core_type<tc>, window_params = [{pipeline_mode = #tpu.pipeline_mode<synchronous>, transform_indices = @transform_0, window_bounds = array<i64: 98, 64>}, {pipeline_mode = #tpu.pipeline_mode<synchronous>, transform_indices = @transform_1, window_bounds = array<i64: 98, 64>}, {pipeline_mode = #tpu.pipeline_mode<synchronous>, transform_indices = @transform_2, window_bounds = array<i64: 98, 64>}, {pipeline_mode = #tpu.pipeline_mode<synchronous>, transform_indices = @transform_3, window_bounds = array<i64: 98, 64>}, {pipeline_mode = #tpu.pipeline_mode<synchronous>, transform_indices = @transform_4, window_bounds = array<i64: 98, 64>}, {pipeline_mode = #tpu.pipeline_mode<synchronous>, transform_indices = @transform_5, window_bounds = array<i64: 98, 64>}, {pipeline_mode = #tpu.pipeline_mode<synchronous>, transform_indices = @transform_6, window_bounds = array<i64: 98, 64>}, {pipeline_mode = #tpu.pipeline_mode<synchronous>, transform_indices = @transform_7, window_bounds = array<i64: 98, 64>}, {pipeline_mode = #tpu.pipeline_mode<synchronous>, transform_indices = @transform_8, window_bounds = array<i64: 98, 64>}, {pipeline_mode = #tpu.pipeline_mode<synchronous>, transform_indices = @transform_9, window_bounds = array<i64: 98, 64>}]} {
    %c0 = arith.constant 0 : index
    %c0_0 = arith.constant 0 : index
    %0 = vector.load %arg1[%c0, %c0_0] : memref<98x64xbf16, #tpu.memory_space<vmem>>, vector<98x64xbf16>
    %1 = arith.extf %0 : vector<98x64xbf16> to vector<98x64xf32>
    %c0_1 = arith.constant 0 : index
    %c0_2 = arith.constant 0 : index
    %2 = vector.load %arg2[%c0_1, %c0_2] : memref<98x64xbf16, #tpu.memory_space<vmem>>, vector<98x64xbf16>
    %3 = arith.extf %2 : vector<98x64xbf16> to vector<98x64xf32>
    %4 = arith.maximumf %1, %3 : vector<98x64xf32>
    %c0_3 = arith.constant 0 : index
    %c0_4 = arith.constant 0 : index
    %5 = vector.load %arg3[%c0_3, %c0_4] : memref<98x64xbf16, #tpu.memory_space<vmem>>, vector<98x64xbf16>
    %6 = arith.extf %5 : vector<98x64xbf16> to vector<98x64xf32>
    %7 = arith.maximumf %4, %6 : vector<98x64xf32>
    %c0_5 = arith.constant 0 : index
    %c0_6 = arith.constant 0 : index
    %8 = vector.load %arg4[%c0_5, %c0_6] : memref<98x64xbf16, #tpu.memory_space<vmem>>, vector<98x64xbf16>
    %9 = arith.extf %8 : vector<98x64xbf16> to vector<98x64xf32>
    %10 = arith.maximumf %7, %9 : vector<98x64xf32>
    %c0_7 = arith.constant 0 : index
    %c0_8 = arith.constant 0 : index
    %11 = vector.load %arg5[%c0_7, %c0_8] : memref<98x64xbf16, #tpu.memory_space<vmem>>, vector<98x64xbf16>
    %12 = arith.extf %11 : vector<98x64xbf16> to vector<98x64xf32>
    %13 = arith.maximumf %10, %12 : vector<98x64xf32>
    %c0_9 = arith.constant 0 : index
    %c0_10 = arith.constant 0 : index
    %14 = vector.load %arg6[%c0_9, %c0_10] : memref<98x64xbf16, #tpu.memory_space<vmem>>, vector<98x64xbf16>
    %15 = arith.extf %14 : vector<98x64xbf16> to vector<98x64xf32>
    %16 = arith.maximumf %13, %15 : vector<98x64xf32>
    %c0_11 = arith.constant 0 : index
    %c0_12 = arith.constant 0 : index
    %17 = vector.load %arg7[%c0_11, %c0_12] : memref<98x64xbf16, #tpu.memory_space<vmem>>, vector<98x64xbf16>
    %18 = arith.extf %17 : vector<98x64xbf16> to vector<98x64xf32>
    %19 = arith.maximumf %16, %18 : vector<98x64xf32>
    %c0_13 = arith.constant 0 : index
    %c0_14 = arith.constant 0 : index
    %20 = vector.load %arg8[%c0_13, %c0_14] : memref<98x64xbf16, #tpu.memory_space<vmem>>, vector<98x64xbf16>
    %21 = arith.extf %20 : vector<98x64xbf16> to vector<98x64xf32>
    %22 = arith.maximumf %19, %21 : vector<98x64xf32>
    %c0_15 = arith.constant 0 : index
    %c0_16 = arith.constant 0 : index
    %23 = vector.load %arg9[%c0_15, %c0_16] : memref<98x64xbf16, #tpu.memory_space<vmem>>, vector<98x64xbf16>
    %24 = arith.extf %23 : vector<98x64xbf16> to vector<98x64xf32>
    %25 = arith.maximumf %22, %24 : vector<98x64xf32>
    %26 = arith.truncf %25 : vector<98x64xf32> to vector<98x64xbf16>
    %c0_17 = arith.constant 0 : index
    %c0_18 = arith.constant 0 : index
    %27 = vector.load %arg10[%c0_17, %c0_18] : memref<98x64xbf16, #tpu.memory_space<vmem>>, vector<98x64xbf16>
    tpu.vector_store %arg10[%c0_17, %c0_18], %26 {strides = array<i32>} : memref<98x64xbf16, #tpu.memory_space<vmem>>, vector<98x64xbf16>,
    return
  }
  func.func @transform_0(%arg0: i32) -> (i32, i32) {
    %c0_i32 = arith.constant 0 : i32
    %c0_i32_0 = arith.constant 0 : i32
    %c0_i32_1 = arith.constant 0 : i32
    return %c0_i32, %c0_i32_0 : i32, i32
  }
  func.func @transform_1(%arg0: i32) -> (i32, i32) {
    %c0_i32 = arith.constant 0 : i32
    %c0_i32_0 = arith.constant 0 : i32
    %c0_i32_1 = arith.constant 0 : i32
    return %c0_i32, %c0_i32_0 : i32, i32
  }
  func.func @transform_2(%arg0: i32) -> (i32, i32) {
    %c0_i32 = arith.constant 0 : i32
    %c0_i32_0 = arith.constant 0 : i32
    %c0_i32_1 = arith.constant 0 : i32
    return %c0_i32, %c0_i32_0 : i32, i32
  }
  func.func @transform_3(%arg0: i32) -> (i32, i32) {
    %c0_i32 = arith.constant 0 : i32
    %c0_i32_0 = arith.constant 0 : i32
    %c0_i32_1 = arith.constant 0 : i32
    return %c0_i32, %c0_i32_0 : i32, i32
  }
  func.func @transform_4(%arg0: i32) -> (i32, i32) {
    %c0_i32 = arith.constant 0 : i32
    %c0_i32_0 = arith.constant 0 : i32
    %c0_i32_1 = arith.constant 0 : i32
    return %c0_i32, %c0_i32_0 : i32, i32
  }
  func.func @transform_5(%arg0: i32) -> (i32, i32) {
    %c0_i32 = arith.constant 0 : i32
    %c0_i32_0 = arith.constant 0 : i32
    %c0_i32_1 = arith.constant 0 : i32
    return %c0_i32, %c0_i32_0 : i32, i32
  }
  func.func @transform_6(%arg0: i32) -> (i32, i32) {
    %c0_i32 = arith.constant 0 : i32
    %c0_i32_0 = arith.constant 0 : i32
    %c0_i32_1 = arith.constant 0 : i32
    return %c0_i32, %c0_i32_0 : i32, i32
  }
  func.func @transform_7(%arg0: i32) -> (i32, i32) {
    %c0_i32 = arith.constant 0 : i32
    %c0_i32_0 = arith.constant 0 : i32
    %c0_i32_1 = arith.constant 0 : i32
    return %c0_i32, %c0_i32_0 : i32, i32
  }
  func.func @transform_8(%arg0: i32) -> (i32, i32) {
    %c0_i32 = arith.constant 0 : i32
    %c0_i32_0 = arith.constant 0 : i32
    %c0_i32_1 = arith.constant 0 : i32
    return %c0_i32, %c0_i32_0 : i32, i32
  }
  func.func @transform_9(%arg0: i32) -> (i32, i32) {
    %c0_i32 = arith.constant 0 : i32
    %c0_i32_0 = arith.constant 0 : i32
    %c0_i32_1 = arith.constant 0 : i32
    return %c0_i32, %c0_i32_0 : i32, i32
  }
}

module attributes {stable_mosaic.version = 11 : i64} {
  func.func @fused_conv_bn_relu_kernel(%arg0: i32, %arg1: memref<112x640xbf16, #tpu.memory_space<vmem>>, %arg2: memref<640x128xbf16, #tpu.memory_space<vmem>>, %arg3: memref<1x128xf32, #tpu.memory_space<vmem>>, %arg4: memref<1x128xf32, #tpu.memory_space<vmem>>, %arg5: memref<112x128xbf16, #tpu.memory_space<vmem>>, %arg6: memref<112x128xf32, #tpu.memory_space<vmem>>) attributes {dimension_semantics = [#tpu.dimension_semantics<arbitrary>], iteration_bounds = array<i64: 1>, scalar_prefetch = 0 : i64, scratch_operands = 1 : i64, tpu.core_type = #tpu.core_type<tc>, window_params = [{transform_indices = @transform_0, window_bounds = array<i64: 112, 640>}, {pipeline_mode = #tpu.pipeline_mode<synchronous>, transform_indices = @transform_1, window_bounds = array<i64: 640, 128>}, {pipeline_mode = #tpu.pipeline_mode<synchronous>, transform_indices = @transform_2, window_bounds = array<i64: 1, 128>}, {pipeline_mode = #tpu.pipeline_mode<synchronous>, transform_indices = @transform_3, window_bounds = array<i64: 1, 128>}, {pipeline_mode = #tpu.pipeline_mode<synchronous>, transform_indices = @transform_4, window_bounds = array<i64: 112, 128>}]} {
    %c0 = arith.constant 0 : index
    %c0_0 = arith.constant 0 : index
    %0 = vector.load %arg1[%c0, %c0_0] : memref<112x640xbf16, #tpu.memory_space<vmem>>, vector<112x640xbf16>
    %c0_1 = arith.constant 0 : index
    %c0_2 = arith.constant 0 : index
    %1 = vector.load %arg2[%c0_1, %c0_2] : memref<640x128xbf16, #tpu.memory_space<vmem>>, vector<640x128xbf16>
    %cst = arith.constant dense<0.000000e+00> : vector<112x128xf32>
    %2 = tpu.matmul %0, %1, %cst {dimension_numbers = #tpu.dot_dimension_numbers<[1], [0], [0], [1], [0, 0, 1, 1], [], []>} : vector<112x640xbf16>, vector<640x128xbf16>, vector<112x128xf32> -> vector<112x128xf32>
    %c112_i32 = arith.constant 112 : i32
    %3 = arith.muli %arg0, %c112_i32 : i32
    %4 = tpu.assume_multiple %3, 16 : i32
    %5 = arith.index_cast %4 : i32 to index
    %c0_3 = arith.constant 0 : index
    %6 = vector.load %arg6[%5, %c0_3] : memref<112x128xf32, #tpu.memory_space<vmem>>, vector<112x128xf32>
    tpu.vector_store %arg6[%5, %c0_3], %2 {strides = array<i32>} : memref<112x128xf32, #tpu.memory_space<vmem>>, vector<112x128xf32>,
    %c0_i32 = arith.constant 0 : i32
    %7 = arith.cmpi eq, %arg0, %c0_i32 : i32
    %8 = arith.extui %7 : i1 to i32
    %c0_i32_4 = arith.constant 0 : i32
    %9 = arith.cmpi ne, %8, %c0_i32_4 : i32
    scf.if %9 {
      %c0_5 = arith.constant 0 : index
      %c0_6 = arith.constant 0 : index
      %10 = vector.load %arg6[%c0_5, %c0_6] : memref<112x128xf32, #tpu.memory_space<vmem>>, vector<112x128xf32>
      %cst_7 = arith.constant dense<0.000000e+00> : vector<128xf32>
      %11 = vector.multi_reduction <add>, %10, %cst_7 [0] : vector<112x128xf32> to vector<128xf32>
      %12 = vector.shape_cast %11 : vector<128xf32> to vector<1x128xf32>
      %13 = arith.mulf %10, %10 : vector<112x128xf32>
      %cst_8 = arith.constant dense<0.000000e+00> : vector<128xf32>
      %14 = vector.multi_reduction <add>, %13, %cst_8 [0] : vector<112x128xf32> to vector<128xf32>
      %15 = vector.shape_cast %14 : vector<128xf32> to vector<1x128xf32>
      %cst_9 = arith.constant 0.0102040814 : f32
      %16 = vector.broadcast %cst_9 : f32 to vector<1x128xf32>
      %17 = arith.mulf %12, %16 : vector<1x128xf32>
      %cst_10 = arith.constant 0.0102040814 : f32
      %18 = vector.broadcast %cst_10 : f32 to vector<1x128xf32>
      %19 = arith.mulf %15, %18 : vector<1x128xf32>
      %20 = arith.mulf %17, %17 : vector<1x128xf32>
      %21 = arith.subf %19, %20 : vector<1x128xf32>
      %c0_11 = arith.constant 0 : index
      %c0_12 = arith.constant 0 : index
      %22 = vector.load %arg3[%c0_11, %c0_12] : memref<1x128xf32, #tpu.memory_space<vmem>>, vector<1x128xf32>
      %cst_13 = arith.constant 9.99999974E-6 : f32
      %23 = vector.broadcast %cst_13 : f32 to vector<1x128xf32>
      %24 = arith.addf %21, %23 : vector<1x128xf32>
      %25 = math.rsqrt %24 : vector<1x128xf32>
      %26 = arith.mulf %22, %25 : vector<1x128xf32>
      %c0_14 = arith.constant 0 : index
      %c0_15 = arith.constant 0 : index
      %27 = vector.load %arg4[%c0_14, %c0_15] : memref<1x128xf32, #tpu.memory_space<vmem>>, vector<1x128xf32>
      %28 = arith.mulf %17, %26 : vector<1x128xf32>
      %29 = arith.subf %27, %28 : vector<1x128xf32>
      %30 = vector.broadcast %26 : vector<1x128xf32> to vector<112x128xf32>
      %31 = arith.mulf %10, %30 : vector<112x128xf32>
      %32 = vector.broadcast %29 : vector<1x128xf32> to vector<112x128xf32>
      %33 = arith.addf %31, %32 : vector<112x128xf32>
      %cst_16 = arith.constant 0.000000e+00 : f32
      %34 = vector.broadcast %cst_16 : f32 to vector<112x128xf32>
      %35 = arith.maximumf %33, %34 : vector<112x128xf32>
      %36 = arith.truncf %35 : vector<112x128xf32> to vector<112x128xbf16>
      %c0_17 = arith.constant 0 : index
      %c0_18 = arith.constant 0 : index
      %37 = vector.load %arg5[%c0_17, %c0_18] : memref<112x128xbf16, #tpu.memory_space<vmem>>, vector<112x128xbf16>
      tpu.vector_store %arg5[%c0_17, %c0_18], %36 {strides = array<i32>} : memref<112x128xbf16, #tpu.memory_space<vmem>>, vector<112x128xbf16>,
    } else {
    }
    return
  }
  func.func @transform_0(%arg0: i32) -> (i32, i32) {
    %c0_i32 = arith.constant 0 : i32
    %c0_i32_0 = arith.constant 0 : i32
    return %arg0, %c0_i32 : i32, i32
  }
  func.func @transform_1(%arg0: i32) -> (i32, i32) {
    %c0_i32 = arith.constant 0 : i32
    %c0_i32_0 = arith.constant 0 : i32
    %c0_i32_1 = arith.constant 0 : i32
    return %c0_i32, %c0_i32_0 : i32, i32
  }
  func.func @transform_2(%arg0: i32) -> (i32, i32) {
    %c0_i32 = arith.constant 0 : i32
    %c0_i32_0 = arith.constant 0 : i32
    %c0_i32_1 = arith.constant 0 : i32
    return %c0_i32, %c0_i32_0 : i32, i32
  }
  func.func @transform_3(%arg0: i32) -> (i32, i32) {
    %c0_i32 = arith.constant 0 : i32
    %c0_i32_0 = arith.constant 0 : i32
    %c0_i32_1 = arith.constant 0 : i32
    return %c0_i32, %c0_i32_0 : i32, i32
  }
  func.func @transform_4(%arg0: i32) -> (i32, i32) {
    %c0_i32 = arith.constant 0 : i32
    %c0_i32_0 = arith.constant 0 : i32
    %c0_i32_1 = arith.constant 0 : i32
    return %c0_i32, %c0_i32_0 : i32, i32
  }
}

module attributes {stable_mosaic.version = 11 : i64} {
  func.func @fused_conv_bn_relu_kernel(%arg0: i32, %arg1: memref<112x256xbf16, #tpu.memory_space<vmem>>, %arg2: memref<256x128xbf16, #tpu.memory_space<vmem>>, %arg3: memref<1x128xf32, #tpu.memory_space<vmem>>, %arg4: memref<1x128xf32, #tpu.memory_space<vmem>>, %arg5: memref<112x128xbf16, #tpu.memory_space<vmem>>, %arg6: memref<112x128xf32, #tpu.memory_space<vmem>>) attributes {dimension_semantics = [#tpu.dimension_semantics<arbitrary>], iteration_bounds = array<i64: 1>, scalar_prefetch = 0 : i64, scratch_operands = 1 : i64, tpu.core_type = #tpu.core_type<tc>, window_params = [{transform_indices = @transform_0, window_bounds = array<i64: 112, 256>}, {pipeline_mode = #tpu.pipeline_mode<synchronous>, transform_indices = @transform_1, window_bounds = array<i64: 256, 128>}, {pipeline_mode = #tpu.pipeline_mode<synchronous>, transform_indices = @transform_2, window_bounds = array<i64: 1, 128>}, {pipeline_mode = #tpu.pipeline_mode<synchronous>, transform_indices = @transform_3, window_bounds = array<i64: 1, 128>}, {pipeline_mode = #tpu.pipeline_mode<synchronous>, transform_indices = @transform_4, window_bounds = array<i64: 112, 128>}]} {
    %c0 = arith.constant 0 : index
    %c0_0 = arith.constant 0 : index
    %0 = vector.load %arg1[%c0, %c0_0] : memref<112x256xbf16, #tpu.memory_space<vmem>>, vector<112x256xbf16>
    %c0_1 = arith.constant 0 : index
    %c0_2 = arith.constant 0 : index
    %1 = vector.load %arg2[%c0_1, %c0_2] : memref<256x128xbf16, #tpu.memory_space<vmem>>, vector<256x128xbf16>
    %cst = arith.constant dense<0.000000e+00> : vector<112x128xf32>
    %2 = tpu.matmul %0, %1, %cst {dimension_numbers = #tpu.dot_dimension_numbers<[1], [0], [0], [1], [0, 0, 1, 1], [], []>} : vector<112x256xbf16>, vector<256x128xbf16>, vector<112x128xf32> -> vector<112x128xf32>
    %c112_i32 = arith.constant 112 : i32
    %3 = arith.muli %arg0, %c112_i32 : i32
    %4 = tpu.assume_multiple %3, 16 : i32
    %5 = arith.index_cast %4 : i32 to index
    %c0_3 = arith.constant 0 : index
    %6 = vector.load %arg6[%5, %c0_3] : memref<112x128xf32, #tpu.memory_space<vmem>>, vector<112x128xf32>
    tpu.vector_store %arg6[%5, %c0_3], %2 {strides = array<i32>} : memref<112x128xf32, #tpu.memory_space<vmem>>, vector<112x128xf32>,
    %c0_i32 = arith.constant 0 : i32
    %7 = arith.cmpi eq, %arg0, %c0_i32 : i32
    %8 = arith.extui %7 : i1 to i32
    %c0_i32_4 = arith.constant 0 : i32
    %9 = arith.cmpi ne, %8, %c0_i32_4 : i32
    scf.if %9 {
      %c0_5 = arith.constant 0 : index
      %c0_6 = arith.constant 0 : index
      %10 = vector.load %arg6[%c0_5, %c0_6] : memref<112x128xf32, #tpu.memory_space<vmem>>, vector<112x128xf32>
      %cst_7 = arith.constant dense<0.000000e+00> : vector<128xf32>
      %11 = vector.multi_reduction <add>, %10, %cst_7 [0] : vector<112x128xf32> to vector<128xf32>
      %12 = vector.shape_cast %11 : vector<128xf32> to vector<1x128xf32>
      %13 = arith.mulf %10, %10 : vector<112x128xf32>
      %cst_8 = arith.constant dense<0.000000e+00> : vector<128xf32>
      %14 = vector.multi_reduction <add>, %13, %cst_8 [0] : vector<112x128xf32> to vector<128xf32>
      %15 = vector.shape_cast %14 : vector<128xf32> to vector<1x128xf32>
      %cst_9 = arith.constant 0.0102040814 : f32
      %16 = vector.broadcast %cst_9 : f32 to vector<1x128xf32>
      %17 = arith.mulf %12, %16 : vector<1x128xf32>
      %cst_10 = arith.constant 0.0102040814 : f32
      %18 = vector.broadcast %cst_10 : f32 to vector<1x128xf32>
      %19 = arith.mulf %15, %18 : vector<1x128xf32>
      %20 = arith.mulf %17, %17 : vector<1x128xf32>
      %21 = arith.subf %19, %20 : vector<1x128xf32>
      %c0_11 = arith.constant 0 : index
      %c0_12 = arith.constant 0 : index
      %22 = vector.load %arg3[%c0_11, %c0_12] : memref<1x128xf32, #tpu.memory_space<vmem>>, vector<1x128xf32>
      %cst_13 = arith.constant 9.99999974E-6 : f32
      %23 = vector.broadcast %cst_13 : f32 to vector<1x128xf32>
      %24 = arith.addf %21, %23 : vector<1x128xf32>
      %25 = math.rsqrt %24 : vector<1x128xf32>
      %26 = arith.mulf %22, %25 : vector<1x128xf32>
      %c0_14 = arith.constant 0 : index
      %c0_15 = arith.constant 0 : index
      %27 = vector.load %arg4[%c0_14, %c0_15] : memref<1x128xf32, #tpu.memory_space<vmem>>, vector<1x128xf32>
      %28 = arith.mulf %17, %26 : vector<1x128xf32>
      %29 = arith.subf %27, %28 : vector<1x128xf32>
      %30 = vector.broadcast %26 : vector<1x128xf32> to vector<112x128xf32>
      %31 = arith.mulf %10, %30 : vector<112x128xf32>
      %32 = vector.broadcast %29 : vector<1x128xf32> to vector<112x128xf32>
      %33 = arith.addf %31, %32 : vector<112x128xf32>
      %cst_16 = arith.constant 0.000000e+00 : f32
      %34 = vector.broadcast %cst_16 : f32 to vector<112x128xf32>
      %35 = arith.maximumf %33, %34 : vector<112x128xf32>
      %36 = arith.truncf %35 : vector<112x128xf32> to vector<112x128xbf16>
      %c0_17 = arith.constant 0 : index
      %c0_18 = arith.constant 0 : index
      %37 = vector.load %arg5[%c0_17, %c0_18] : memref<112x128xbf16, #tpu.memory_space<vmem>>, vector<112x128xbf16>
      tpu.vector_store %arg5[%c0_17, %c0_18], %36 {strides = array<i32>} : memref<112x128xbf16, #tpu.memory_space<vmem>>, vector<112x128xbf16>,
    } else {
    }
    return
  }
  func.func @transform_0(%arg0: i32) -> (i32, i32) {
    %c0_i32 = arith.constant 0 : i32
    %c0_i32_0 = arith.constant 0 : i32
    return %arg0, %c0_i32 : i32, i32
  }
  func.func @transform_1(%arg0: i32) -> (i32, i32) {
    %c0_i32 = arith.constant 0 : i32
    %c0_i32_0 = arith.constant 0 : i32
    %c0_i32_1 = arith.constant 0 : i32
    return %c0_i32, %c0_i32_0 : i32, i32
  }
  func.func @transform_2(%arg0: i32) -> (i32, i32) {
    %c0_i32 = arith.constant 0 : i32
    %c0_i32_0 = arith.constant 0 : i32
    %c0_i32_1 = arith.constant 0 : i32
    return %c0_i32, %c0_i32_0 : i32, i32
  }
  func.func @transform_3(%arg0: i32) -> (i32, i32) {
    %c0_i32 = arith.constant 0 : i32
    %c0_i32_0 = arith.constant 0 : i32
    %c0_i32_1 = arith.constant 0 : i32
    return %c0_i32, %c0_i32_0 : i32, i32
  }
  func.func @transform_4(%arg0: i32) -> (i32, i32) {
    %c0_i32 = arith.constant 0 : i32
    %c0_i32_0 = arith.constant 0 : i32
    %c0_i32_1 = arith.constant 0 : i32
    return %c0_i32, %c0_i32_0 : i32, i32
  }
}

module attributes {stable_mosaic.version = 11 : i64} {
  func.func @fused_conv_bn_relu_kernel(%arg0: i32, %arg1: memref<64x640xbf16, #tpu.memory_space<vmem>>, %arg2: memref<640x128xbf16, #tpu.memory_space<vmem>>, %arg3: memref<1x128xf32, #tpu.memory_space<vmem>>, %arg4: memref<1x128xf32, #tpu.memory_space<vmem>>, %arg5: memref<64x128xbf16, #tpu.memory_space<vmem>>, %arg6: memref<64x128xf32, #tpu.memory_space<vmem>>) attributes {dimension_semantics = [#tpu.dimension_semantics<arbitrary>], iteration_bounds = array<i64: 1>, scalar_prefetch = 0 : i64, scratch_operands = 1 : i64, tpu.core_type = #tpu.core_type<tc>, window_params = [{transform_indices = @transform_0, window_bounds = array<i64: 64, 640>}, {pipeline_mode = #tpu.pipeline_mode<synchronous>, transform_indices = @transform_1, window_bounds = array<i64: 640, 128>}, {pipeline_mode = #tpu.pipeline_mode<synchronous>, transform_indices = @transform_2, window_bounds = array<i64: 1, 128>}, {pipeline_mode = #tpu.pipeline_mode<synchronous>, transform_indices = @transform_3, window_bounds = array<i64: 1, 128>}, {pipeline_mode = #tpu.pipeline_mode<synchronous>, transform_indices = @transform_4, window_bounds = array<i64: 64, 128>}]} {
    %c0 = arith.constant 0 : index
    %c0_0 = arith.constant 0 : index
    %0 = vector.load %arg1[%c0, %c0_0] : memref<64x640xbf16, #tpu.memory_space<vmem>>, vector<64x640xbf16>
    %c0_1 = arith.constant 0 : index
    %c0_2 = arith.constant 0 : index
    %1 = vector.load %arg2[%c0_1, %c0_2] : memref<640x128xbf16, #tpu.memory_space<vmem>>, vector<640x128xbf16>
    %cst = arith.constant dense<0.000000e+00> : vector<64x128xf32>
    %2 = tpu.matmul %0, %1, %cst {dimension_numbers = #tpu.dot_dimension_numbers<[1], [0], [0], [1], [0, 0, 1, 1], [], []>} : vector<64x640xbf16>, vector<640x128xbf16>, vector<64x128xf32> -> vector<64x128xf32>
    %c64_i32 = arith.constant 64 : i32
    %3 = arith.muli %arg0, %c64_i32 : i32
    %4 = tpu.assume_multiple %3, 16 : i32
    %5 = arith.index_cast %4 : i32 to index
    %c0_3 = arith.constant 0 : index
    %6 = vector.load %arg6[%5, %c0_3] : memref<64x128xf32, #tpu.memory_space<vmem>>, vector<64x128xf32>
    tpu.vector_store %arg6[%5, %c0_3], %2 {strides = array<i32>} : memref<64x128xf32, #tpu.memory_space<vmem>>, vector<64x128xf32>,
    %c0_i32 = arith.constant 0 : i32
    %7 = arith.cmpi eq, %arg0, %c0_i32 : i32
    %8 = arith.extui %7 : i1 to i32
    %c0_i32_4 = arith.constant 0 : i32
    %9 = arith.cmpi ne, %8, %c0_i32_4 : i32
    scf.if %9 {
      %c0_5 = arith.constant 0 : index
      %c0_6 = arith.constant 0 : index
      %10 = vector.load %arg6[%c0_5, %c0_6] : memref<64x128xf32, #tpu.memory_space<vmem>>, vector<64x128xf32>
      %cst_7 = arith.constant dense<0.000000e+00> : vector<128xf32>
      %11 = vector.multi_reduction <add>, %10, %cst_7 [0] : vector<64x128xf32> to vector<128xf32>
      %12 = vector.shape_cast %11 : vector<128xf32> to vector<1x128xf32>
      %13 = arith.mulf %10, %10 : vector<64x128xf32>
      %cst_8 = arith.constant dense<0.000000e+00> : vector<128xf32>
      %14 = vector.multi_reduction <add>, %13, %cst_8 [0] : vector<64x128xf32> to vector<128xf32>
      %15 = vector.shape_cast %14 : vector<128xf32> to vector<1x128xf32>
      %cst_9 = arith.constant 2.000000e-02 : f32
      %16 = vector.broadcast %cst_9 : f32 to vector<1x128xf32>
      %17 = arith.mulf %12, %16 : vector<1x128xf32>
      %cst_10 = arith.constant 2.000000e-02 : f32
      %18 = vector.broadcast %cst_10 : f32 to vector<1x128xf32>
      %19 = arith.mulf %15, %18 : vector<1x128xf32>
      %20 = arith.mulf %17, %17 : vector<1x128xf32>
      %21 = arith.subf %19, %20 : vector<1x128xf32>
      %c0_11 = arith.constant 0 : index
      %c0_12 = arith.constant 0 : index
      %22 = vector.load %arg3[%c0_11, %c0_12] : memref<1x128xf32, #tpu.memory_space<vmem>>, vector<1x128xf32>
      %cst_13 = arith.constant 9.99999974E-6 : f32
      %23 = vector.broadcast %cst_13 : f32 to vector<1x128xf32>
      %24 = arith.addf %21, %23 : vector<1x128xf32>
      %25 = math.rsqrt %24 : vector<1x128xf32>
      %26 = arith.mulf %22, %25 : vector<1x128xf32>
      %c0_14 = arith.constant 0 : index
      %c0_15 = arith.constant 0 : index
      %27 = vector.load %arg4[%c0_14, %c0_15] : memref<1x128xf32, #tpu.memory_space<vmem>>, vector<1x128xf32>
      %28 = arith.mulf %17, %26 : vector<1x128xf32>
      %29 = arith.subf %27, %28 : vector<1x128xf32>
      %30 = vector.broadcast %26 : vector<1x128xf32> to vector<64x128xf32>
      %31 = arith.mulf %10, %30 : vector<64x128xf32>
      %32 = vector.broadcast %29 : vector<1x128xf32> to vector<64x128xf32>
      %33 = arith.addf %31, %32 : vector<64x128xf32>
      %cst_16 = arith.constant 0.000000e+00 : f32
      %34 = vector.broadcast %cst_16 : f32 to vector<64x128xf32>
      %35 = arith.maximumf %33, %34 : vector<64x128xf32>
      %36 = arith.truncf %35 : vector<64x128xf32> to vector<64x128xbf16>
      %c0_17 = arith.constant 0 : index
      %c0_18 = arith.constant 0 : index
      %37 = vector.load %arg5[%c0_17, %c0_18] : memref<64x128xbf16, #tpu.memory_space<vmem>>, vector<64x128xbf16>
      tpu.vector_store %arg5[%c0_17, %c0_18], %36 {strides = array<i32>} : memref<64x128xbf16, #tpu.memory_space<vmem>>, vector<64x128xbf16>,
    } else {
    }
    return
  }
  func.func @transform_0(%arg0: i32) -> (i32, i32) {
    %c0_i32 = arith.constant 0 : i32
    %c0_i32_0 = arith.constant 0 : i32
    return %arg0, %c0_i32 : i32, i32
  }
  func.func @transform_1(%arg0: i32) -> (i32, i32) {
    %c0_i32 = arith.constant 0 : i32
    %c0_i32_0 = arith.constant 0 : i32
    %c0_i32_1 = arith.constant 0 : i32
    return %c0_i32, %c0_i32_0 : i32, i32
  }
  func.func @transform_2(%arg0: i32) -> (i32, i32) {
    %c0_i32 = arith.constant 0 : i32
    %c0_i32_0 = arith.constant 0 : i32
    %c0_i32_1 = arith.constant 0 : i32
    return %c0_i32, %c0_i32_0 : i32, i32
  }
  func.func @transform_3(%arg0: i32) -> (i32, i32) {
    %c0_i32 = arith.constant 0 : i32
    %c0_i32_0 = arith.constant 0 : i32
    %c0_i32_1 = arith.constant 0 : i32
    return %c0_i32, %c0_i32_0 : i32, i32
  }
  func.func @transform_4(%arg0: i32) -> (i32, i32) {
    %c0_i32 = arith.constant 0 : i32
    %c0_i32_0 = arith.constant 0 : i32
    %c0_i32_1 = arith.constant 0 : i32
    return %c0_i32, %c0_i32_0 : i32, i32
  }
}

module attributes {stable_mosaic.version = 11 : i64} {
  func.func @fused_conv_bn_relu_kernel(%arg0: i32, %arg1: memref<112x512xbf16, #tpu.memory_space<vmem>>, %arg2: memref<512x128xbf16, #tpu.memory_space<vmem>>, %arg3: memref<1x128xf32, #tpu.memory_space<vmem>>, %arg4: memref<1x128xf32, #tpu.memory_space<vmem>>, %arg5: memref<112x128xbf16, #tpu.memory_space<vmem>>, %arg6: memref<112x128xf32, #tpu.memory_space<vmem>>) attributes {dimension_semantics = [#tpu.dimension_semantics<arbitrary>], iteration_bounds = array<i64: 1>, scalar_prefetch = 0 : i64, scratch_operands = 1 : i64, tpu.core_type = #tpu.core_type<tc>, window_params = [{transform_indices = @transform_0, window_bounds = array<i64: 112, 512>}, {pipeline_mode = #tpu.pipeline_mode<synchronous>, transform_indices = @transform_1, window_bounds = array<i64: 512, 128>}, {pipeline_mode = #tpu.pipeline_mode<synchronous>, transform_indices = @transform_2, window_bounds = array<i64: 1, 128>}, {pipeline_mode = #tpu.pipeline_mode<synchronous>, transform_indices = @transform_3, window_bounds = array<i64: 1, 128>}, {pipeline_mode = #tpu.pipeline_mode<synchronous>, transform_indices = @transform_4, window_bounds = array<i64: 112, 128>}]} {
    %c0 = arith.constant 0 : index
    %c0_0 = arith.constant 0 : index
    %0 = vector.load %arg1[%c0, %c0_0] : memref<112x512xbf16, #tpu.memory_space<vmem>>, vector<112x512xbf16>
    %c0_1 = arith.constant 0 : index
    %c0_2 = arith.constant 0 : index
    %1 = vector.load %arg2[%c0_1, %c0_2] : memref<512x128xbf16, #tpu.memory_space<vmem>>, vector<512x128xbf16>
    %cst = arith.constant dense<0.000000e+00> : vector<112x128xf32>
    %2 = tpu.matmul %0, %1, %cst {dimension_numbers = #tpu.dot_dimension_numbers<[1], [0], [0], [1], [0, 0, 1, 1], [], []>} : vector<112x512xbf16>, vector<512x128xbf16>, vector<112x128xf32> -> vector<112x128xf32>
    %c112_i32 = arith.constant 112 : i32
    %3 = arith.muli %arg0, %c112_i32 : i32
    %4 = tpu.assume_multiple %3, 16 : i32
    %5 = arith.index_cast %4 : i32 to index
    %c0_3 = arith.constant 0 : index
    %6 = vector.load %arg6[%5, %c0_3] : memref<112x128xf32, #tpu.memory_space<vmem>>, vector<112x128xf32>
    tpu.vector_store %arg6[%5, %c0_3], %2 {strides = array<i32>} : memref<112x128xf32, #tpu.memory_space<vmem>>, vector<112x128xf32>,
    %c0_i32 = arith.constant 0 : i32
    %7 = arith.cmpi eq, %arg0, %c0_i32 : i32
    %8 = arith.extui %7 : i1 to i32
    %c0_i32_4 = arith.constant 0 : i32
    %9 = arith.cmpi ne, %8, %c0_i32_4 : i32
    scf.if %9 {
      %c0_5 = arith.constant 0 : index
      %c0_6 = arith.constant 0 : index
      %10 = vector.load %arg6[%c0_5, %c0_6] : memref<112x128xf32, #tpu.memory_space<vmem>>, vector<112x128xf32>
      %cst_7 = arith.constant dense<0.000000e+00> : vector<128xf32>
      %11 = vector.multi_reduction <add>, %10, %cst_7 [0] : vector<112x128xf32> to vector<128xf32>
      %12 = vector.shape_cast %11 : vector<128xf32> to vector<1x128xf32>
      %13 = arith.mulf %10, %10 : vector<112x128xf32>
      %cst_8 = arith.constant dense<0.000000e+00> : vector<128xf32>
      %14 = vector.multi_reduction <add>, %13, %cst_8 [0] : vector<112x128xf32> to vector<128xf32>
      %15 = vector.shape_cast %14 : vector<128xf32> to vector<1x128xf32>
      %cst_9 = arith.constant 0.0102040814 : f32
      %16 = vector.broadcast %cst_9 : f32 to vector<1x128xf32>
      %17 = arith.mulf %12, %16 : vector<1x128xf32>
      %cst_10 = arith.constant 0.0102040814 : f32
      %18 = vector.broadcast %cst_10 : f32 to vector<1x128xf32>
      %19 = arith.mulf %15, %18 : vector<1x128xf32>
      %20 = arith.mulf %17, %17 : vector<1x128xf32>
      %21 = arith.subf %19, %20 : vector<1x128xf32>
      %c0_11 = arith.constant 0 : index
      %c0_12 = arith.constant 0 : index
      %22 = vector.load %arg3[%c0_11, %c0_12] : memref<1x128xf32, #tpu.memory_space<vmem>>, vector<1x128xf32>
      %cst_13 = arith.constant 9.99999974E-6 : f32
      %23 = vector.broadcast %cst_13 : f32 to vector<1x128xf32>
      %24 = arith.addf %21, %23 : vector<1x128xf32>
      %25 = math.rsqrt %24 : vector<1x128xf32>
      %26 = arith.mulf %22, %25 : vector<1x128xf32>
      %c0_14 = arith.constant 0 : index
      %c0_15 = arith.constant 0 : index
      %27 = vector.load %arg4[%c0_14, %c0_15] : memref<1x128xf32, #tpu.memory_space<vmem>>, vector<1x128xf32>
      %28 = arith.mulf %17, %26 : vector<1x128xf32>
      %29 = arith.subf %27, %28 : vector<1x128xf32>
      %30 = vector.broadcast %26 : vector<1x128xf32> to vector<112x128xf32>
      %31 = arith.mulf %10, %30 : vector<112x128xf32>
      %32 = vector.broadcast %29 : vector<1x128xf32> to vector<112x128xf32>
      %33 = arith.addf %31, %32 : vector<112x128xf32>
      %cst_16 = arith.constant 0.000000e+00 : f32
      %34 = vector.broadcast %cst_16 : f32 to vector<112x128xf32>
      %35 = arith.maximumf %33, %34 : vector<112x128xf32>
      %36 = arith.truncf %35 : vector<112x128xf32> to vector<112x128xbf16>
      %c0_17 = arith.constant 0 : index
      %c0_18 = arith.constant 0 : index
      %37 = vector.load %arg5[%c0_17, %c0_18] : memref<112x128xbf16, #tpu.memory_space<vmem>>, vector<112x128xbf16>
      tpu.vector_store %arg5[%c0_17, %c0_18], %36 {strides = array<i32>} : memref<112x128xbf16, #tpu.memory_space<vmem>>, vector<112x128xbf16>,
    } else {
    }
    return
  }
  func.func @transform_0(%arg0: i32) -> (i32, i32) {
    %c0_i32 = arith.constant 0 : i32
    %c0_i32_0 = arith.constant 0 : i32
    return %arg0, %c0_i32 : i32, i32
  }
  func.func @transform_1(%arg0: i32) -> (i32, i32) {
    %c0_i32 = arith.constant 0 : i32
    %c0_i32_0 = arith.constant 0 : i32
    %c0_i32_1 = arith.constant 0 : i32
    return %c0_i32, %c0_i32_0 : i32, i32
  }
  func.func @transform_2(%arg0: i32) -> (i32, i32) {
    %c0_i32 = arith.constant 0 : i32
    %c0_i32_0 = arith.constant 0 : i32
    %c0_i32_1 = arith.constant 0 : i32
    return %c0_i32, %c0_i32_0 : i32, i32
  }
  func.func @transform_3(%arg0: i32) -> (i32, i32) {
    %c0_i32 = arith.constant 0 : i32
    %c0_i32_0 = arith.constant 0 : i32
    %c0_i32_1 = arith.constant 0 : i32
    return %c0_i32, %c0_i32_0 : i32, i32
  }
  func.func @transform_4(%arg0: i32) -> (i32, i32) {
    %c0_i32 = arith.constant 0 : i32
    %c0_i32_0 = arith.constant 0 : i32
    %c0_i32_1 = arith.constant 0 : i32
    return %c0_i32, %c0_i32_0 : i32, i32
  }
}

module attributes {stable_mosaic.version = 11 : i64} {
  func.func @fused_conv_bn_relu_kernel(%arg0: i32, %arg1: memref<16x1792xbf16, #tpu.memory_space<vmem>>, %arg2: memref<1792x256xbf16, #tpu.memory_space<vmem>>, %arg3: memref<1x256xf32, #tpu.memory_space<vmem>>, %arg4: memref<1x256xf32, #tpu.memory_space<vmem>>, %arg5: memref<16x256xbf16, #tpu.memory_space<vmem>>, %arg6: memref<16x256xf32, #tpu.memory_space<vmem>>) attributes {dimension_semantics = [#tpu.dimension_semantics<arbitrary>], iteration_bounds = array<i64: 1>, scalar_prefetch = 0 : i64, scratch_operands = 1 : i64, tpu.core_type = #tpu.core_type<tc>, window_params = [{transform_indices = @transform_0, window_bounds = array<i64: 16, 1792>}, {pipeline_mode = #tpu.pipeline_mode<synchronous>, transform_indices = @transform_1, window_bounds = array<i64: 1792, 256>}, {pipeline_mode = #tpu.pipeline_mode<synchronous>, transform_indices = @transform_2, window_bounds = array<i64: 1, 256>}, {pipeline_mode = #tpu.pipeline_mode<synchronous>, transform_indices = @transform_3, window_bounds = array<i64: 1, 256>}, {pipeline_mode = #tpu.pipeline_mode<synchronous>, transform_indices = @transform_4, window_bounds = array<i64: 16, 256>}]} {
    %c0 = arith.constant 0 : index
    %c0_0 = arith.constant 0 : index
    %0 = vector.load %arg1[%c0, %c0_0] : memref<16x1792xbf16, #tpu.memory_space<vmem>>, vector<16x1792xbf16>
    %c0_1 = arith.constant 0 : index
    %c0_2 = arith.constant 0 : index
    %1 = vector.load %arg2[%c0_1, %c0_2] : memref<1792x256xbf16, #tpu.memory_space<vmem>>, vector<1792x256xbf16>
    %cst = arith.constant dense<0.000000e+00> : vector<16x256xf32>
    %2 = tpu.matmul %0, %1, %cst {dimension_numbers = #tpu.dot_dimension_numbers<[1], [0], [0], [1], [0, 0, 1, 1], [], []>} : vector<16x1792xbf16>, vector<1792x256xbf16>, vector<16x256xf32> -> vector<16x256xf32>
    %c16_i32 = arith.constant 16 : i32
    %3 = arith.muli %arg0, %c16_i32 : i32
    %4 = tpu.assume_multiple %3, 16 : i32
    %5 = arith.index_cast %4 : i32 to index
    %c0_3 = arith.constant 0 : index
    %6 = vector.load %arg6[%5, %c0_3] : memref<16x256xf32, #tpu.memory_space<vmem>>, vector<16x256xf32>
    tpu.vector_store %arg6[%5, %c0_3], %2 {strides = array<i32>} : memref<16x256xf32, #tpu.memory_space<vmem>>, vector<16x256xf32>,
    %c0_i32 = arith.constant 0 : i32
    %7 = arith.cmpi eq, %arg0, %c0_i32 : i32
    %8 = arith.extui %7 : i1 to i32
    %c0_i32_4 = arith.constant 0 : i32
    %9 = arith.cmpi ne, %8, %c0_i32_4 : i32
    scf.if %9 {
      %c0_5 = arith.constant 0 : index
      %c0_6 = arith.constant 0 : index
      %10 = vector.load %arg6[%c0_5, %c0_6] : memref<16x256xf32, #tpu.memory_space<vmem>>, vector<16x256xf32>
      %cst_7 = arith.constant dense<0.000000e+00> : vector<256xf32>
      %11 = vector.multi_reduction <add>, %10, %cst_7 [0] : vector<16x256xf32> to vector<256xf32>
      %12 = vector.shape_cast %11 : vector<256xf32> to vector<1x256xf32>
      %13 = arith.mulf %10, %10 : vector<16x256xf32>
      %cst_8 = arith.constant dense<0.000000e+00> : vector<256xf32>
      %14 = vector.multi_reduction <add>, %13, %cst_8 [0] : vector<16x256xf32> to vector<256xf32>
      %15 = vector.shape_cast %14 : vector<256xf32> to vector<1x256xf32>
      %cst_9 = arith.constant 1.250000e-01 : f32
      %16 = vector.broadcast %cst_9 : f32 to vector<1x256xf32>
      %17 = arith.mulf %12, %16 : vector<1x256xf32>
      %cst_10 = arith.constant 1.250000e-01 : f32
      %18 = vector.broadcast %cst_10 : f32 to vector<1x256xf32>
      %19 = arith.mulf %15, %18 : vector<1x256xf32>
      %20 = arith.mulf %17, %17 : vector<1x256xf32>
      %21 = arith.subf %19, %20 : vector<1x256xf32>
      %c0_11 = arith.constant 0 : index
      %c0_12 = arith.constant 0 : index
      %22 = vector.load %arg3[%c0_11, %c0_12] : memref<1x256xf32, #tpu.memory_space<vmem>>, vector<1x256xf32>
      %cst_13 = arith.constant 9.99999974E-6 : f32
      %23 = vector.broadcast %cst_13 : f32 to vector<1x256xf32>
      %24 = arith.addf %21, %23 : vector<1x256xf32>
      %25 = math.rsqrt %24 : vector<1x256xf32>
      %26 = arith.mulf %22, %25 : vector<1x256xf32>
      %c0_14 = arith.constant 0 : index
      %c0_15 = arith.constant 0 : index
      %27 = vector.load %arg4[%c0_14, %c0_15] : memref<1x256xf32, #tpu.memory_space<vmem>>, vector<1x256xf32>
      %28 = arith.mulf %17, %26 : vector<1x256xf32>
      %29 = arith.subf %27, %28 : vector<1x256xf32>
      %30 = vector.broadcast %26 : vector<1x256xf32> to vector<16x256xf32>
      %31 = arith.mulf %10, %30 : vector<16x256xf32>
      %32 = vector.broadcast %29 : vector<1x256xf32> to vector<16x256xf32>
      %33 = arith.addf %31, %32 : vector<16x256xf32>
      %cst_16 = arith.constant 0.000000e+00 : f32
      %34 = vector.broadcast %cst_16 : f32 to vector<16x256xf32>
      %35 = arith.maximumf %33, %34 : vector<16x256xf32>
      %36 = arith.truncf %35 : vector<16x256xf32> to vector<16x256xbf16>
      %c0_17 = arith.constant 0 : index
      %c0_18 = arith.constant 0 : index
      %37 = vector.load %arg5[%c0_17, %c0_18] : memref<16x256xbf16, #tpu.memory_space<vmem>>, vector<16x256xbf16>
      tpu.vector_store %arg5[%c0_17, %c0_18], %36 {strides = array<i32>} : memref<16x256xbf16, #tpu.memory_space<vmem>>, vector<16x256xbf16>,
    } else {
    }
    return
  }
  func.func @transform_0(%arg0: i32) -> (i32, i32) {
    %c0_i32 = arith.constant 0 : i32
    %c0_i32_0 = arith.constant 0 : i32
    return %arg0, %c0_i32 : i32, i32
  }
  func.func @transform_1(%arg0: i32) -> (i32, i32) {
    %c0_i32 = arith.constant 0 : i32
    %c0_i32_0 = arith.constant 0 : i32
    %c0_i32_1 = arith.constant 0 : i32
    return %c0_i32, %c0_i32_0 : i32, i32
  }
  func.func @transform_2(%arg0: i32) -> (i32, i32) {
    %c0_i32 = arith.constant 0 : i32
    %c0_i32_0 = arith.constant 0 : i32
    %c0_i32_1 = arith.constant 0 : i32
    return %c0_i32, %c0_i32_0 : i32, i32
  }
  func.func @transform_3(%arg0: i32) -> (i32, i32) {
    %c0_i32 = arith.constant 0 : i32
    %c0_i32_0 = arith.constant 0 : i32
    %c0_i32_1 = arith.constant 0 : i32
    return %c0_i32, %c0_i32_0 : i32, i32
  }
  func.func @transform_4(%arg0: i32) -> (i32, i32) {
    %c0_i32 = arith.constant 0 : i32
    %c0_i32_0 = arith.constant 0 : i32
    %c0_i32_1 = arith.constant 0 : i32
    return %c0_i32, %c0_i32_0 : i32, i32
  }
}

module attributes {stable_mosaic.version = 11 : i64} {
  func.func @maxpool_kernel(%arg0: i32, %arg1: memref<8x192xbf16, #tpu.memory_space<vmem>>, %arg2: memref<8x192xbf16, #tpu.memory_space<vmem>>, %arg3: memref<8x192xbf16, #tpu.memory_space<vmem>>, %arg4: memref<8x192xbf16, #tpu.memory_space<vmem>>, %arg5: memref<8x192xbf16, #tpu.memory_space<vmem>>, %arg6: memref<8x192xbf16, #tpu.memory_space<vmem>>, %arg7: memref<8x192xbf16, #tpu.memory_space<vmem>>, %arg8: memref<8x192xbf16, #tpu.memory_space<vmem>>, %arg9: memref<8x192xbf16, #tpu.memory_space<vmem>>, %arg10: memref<8x192xbf16, #tpu.memory_space<vmem>>) attributes {dimension_semantics = [#tpu.dimension_semantics<arbitrary>], iteration_bounds = array<i64: 1>, scalar_prefetch = 0 : i64, scratch_operands = 0 : i64, tpu.core_type = #tpu.core_type<tc>, window_params = [{pipeline_mode = #tpu.pipeline_mode<synchronous>, transform_indices = @transform_0, window_bounds = array<i64: 8, 192>}, {pipeline_mode = #tpu.pipeline_mode<synchronous>, transform_indices = @transform_1, window_bounds = array<i64: 8, 192>}, {pipeline_mode = #tpu.pipeline_mode<synchronous>, transform_indices = @transform_2, window_bounds = array<i64: 8, 192>}, {pipeline_mode = #tpu.pipeline_mode<synchronous>, transform_indices = @transform_3, window_bounds = array<i64: 8, 192>}, {pipeline_mode = #tpu.pipeline_mode<synchronous>, transform_indices = @transform_4, window_bounds = array<i64: 8, 192>}, {pipeline_mode = #tpu.pipeline_mode<synchronous>, transform_indices = @transform_5, window_bounds = array<i64: 8, 192>}, {pipeline_mode = #tpu.pipeline_mode<synchronous>, transform_indices = @transform_6, window_bounds = array<i64: 8, 192>}, {pipeline_mode = #tpu.pipeline_mode<synchronous>, transform_indices = @transform_7, window_bounds = array<i64: 8, 192>}, {pipeline_mode = #tpu.pipeline_mode<synchronous>, transform_indices = @transform_8, window_bounds = array<i64: 8, 192>}, {pipeline_mode = #tpu.pipeline_mode<synchronous>, transform_indices = @transform_9, window_bounds = array<i64: 8, 192>}]} {
    %c0 = arith.constant 0 : index
    %c0_0 = arith.constant 0 : index
    %0 = vector.load %arg1[%c0, %c0_0] : memref<8x192xbf16, #tpu.memory_space<vmem>>, vector<8x192xbf16>
    %1 = arith.extf %0 : vector<8x192xbf16> to vector<8x192xf32>
    %c0_1 = arith.constant 0 : index
    %c0_2 = arith.constant 0 : index
    %2 = vector.load %arg2[%c0_1, %c0_2] : memref<8x192xbf16, #tpu.memory_space<vmem>>, vector<8x192xbf16>
    %3 = arith.extf %2 : vector<8x192xbf16> to vector<8x192xf32>
    %4 = arith.maximumf %1, %3 : vector<8x192xf32>
    %c0_3 = arith.constant 0 : index
    %c0_4 = arith.constant 0 : index
    %5 = vector.load %arg3[%c0_3, %c0_4] : memref<8x192xbf16, #tpu.memory_space<vmem>>, vector<8x192xbf16>
    %6 = arith.extf %5 : vector<8x192xbf16> to vector<8x192xf32>
    %7 = arith.maximumf %4, %6 : vector<8x192xf32>
    %c0_5 = arith.constant 0 : index
    %c0_6 = arith.constant 0 : index
    %8 = vector.load %arg4[%c0_5, %c0_6] : memref<8x192xbf16, #tpu.memory_space<vmem>>, vector<8x192xbf16>
    %9 = arith.extf %8 : vector<8x192xbf16> to vector<8x192xf32>
    %10 = arith.maximumf %7, %9 : vector<8x192xf32>
    %c0_7 = arith.constant 0 : index
    %c0_8 = arith.constant 0 : index
    %11 = vector.load %arg5[%c0_7, %c0_8] : memref<8x192xbf16, #tpu.memory_space<vmem>>, vector<8x192xbf16>
    %12 = arith.extf %11 : vector<8x192xbf16> to vector<8x192xf32>
    %13 = arith.maximumf %10, %12 : vector<8x192xf32>
    %c0_9 = arith.constant 0 : index
    %c0_10 = arith.constant 0 : index
    %14 = vector.load %arg6[%c0_9, %c0_10] : memref<8x192xbf16, #tpu.memory_space<vmem>>, vector<8x192xbf16>
    %15 = arith.extf %14 : vector<8x192xbf16> to vector<8x192xf32>
    %16 = arith.maximumf %13, %15 : vector<8x192xf32>
    %c0_11 = arith.constant 0 : index
    %c0_12 = arith.constant 0 : index
    %17 = vector.load %arg7[%c0_11, %c0_12] : memref<8x192xbf16, #tpu.memory_space<vmem>>, vector<8x192xbf16>
    %18 = arith.extf %17 : vector<8x192xbf16> to vector<8x192xf32>
    %19 = arith.maximumf %16, %18 : vector<8x192xf32>
    %c0_13 = arith.constant 0 : index
    %c0_14 = arith.constant 0 : index
    %20 = vector.load %arg8[%c0_13, %c0_14] : memref<8x192xbf16, #tpu.memory_space<vmem>>, vector<8x192xbf16>
    %21 = arith.extf %20 : vector<8x192xbf16> to vector<8x192xf32>
    %22 = arith.maximumf %19, %21 : vector<8x192xf32>
    %c0_15 = arith.constant 0 : index
    %c0_16 = arith.constant 0 : index
    %23 = vector.load %arg9[%c0_15, %c0_16] : memref<8x192xbf16, #tpu.memory_space<vmem>>, vector<8x192xbf16>
    %24 = arith.extf %23 : vector<8x192xbf16> to vector<8x192xf32>
    %25 = arith.maximumf %22, %24 : vector<8x192xf32>
    %26 = arith.truncf %25 : vector<8x192xf32> to vector<8x192xbf16>
    %c0_17 = arith.constant 0 : index
    %c0_18 = arith.constant 0 : index
    %27 = vector.load %arg10[%c0_17, %c0_18] : memref<8x192xbf16, #tpu.memory_space<vmem>>, vector<8x192xbf16>
    tpu.vector_store %arg10[%c0_17, %c0_18], %26 {strides = array<i32>} : memref<8x192xbf16, #tpu.memory_space<vmem>>, vector<8x192xbf16>,
    return
  }
  func.func @transform_0(%arg0: i32) -> (i32, i32) {
    %c0_i32 = arith.constant 0 : i32
    %c0_i32_0 = arith.constant 0 : i32
    %c0_i32_1 = arith.constant 0 : i32
    return %c0_i32, %c0_i32_0 : i32, i32
  }
  func.func @transform_1(%arg0: i32) -> (i32, i32) {
    %c0_i32 = arith.constant 0 : i32
    %c0_i32_0 = arith.constant 0 : i32
    %c0_i32_1 = arith.constant 0 : i32
    return %c0_i32, %c0_i32_0 : i32, i32
  }
  func.func @transform_2(%arg0: i32) -> (i32, i32) {
    %c0_i32 = arith.constant 0 : i32
    %c0_i32_0 = arith.constant 0 : i32
    %c0_i32_1 = arith.constant 0 : i32
    return %c0_i32, %c0_i32_0 : i32, i32
  }
  func.func @transform_3(%arg0: i32) -> (i32, i32) {
    %c0_i32 = arith.constant 0 : i32
    %c0_i32_0 = arith.constant 0 : i32
    %c0_i32_1 = arith.constant 0 : i32
    return %c0_i32, %c0_i32_0 : i32, i32
  }
  func.func @transform_4(%arg0: i32) -> (i32, i32) {
    %c0_i32 = arith.constant 0 : i32
    %c0_i32_0 = arith.constant 0 : i32
    %c0_i32_1 = arith.constant 0 : i32
    return %c0_i32, %c0_i32_0 : i32, i32
  }
  func.func @transform_5(%arg0: i32) -> (i32, i32) {
    %c0_i32 = arith.constant 0 : i32
    %c0_i32_0 = arith.constant 0 : i32
    %c0_i32_1 = arith.constant 0 : i32
    return %c0_i32, %c0_i32_0 : i32, i32
  }
  func.func @transform_6(%arg0: i32) -> (i32, i32) {
    %c0_i32 = arith.constant 0 : i32
    %c0_i32_0 = arith.constant 0 : i32
    %c0_i32_1 = arith.constant 0 : i32
    return %c0_i32, %c0_i32_0 : i32, i32
  }
  func.func @transform_7(%arg0: i32) -> (i32, i32) {
    %c0_i32 = arith.constant 0 : i32
    %c0_i32_0 = arith.constant 0 : i32
    %c0_i32_1 = arith.constant 0 : i32
    return %c0_i32, %c0_i32_0 : i32, i32
  }
  func.func @transform_8(%arg0: i32) -> (i32, i32) {
    %c0_i32 = arith.constant 0 : i32
    %c0_i32_0 = arith.constant 0 : i32
    %c0_i32_1 = arith.constant 0 : i32
    return %c0_i32, %c0_i32_0 : i32, i32
  }
  func.func @transform_9(%arg0: i32) -> (i32, i32) {
    %c0_i32 = arith.constant 0 : i32
    %c0_i32_0 = arith.constant 0 : i32
    %c0_i32_1 = arith.constant 0 : i32
    return %c0_i32, %c0_i32_0 : i32, i32
  }
}

</mosaic_0001>

<bundles_post_ra>
// kernel: stem_forward.12
= control target key start
LH: loop header
LB: loop body
LE: loop exit
PB: predicated region body
PF: predicated region fallthrough
CT: control target
= control target key end

     0   :  { %s2229_s15 = smov 0   ;;  %s3119_s0 = inlined_call_operand.vmem [shape: bf16[608,128], index: 0, kind: input, shape index: {}]   ;;  %s3120_s1 = inlined_call_operand.vmem [shape: bf16[128,128], index: 1, kind: input, shape index: {}]   ;;  %s3121_s2 = inlined_call_operand.vmem [shape: f32[1,128], index: 2, kind: input, shape index: {}]   ;;  %s3122_s3 = inlined_call_operand.vmem [shape: f32[1,128], index: 3, kind: input, shape index: {}]   ;;  %s3123_s4 = inlined_call_operand.vmem [shape: bf16[608,128], index: 4, kind: output, shape index: {}]  }
   0x1 LB: > { %s2235_s16 = sadd.s32 4294967295, %s2200_s15   ;;  %p1609_p0 = scmp.ge.s32.totalorder %s2200_s15, 1  ;;  %s2200_s15 = sphi %s2229_s15, %s14_s15  }
   0x2   : > { %p158_p1 = scmp.lt.s32.totalorder %s2200_s15, 3 }
   0x4   : > { %p159_p2 = pnand %p1609_p0, %p158_p1 }
   0x5   : > { %s179_s21 = smul.u32 (!%p159_p2), 38, %s2235_s16  ;;  %p1638_p4 = scmp.ne.s32.totalorder (!%p159_p2), %s2235_s16, 1 }
   0x6   : > { %162 = sbr.rel (%p159_p2) target bundleno = 581 (0x245), region = 36 }
   0x7   : > { %p180_p3 = scmp.lt.s32.totalorder (!%p159_p2), %s179_s21, 75  ;;  %s587_s12 = smul.u32 (!%p159_p2), 304, %s2235_s16 }
   0x9   : > { %s2343_s13 = scalar_lea.vmem (!%p159_p2), [#allocation2], %s587_s12 }
   0xb   : > { %v2165_v0 = vld [vmem:[%s3120_s1 + $0x38] sm:$0xff]   ;;  %v2202_v1 = vmov 0.0   ;;  %v2166_v2 = vld [vmem:[%s3120_s1 + $0x30] sm:$0xff]   ;;  %vm2203_vm0 = vmmov 0   ;;  %v2167_v3 = vld [vmem:[%s3120_s1 + $0x28] sm:$0xff]   ;;  %s3233_s21 = smov (!%p180_p3, %s179_s21), 75 }
   0xc   : > { %2047 = vmatprep.subr.bf16.mxu0 %v2202_v1  ;;  %2139 = vmatprep.subr.bf16.mxu1 %v2202_v1  ;;  %s1610_s24 = sshll.u32 %s3233_s21, 2  ;;  %v2168_v4 = vld [vmem:[%s3120_s1 + $0x20] sm:$0xff]   ;;  %v2169_v5 = vld [vmem:[%s3120_s1 + $0x18] sm:$0xff]   ;;  %v2170_v6 = vld [vmem:[%s3120_s1 + $0x10] sm:$0xff]  }
   0xd   : > { %2048 = vmatpush3.bf16.msra.mxu0 %v2165_v0  ;;  %2147 = vmatpush3.bf16.msra.mxu1 %v2165_v0  ;;  %s2262_s27 = scalar_lea.vmem %s3119_s0, %s1610_s24  ;;  %v2171_v7 = vld [vmem:[%s3120_s1 + $0x8] sm:$0xff]   ;;  %v2172_v8 = vld [vmem:[%s3120_s1] sm:$0xff]  }
   0xe   : > { %2049 = vmatprep.subr.bf16.mxu0 %v2202_v1  ;;  %2140 = vmatprep.subr.bf16.mxu1 %v2202_v1  ;;  %v2173_v9 = vld [vmem:[%s2262_s27] sm:$0xff]   ;;  %v2174_v10 = vld [vmem:[%s2262_s27 + $0x50] sm:$0xff]   ;;  %v2175_v11 = vld [vmem:[%s2262_s27 + $0x8] sm:$0xff]  }
   0xf   : > { %2063 = vmatprep.mubr.msk.bf16.mxu0 %vm2203_vm0, %v2202_v1  ;;  %2103 = vmatprep.mubr.msk.bf16.mxu1 %vm2203_vm0, %v2202_v1  ;;  %v2176_v12 = vld [vmem:[%s2262_s27 + $0x58] sm:$0xff]   ;;  %v2177_v13 = vld [vmem:[%s2262_s27 + $0x10] sm:$0xff]   ;;  %v2178_v14 = vld [vmem:[%s2262_s27 + $0x60] sm:$0xff]  }
  0x10   : > { %v2179_v15 = vld [vmem:[%s2262_s27 + $0x18] sm:$0xff]   ;;  %v2180_v16 = vld [vmem:[%s2262_s27 + $0x68] sm:$0xff]   ;;  %v2181_v17 = vld [vmem:[%s2262_s27 + $0x20] sm:$0xff]  }
  0x11   : > { %2050 = vmatpush3.bf16.msra.mxu0 %v2166_v2  ;;  %2148 = vmatpush3.bf16.msra.mxu1 %v2166_v2  ;;  %v2182_v18 = vld [vmem:[%s2262_s27 + $0x70] sm:$0xff]   ;;  %v2183_v19 = vld [vmem:[%s2262_s27 + $0x28] sm:$0xff]   ;;  %v2184_v20 = vld [vmem:[%s2262_s27 + $0x78] sm:$0xff]  }
  0x12   : > { %2051 = vmatprep.subr.bf16.mxu0 %v2202_v1  ;;  %2141 = vmatprep.subr.bf16.mxu1 %v2202_v1  ;;  %v2185_v21 = vld [vmem:[%s2262_s27 + $0x30] sm:$0xff]   ;;  %v2186_v22 = vld [vmem:[%s2262_s27 + $0x80] sm:$0xff]   ;;  %v2187_v23 = vld [vmem:[%s2262_s27 + $0x38] sm:$0xff]  }
  0x13   : > { %v2188_v24 = vld [vmem:[%s2262_s27 + $0x88] sm:$0xff]   ;;  %v2189_v25 = vld [vmem:[%s2262_s27 + $0x40] sm:$0xff]   ;;  %v2190_v26 = vld [vmem:[%s2262_s27 + $0x90] sm:$0xff]  }
  0x14   : > { %v2191_v27 = vld [vmem:[%s2262_s27 + $0x48] sm:$0xff]  }
  0x15   : > { %2052 = vmatpush3.bf16.msra.mxu0 %v2167_v3  ;;  %2149 = vmatpush3.bf16.msra.mxu1 %v2167_v3 }
  0x16   : > { %2053 = vmatprep.subr.bf16.mxu0 %v2202_v1  ;;  %2142 = vmatprep.subr.bf16.mxu1 %v2202_v1 }
  0x19   : > { %2054 = vmatpush3.bf16.msra.mxu0 %v2168_v4  ;;  %2150 = vmatpush3.bf16.msra.mxu1 %v2168_v4 }
  0x1a   : > { %2055 = vmatprep.subr.bf16.mxu0 %v2202_v1  ;;  %2143 = vmatprep.subr.bf16.mxu1 %v2202_v1 }
  0x1d   : > { %2056 = vmatpush3.bf16.msra.mxu0 %v2169_v5  ;;  %2151 = vmatpush3.bf16.msra.mxu1 %v2169_v5 }
  0x1e   : > { %2057 = vmatprep.subr.bf16.mxu0 %v2202_v1  ;;  %2144 = vmatprep.subr.bf16.mxu1 %v2202_v1 }
  0x21   : > { %2058 = vmatpush3.bf16.msra.mxu0 %v2170_v6  ;;  %2152 = vmatpush3.bf16.msra.mxu1 %v2170_v6 }
  0x22   : > { %2059 = vmatprep.subr.bf16.mxu0 %v2202_v1  ;;  %2145 = vmatprep.subr.bf16.mxu1 %v2202_v1 }
  0x25   : > { %2060 = vmatpush3.bf16.msra.mxu0 %v2171_v7  ;;  %2153 = vmatpush3.bf16.msra.mxu1 %v2171_v7 }
  0x26   : > { %2061 = vmatprep.subr.bf16.mxu0 %v2202_v1  ;;  %2146 = vmatprep.subr.bf16.mxu1 %v2202_v1 }
  0x29   : > { %2062 = vmatpush3.bf16.msra.mxu0 %v2172_v8  ;;  %2154 = vmatpush3.bf16.msra.mxu1 %v2172_v8 }
  0x2c   : > { %2064 = vmatmul.mubr.bf16.vlgmr.msra.gmra.mxu0 %v2173_v9  ;;  %2104 = vmatmul.mubr.bf16.vlgmr.msra.gmra.mxu1 %v2174_v10 }
  0x2d   : > { %2067 = vmatprep.mubr.msk.bf16.mxu0 %vm2203_vm0, %v2202_v1  ;;  %2107 = vmatprep.mubr.msk.bf16.mxu1 %vm2203_vm0, %v2202_v1 }
  0x34   : > { %2068 = vmatmul.mubr.bf16.gmra.mxu0 %v2175_v11  ;;  %2108 = vmatmul.mubr.bf16.gmra.mxu1 %v2176_v12 }
  0x35   : > { %2071 = vmatprep.mubr.msk.bf16.mxu0 %vm2203_vm0, %v2202_v1  ;;  %2111 = vmatprep.mubr.msk.bf16.mxu1 %vm2203_vm0, %v2202_v1 }
  0x3c   : > { %2072 = vmatmul.mubr.bf16.gmra.mxu0 %v2177_v13  ;;  %2112 = vmatmul.mubr.bf16.gmra.mxu1 %v2178_v14 }
  0x3d   : > { %2075 = vmatprep.mubr.msk.bf16.mxu0 %vm2203_vm0, %v2202_v1  ;;  %2115 = vmatprep.mubr.msk.bf16.mxu1 %vm2203_vm0, %v2202_v1 }
  0x44   : > { %2076 = vmatmul.mubr.bf16.gmra.mxu0 %v2179_v15  ;;  %2116 = vmatmul.mubr.bf16.gmra.mxu1 %v2180_v16 }
  0x45   : > { %2079 = vmatprep.mubr.msk.bf16.mxu0 %vm2203_vm0, %v2202_v1  ;;  %2119 = vmatprep.mubr.msk.bf16.mxu1 %vm2203_vm0, %v2202_v1 }
  0x4c   : > { %2080 = vmatmul.mubr.bf16.gmra.mxu0 %v2181_v17  ;;  %2120 = vmatmul.mubr.bf16.gmra.mxu1 %v2182_v18 }
  0x4d   : > { %2083 = vmatprep.mubr.msk.bf16.mxu0 %vm2203_vm0, %v2202_v1  ;;  %2123 = vmatprep.mubr.msk.bf16.mxu1 %vm2203_vm0, %v2202_v1 }
  0x54   : > { %2084 = vmatmul.mubr.bf16.gmra.mxu0 %v2183_v19  ;;  %2124 = vmatmul.mubr.bf16.gmra.mxu1 %v2184_v20 }
  0x55   : > { %2087 = vmatprep.mubr.msk.bf16.mxu0 %vm2203_vm0, %v2202_v1  ;;  %2127 = vmatprep.mubr.msk.bf16.mxu1 %vm2203_vm0, %v2202_v1 }
  0x5c   : > { %2088 = vmatmul.mubr.bf16.gmra.mxu0 %v2185_v21  ;;  %2128 = vmatmul.mubr.bf16.gmra.mxu1 %v2186_v22 }
  0x5d   : > { %2091 = vmatprep.mubr.msk.bf16.mxu0 %vm2203_vm0, %v2202_v1  ;;  %2131 = vmatprep.mubr.msk.bf16.mxu1 %vm2203_vm0, %v2202_v1 }
  0x64   : > { %2092 = vmatmul.mubr.bf16.gmra.mxu0 %v2187_v23  ;;  %2132 = vmatmul.mubr.bf16.gmra.mxu1 %v2188_v24 }
  0x65   : > { %2095 = vmatprep.mubr.msk.bf16.mxu0 %vm2203_vm0, %v2202_v1  ;;  %2135 = vmatprep.mubr.msk.bf16.mxu1 %vm2203_vm0, %v2202_v1 }
  0x6c   : > { %2096 = vmatmul.mubr.bf16.gmra.mxu0 %v2189_v25  ;;  %2136 = vmatmul.mubr.bf16.gmra.mxu1 %v2190_v26 }
  0x6d   : > { %2099 = vmatprep.mubr.msk.bf16.mxu0 %vm2203_vm0, %v2202_v1 }
  0x74   : > { %2100 = vmatmul.mubr.bf16.gmra.mxu0 %v2191_v27 }
  0xec   : > { %v436_v28 = vpop.f32.mrf.mxu0  ;;  %v516_v29 = vpop.f32.mrf.mxu1 }
  0xed   : > { %589 = vst [vmem:[%s2343_s13] sm:$0xff] %v436_v28  ;;  %609 = vst [vmem:[%s2343_s13 + $0xa0] sm:$0xff] %v516_v29 }
  0xee   : > { %v2065_v30 = vpop.f32.mrf.mxu0  ;;  %v2105_v31 = vpop.f32.mrf.mxu1 }
  0xf0   : > { %v439_v32 = vpop.f32.mrf.mxu0  ;;  %v519_v33 = vpop.f32.mrf.mxu1 }
  0xf1   : > { %590 = vst [vmem:[%s2343_s13 + $0x8] sm:$0xff] %v439_v32  ;;  %610 = vst [vmem:[%s2343_s13 + $0xa8] sm:$0xff] %v519_v33 }
  0xf2   : > { %v2066_v34 = vpop.f32.mrf.mxu0  ;;  %v2106_v35 = vpop.f32.mrf.mxu1 }
  0xf4   : > { %v444_v36 = vpop.f32.mrf.mxu0  ;;  %v524_v37 = vpop.f32.mrf.mxu1 }
  0xf5   : > { %591 = vst [vmem:[%s2343_s13 + $0x10] sm:$0xff] %v444_v36  ;;  %611 = vst [vmem:[%s2343_s13 + $0xb0] sm:$0xff] %v524_v37 }
  0xf6   : > { %v2069_v38 = vpop.f32.mrf.mxu0  ;;  %v2109_v39 = vpop.f32.mrf.mxu1 }
  0xf8   : > { %v447_v40 = vpop.f32.mrf.mxu0  ;;  %v527_v41 = vpop.f32.mrf.mxu1 }
  0xf9   : > { %592 = vst [vmem:[%s2343_s13 + $0x18] sm:$0xff] %v447_v40  ;;  %612 = vst [vmem:[%s2343_s13 + $0xb8] sm:$0xff] %v527_v41 }
  0xfa   : > { %v2070_v42 = vpop.f32.mrf.mxu0  ;;  %v2110_v43 = vpop.f32.mrf.mxu1 }
  0xfc   : > { %v452_v44 = vpop.f32.mrf.mxu0  ;;  %v532_v45 = vpop.f32.mrf.mxu1 }
  0xfd   : > { %593 = vst [vmem:[%s2343_s13 + $0x20] sm:$0xff] %v452_v44  ;;  %613 = vst [vmem:[%s2343_s13 + $0xc0] sm:$0xff] %v532_v45 }
  0xfe   : > { %v2073_v46 = vpop.f32.mrf.mxu0  ;;  %v2113_v47 = vpop.f32.mrf.mxu1 }
 0x100   : > { %v455_v48 = vpop.f32.mrf.mxu0  ;;  %v535_v49 = vpop.f32.mrf.mxu1 }
 0x101   : > { %594 = vst [vmem:[%s2343_s13 + $0x28] sm:$0xff] %v455_v48  ;;  %614 = vst [vmem:[%s2343_s13 + $0xc8] sm:$0xff] %v535_v49 }
 0x102   : > { %v2074_v50 = vpop.f32.mrf.mxu0  ;;  %v2114_v51 = vpop.f32.mrf.mxu1 }
 0x104   : > { %v460_v52 = vpop.f32.mrf.mxu0  ;;  %v540_v53 = vpop.f32.mrf.mxu1 }
 0x105   : > { %595 = vst [vmem:[%s2343_s13 + $0x30] sm:$0xff] %v460_v52  ;;  %615 = vst [vmem:[%s2343_s13 + $0xd0] sm:$0xff] %v540_v53 }
 0x106   : > { %v2077_v54 = vpop.f32.mrf.mxu0  ;;  %v2117_v55 = vpop.f32.mrf.mxu1 }
 0x108   : > { %v463_v56 = vpop.f32.mrf.mxu0  ;;  %v543_v57 = vpop.f32.mrf.mxu1 }
 0x109   : > { %596 = vst [vmem:[%s2343_s13 + $0x38] sm:$0xff] %v463_v56  ;;  %616 = vst [vmem:[%s2343_s13 + $0xd8] sm:$0xff] %v543_v57 }
 0x10a   : > { %v2078_v58 = vpop.f32.mrf.mxu0  ;;  %v2118_v59 = vpop.f32.mrf.mxu1 }
 0x10c   : > { %v468_v60 = vpop.f32.mrf.mxu0  ;;  %v548_v61 = vpop.f32.mrf.mxu1 }
 0x10d   : > { %597 = vst [vmem:[%s2343_s13 + $0x40] sm:$0xff] %v468_v60  ;;  %617 = vst [vmem:[%s2343_s13 + $0xe0] sm:$0xff] %v548_v61 }
 0x10e   : > { %v2081_v62 = vpop.f32.mrf.mxu0  ;;  %v2121_v63 = vpop.f32.mrf.mxu1 }
 0x110   : > { %v471_v0 = vpop.f32.mrf.mxu0  ;;  %v551_v1 = vpop.f32.mrf.mxu1 }
 0x111   : > { %598 = vst [vmem:[%s2343_s13 + $0x48] sm:$0xff] %v471_v0  ;;  %618 = vst [vmem:[%s2343_s13 + $0xe8] sm:$0xff] %v551_v1 }
 0x112   : > { %v2082_v2 = vpop.f32.mrf.mxu0  ;;  %v2122_v3 = vpop.f32.mrf.mxu1 }
 0x114   : > { %v476_v4 = vpop.f32.mrf.mxu0  ;;  %v556_v5 = vpop.f32.mrf.mxu1 }
 0x115   : > { %599 = vst [vmem:[%s2343_s13 + $0x50] sm:$0xff] %v476_v4  ;;  %619 = vst [vmem:[%s2343_s13 + $0xf0] sm:$0xff] %v556_v5 }
 0x116   : > { %v2085_v6 = vpop.f32.mrf.mxu0  ;;  %v2125_v7 = vpop.f32.mrf.mxu1 }
 0x118   : > { %v479_v8 = vpop.f32.mrf.mxu0  ;;  %v559_v9 = vpop.f32.mrf.mxu1 }
 0x119   : > { %600 = vst [vmem:[%s2343_s13 + $0x58] sm:$0xff] %v479_v8  ;;  %620 = vst [vmem:[%s2343_s13 + $0xf8] sm:$0xff] %v559_v9 }
 0x11a   : > { %v2086_v10 = vpop.f32.mrf.mxu0  ;;  %v2126_v11 = vpop.f32.mrf.mxu1 }
 0x11c   : > { %v484_v12 = vpop.f32.mrf.mxu0  ;;  %v564_v13 = vpop.f32.mrf.mxu1 }
 0x11d   : > { %601 = vst [vmem:[%s2343_s13 + $0x60] sm:$0xff] %v484_v12  ;;  %621 = vst [vmem:[%s2343_s13 + $0x100] sm:$0xff] %v564_v13 }
 0x11e   : > { %v2089_v14 = vpop.f32.mrf.mxu0  ;;  %v2129_v15 = vpop.f32.mrf.mxu1 }
 0x120   : > { %v487_v16 = vpop.f32.mrf.mxu0  ;;  %v567_v17 = vpop.f32.mrf.mxu1 }
 0x121   : > { %602 = vst [vmem:[%s2343_s13 + $0x68] sm:$0xff] %v487_v16  ;;  %622 = vst [vmem:[%s2343_s13 + $0x108] sm:$0xff] %v567_v17 }
 0x122   : > { %v2090_v18 = vpop.f32.mrf.mxu0  ;;  %v2130_v19 = vpop.f32.mrf.mxu1 }
 0x124   : > { %v492_v20 = vpop.f32.mrf.mxu0  ;;  %v572_v21 = vpop.f32.mrf.mxu1 }
 0x125   : > { %603 = vst [vmem:[%s2343_s13 + $0x70] sm:$0xff] %v492_v20  ;;  %623 = vst [vmem:[%s2343_s13 + $0x110] sm:$0xff] %v572_v21 }
 0x126   : > { %v2093_v22 = vpop.f32.mrf.mxu0  ;;  %v2133_v23 = vpop.f32.mrf.mxu1 }
 0x128   : > { %v495_v24 = vpop.f32.mrf.mxu0  ;;  %v575_v25 = vpop.f32.mrf.mxu1 }
 0x129   : > { %604 = vst [vmem:[%s2343_s13 + $0x78] sm:$0xff] %v495_v24  ;;  %624 = vst [vmem:[%s2343_s13 + $0x118] sm:$0xff] %v575_v25 }
 0x12a   : > { %v2094_v26 = vpop.f32.mrf.mxu0  ;;  %v2134_v27 = vpop.f32.mrf.mxu1 }
 0x12c   : > { %v500_v28 = vpop.f32.mrf.mxu0  ;;  %v580_v29 = vpop.f32.mrf.mxu1 }
 0x12d   : > { %605 = vst [vmem:[%s2343_s13 + $0x80] sm:$0xff] %v500_v28  ;;  %625 = vst [vmem:[%s2343_s13 + $0x120] sm:$0xff] %v580_v29 }
 0x12e   : > { %v2097_v30 = vpop.f32.mrf.mxu0  ;;  %v2137_v31 = vpop.f32.mrf.mxu1 }
 0x130   : > { %v503_v32 = vpop.f32.mrf.mxu0  ;;  %v583_v33 = vpop.f32.mrf.mxu1 }
 0x131   : > { %606 = vst [vmem:[%s2343_s13 + $0x88] sm:$0xff] %v503_v32  ;;  %626 = vst [vmem:[%s2343_s13 + $0x128] sm:$0xff] %v583_v33 }
 0x132   : > { %v2098_v34 = vpop.f32.mrf.mxu0  ;;  %v2138_v35 = vpop.f32.mrf.mxu1 }
 0x134   : > { %v508_v36 = vpop.f32.mrf.mxu0 }
 0x135   : > { %607 = vst [vmem:[%s2343_s13 + $0x90] sm:$0xff] %v508_v36 }
 0x136   : > { %v2101_v37 = vpop.f32.mrf.mxu0  ;;  %630 = sbr.rel (%p1638_p4) target bundleno = 581 (0x245), region = 40 }
 0x138   : > { %v511_v38 = vpop.f32.mrf.mxu0 }
 0x139   : > { %608 = vst [vmem:[%s2343_s13 + $0x98] sm:$0xff] %v511_v38 }
 0x13a   : > { %v2102_v39 = vpop.f32.mrf.mxu0 }
 0x140   : > { %v2384_v40 = vld [vmem:[#allocation2] sm:$0xff]  ;;  %v2386_v41 = vld [vmem:[#allocation2 + $0x8] sm:$0xff]  ;;  %v2388_v42 = vld [vmem:[#allocation2 + $0x10] sm:$0xff] }
 0x141   : > { %v2390_v43 = vld [vmem:[#allocation2 + $0x18] sm:$0xff]  ;;  %v707_v44 = vadd.f32 %v2386_v41, %v2384_v40  ;;  %v788_v45 = vmul.f32 %v2384_v40, %v2384_v40  ;;  %v789_v46 = vmul.f32 %v2386_v41, %v2386_v41  ;;  %v790_v47 = vmul.f32 %v2388_v42, %v2388_v42  ;;  %v2400_v48 = vld [vmem:[#allocation2 + $0x20] sm:$0xff]  ;;  %v2405_v52 = vld [vmem:[#allocation2 + $0x28] sm:$0xff] }
 0x142   : > { %v791_v50 = vmul.f32 %v2390_v43, %v2390_v43  ;;  %v792_v54 = vmul.f32 %v2400_v48, %v2400_v48  ;;  %v2410_v56 = vld [vmem:[#allocation2 + $0x30] sm:$0xff]  ;;  %v793_v58 = vmul.f32 %v2405_v52, %v2405_v52  ;;  %v2415_v60 = vld [vmem:[#allocation2 + $0x38] sm:$0xff]  ;;  %v2420_v0 = vld [vmem:[#allocation2 + $0x40] sm:$0xff] }
 0x143   : > { %v708_v49 = vadd.f32 %v707_v44, %v2388_v42  ;;  %v864_v51 = vadd.f32 %v789_v46, %v788_v45  ;;  %v794_v62 = vmul.f32 %v2410_v56, %v2410_v56  ;;  %v795_v2 = vmul.f32 %v2415_v60, %v2415_v60  ;;  %v2425_v4 = vld [vmem:[#allocation2 + $0x48] sm:$0xff]  ;;  %v2430_v8 = vld [vmem:[#allocation2 + $0x50] sm:$0xff]  ;;  %v2435_v12 = vld [vmem:[#allocation2 + $0x58] sm:$0xff] }
 0x144   : > { %v796_v6 = vmul.f32 %v2420_v0, %v2420_v0  ;;  %v797_v10 = vmul.f32 %v2425_v4, %v2425_v4  ;;  %v798_v14 = vmul.f32 %v2430_v8, %v2430_v8  ;;  %v2440_v16 = vld [vmem:[#allocation2 + $0x60] sm:$0xff]  ;;  %v799_v18 = vmul.f32 %v2435_v12, %v2435_v12  ;;  %v2445_v20 = vld [vmem:[#allocation2 + $0x68] sm:$0xff]  ;;  %v2450_v24 = vld [vmem:[#allocation2 + $0x70] sm:$0xff] }
 0x145   : > { %v709_v53 = vadd.f32 %v708_v49, %v2390_v43  ;;  %v865_v55 = vadd.f32 %v864_v51, %v790_v47  ;;  %v800_v22 = vmul.f32 %v2440_v16, %v2440_v16  ;;  %v801_v26 = vmul.f32 %v2445_v20, %v2445_v20  ;;  %v2455_v28 = vld [vmem:[#allocation2 + $0x78] sm:$0xff]  ;;  %v2460_v32 = vld [vmem:[#allocation2 + $0x80] sm:$0xff]  ;;  %v2465_v36 = vld [vmem:[#allocation2 + $0x88] sm:$0xff] }
 0x146   : > { %v802_v30 = vmul.f32 %v2450_v24, %v2450_v24  ;;  %v803_v34 = vmul.f32 %v2455_v28, %v2455_v28  ;;  %v804_v38 = vmul.f32 %v2460_v32, %v2460_v32  ;;  %v2470_v44 = vld [vmem:[#allocation2 + $0x90] sm:$0xff]  ;;  %v805_v46 = vmul.f32 %v2465_v36, %v2465_v36  ;;  %v2475_v49 = vld [vmem:[#allocation2 + $0x98] sm:$0xff] }
 0x147   : > { %v710_v57 = vadd.f32 %v709_v53, %v2400_v48  ;;  %v866_v59 = vadd.f32 %v865_v55, %v791_v50  ;;  %v806_v51 = vmul.f32 %v2470_v44, %v2470_v44 }
 0x149   : > { %v711_v61 = vadd.f32 %v710_v57, %v2405_v52  ;;  %v867_v63 = vadd.f32 %v866_v59, %v792_v54  ;;  %v2480_v54 = vld [vmem:[#allocation2 + $0xa0] sm:$0xff]  ;;  %v807_v57 = vmul.f32 %v2475_v49, %v2475_v49  ;;  %v2485_v59 = vld [vmem:[#allocation2 + $0xa8] sm:$0xff] }
 0x14b   : > { %v712_v1 = vadd.f32 %v711_v61, %v2410_v56  ;;  %v868_v3 = vadd.f32 %v867_v63, %v793_v58 }
 0x14d   : > { %v713_v5 = vadd.f32 %v712_v1, %v2415_v60  ;;  %v869_v7 = vadd.f32 %v868_v3, %v794_v62  ;;  %v808_v62 = vmul.f32 %v2480_v54, %v2480_v54  ;;  %v2490_v1 = vld [vmem:[#allocation2 + $0xb0] sm:$0xff]  ;;  %v809_v3 = vmul.f32 %v2485_v59, %v2485_v59 }
 0x14f   : > { %v714_v9 = vadd.f32 %v713_v5, %v2420_v0  ;;  %v870_v11 = vadd.f32 %v869_v7, %v795_v2 }
 0x151   : > { %v715_v13 = vadd.f32 %v714_v9, %v2425_v4  ;;  %v871_v15 = vadd.f32 %v870_v11, %v796_v6  ;;  %v2495_v6 = vld [vmem:[#allocation2 + $0xb8] sm:$0xff]  ;;  %v810_v9 = vmul.f32 %v2490_v1, %v2490_v1  ;;  %v2500_v11 = vld [vmem:[#allocation2 + $0xc0] sm:$0xff] }
 0x153   : > { %v716_v17 = vadd.f32 %v715_v13, %v2430_v8  ;;  %v872_v19 = vadd.f32 %v871_v15, %v797_v10 }
 0x155   : > { %v717_v21 = vadd.f32 %v716_v17, %v2435_v12  ;;  %v873_v23 = vadd.f32 %v872_v19, %v798_v14  ;;  %v811_v14 = vmul.f32 %v2495_v6, %v2495_v6  ;;  %v2505_v17 = vld [vmem:[#allocation2 + $0xc8] sm:$0xff]  ;;  %v812_v19 = vmul.f32 %v2500_v11, %v2500_v11 }
 0x157   : > { %v718_v25 = vadd.f32 %v717_v21, %v2440_v16  ;;  %v874_v27 = vadd.f32 %v873_v23, %v799_v18 }
 0x159   : > { %v719_v29 = vadd.f32 %v718_v25, %v2445_v20  ;;  %v875_v31 = vadd.f32 %v874_v27, %v800_v22  ;;  %v2510_v22 = vld [vmem:[#allocation2 + $0xd0] sm:$0xff]  ;;  %v813_v25 = vmul.f32 %v2505_v17, %v2505_v17  ;;  %v2515_v27 = vld [vmem:[#allocation2 + $0xd8] sm:$0xff] }
 0x15b   : > { %v720_v33 = vadd.f32 %v719_v29, %v2450_v24  ;;  %v876_v35 = vadd.f32 %v875_v31, %v801_v26 }
 0x15d   : > { %v721_v37 = vadd.f32 %v720_v33, %v2455_v28  ;;  %v877_v39 = vadd.f32 %v876_v35, %v802_v30  ;;  %v814_v30 = vmul.f32 %v2510_v22, %v2510_v22  ;;  %v2520_v33 = vld [vmem:[#allocation2 + $0xe0] sm:$0xff]  ;;  %v815_v35 = vmul.f32 %v2515_v27, %v2515_v27 }
 0x15f   : > { %v722_v45 = vadd.f32 %v721_v37, %v2460_v32  ;;  %v878_v47 = vadd.f32 %v877_v39, %v803_v34 }
 0x161   : > { %v723_v50 = vadd.f32 %v722_v45, %v2465_v36  ;;  %v879_v53 = vadd.f32 %v878_v47, %v804_v38  ;;  %v2525_v38 = vld [vmem:[#allocation2 + $0xe8] sm:$0xff]  ;;  %v816_v45 = vmul.f32 %v2520_v33, %v2520_v33  ;;  %v2530_v47 = vld [vmem:[#allocation2 + $0xf0] sm:$0xff] }
 0x163   : > { %v724_v55 = vadd.f32 %v723_v50, %v2470_v44  ;;  %v880_v58 = vadd.f32 %v879_v53, %v805_v46 }
 0x165   : > { %v725_v61 = vadd.f32 %v724_v55, %v2475_v49  ;;  %v881_v63 = vadd.f32 %v880_v58, %v806_v51  ;;  %v817_v51 = vmul.f32 %v2525_v38, %v2525_v38  ;;  %v2535_v55 = vld [vmem:[#allocation2 + $0xf8] sm:$0xff]  ;;  %v818_v58 = vmul.f32 %v2530_v47, %v2530_v47 }
 0x167   : > { %v726_v2 = vadd.f32 %v725_v61, %v2480_v54  ;;  %v882_v5 = vadd.f32 %v881_v63, %v807_v57 }
 0x169   : > { %v727_v7 = vadd.f32 %v726_v2, %v2485_v59  ;;  %v883_v10 = vadd.f32 %v882_v5, %v808_v62  ;;  %v2540_v62 = vld [vmem:[#allocation2 + $0x100] sm:$0xff]  ;;  %v819_v2 = vmul.f32 %v2535_v55, %v2535_v55  ;;  %v2545_v5 = vld [vmem:[#allocation2 + $0x108] sm:$0xff] }
 0x16b   : > { %v728_v13 = vadd.f32 %v727_v7, %v2490_v1  ;;  %v884_v15 = vadd.f32 %v883_v10, %v809_v3 }
 0x16d   : > { %v729_v18 = vadd.f32 %v728_v13, %v2495_v6  ;;  %v885_v21 = vadd.f32 %v884_v15, %v810_v9  ;;  %v820_v9 = vmul.f32 %v2540_v62, %v2540_v62  ;;  %v2550_v13 = vld [vmem:[#allocation2 + $0x110] sm:$0xff]  ;;  %v821_v15 = vmul.f32 %v2545_v5, %v2545_v5 }
 0x16f   : > { %v730_v23 = vadd.f32 %v729_v18, %v2500_v11  ;;  %v886_v26 = vadd.f32 %v885_v21, %v811_v14 }
 0x171   : > { %v731_v29 = vadd.f32 %v730_v23, %v2505_v17  ;;  %v887_v31 = vadd.f32 %v886_v26, %v812_v19  ;;  %v2555_v19 = vld [vmem:[#allocation2 + $0x118] sm:$0xff]  ;;  %v822_v23 = vmul.f32 %v2550_v13, %v2550_v13  ;;  %v2560_v26 = vld [vmem:[#allocation2 + $0x120] sm:$0xff] }
 0x173   : > { %v732_v34 = vadd.f32 %v731_v29, %v2510_v22  ;;  %v888_v37 = vadd.f32 %v887_v31, %v813_v25 }
 0x175   : > { %v733_v39 = vadd.f32 %v732_v34, %v2515_v27  ;;  %v889_v46 = vadd.f32 %v888_v37, %v814_v30  ;;  %v823_v30 = vmul.f32 %v2555_v19, %v2555_v19  ;;  %v2565_v34 = vld [vmem:[#allocation2 + $0x128] sm:$0xff]  ;;  %v824_v37 = vmul.f32 %v2560_v26, %v2560_v26 }
 0x177   : > { %v734_v50 = vadd.f32 %v733_v39, %v2520_v33  ;;  %v890_v53 = vadd.f32 %v889_v46, %v815_v35 }
 0x179   : > { %v735_v57 = vadd.f32 %v734_v50, %v2525_v38  ;;  %v891_v61 = vadd.f32 %v890_v53, %v816_v45  ;;  %v2570_v45 = vld [vmem:[#allocation2 + $0x130] sm:$0xff]  ;;  %v825_v50 = vmul.f32 %v2565_v34, %v2565_v34  ;;  %v2575_v53 = vld [vmem:[#allocation2 + $0x138] sm:$0xff] }
 0x17a   : > { %3160 = vst [vmem:[#allocation3_spill] sm:$0xff] %v2575_v53 }
 0x17b   : > { %v736_v63 = vadd.f32 %v735_v57, %v2530_v47  ;;  %v892_v3 = vadd.f32 %v891_v61, %v817_v51 }
 0x17d   : > { %v737_v7 = vadd.f32 %v736_v63, %v2535_v55  ;;  %v893_v10 = vadd.f32 %v892_v3, %v818_v58  ;;  %v826_v58 = vmul.f32 %v2570_v45, %v2570_v45  ;;  %v2580_v63 = vld [vmem:[#allocation2 + $0x140] sm:$0xff]  ;;  %v827_v3 = vmul.f32 %v2575_v53, %v2575_v53 }
 0x17e   : > { %3161 = vst [vmem:[#allocation4_spill] sm:$0xff] %v2580_v63 }
 0x17f   : > { %v738_v14 = vadd.f32 %v737_v7, %v2540_v62  ;;  %v894_v18 = vadd.f32 %v893_v10, %v819_v2 }
 0x181   : > { %v739_v21 = vadd.f32 %v738_v14, %v2545_v5  ;;  %v895_v25 = vadd.f32 %v894_v18, %v820_v9  ;;  %v2585_v9 = vld [vmem:[#allocation2 + $0x148] sm:$0xff]  ;;  %v828_v14 = vmul.f32 %v2580_v63, %v2580_v63  ;;  %v2590_v18 = vld [vmem:[#allocation2 + $0x150] sm:$0xff] }
 0x182   : > { %3162 = vst [vmem:[#allocation5_spill] sm:$0xff] %v2585_v9  ;;  %3163 = vst [vmem:[#allocation6_spill] sm:$0xff] %v2590_v18 }
 0x183   : > { %v740_v29 = vadd.f32 %v739_v21, %v2550_v13  ;;  %v896_v31 = vadd.f32 %v895_v25, %v821_v15 }
 0x185   : > { %v741_v35 = vadd.f32 %v740_v29, %v2555_v19  ;;  %v897_v39 = vadd.f32 %v896_v31, %v822_v23  ;;  %v829_v23 = vmul.f32 %v2585_v9, %v2585_v9  ;;  %v2595_v29 = vld [vmem:[#allocation2 + $0x158] sm:$0xff]  ;;  %v830_v31 = vmul.f32 %v2590_v18, %v2590_v18 }
 0x186   : > { %3164 = vst [vmem:[#allocation7_spill] sm:$0xff] %v2595_v29 }
 0x187   : > { %v742_v46 = vadd.f32 %v741_v35, %v2560_v26  ;;  %v898_v51 = vadd.f32 %v897_v39, %v823_v30 }
 0x189   : > { %v743_v57 = vadd.f32 %v742_v46, %v2565_v34  ;;  %v899_v61 = vadd.f32 %v898_v51, %v824_v37  ;;  %v2600_v37 = vld [vmem:[#allocation2 + $0x160] sm:$0xff]  ;;  %v831_v46 = vmul.f32 %v2595_v29, %v2595_v29  ;;  %v2605_v51 = vld [vmem:[#allocation2 + $0x168] sm:$0xff] }
 0x18a   : > { %3165 = vst [vmem:[#allocation8_spill] sm:$0xff] %v2600_v37  ;;  %3166 = vst [vmem:[#allocation9_spill] sm:$0xff] %v2605_v51 }
 0x18b   : > { %v744_v2 = vadd.f32 %v743_v57, %v2570_v45  ;;  %v900_v7 = vadd.f32 %v899_v61, %v825_v50 }
 0x18d   : > { %v745_v10 = vadd.f32 %v744_v2, %v2575_v53  ;;  %v901_v15 = vadd.f32 %v900_v7, %v826_v58  ;;  %v832_v58 = vmul.f32 %v2600_v37, %v2600_v37  ;;  %v2610_v2 = vld [vmem:[#allocation2 + $0x170] sm:$0xff]  ;;  %v833_v7 = vmul.f32 %v2605_v51, %v2605_v51 }
 0x18e   : > { %3167 = vst [vmem:[#allocation10_spill] sm:$0xff] %v2610_v2 }
 0x18f   : > { %v746_v21 = vadd.f32 %v745_v10, %v2580_v63  ;;  %v902_v25 = vadd.f32 %v901_v15, %v827_v3 }
 0x191   : > { %v747_v30 = vadd.f32 %v746_v21, %v2585_v9  ;;  %v903_v35 = vadd.f32 %v902_v25, %v828_v14  ;;  %v2615_v14 = vld [vmem:[#allocation2 + $0x178] sm:$0xff]  ;;  %v834_v21 = vmul.f32 %v2610_v2, %v2610_v2  ;;  %v2620_v25 = vld [vmem:[#allocation2 + $0x180] sm:$0xff] }
 0x192   : > { %3168 = vst [vmem:[#allocation11_spill] sm:$0xff] %v2615_v14  ;;  %3169 = vst [vmem:[#allocation12_spill] sm:$0xff] %v2620_v25 }
 0x193   : > { %v748_v39 = vadd.f32 %v747_v30, %v2590_v18  ;;  %v904_v50 = vadd.f32 %v903_v35, %v829_v23 }
 0x195   : > { %v749_v57 = vadd.f32 %v748_v39, %v2595_v29  ;;  %v905_v61 = vadd.f32 %v904_v50, %v830_v31  ;;  %v835_v31 = vmul.f32 %v2615_v14, %v2615_v14  ;;  %v2625_v39 = vld [vmem:[#allocation2 + $0x188] sm:$0xff]  ;;  %v836_v50 = vmul.f32 %v2620_v25, %v2620_v25 }
 0x196   : > { %3170 = vst [vmem:[#allocation13_spill] sm:$0xff] %v2625_v39 }
 0x197   : > { %v750_v3 = vadd.f32 %v749_v57, %v2600_v37  ;;  %v906_v10 = vadd.f32 %v905_v61, %v831_v46  ;;  %v2630_v61 = vld [vmem:[#allocation2 + $0x190] sm:$0xff] }
 0x198   : > { %3171 = vst [vmem:[#allocation14_spill] sm:$0xff] %v2630_v61 }
 0x199   : > { %v751_v15 = vadd.f32 %v750_v3, %v2605_v51  ;;  %v907_v23 = vadd.f32 %v906_v10, %v832_v58  ;;  %v837_v3 = vmul.f32 %v2625_v39, %v2625_v39 }
 0x19b   : > { %v752_v30 = vadd.f32 %v751_v15, %v2610_v2  ;;  %v908_v35 = vadd.f32 %v907_v23, %v833_v7  ;;  %v2635_v15 = vld [vmem:[#allocation2 + $0x198] sm:$0xff]  ;;  %v838_v23 = vmul.f32 %v2630_v61, %v2630_v61 }
 0x19c   : > { %3172 = vst [vmem:[#allocation15_spill] sm:$0xff] %v2635_v15 }
 0x19d   : > { %v753_v46 = vadd.f32 %v752_v30, %v2615_v14  ;;  %v909_v57 = vadd.f32 %v908_v35, %v834_v21  ;;  %v2640_v14 = vld [vmem:[#allocation2 + $0x1a0] sm:$0xff]  ;;  %v839_v35 = vmul.f32 %v2635_v15, %v2635_v15 }
 0x19e   : > { %3173 = vst [vmem:[#allocation16_spill] sm:$0xff] %v2640_v14 }
 0x19f   : > { %v754_v58 = vadd.f32 %v753_v46, %v2620_v25  ;;  %v910_v10 = vadd.f32 %v909_v57, %v835_v31  ;;  %v2645_v25 = vld [vmem:[#allocation2 + $0x1a8] sm:$0xff]  ;;  %v840_v57 = vmul.f32 %v2640_v14, %v2640_v14 }
 0x1a0   : > { %3174 = vst [vmem:[#allocation17_spill] sm:$0xff] %v2645_v25 }
 0x1a1   : > { %v755_v7 = vadd.f32 %v754_v58, %v2625_v39  ;;  %v911_v30 = vadd.f32 %v910_v10, %v836_v50  ;;  %v2650_v39 = vld [vmem:[#allocation2 + $0x1b0] sm:$0xff]  ;;  %v841_v10 = vmul.f32 %v2645_v25, %v2645_v25 }
 0x1a2   : > { %3175 = vst [vmem:[#allocation18_spill] sm:$0xff] %v2650_v39 }
 0x1a3   : > { %v756_v21 = vadd.f32 %v755_v7, %v2630_v61  ;;  %v912_v46 = vadd.f32 %v911_v30, %v837_v3  ;;  %v2655_v61 = vld [vmem:[#allocation2 + $0x1b8] sm:$0xff]  ;;  %v842_v30 = vmul.f32 %v2650_v39, %v2650_v39 }
 0x1a4   : > { %3176 = vst [vmem:[#allocation19_spill] sm:$0xff] %v2655_v61 }
 0x1a5   : > { %v757_v31 = vadd.f32 %v756_v21, %v2635_v15  ;;  %v913_v58 = vadd.f32 %v912_v46, %v838_v23  ;;  %v2660_v15 = vld [vmem:[#allocation2 + $0x1c0] sm:$0xff]  ;;  %v843_v46 = vmul.f32 %v2655_v61, %v2655_v61 }
 0x1a6   : > { %3177 = vst [vmem:[#allocation20_spill] sm:$0xff] %v2660_v15 }
 0x1a7   : > { %v758_v50 = vadd.f32 %v757_v31, %v2640_v14  ;;  %v914_v7 = vadd.f32 %v913_v58, %v839_v35  ;;  %v2665_v14 = vld [vmem:[#allocation2 + $0x1c8] sm:$0xff]  ;;  %v844_v58 = vmul.f32 %v2660_v15, %v2660_v15 }
 0x1a8   : > { %3178 = vst [vmem:[#allocation21_spill] sm:$0xff] %v2665_v14 }
 0x1a9   : > { %v759_v3 = vadd.f32 %v758_v50, %v2645_v25  ;;  %v915_v21 = vadd.f32 %v914_v7, %v840_v57  ;;  %v2670_v25 = vld [vmem:[#allocation2 + $0x1d0] sm:$0xff]  ;;  %v845_v7 = vmul.f32 %v2665_v14, %v2665_v14 }
 0x1aa   : > { %3179 = vst [vmem:[#allocation22_spill] sm:$0xff] %v2670_v25 }
 0x1ab   : > { %v760_v23 = vadd.f32 %v759_v3, %v2650_v39  ;;  %v916_v31 = vadd.f32 %v915_v21, %v841_v10  ;;  %v2675_v39 = vld [vmem:[#allocation2 + $0x1d8] sm:$0xff]  ;;  %v846_v21 = vmul.f32 %v2670_v25, %v2670_v25 }
 0x1ac   : > { %3180 = vst [vmem:[#allocation23_spill] sm:$0xff] %v2675_v39 }
 0x1ad   : > { %v761_v35 = vadd.f32 %v760_v23, %v2655_v61  ;;  %v917_v50 = vadd.f32 %v916_v31, %v842_v30  ;;  %v2680_v61 = vld [vmem:[#allocation2 + $0x1e0] sm:$0xff]  ;;  %v847_v31 = vmul.f32 %v2675_v39, %v2675_v39 }
 0x1ae   : > { %3181 = vst [vmem:[#allocation24_spill] sm:$0xff] %v2680_v61 }
 0x1af   : > { %v762_v57 = vadd.f32 %v761_v35, %v2660_v15  ;;  %v918_v3 = vadd.f32 %v917_v50, %v843_v46  ;;  %v2685_v15 = vld [vmem:[#allocation2 + $0x1e8] sm:$0xff]  ;;  %v848_v50 = vmul.f32 %v2680_v61, %v2680_v61 }
 0x1b0   : > { %3182 = vst [vmem:[#allocation25_spill] sm:$0xff] %v2685_v15 }
 0x1b1   : > { %v763_v10 = vadd.f32 %v762_v57, %v2665_v14  ;;  %v919_v23 = vadd.f32 %v918_v3, %v844_v58  ;;  %v2690_v14 = vld [vmem:[#allocation2 + $0x1f0] sm:$0xff]  ;;  %v849_v3 = vmul.f32 %v2685_v15, %v2685_v15 }
 0x1b2   : > { %3183 = vst [vmem:[#allocation26_spill] sm:$0xff] %v2690_v14 }
 0x1b3   : > { %v764_v30 = vadd.f32 %v763_v10, %v2670_v25  ;;  %v920_v35 = vadd.f32 %v919_v23, %v845_v7  ;;  %v2695_v25 = vld [vmem:[#allocation2 + $0x1f8] sm:$0xff]  ;;  %v850_v23 = vmul.f32 %v2690_v14, %v2690_v14 }
 0x1b4   : > { %3184 = vst [vmem:[#allocation27_spill] sm:$0xff] %v2695_v25 }
 0x1b5   : > { %v765_v46 = vadd.f32 %v764_v30, %v2675_v39  ;;  %v921_v57 = vadd.f32 %v920_v35, %v846_v21  ;;  %v2700_v39 = vld [vmem:[#allocation2 + $0x200] sm:$0xff]  ;;  %v851_v35 = vmul.f32 %v2695_v25, %v2695_v25 }
 0x1b6   : > { %3185 = vst [vmem:[#allocation28_spill] sm:$0xff] %v2700_v39 }
 0x1b7   : > { %v766_v58 = vadd.f32 %v765_v46, %v2680_v61  ;;  %v922_v10 = vadd.f32 %v921_v57, %v847_v31  ;;  %v2705_v61 = vld [vmem:[#allocation2 + $0x208] sm:$0xff]  ;;  %v852_v57 = vmul.f32 %v2700_v39, %v2700_v39 }
 0x1b8   : > { %3186 = vst [vmem:[#allocation29_spill] sm:$0xff] %v2705_v61 }
 0x1b9   : > { %v767_v7 = vadd.f32 %v766_v58, %v2685_v15  ;;  %v923_v30 = vadd.f32 %v922_v10, %v848_v50  ;;  %v2710_v15 = vld [vmem:[#allocation2 + $0x210] sm:$0xff]  ;;  %v853_v10 = vmul.f32 %v2705_v61, %v2705_v61 }
 0x1ba   : > { %3187 = vst [vmem:[#allocation30_spill] sm:$0xff] %v2710_v15 }
 0x1bb   : > { %v768_v21 = vadd.f32 %v767_v7, %v2690_v14  ;;  %v924_v46 = vadd.f32 %v923_v30, %v849_v3  ;;  %v2715_v14 = vld [vmem:[#allocation2 + $0x218] sm:$0xff]  ;;  %v854_v30 = vmul.f32 %v2710_v15, %v2710_v15 }
 0x1bc   : > { %3188 = vst [vmem:[#allocation31_spill] sm:$0xff] %v2715_v14 }
 0x1bd   : > { %v769_v31 = vadd.f32 %v768_v21, %v2695_v25  ;;  %v925_v58 = vadd.f32 %v924_v46, %v850_v23  ;;  %v2720_v25 = vld [vmem:[#allocation2 + $0x220] sm:$0xff]  ;;  %v855_v46 = vmul.f32 %v2715_v14, %v2715_v14 }
 0x1be   : > { %3189 = vst [vmem:[#allocation32_spill] sm:$0xff] %v2720_v25 }
 0x1bf   : > { %v770_v50 = vadd.f32 %v769_v31, %v2700_v39  ;;  %v926_v7 = vadd.f32 %v925_v58, %v851_v35  ;;  %v2725_v39 = vld [vmem:[#allocation2 + $0x228] sm:$0xff]  ;;  %v856_v58 = vmul.f32 %v2720_v25, %v2720_v25 }
 0x1c0   : > { %3190 = vst [vmem:[#allocation33_spill] sm:$0xff] %v2725_v39 }
 0x1c1   : > { %v771_v3 = vadd.f32 %v770_v50, %v2705_v61  ;;  %v927_v21 = vadd.f32 %v926_v7, %v852_v57  ;;  %v2730_v61 = vld [vmem:[#allocation2 + $0x230] sm:$0xff]  ;;  %v857_v7 = vmul.f32 %v2725_v39, %v2725_v39 }
 0x1c2   : > { %3191 = vst [vmem:[#allocation34_spill] sm:$0xff] %v2730_v61 }
 0x1c3   : > { %v772_v23 = vadd.f32 %v771_v3, %v2710_v15  ;;  %v928_v31 = vadd.f32 %v927_v21, %v853_v10  ;;  %v2735_v15 = vld [vmem:[#allocation2 + $0x238] sm:$0xff]  ;;  %v858_v21 = vmul.f32 %v2730_v61, %v2730_v61 }
 0x1c4   : > { %3192 = vst [vmem:[#allocation35_spill] sm:$0xff] %v2735_v15 }
 0x1c5   : > { %v773_v35 = vadd.f32 %v772_v23, %v2715_v14  ;;  %v929_v50 = vadd.f32 %v928_v31, %v854_v30  ;;  %v2740_v14 = vld [vmem:[#allocation2 + $0x240] sm:$0xff]  ;;  %v859_v31 = vmul.f32 %v2735_v15, %v2735_v15 }
 0x1c6   : > { %3193 = vst [vmem:[#allocation36_spill] sm:$0xff] %v2740_v14 }
 0x1c7   : > { %v774_v57 = vadd.f32 %v773_v35, %v2720_v25  ;;  %v930_v3 = vadd.f32 %v929_v50, %v855_v46  ;;  %v2745_v25 = vld [vmem:[#allocation2 + $0x248] sm:$0xff]  ;;  %v860_v50 = vmul.f32 %v2740_v14, %v2740_v14 }
 0x1c8   : > { %3194 = vst [vmem:[#allocation37_spill] sm:$0xff] %v2745_v25 }
 0x1c9   : > { %v775_v10 = vadd.f32 %v774_v57, %v2725_v39  ;;  %v931_v23 = vadd.f32 %v930_v3, %v856_v58  ;;  %v2750_v39 = vld [vmem:[#allocation2 + $0x250] sm:$0xff]  ;;  %v861_v3 = vmul.f32 %v2745_v25, %v2745_v25 }
 0x1ca   : > { %3195 = vst [vmem:[#allocation38_spill] sm:$0xff] %v2750_v39 }
 0x1cb   : > { %v776_v30 = vadd.f32 %v775_v10, %v2730_v61  ;;  %v932_v35 = vadd.f32 %v931_v23, %v857_v7  ;;  %v2755_v61 = vld [vmem:[#allocation2 + $0x258] sm:$0xff]  ;;  %v862_v23 = vmul.f32 %v2750_v39, %v2750_v39 }
 0x1cd   : > { %v777_v46 = vadd.f32 %v776_v30, %v2735_v15  ;;  %v933_v57 = vadd.f32 %v932_v35, %v858_v21  ;;  %v863_v21 = vmul.f32 %v2755_v61, %v2755_v61 }
 0x1cf   : > { %v778_v58 = vadd.f32 %v777_v46, %v2740_v14  ;;  %v934_v10 = vadd.f32 %v933_v57, %v859_v31 }
 0x1d1   : > { %v779_v7 = vadd.f32 %v778_v58, %v2745_v25  ;;  %v935_v30 = vadd.f32 %v934_v10, %v860_v50 }
 0x1d3   : > { %v780_v15 = vadd.f32 %v779_v7, %v2750_v39  ;;  %v936_v35 = vadd.f32 %v935_v30, %v861_v3 }
 0x1d5   : > { %v781_v46 = vadd.f32 %v780_v15, %v2755_v61  ;;  %v937_v14 = vadd.f32 %v936_v35, %v862_v23  ;;  %v957_v15 = vlaneseq }
 0x1d7   : > { %v782_v2 = vrot.slane %v781_v46, 4  ;;  %v938_v51 = vadd.f32 %v937_v14, %v863_v21  ;;  %v958_v23 = vshrl.u32 %v957_v15, 7 }
 0x1d9   : > { %v783_v31 = vadd.f32 %v782_v2, %v781_v46  ;;  %v939_v57 = vrot.slane %v938_v51, 4  ;;  %v949_v2 = vld [vmem:[%s3121_s2] sm:$0x1] }
 0x1db   : > { %v784_v37 = vrot.slane %v783_v31, 2  ;;  %v940_v29 = vadd.f32 %v939_v57, %v938_v51  ;;  %v959_v51 = vsub.s32 0, %v958_v23 }
 0x1dd   : > { %v785_v58 = vadd.f32 %v784_v37, %v783_v31  ;;  %v941_v25 = vrot.slane %v940_v29, 2 }
 0x1df   : > { %v786_v18 = vrot.slane %v785_v58, 1  ;;  %v942_v9 = vadd.f32 %v941_v25, %v940_v29 }
 0x1e1   : > { %v787_v50 = vadd.f32 %v786_v18, %v785_v58  ;;  %v943_v10 = vrot.slane %v942_v9, 1  ;;  %v953_v18 = vld [vmem:[%s3122_s3] sm:$0x1] }
 0x1e3   : > { %v945_v7 = vmul.f32 0.0017301039, %v787_v50  ;;  %v944_v39 = vadd.f32 %v943_v10, %v942_v9 }
 0x1e5   : > { %v947_v63 = vmul.f32 %v945_v7, %v945_v7  ;;  %v946_v53 = vmul.f32 0.0017301039, %v944_v39 }
 0x1e7   : > { %v948_v3 = vsub.f32 %v946_v53, %v947_v63 }
 0x1e9   : > { %v950_v30 = vadd.f32 1e-05, %v948_v3 }
 0x1eb   : > { %2192 = vrsqrt.f32 %v950_v30 }
 0x1f8   : > { %v2193_v37 = vpop.eup %2192 }
 0x1f9   : > { %v952_v14 = vmul.f32 %v2193_v37, %v949_v2 }
 0x1fb   : > { %v954_v29 = vmul.f32 %v952_v14, %v945_v7  ;;  %v2770_v9 = vrot.slane %v952_v14, %v959_v51 }
 0x1fd   : > { %v955_v25 = vsub.f32 %v953_v18, %v954_v29  ;;  %v962_v53 = vmul.f32 %v2770_v9, %v2384_v40  ;;  %v963_v63 = vmul.f32 %v2770_v9, %v2386_v41  ;;  %v964_v39 = vmul.f32 %v2770_v9, %v2388_v42 }
 0x1fe   : > { %v965_v21 = vmul.f32 %v2770_v9, %v2390_v43  ;;  %v966_v35 = vmul.f32 %v2770_v9, %v2400_v48  ;;  %v967_v46 = vmul.f32 %v2770_v9, %v2405_v52  ;;  %v968_v31 = vmul.f32 %v2770_v9, %v2410_v56 }
 0x1ff   : > { %v2786_v57 = vrot.slane %v955_v25, %v959_v51  ;;  %v969_v40 = vmul.f32 %v2770_v9, %v2415_v60  ;;  %v970_v41 = vmul.f32 %v2770_v9, %v2420_v0  ;;  %v971_v42 = vmul.f32 %v2770_v9, %v2425_v4 }
 0x200   : > { %v972_v43 = vmul.f32 %v2770_v9, %v2430_v8  ;;  %v973_v48 = vmul.f32 %v2770_v9, %v2435_v12  ;;  %v974_v52 = vmul.f32 %v2770_v9, %v2440_v16  ;;  %v975_v56 = vmul.f32 %v2770_v9, %v2445_v20 }
 0x201   : > { %v1044_v60 = vadd.f32 %v2786_v57, %v962_v53  ;;  %v1045_v58 = vadd.f32 %v2786_v57, %v963_v63  ;;  %v1046_v0 = vadd.f32 %v2786_v57, %v964_v39  ;;  %v1047_v4 = vadd.f32 %v2786_v57, %v965_v21 }
 0x202   : > { %v1048_v50 = vadd.f32 %v2786_v57, %v966_v35  ;;  %v1049_v8 = vadd.f32 %v2786_v57, %v967_v46  ;;  %v1050_v12 = vadd.f32 %v2786_v57, %v968_v31  ;;  %v1051_v10 = vadd.f32 %v2786_v57, %v969_v40 }
 0x203   : > { %v1120_v16 = vmax.f32 %v1044_v60, 0.0  ;;  %v1121_v7 = vmax.f32 %v1045_v58, 0.0  ;;  %v1122_v3 = vmax.f32 %v1046_v0, 0.0  ;;  %v1123_v20 = vmax.f32 %v1047_v4, 0.0 }
 0x204   : > { %v1124_v30 = vmax.f32 %v1048_v50, 0.0  ;;  %v1125_v15 = vmax.f32 %v1049_v8, 0.0  ;;  %v1126_v23 = vmax.f32 %v1050_v12, 0.0  ;;  %v1127_v2 = vmax.f32 %v1051_v10, 0.0 }
 0x205   : > { %v1796_v51 = vpack.c.bf16 %v1121_v7, %v1120_v16  ;;  %v1801_v37 = vpack.c.bf16 %v1123_v20, %v1122_v3  ;;  %v1052_v14 = vadd.f32 %v2786_v57, %v970_v41  ;;  %v1053_v18 = vadd.f32 %v2786_v57, %v971_v42 }
 0x206   : > { %v1806_v29 = vpack.c.bf16 %v1125_v15, %v1124_v30  ;;  %v1811_v25 = vpack.c.bf16 %v1127_v2, %v1126_v23  ;;  %v1054_v53 = vadd.f32 %v2786_v57, %v972_v43  ;;  %v1055_v63 = vadd.f32 %v2786_v57, %v973_v48 }
 0x207   : > { %1797 = vst [vmem:[%s3123_s4] sm:$0xff] %v1796_v51   ;;  %1983 = vst [vmem:[%s3123_s4 + $0x8] sm:$0xff] %v1801_v37   ;;  %v1128_v39 = vmax.f32 %v1052_v14, 0.0  ;;  %v1129_v21 = vmax.f32 %v1053_v18, 0.0  ;;  %v1056_v35 = vadd.f32 %v2786_v57, %v974_v52  ;;  %v1057_v46 = vadd.f32 %v2786_v57, %v975_v56 }
 0x208   : > { %1984 = vst [vmem:[%s3123_s4 + $0x10] sm:$0xff] %v1806_v29   ;;  %1985 = vst [vmem:[%s3123_s4 + $0x18] sm:$0xff] %v1811_v25   ;;  %v1130_v31 = vmax.f32 %v1054_v53, 0.0  ;;  %v1131_v40 = vmax.f32 %v1055_v63, 0.0  ;;  %v976_v41 = vmul.f32 %v2770_v9, %v2450_v24  ;;  %v977_v42 = vmul.f32 %v2770_v9, %v2455_v28 }
 0x209   : > { %v1816_v43 = vpack.c.bf16 %v1129_v21, %v1128_v39  ;;  %v1132_v48 = vmax.f32 %v1056_v35, 0.0  ;;  %v1133_v52 = vmax.f32 %v1057_v46, 0.0  ;;  %v978_v56 = vmul.f32 %v2770_v9, %v2460_v32 }
 0x20a   : > { %v1821_v60 = vpack.c.bf16 %v1131_v40, %v1130_v31  ;;  %v1058_v58 = vadd.f32 %v2786_v57, %v976_v41  ;;  %v1059_v0 = vadd.f32 %v2786_v57, %v977_v42  ;;  %v979_v4 = vmul.f32 %v2770_v9, %v2465_v36 }
 0x20b   : > { %1986 = vst [vmem:[%s3123_s4 + $0x20] sm:$0xff] %v1816_v43   ;;  %v1826_v24 = vpack.c.bf16 %v1133_v52, %v1132_v48  ;;  %v1060_v28 = vadd.f32 %v2786_v57, %v978_v56  ;;  %v980_v50 = vmul.f32 %v2770_v9, %v2470_v44  ;;  %v981_v32 = vmul.f32 %v2770_v9, %v2475_v49 }
 0x20c   : > { %1987 = vst [vmem:[%s3123_s4 + $0x28] sm:$0xff] %v1821_v60   ;;  %v1134_v8 = vmax.f32 %v1058_v58, 0.0  ;;  %v1135_v12 = vmax.f32 %v1059_v0, 0.0  ;;  %v1061_v36 = vadd.f32 %v2786_v57, %v979_v4  ;;  %v982_v10 = vmul.f32 %v2770_v9, %v2480_v54 }
 0x20d   : > { %1988 = vst [vmem:[%s3123_s4 + $0x30] sm:$0xff] %v1826_v24   ;;  %v1136_v16 = vmax.f32 %v1060_v28, 0.0  ;;  %v1062_v44 = vadd.f32 %v2786_v57, %v980_v50  ;;  %v1063_v49 = vadd.f32 %v2786_v57, %v981_v32  ;;  %v983_v7 = vmul.f32 %v2770_v9, %v2485_v59 }
 0x20e   : > { %v1831_v3 = vpack.c.bf16 %v1135_v12, %v1134_v8  ;;  %v1137_v20 = vmax.f32 %v1061_v36, 0.0  ;;  %v1064_v30 = vadd.f32 %v2786_v57, %v982_v10  ;;  %v984_v15 = vmul.f32 %v2770_v9, %v2490_v1 }
 0x20f   : > { %v1138_v54 = vmax.f32 %v1062_v44, 0.0  ;;  %v1139_v23 = vmax.f32 %v1063_v49, 0.0  ;;  %v1065_v2 = vadd.f32 %v2786_v57, %v983_v7  ;;  %v985_v51 = vmul.f32 %v2770_v9, %v2495_v6 }
 0x210   : > { %1989 = vst [vmem:[%s3123_s4 + $0x38] sm:$0xff] %v1831_v3   ;;  %v1836_v37 = vpack.c.bf16 %v1137_v20, %v1136_v16  ;;  %v1140_v59 = vmax.f32 %v1064_v30, 0.0  ;;  %v1066_v14 = vadd.f32 %v2786_v57, %v984_v15  ;;  %v986_v18 = vmul.f32 %v2770_v9, %v2500_v11 }
 0x211   : > { %v1841_v29 = vpack.c.bf16 %v1139_v23, %v1138_v54  ;;  %v1141_v1 = vmax.f32 %v1065_v2, 0.0  ;;  %v1067_v25 = vadd.f32 %v2786_v57, %v985_v51  ;;  %v987_v53 = vmul.f32 %v2770_v9, %v2505_v17  ;;  %v3196_v54 = vld [vmem:[#allocation3_spill] sm:$0xff] }
 0x212   : > { %1990 = vst [vmem:[%s3123_s4 + $0x40] sm:$0xff] %v1836_v37   ;;  %v1142_v6 = vmax.f32 %v1066_v14, 0.0  ;;  %v1068_v63 = vadd.f32 %v2786_v57, %v986_v18  ;;  %v988_v39 = vmul.f32 %v2770_v9, %v2510_v22  ;;  %v989_v11 = vmul.f32 %v2770_v9, %v2515_v27  ;;  %v3197_v37 = vld [vmem:[#allocation4_spill] sm:$0xff] }
 0x213   : > { %1991 = vst [vmem:[%s3123_s4 + $0x48] sm:$0xff] %v1841_v29   ;;  %v1846_v21 = vpack.c.bf16 %v1141_v1, %v1140_v59  ;;  %v1143_v35 = vmax.f32 %v1067_v25, 0.0  ;;  %v1069_v17 = vadd.f32 %v2786_v57, %v987_v53  ;;  %v990_v46 = vmul.f32 %v2770_v9, %v2520_v33  ;;  %v3198_v29 = vld [vmem:[#allocation5_spill] sm:$0xff] }
 0x214   : > { %v1144_v31 = vmax.f32 %v1068_v63, 0.0  ;;  %v1070_v40 = vadd.f32 %v2786_v57, %v988_v39  ;;  %v1071_v41 = vadd.f32 %v2786_v57, %v989_v11  ;;  %v991_v22 = vmul.f32 %v2770_v9, %v2525_v38  ;;  %v3200_v39 = vld [vmem:[#allocation7_spill] sm:$0xff] }
 0x215   : > { %1992 = vst [vmem:[%s3123_s4 + $0x50] sm:$0xff] %v1846_v21   ;;  %v1851_v27 = vpack.c.bf16 %v1143_v35, %v1142_v6  ;;  %v1145_v42 = vmax.f32 %v1069_v17, 0.0  ;;  %v1072_v43 = vadd.f32 %v2786_v57, %v990_v46  ;;  %v992_v48 = vmul.f32 %v2770_v9, %v2530_v47  ;;  %v3199_v6 = vld [vmem:[#allocation6_spill] sm:$0xff]  ;;  %v3201_v46 = vld [vmem:[#allocation8_spill] sm:$0xff] }
 0x216   : > { %v1146_v33 = vmax.f32 %v1070_v40, 0.0  ;;  %v1147_v52 = vmax.f32 %v1071_v41, 0.0  ;;  %v1073_v56 = vadd.f32 %v2786_v57, %v991_v22  ;;  %v993_v60 = vmul.f32 %v2770_v9, %v2535_v55 }
 0x217   : > { %1993 = vst [vmem:[%s3123_s4 + $0x58] sm:$0xff] %v1851_v27   ;;  %v1856_v38 = vpack.c.bf16 %v1145_v42, %v1144_v31  ;;  %v1148_v58 = vmax.f32 %v1072_v43, 0.0  ;;  %v1074_v0 = vadd.f32 %v2786_v57, %v992_v48  ;;  %v994_v4 = vmul.f32 %v2770_v9, %v2540_v62  ;;  %v3202_v27 = vld [vmem:[#allocation9_spill] sm:$0xff] }
 0x218   : > { %v1861_v24 = vpack.c.bf16 %v1147_v52, %v1146_v33  ;;  %v1149_v47 = vmax.f32 %v1073_v56, 0.0  ;;  %v1075_v28 = vadd.f32 %v2786_v57, %v993_v60  ;;  %v995_v50 = vmul.f32 %v2770_v9, %v2545_v5  ;;  %v3203_v52 = vld [vmem:[#allocation10_spill] sm:$0xff] }
 0x219   : > { %1994 = vst [vmem:[%s3123_s4 + $0x60] sm:$0xff] %v1856_v38   ;;  %v1150_v55 = vmax.f32 %v1074_v0, 0.0  ;;  %v1076_v32 = vadd.f32 %v2786_v57, %v994_v4  ;;  %v996_v8 = vmul.f32 %v2770_v9, %v2550_v13  ;;  %v997_v62 = vmul.f32 %v2770_v9, %v2555_v19  ;;  %v3204_v0 = vld [vmem:[#allocation11_spill] sm:$0xff] }
 0x21a   : > { %1995 = vst [vmem:[%s3123_s4 + $0x68] sm:$0xff] %v1861_v24   ;;  %v1866_v12 = vpack.c.bf16 %v1149_v47, %v1148_v58  ;;  %v1151_v36 = vmax.f32 %v1075_v28, 0.0  ;;  %v1077_v5 = vadd.f32 %v2786_v57, %v995_v50  ;;  %v998_v10 = vmul.f32 %v2770_v9, %v2560_v26  ;;  %v3205_v50 = vld [vmem:[#allocation12_spill] sm:$0xff] }
 0x21b   : > { %v1152_v16 = vmax.f32 %v1076_v32, 0.0  ;;  %v1078_v44 = vadd.f32 %v2786_v57, %v996_v8  ;;  %v1079_v49 = vadd.f32 %v2786_v57, %v997_v62  ;;  %v999_v13 = vmul.f32 %v2770_v9, %v2565_v34 }
 0x21c   : > { %1996 = vst [vmem:[%s3123_s4 + $0x70] sm:$0xff] %v1866_v12   ;;  %v1871_v19 = vpack.c.bf16 %v1151_v36, %v1150_v55  ;;  %v1153_v7 = vmax.f32 %v1077_v5, 0.0  ;;  %v1080_v3 = vadd.f32 %v2786_v57, %v998_v10  ;;  %v1000_v20 = vmul.f32 %v2770_v9, %v2570_v45  ;;  %v3206_v12 = vld [vmem:[#allocation13_spill] sm:$0xff] }
 0x21d   : > { %v1154_v26 = vmax.f32 %v1078_v44, 0.0  ;;  %v1155_v30 = vmax.f32 %v1079_v49, 0.0  ;;  %v1081_v15 = vadd.f32 %v2786_v57, %v999_v13  ;;  %v1001_v23 = vmul.f32 %v2770_v9, %v3196_v54  ;;  %v3208_v49 = vld [vmem:[#allocation15_spill] sm:$0xff] }
 0x21e   : > { %1997 = vst [vmem:[%s3123_s4 + $0x78] sm:$0xff] %v1871_v19   ;;  %v1876_v34 = vpack.c.bf16 %v1153_v7, %v1152_v16  ;;  %v1156_v2 = vmax.f32 %v1080_v3, 0.0  ;;  %v1082_v51 = vadd.f32 %v2786_v57, %v1000_v20  ;;  %v1002_v59 = vmul.f32 %v2770_v9, %v3197_v37  ;;  %v3207_v16 = vld [vmem:[#allocation14_spill] sm:$0xff]  ;;  %v3209_v20 = vld [vmem:[#allocation16_spill] sm:$0xff] }
 0x21f   : > { %v1881_v14 = vpack.c.bf16 %v1155_v30, %v1154_v26  ;;  %v1157_v45 = vmax.f32 %v1081_v15, 0.0  ;;  %v1083_v18 = vadd.f32 %v2786_v57, %v1001_v23  ;;  %v1003_v1 = vmul.f32 %v2770_v9, %v3198_v29  ;;  %v3210_v23 = vld [vmem:[#allocation17_spill] sm:$0xff] }
 0x220   : > { %1998 = vst [vmem:[%s3123_s4 + $0x80] sm:$0xff] %v1876_v34   ;;  %v1158_v25 = vmax.f32 %v1082_v51, 0.0  ;;  %v1084_v53 = vadd.f32 %v2786_v57, %v1002_v59  ;;  %v1004_v63 = vmul.f32 %v2770_v9, %v3199_v6  ;;  %v1005_v11 = vmul.f32 %v2770_v9, %v3200_v39  ;;  %v3211_v59 = vld [vmem:[#allocation18_spill] sm:$0xff]  ;;  %v3213_v39 = vld [vmem:[#allocation20_spill] sm:$0xff] }
 0x221   : > { %1999 = vst [vmem:[%s3123_s4 + $0x88] sm:$0xff] %v1881_v14   ;;  %v1886_v21 = vpack.c.bf16 %v1157_v45, %v1156_v2  ;;  %v1159_v35 = vmax.f32 %v1083_v18, 0.0  ;;  %v1085_v17 = vadd.f32 %v2786_v57, %v1003_v1  ;;  %v1006_v31 = vmul.f32 %v2770_v9, %v3201_v46  ;;  %v3212_v1 = vld [vmem:[#allocation19_spill] sm:$0xff]  ;;  %v3214_v46 = vld [vmem:[#allocation21_spill] sm:$0xff] }
 0x222   : > { %v1160_v40 = vmax.f32 %v1084_v53, 0.0  ;;  %v1086_v41 = vadd.f32 %v2786_v57, %v1004_v63  ;;  %v1087_v22 = vadd.f32 %v2786_v57, %v1005_v11  ;;  %v1007_v42 = vmul.f32 %v2770_v9, %v3202_v27 }
 0x223   : > { %2000 = vst [vmem:[%s3123_s4 + $0x90] sm:$0xff] %v1886_v21   ;;  %v1891_v43 = vpack.c.bf16 %v1159_v35, %v1158_v25  ;;  %v1161_v48 = vmax.f32 %v1085_v17, 0.0  ;;  %v1088_v33 = vadd.f32 %v2786_v57, %v1006_v31  ;;  %v1008_v56 = vmul.f32 %v2770_v9, %v3203_v52 }
 0x224   : > { %v1162_v60 = vmax.f32 %v1086_v41, 0.0  ;;  %v1163_v38 = vmax.f32 %v1087_v22, 0.0  ;;  %v1089_v58 = vadd.f32 %v2786_v57, %v1007_v42  ;;  %v1009_v4 = vmul.f32 %v2770_v9, %v3204_v0  ;;  %v3215_v22 = vld [vmem:[#allocation22_spill] sm:$0xff]  ;;  %v3216_v42 = vld [vmem:[#allocation23_spill] sm:$0xff] }
 0x225   : > { %2001 = vst [vmem:[%s3123_s4 + $0x98] sm:$0xff] %v1891_v43   ;;  %v1896_v24 = vpack.c.bf16 %v1161_v48, %v1160_v40  ;;  %v1164_v47 = vmax.f32 %v1088_v33, 0.0  ;;  %v1090_v28 = vadd.f32 %v2786_v57, %v1008_v56  ;;  %v1010_v55 = vmul.f32 %v2770_v9, %v3205_v50  ;;  %v3217_v56 = vld [vmem:[#allocation24_spill] sm:$0xff] }
 0x226   : > { %v1901_v32 = vpack.c.bf16 %v1163_v38, %v1162_v60  ;;  %v1165_v8 = vmax.f32 %v1089_v58, 0.0  ;;  %v1091_v62 = vadd.f32 %v2786_v57, %v1009_v4  ;;  %v1011_v36 = vmul.f32 %v2770_v9, %v3206_v12  ;;  %v3218_v4 = vld [vmem:[#allocation25_spill] sm:$0xff] }
 0x227   : > { %2002 = vst [vmem:[%s3123_s4 + $0xa0] sm:$0xff] %v1896_v24   ;;  %v1166_v5 = vmax.f32 %v1090_v28, 0.0  ;;  %v1092_v10 = vadd.f32 %v2786_v57, %v1010_v55  ;;  %v1012_v44 = vmul.f32 %v2770_v9, %v3207_v16  ;;  %v1013_v13 = vmul.f32 %v2770_v9, %v3208_v49  ;;  %v3219_v55 = vld [vmem:[#allocation26_spill] sm:$0xff]  ;;  %v3221_v49 = vld [vmem:[#allocation28_spill] sm:$0xff] }
 0x228   : > { %2003 = vst [vmem:[%s3123_s4 + $0xa8] sm:$0xff] %v1901_v32   ;;  %v1906_v19 = vpack.c.bf16 %v1165_v8, %v1164_v47  ;;  %v1167_v7 = vmax.f32 %v1091_v62, 0.0  ;;  %v1093_v3 = vadd.f32 %v2786_v57, %v1011_v36  ;;  %v1014_v26 = vmul.f32 %v2770_v9, %v3209_v20  ;;  %v3220_v36 = vld [vmem:[#allocation27_spill] sm:$0xff]  ;;  %v3222_v20 = vld [vmem:[#allocation29_spill] sm:$0xff] }
 0x229   : > { %v1168_v30 = vmax.f32 %v1092_v10, 0.0  ;;  %v1094_v15 = vadd.f32 %v2786_v57, %v1012_v44  ;;  %v1095_v54 = vadd.f32 %v2786_v57, %v1013_v13  ;;  %v1015_v34 = vmul.f32 %v2770_v9, %v3210_v23 }
 0x22a   : > { %2004 = vst [vmem:[%s3123_s4 + $0xb0] sm:$0xff] %v1906_v19   ;;  %v1911_v2 = vpack.c.bf16 %v1167_v7, %v1166_v5  ;;  %v1169_v51 = vmax.f32 %v1093_v3, 0.0  ;;  %v1096_v37 = vadd.f32 %v2786_v57, %v1014_v26  ;;  %v1016_v14 = vmul.f32 %v2770_v9, %v3211_v59 }
 0x22b   : > { %v1170_v45 = vmax.f32 %v1094_v15, 0.0  ;;  %v1171_v18 = vmax.f32 %v1095_v54, 0.0  ;;  %v1097_v29 = vadd.f32 %v2786_v57, %v1015_v34  ;;  %v1017_v25 = vmul.f32 %v2770_v9, %v3212_v1  ;;  %v3223_v54 = vld [vmem:[#allocation30_spill] sm:$0xff]  ;;  %v3224_v34 = vld [vmem:[#allocation31_spill] sm:$0xff] }
 0x22c   : > { %2005 = vst [vmem:[%s3123_s4 + $0xb8] sm:$0xff] %v1911_v2   ;;  %v1916_v53 = vpack.c.bf16 %v1169_v51, %v1168_v30  ;;  %v1172_v6 = vmax.f32 %v1096_v37, 0.0  ;;  %v1098_v63 = vadd.f32 %v2786_v57, %v1016_v14  ;;  %v1018_v11 = vmul.f32 %v2770_v9, %v3213_v39  ;;  %v3225_v14 = vld [vmem:[#allocation32_spill] sm:$0xff] }
 0x22d   : > { %v1921_v21 = vpack.c.bf16 %v1171_v18, %v1170_v45  ;;  %v1173_v35 = vmax.f32 %v1097_v29, 0.0  ;;  %v1099_v17 = vadd.f32 %v2786_v57, %v1017_v25  ;;  %v1019_v31 = vmul.f32 %v2770_v9, %v3214_v46  ;;  %v3226_v25 = vld [vmem:[#allocation33_spill] sm:$0xff] }
 0x22e   : > { %2006 = vst [vmem:[%s3123_s4 + $0xc0] sm:$0xff] %v1916_v53   ;;  %v1174_v40 = vmax.f32 %v1098_v63, 0.0  ;;  %v1100_v41 = vadd.f32 %v2786_v57, %v1018_v11  ;;  %v1020_v27 = vmul.f32 %v2770_v9, %v3215_v22  ;;  %v1021_v43 = vmul.f32 %v2770_v9, %v3216_v42  ;;  %v3227_v11 = vld [vmem:[#allocation34_spill] sm:$0xff]  ;;  %v3229_v42 = vld [vmem:[#allocation36_spill] sm:$0xff] }
 0x22f   : > { %2007 = vst [vmem:[%s3123_s4 + $0xc8] sm:$0xff] %v1921_v21   ;;  %v1926_v48 = vpack.c.bf16 %v1173_v35, %v1172_v6  ;;  %v1175_v33 = vmax.f32 %v1099_v17, 0.0  ;;  %v1101_v52 = vadd.f32 %v2786_v57, %v1019_v31  ;;  %v1022_v60 = vmul.f32 %v2770_v9, %v3217_v56  ;;  %v3228_v31 = vld [vmem:[#allocation35_spill] sm:$0xff]  ;;  %v3230_v56 = vld [vmem:[#allocation37_spill] sm:$0xff] }
 0x230   : > { %v1176_v38 = vmax.f32 %v1100_v41, 0.0  ;;  %v1102_v58 = vadd.f32 %v2786_v57, %v1020_v27  ;;  %v1103_v0 = vadd.f32 %v2786_v57, %v1021_v43  ;;  %v1023_v24 = vmul.f32 %v2770_v9, %v3218_v4 }
 0x231   : > { %2008 = vst [vmem:[%s3123_s4 + $0xd0] sm:$0xff] %v1926_v48   ;;  %v1931_v47 = vpack.c.bf16 %v1175_v33, %v1174_v40  ;;  %v1177_v28 = vmax.f32 %v1101_v52, 0.0  ;;  %v1104_v50 = vadd.f32 %v2786_v57, %v1022_v60  ;;  %v1024_v32 = vmul.f32 %v2770_v9, %v3219_v55 }
 0x232   : > { %v1178_v8 = vmax.f32 %v1102_v58, 0.0  ;;  %v1179_v62 = vmax.f32 %v1103_v0, 0.0  ;;  %v1105_v12 = vadd.f32 %v2786_v57, %v1023_v24  ;;  %v1025_v5 = vmul.f32 %v2770_v9, %v3220_v36  ;;  %v3231_v0 = vld [vmem:[#allocation38_spill] sm:$0xff] }
 0x233   : > { %2009 = vst [vmem:[%s3123_s4 + $0xd8] sm:$0xff] %v1931_v47   ;;  %v1936_v10 = vpack.c.bf16 %v1177_v28, %v1176_v38  ;;  %v1180_v16 = vmax.f32 %v1104_v50, 0.0  ;;  %v1106_v44 = vadd.f32 %v2786_v57, %v1024_v32  ;;  %v1026_v13 = vmul.f32 %v2770_v9, %v3221_v49 }
 0x234   : > { %v1941_v19 = vpack.c.bf16 %v1179_v62, %v1178_v8  ;;  %v1181_v7 = vmax.f32 %v1105_v12, 0.0  ;;  %v1107_v3 = vadd.f32 %v2786_v57, %v1025_v5  ;;  %v1027_v26 = vmul.f32 %v2770_v9, %v3222_v20 }
 0x235   : > { %2010 = vst [vmem:[%s3123_s4 + $0xe0] sm:$0xff] %v1936_v10   ;;  %v1182_v30 = vmax.f32 %v1106_v44, 0.0  ;;  %v1108_v15 = vadd.f32 %v2786_v57, %v1026_v13  ;;  %v1028_v23 = vmul.f32 %v2770_v9, %v3223_v54  ;;  %v1029_v2 = vmul.f32 %v2770_v9, %v3224_v34 }
 0x236   : > { %2011 = vst [vmem:[%s3123_s4 + $0xe8] sm:$0xff] %v1941_v19   ;;  %v1946_v51 = vpack.c.bf16 %v1181_v7, %v1180_v16  ;;  %v1183_v37 = vmax.f32 %v1107_v3, 0.0  ;;  %v1109_v59 = vadd.f32 %v2786_v57, %v1027_v26  ;;  %v1030_v45 = vmul.f32 %v2770_v9, %v3225_v14 }
 0x237   : > { %v1184_v18 = vmax.f32 %v1108_v15, 0.0  ;;  %v1110_v29 = vadd.f32 %v2786_v57, %v1028_v23  ;;  %v1111_v1 = vadd.f32 %v2786_v57, %v1029_v2  ;;  %v1031_v53 = vmul.f32 %v2770_v9, %v3226_v25 }
 0x238   : > { %2012 = vst [vmem:[%s3123_s4 + $0xf0] sm:$0xff] %v1946_v51   ;;  %v1951_v6 = vpack.c.bf16 %v1183_v37, %v1182_v30  ;;  %v1185_v63 = vmax.f32 %v1109_v59, 0.0  ;;  %v1112_v39 = vadd.f32 %v2786_v57, %v1030_v45  ;;  %v1032_v21 = vmul.f32 %v2770_v9, %v3227_v11 }
 0x239   : > { %v1186_v35 = vmax.f32 %v1110_v29, 0.0  ;;  %v1187_v17 = vmax.f32 %v1111_v1, 0.0  ;;  %v1113_v46 = vadd.f32 %v2786_v57, %v1031_v53  ;;  %v1033_v40 = vmul.f32 %v2770_v9, %v3228_v31 }
 0x23a   : > { %2013 = vst [vmem:[%s3123_s4 + $0xf8] sm:$0xff] %v1951_v6   ;;  %v1956_v41 = vpack.c.bf16 %v1185_v63, %v1184_v18  ;;  %v1188_v22 = vmax.f32 %v1112_v39, 0.0  ;;  %v1114_v27 = vadd.f32 %v2786_v57, %v1032_v21  ;;  %v1034_v43 = vmul.f32 %v2770_v9, %v3229_v42 }
 0x23b   : > { %v1961_v48 = vpack.c.bf16 %v1187_v17, %v1186_v35  ;;  %v1189_v33 = vmax.f32 %v1113_v46, 0.0  ;;  %v1115_v52 = vadd.f32 %v2786_v57, %v1033_v40  ;;  %v1035_v60 = vmul.f32 %v2770_v9, %v3230_v56 }
 0x23c   : > { %2014 = vst [vmem:[%s3123_s4 + $0x100] sm:$0xff] %v1956_v41   ;;  %v1190_v38 = vmax.f32 %v1114_v27, 0.0  ;;  %v1116_v58 = vadd.f32 %v2786_v57, %v1034_v43  ;;  %v1036_v4 = vmul.f32 %v2770_v9, %v3231_v0  ;;  %v1037_v24 = vmul.f32 %v2770_v9, %v2755_v61 }
 0x23d   : > { %2015 = vst [vmem:[%s3123_s4 + $0x108] sm:$0xff] %v1961_v48   ;;  %v1966_v47 = vpack.c.bf16 %v1189_v33, %v1188_v22  ;;  %v1191_v28 = vmax.f32 %v1115_v52, 0.0  ;;  %v1117_v50 = vadd.f32 %v2786_v57, %v1035_v60 }
 0x23e   : > { %v1192_v55 = vmax.f32 %v1116_v58, 0.0  ;;  %v1118_v32 = vadd.f32 %v2786_v57, %v1036_v4  ;;  %v1119_v8 = vadd.f32 %v2786_v57, %v1037_v24 }
 0x23f   : > { %2016 = vst [vmem:[%s3123_s4 + $0x110] sm:$0xff] %v1966_v47   ;;  %v1971_v62 = vpack.c.bf16 %v1191_v28, %v1190_v38  ;;  %v1193_v12 = vmax.f32 %v1117_v50, 0.0 }
 0x240   : > { %v1194_v61 = vmax.f32 %v1118_v32, 0.0  ;;  %v1195_v9 = vmax.f32 %v1119_v8, 0.0 }
 0x241   : > { %2017 = vst [vmem:[%s3123_s4 + $0x118] sm:$0xff] %v1971_v62   ;;  %v1976_v36 = vpack.c.bf16 %v1193_v12, %v1192_v55 }
 0x242   : > { %v1981_v5 = vpack.c.bf16 %v1195_v9, %v1194_v61 }
 0x243   : > { %2018 = vst [vmem:[%s3123_s4 + $0x120] sm:$0xff] %v1976_v36  }
 0x244   : > { %2019 = vst [vmem:[%s3123_s4 + $0x128] sm:$0xff] %v1981_v5  }
 0x245 PF: > { %s14_s15 = sadd.s32 1, %s2200_s15  }
 0x246   : > { %p11_p5 = scmp.ge.s32.totalorder %s14_s15, 4  }
 0x248   :  { %13 = sbr.rel (!%p11_p5) target bundleno = 1 (0x1), region = 67 }

// kernel: stem_forward.13
= control target key start
LH: loop header
LB: loop body
LE: loop exit
PB: predicated region body
PF: predicated region fallthrough
CT: control target
= control target key end

     0   :  { %v2831_v0 = vmov 0   ;;  %v2832_v2 = vmov 0.0   ;;  %vm2833_vm0 = vmmov 0   ;;  %s3976_s1 = inlined_call_operand.vmem [shape: bf16[384,128], index: 1, kind: input, shape index: {}]   ;;  %s3977_s0 = inlined_call_operand.vmem [shape: bf16[464,384], index: 0, kind: input, shape index: {}]   ;;  %s3978_s2 = inlined_call_operand.vmem [shape: f32[1,128], index: 2, kind: input, shape index: {}]   ;;  %s3979_s3 = inlined_call_operand.vmem [shape: f32[1,128], index: 3, kind: input, shape index: {}]   ;;  %s3980_s4 = inlined_call_operand.vmem [shape: bf16[464,128], index: 4, kind: output, shape index: {}]  }
   0x1   :  { %790 = vmatprep.subr.bf16.mxu0 %v2831_v0  ;;  %v2689_v1 = vld [vmem:[%s3976_s1 + $0x38] sm:$0xff]   ;;  %2554 = vmatprep.subr.bf16.mxu1 %v2832_v2  ;;  %v2690_v3 = vld [vmem:[%s3976_s1 + $0x30] sm:$0xff]   ;;  %v2691_v4 = vld [vmem:[%s3976_s1 + $0x28] sm:$0xff]  }
   0x2   :  { %2570 = vmatprep.mubr.msk.bf16.mxu1 %vm2833_vm0, %v2832_v2  ;;  %791 = vmatpush1.bf16.msra.mxu0 %v2689_v1  ;;  %v2696_v5 = vld [vmem:[%s3976_s1 + $0xb8] sm:$0xff]   ;;  %v2698_v6 = vld [vmem:[%s3976_s1 + $0xb0] sm:$0xff]   ;;  %v2692_v7 = vld [vmem:[%s3976_s1 + $0x20] sm:$0xff]  }
   0x3   :  { %792 = vmatprep.subr.bf16.mxu0 %v2831_v0  ;;  %2555 = vmatpush3.bf16.msra.mxu1 %v2696_v5  ;;  %v2700_v8 = vld [vmem:[%s3976_s1 + $0xa8] sm:$0xff]   ;;  %v2693_v9 = vld [vmem:[%s3976_s1 + $0x18] sm:$0xff]   ;;  %v2702_v10 = vld [vmem:[%s3976_s1 + $0xa0] sm:$0xff]  }
   0x4   :  { %2556 = vmatprep.subr.bf16.mxu1 %v2832_v2  ;;  %v2694_v11 = vld [vmem:[%s3976_s1 + $0x10] sm:$0xff]   ;;  %v2704_v12 = vld [vmem:[%s3976_s1 + $0x98] sm:$0xff]   ;;  %v2695_v13 = vld [vmem:[%s3976_s1 + $0x8] sm:$0xff]  }
   0x5   :  { %v2697_v14 = vld [vmem:[%s3976_s1] sm:$0xff]   ;;  %v2706_v15 = vld [vmem:[%s3976_s1 + $0x90] sm:$0xff]   ;;  %v2708_v17 = vld [vmem:[%s3976_s1 + $0x88] sm:$0xff]  }
   0x6   :  { %793 = vmatpush1.bf16.msra.mxu0 %v2690_v3  ;;  %v2716_v16 = vld [vmem:[%s3977_s0 + $0x4] ss:$12 sps:$4 sm:$0xff]   ;;  %v2699_v18 = vld [vmem:[%s3976_s1 + $0x78] sm:$0xff]   ;;  %v2712_v21 = vld [vmem:[%s3977_s0 + $0x8] ss:$12 sps:$4 sm:$0xff]  }
   0x7   :  { %794 = vmatprep.subr.bf16.mxu0 %v2831_v0  ;;  %2557 = vmatpush3.bf16.msra.mxu1 %v2698_v6  ;;  %v2710_v19 = vld [vmem:[%s3976_s1 + $0x80] sm:$0xff]   ;;  %v2701_v20 = vld [vmem:[%s3976_s1 + $0x70] sm:$0xff]   ;;  %v2703_v22 = vld [vmem:[%s3976_s1 + $0x68] sm:$0xff]  }
   0x8   :  { %2558 = vmatprep.subr.bf16.mxu1 %v2832_v2  ;;  %822 = vmatprep.mubr.bf16.mxu0 %v2716_v16  ;;  %v2705_v23 = vld [vmem:[%s3976_s1 + $0x60] sm:$0xff]   ;;  %v2707_v25 = vld [vmem:[%s3976_s1 + $0x58] sm:$0xff]   ;;  %v2709_v26 = vld [vmem:[%s3976_s1 + $0x50] sm:$0xff]  }
   0x9   :  { %v2717_v24 = vld [vmem:[%s3977_s0 + $0x20] ss:$12 sps:$4 sm:$0xff]   ;;  %v2721_v27 = vld [vmem:[%s3977_s0 + $0x38] ss:$12 sps:$4 sm:$0xff]   ;;  %v2725_v30 = vld [vmem:[%s3977_s0 + $0x50] ss:$12 sps:$4 sm:$0xff]  }
   0xa   :  { %795 = vmatpush1.bf16.msra.mxu0 %v2691_v4  ;;  %v2711_v28 = vld [vmem:[%s3976_s1 + $0x48] sm:$0xff]   ;;  %v2713_v29 = vld [vmem:[%s3976_s1 + $0x40] sm:$0xff]   ;;  %v2724_v37 = vld [vmem:[%s3977_s0 + $0x30] ss:$12 sps:$4 sm:$0xff]  }
   0xb   :  { %796 = vmatprep.subr.bf16.mxu0 %v2831_v0  ;;  %2559 = vmatpush3.bf16.msra.mxu1 %v2700_v8  ;;  %v2714_v31 = vld [vmem:[%s3977_s0] ss:$12 sps:$4 sm:$0xff]   ;;  %v2718_v32 = vld [vmem:[%s3977_s0 + $0x1c] ss:$12 sps:$4 sm:$0xff]   ;;  %v2720_v34 = vld [vmem:[%s3977_s0 + $0x18] ss:$12 sps:$4 sm:$0xff]  }
   0xc   :  { %2560 = vmatprep.subr.bf16.mxu1 %v2832_v2  ;;  %v2729_v33 = vld [vmem:[%s3977_s0 + $0x68] ss:$12 sps:$4 sm:$0xff]   ;;  %v2733_v36 = vld [vmem:[%s3977_s0 + $0x80] ss:$12 sps:$4 sm:$0xff]   ;;  %v2737_v39 = vld [vmem:[%s3977_s0 + $0x98] ss:$12 sps:$4 sm:$0xff]  }
   0xd   :  { %v2722_v35 = vld [vmem:[%s3977_s0 + $0x34] ss:$12 sps:$4 sm:$0xff]   ;;  %v2726_v38 = vld [vmem:[%s3977_s0 + $0x4c] ss:$12 sps:$4 sm:$0xff]   ;;  %v2730_v41 = vld [vmem:[%s3977_s0 + $0x64] ss:$12 sps:$4 sm:$0xff]  }
   0xe   :  { %797 = vmatpush1.bf16.msra.mxu0 %v2692_v7  ;;  %v2728_v40 = vld [vmem:[%s3977_s0 + $0x48] ss:$12 sps:$4 sm:$0xff]   ;;  %v2741_v42 = vld [vmem:[%s3977_s0 + $0xb0] ss:$12 sps:$4 sm:$0xff]   ;;  %v2732_v43 = vld [vmem:[%s3977_s0 + $0x60] ss:$12 sps:$4 sm:$0xff]  }
   0xf   :  { %798 = vmatprep.subr.bf16.mxu0 %v2831_v0  ;;  %2561 = vmatpush3.bf16.msra.mxu1 %v2702_v10  ;;  %v2734_v44 = vld [vmem:[%s3977_s0 + $0x7c] ss:$12 sps:$4 sm:$0xff]   ;;  %v2736_v46 = vld [vmem:[%s3977_s0 + $0x78] ss:$12 sps:$4 sm:$0xff]   ;;  %v2738_v47 = vld [vmem:[%s3977_s0 + $0x94] ss:$12 sps:$4 sm:$0xff]  }
  0x10   :  { %2562 = vmatprep.subr.bf16.mxu1 %v2832_v2  ;;  %v2745_v45 = vld [vmem:[%s3977_s0 + $0xc8] ss:$12 sps:$4 sm:$0xff]   ;;  %v2749_v48 = vld [vmem:[%s3977_s0 + $0xe0] ss:$12 sps:$4 sm:$0xff]   ;;  %v2740_v49 = vld [vmem:[%s3977_s0 + $0x90] ss:$12 sps:$4 sm:$0xff]  }
  0x11   :  { %v2742_v50 = vld [vmem:[%s3977_s0 + $0xac] ss:$12 sps:$4 sm:$0xff]   ;;  %v2744_v52 = vld [vmem:[%s3977_s0 + $0xa8] ss:$12 sps:$4 sm:$0xff]   ;;  %v2746_v53 = vld [vmem:[%s3977_s0 + $0xc4] ss:$12 sps:$4 sm:$0xff]  }
  0x12   :  { %799 = vmatpush1.bf16.msra.mxu0 %v2693_v9  ;;  %v2753_v51 = vld [vmem:[%s3977_s0 + $0xf8] ss:$12 sps:$4 sm:$0xff]   ;;  %v2757_v54 = vld [vmem:[%s3977_s0 + $0x110] ss:$12 sps:$4 sm:$0xff]   ;;  %v2748_v55 = vld [vmem:[%s3977_s0 + $0xc0] ss:$12 sps:$4 sm:$0xff]  }
  0x13   :  { %800 = vmatprep.subr.bf16.mxu0 %v2831_v0  ;;  %2563 = vmatpush3.bf16.msra.mxu1 %v2704_v12  ;;  %v2750_v56 = vld [vmem:[%s3977_s0 + $0xdc] ss:$12 sps:$4 sm:$0xff]   ;;  %v2752_v58 = vld [vmem:[%s3977_s0 + $0xd8] ss:$12 sps:$4 sm:$0xff]   ;;  %v2754_v59 = vld [vmem:[%s3977_s0 + $0xf4] ss:$12 sps:$4 sm:$0xff]  }
  0x14   :  { %2564 = vmatprep.subr.bf16.mxu1 %v2832_v2  ;;  %v2761_v57 = vld [vmem:[%s3977_s0 + $0x128] ss:$12 sps:$4 sm:$0xff]   ;;  %v2765_v60 = vld [vmem:[%s3977_s0 + $0x140] ss:$12 sps:$4 sm:$0xff]   ;;  %v2756_v61 = vld [vmem:[%s3977_s0 + $0xf0] ss:$12 sps:$4 sm:$0xff]  }
  0x15   :  { %v2758_v62 = vld [vmem:[%s3977_s0 + $0x10c] ss:$12 sps:$4 sm:$0xff]   ;;  %v2762_v1 = vld [vmem:[%s3977_s0 + $0x124] ss:$12 sps:$4 sm:$0xff]   ;;  %v2766_v5 = vld [vmem:[%s3977_s0 + $0x13c] ss:$12 sps:$4 sm:$0xff]  }
  0x16   :  { %801 = vmatpush1.bf16.msra.mxu0 %v2694_v11  ;;  %v2769_v63 = vld [vmem:[%s3977_s0 + $0x158] ss:$12 sps:$4 sm:$0xff]   ;;  %v2773_v3 = vld [vmem:[%s3977_s0 + $0x170] ss:$12 sps:$4 sm:$0xff]   ;;  %v2764_v4 = vld [vmem:[%s3977_s0 + $0x120] ss:$12 sps:$4 sm:$0xff]  }
  0x17   :  { %802 = vmatprep.subr.bf16.mxu0 %v2831_v0  ;;  %2565 = vmatpush3.bf16.msra.mxu1 %v2706_v15  ;;  %v2777_v6 = vld [vmem:[%s3977_s0 + $0x188] ss:$12 sps:$4 sm:$0xff]   ;;  %v2768_v7 = vld [vmem:[%s3977_s0 + $0x138] ss:$12 sps:$4 sm:$0xff]   ;;  %v2781_v9 = vld [vmem:[%s3977_s0 + $0x1a0] ss:$12 sps:$4 sm:$0xff]  }
  0x18   :  { %2566 = vmatprep.subr.bf16.mxu1 %v2832_v2  ;;  %v2770_v8 = vld [vmem:[%s3977_s0 + $0x154] ss:$12 sps:$4 sm:$0xff]   ;;  %v2772_v10 = vld [vmem:[%s3977_s0 + $0x150] ss:$12 sps:$4 sm:$0xff]   ;;  %v2774_v11 = vld [vmem:[%s3977_s0 + $0x16c] ss:$12 sps:$4 sm:$0xff]  }
  0x19   :  { %v2785_v12 = vld [vmem:[%s3977_s0 + $0x1b8] ss:$12 sps:$4 sm:$0xff]   ;;  %v2789_v15 = vld [vmem:[%s3977_s0 + $0x1d0] ss:$12 sps:$4 sm:$0xff]   ;;  %v2780_v16 = vld [vmem:[%s3977_s0 + $0x180] ss:$12 sps:$4 sm:$0xff]  }
  0x1a   :  { %803 = vmatpush1.bf16.msra.mxu0 %v2695_v13  ;;  %v2776_v13 = vld [vmem:[%s3977_s0 + $0x168] ss:$12 sps:$4 sm:$0xff]  }
  0x1b   :  { %804 = vmatprep.subr.bf16.mxu0 %v2831_v0  ;;  %2567 = vmatpush3.bf16.msra.mxu1 %v2708_v17  ;;  %v2782_v17 = vld [vmem:[%s3977_s0 + $0x19c] ss:$12 sps:$4 sm:$0xff]  }
  0x1c   :  { %2568 = vmatprep.subr.bf16.mxu1 %v2832_v2 }
  0x1e   :  { %805 = vmatpush1.bf16.msra.mxu0 %v2697_v14  ;;  %v2778_v14 = vld [vmem:[%s3977_s0 + $0x184] ss:$12 sps:$4 sm:$0xff]  }
  0x1f   :  { %806 = vmatprep.subr.bf16.mxu0 %v2831_v0  ;;  %2569 = vmatpush3.bf16.msra.mxu1 %v2710_v19  ;;  %v2784_v19 = vld [vmem:[%s3977_s0 + $0x198] ss:$12 sps:$4 sm:$0xff]  }
  0x22   :  { %807 = vmatpush2.bf16.msra.mxu0 %v2699_v18  ;;  %2571 = vmatmul.mubr.bf16.vlgmr.msra.gmra.mxu1 %v2712_v21  ;;  %v2793_v18 = vld [vmem:[%s3977_s0 + $0x1e8] ss:$12 sps:$4 sm:$0xff]   ;;  %v2797_v21 = vld [vmem:[%s3977_s0 + $0x200] ss:$12 sps:$4 sm:$0xff]  }
  0x23   :  { %808 = vmatprep.subr.bf16.mxu0 %v2831_v0  ;;  %2574 = vmatprep.mubr.msk.bf16.mxu1 %vm2833_vm0, %v2832_v2 }
  0x26   :  { %809 = vmatpush2.bf16.msra.mxu0 %v2701_v20  ;;  %v2786_v20 = vld [vmem:[%s3977_s0 + $0x1b4] ss:$12 sps:$4 sm:$0xff]  }
  0x27   :  { %810 = vmatprep.subr.bf16.mxu0 %v2831_v0 }
  0x2a   :  { %811 = vmatpush2.bf16.msra.mxu0 %v2703_v22  ;;  %2575 = vmatmul.mubr.bf16.gmra.mxu1 %v2717_v24  ;;  %v2788_v22 = vld [vmem:[%s3977_s0 + $0x1b0] ss:$12 sps:$4 sm:$0xff]   ;;  %v2801_v24 = vld [vmem:[%s3977_s0 + $0x218] ss:$12 sps:$4 sm:$0xff]  }
  0x2b   :  { %812 = vmatprep.subr.bf16.mxu0 %v2831_v0  ;;  %2578 = vmatprep.mubr.msk.bf16.mxu1 %vm2833_vm0, %v2832_v2 }
  0x2e   :  { %813 = vmatpush2.bf16.msra.mxu0 %v2705_v23  ;;  %v2790_v23 = vld [vmem:[%s3977_s0 + $0x1cc] ss:$12 sps:$4 sm:$0xff]  }
  0x2f   :  { %814 = vmatprep.subr.bf16.mxu0 %v2831_v0 }
  0x32   :  { %815 = vmatpush2.bf16.msra.mxu0 %v2707_v25  ;;  %2579 = vmatmul.mubr.bf16.gmra.mxu1 %v2721_v27  ;;  %v2792_v25 = vld [vmem:[%s3977_s0 + $0x1c8] ss:$12 sps:$4 sm:$0xff]   ;;  %v2805_v27 = vld [vmem:[%s3977_s0 + $0x230] ss:$12 sps:$4 sm:$0xff]  }
  0x33   :  { %816 = vmatprep.subr.bf16.mxu0 %v2831_v0  ;;  %2582 = vmatprep.mubr.msk.bf16.mxu1 %vm2833_vm0, %v2832_v2 }
  0x36   :  { %817 = vmatpush2.bf16.msra.mxu0 %v2709_v26  ;;  %v2794_v26 = vld [vmem:[%s3977_s0 + $0x1e4] ss:$12 sps:$4 sm:$0xff]  }
  0x37   :  { %818 = vmatprep.subr.bf16.mxu0 %v2831_v0 }
  0x3a   :  { %819 = vmatpush2.bf16.msra.mxu0 %v2711_v28  ;;  %2583 = vmatmul.mubr.bf16.gmra.mxu1 %v2725_v30  ;;  %v2796_v28 = vld [vmem:[%s3977_s0 + $0x1e0] ss:$12 sps:$4 sm:$0xff]   ;;  %v2809_v30 = vld [vmem:[%s3977_s0 + $0x248] ss:$12 sps:$4 sm:$0xff]  }
  0x3b   :  { %820 = vmatprep.subr.bf16.mxu0 %v2831_v0  ;;  %2586 = vmatprep.mubr.msk.bf16.mxu1 %vm2833_vm0, %v2832_v2  ;;  %v2760_v0 = vld [vmem:[%s3977_s0 + $0x108] ss:$12 sps:$4 sm:$0xff]  }
  0x3e   :  { %821 = vmatpush2.bf16.msra.mxu0 %v2713_v29  ;;  %v2798_v29 = vld [vmem:[%s3977_s0 + $0x1fc] ss:$12 sps:$4 sm:$0xff]  }
  0x41   :  { %823 = vmatmul.mubr.bf16.vlgmr.msra.gmra.mxu0 %v2714_v31  ;;  %v2800_v31 = vld [vmem:[%s3977_s0 + $0x1f8] ss:$12 sps:$4 sm:$0xff]  }
  0x42   :  { %830 = vmatprep.mubr.bf16.mxu0 %v2718_v32  ;;  %2587 = vmatmul.mubr.bf16.gmra.mxu1 %v2729_v33  ;;  %v2802_v32 = vld [vmem:[%s3977_s0 + $0x214] ss:$12 sps:$4 sm:$0xff]  }
  0x43   :  { %2590 = vmatprep.mubr.msk.bf16.mxu1 %vm2833_vm0, %v2832_v2 }
  0x49   :  { %831 = vmatmul.mubr.bf16.gmra.mxu0 %v2720_v34 }
  0x4a   :  { %838 = vmatprep.mubr.bf16.mxu0 %v2722_v35  ;;  %2591 = vmatmul.mubr.bf16.gmra.mxu1 %v2733_v36  ;;  %v2813_v36 = vld [vmem:[%s3977_s0 + $0x260] ss:$12 sps:$4 sm:$0xff]  }
  0x4b   :  { %2594 = vmatprep.mubr.msk.bf16.mxu1 %vm2833_vm0, %v2832_v2 }
  0x51   :  { %839 = vmatmul.mubr.bf16.gmra.mxu0 %v2724_v37  ;;  %v2804_v37 = vld [vmem:[%s3977_s0 + $0x210] ss:$12 sps:$4 sm:$0xff]  }
  0x52   :  { %846 = vmatprep.mubr.bf16.mxu0 %v2726_v38  ;;  %2595 = vmatmul.mubr.bf16.gmra.mxu1 %v2737_v39  ;;  %v2806_v38 = vld [vmem:[%s3977_s0 + $0x22c] ss:$12 sps:$4 sm:$0xff]  }
  0x53   :  { %2598 = vmatprep.mubr.msk.bf16.mxu1 %vm2833_vm0, %v2832_v2 }
  0x59   :  { %847 = vmatmul.mubr.bf16.gmra.mxu0 %v2728_v40 }
  0x5a   :  { %854 = vmatprep.mubr.bf16.mxu0 %v2730_v41  ;;  %2599 = vmatmul.mubr.bf16.gmra.mxu1 %v2741_v42 }
  0x5b   :  { %2602 = vmatprep.mubr.msk.bf16.mxu1 %vm2833_vm0, %v2832_v2 }
  0x61   :  { %855 = vmatmul.mubr.bf16.gmra.mxu0 %v2732_v43  ;;  %v2817_v43 = vld [vmem:[%s3977_s0 + $0x278] ss:$12 sps:$4 sm:$0xff]  }
  0x62   :  { %862 = vmatprep.mubr.bf16.mxu0 %v2734_v44  ;;  %2603 = vmatmul.mubr.bf16.gmra.mxu1 %v2745_v45  ;;  %v2808_v44 = vld [vmem:[%s3977_s0 + $0x228] ss:$12 sps:$4 sm:$0xff]   ;;  %v2810_v45 = vld [vmem:[%s3977_s0 + $0x244] ss:$12 sps:$4 sm:$0xff]  }
  0x63   :  { %2606 = vmatprep.mubr.msk.bf16.mxu1 %vm2833_vm0, %v2832_v2 }
  0x69   :  { %863 = vmatmul.mubr.bf16.gmra.mxu0 %v2736_v46 }
  0x6a   :  { %870 = vmatprep.mubr.bf16.mxu0 %v2738_v47  ;;  %2607 = vmatmul.mubr.bf16.gmra.mxu1 %v2749_v48 }
  0x6b   :  { %2610 = vmatprep.mubr.msk.bf16.mxu1 %vm2833_vm0, %v2832_v2 }
  0x71   :  { %871 = vmatmul.mubr.bf16.gmra.mxu0 %v2740_v49 }
  0x72   :  { %878 = vmatprep.mubr.bf16.mxu0 %v2742_v50  ;;  %2611 = vmatmul.mubr.bf16.gmra.mxu1 %v2753_v51  ;;  %v2821_v50 = vld [vmem:[%s3977_s0 + $0x290] ss:$12 sps:$4 sm:$0xff]   ;;  %v2812_v51 = vld [vmem:[%s3977_s0 + $0x240] ss:$12 sps:$4 sm:$0xff]  }
  0x73   :  { %2614 = vmatprep.mubr.msk.bf16.mxu1 %vm2833_vm0, %v2832_v2 }
  0x79   :  { %879 = vmatmul.mubr.bf16.gmra.mxu0 %v2744_v52  ;;  %v2814_v52 = vld [vmem:[%s3977_s0 + $0x25c] ss:$12 sps:$4 sm:$0xff]  }
  0x7a   :  { %886 = vmatprep.mubr.bf16.mxu0 %v2746_v53  ;;  %2615 = vmatmul.mubr.bf16.gmra.mxu1 %v2757_v54 }
  0x7b   :  { %2618 = vmatprep.mubr.msk.bf16.mxu1 %vm2833_vm0, %v2832_v2 }
  0x81   :  { %887 = vmatmul.mubr.bf16.gmra.mxu0 %v2748_v55 }
  0x82   :  { %894 = vmatprep.mubr.bf16.mxu0 %v2750_v56  ;;  %2619 = vmatmul.mubr.bf16.gmra.mxu1 %v2761_v57 }
  0x83   :  { %2622 = vmatprep.mubr.msk.bf16.mxu1 %vm2833_vm0, %v2832_v2 }
  0x89   :  { %895 = vmatmul.mubr.bf16.gmra.mxu0 %v2752_v58 }
  0x8a   :  { %902 = vmatprep.mubr.bf16.mxu0 %v2754_v59  ;;  %2623 = vmatmul.mubr.bf16.gmra.mxu1 %v2765_v60  ;;  %v2825_v60 = vld [vmem:[%s3977_s0 + $0x2a8] ss:$12 sps:$4 sm:$0xff]  }
  0x8b   :  { %2626 = vmatprep.mubr.msk.bf16.mxu1 %vm2833_vm0, %v2832_v2 }
  0x91   :  { %903 = vmatmul.mubr.bf16.gmra.mxu0 %v2756_v61 }
  0x92   :  { %910 = vmatprep.mubr.bf16.mxu0 %v2758_v62  ;;  %2627 = vmatmul.mubr.bf16.gmra.mxu1 %v2769_v63  ;;  %v2816_v62 = vld [vmem:[%s3977_s0 + $0x258] ss:$12 sps:$4 sm:$0xff]  }
  0x93   :  { %2630 = vmatprep.mubr.msk.bf16.mxu1 %vm2833_vm0, %v2832_v2 }
  0x99   :  { %911 = vmatmul.mubr.bf16.gmra.mxu0 %v2760_v0 }
  0x9a   :  { %918 = vmatprep.mubr.bf16.mxu0 %v2762_v1  ;;  %2631 = vmatmul.mubr.bf16.gmra.mxu1 %v2773_v3 }
  0x9b   :  { %2634 = vmatprep.mubr.msk.bf16.mxu1 %vm2833_vm0, %v2832_v2 }
  0xa1   :  { %919 = vmatmul.mubr.bf16.gmra.mxu0 %v2764_v4 }
  0xa2   :  { %926 = vmatprep.mubr.bf16.mxu0 %v2766_v5  ;;  %2635 = vmatmul.mubr.bf16.gmra.mxu1 %v2777_v6 }
  0xa3   :  { %2638 = vmatprep.mubr.msk.bf16.mxu1 %vm2833_vm0, %v2832_v2 }
  0xa9   :  { %927 = vmatmul.mubr.bf16.gmra.mxu0 %v2768_v7 }
  0xaa   :  { %934 = vmatprep.mubr.bf16.mxu0 %v2770_v8  ;;  %2639 = vmatmul.mubr.bf16.gmra.mxu1 %v2781_v9 }
  0xab   :  { %2642 = vmatprep.mubr.msk.bf16.mxu1 %vm2833_vm0, %v2832_v2 }
  0xb1   :  { %935 = vmatmul.mubr.bf16.gmra.mxu0 %v2772_v10  ;;  %v2820_v10 = vld [vmem:[%s3977_s0 + $0x270] ss:$12 sps:$4 sm:$0xff]  }
  0xb2   :  { %942 = vmatprep.mubr.bf16.mxu0 %v2774_v11  ;;  %2643 = vmatmul.mubr.bf16.gmra.mxu1 %v2785_v12  ;;  %v2822_v12 = vld [vmem:[%s3977_s0 + $0x28c] ss:$12 sps:$4 sm:$0xff]  }
  0xb3   :  { %2646 = vmatprep.mubr.msk.bf16.mxu1 %vm2833_vm0, %v2832_v2 }
  0xb9   :  { %943 = vmatmul.mubr.bf16.gmra.mxu0 %v2776_v13 }
  0xba   :  { %950 = vmatprep.mubr.bf16.mxu0 %v2778_v14  ;;  %2647 = vmatmul.mubr.bf16.gmra.mxu1 %v2789_v15 }
  0xbb   :  { %2650 = vmatprep.mubr.msk.bf16.mxu1 %vm2833_vm0, %v2832_v2 }
  0xc1   :  { %951 = vmatmul.mubr.bf16.gmra.mxu0 %v2780_v16 }
  0xc2   :  { %958 = vmatprep.mubr.bf16.mxu0 %v2782_v17  ;;  %2651 = vmatmul.mubr.bf16.gmra.mxu1 %v2793_v18 }
  0xc3   :  { %2654 = vmatprep.mubr.msk.bf16.mxu1 %vm2833_vm0, %v2832_v2 }
  0xc9   :  { %959 = vmatmul.mubr.bf16.gmra.mxu0 %v2784_v19 }
  0xca   :  { %966 = vmatprep.mubr.bf16.mxu0 %v2786_v20  ;;  %2655 = vmatmul.mubr.bf16.gmra.mxu1 %v2797_v21 }
  0xcb   :  { %2658 = vmatprep.mubr.msk.bf16.mxu1 %vm2833_vm0, %v2832_v2 }
  0xd1   :  { %967 = vmatmul.mubr.bf16.gmra.mxu0 %v2788_v22  ;;  %v2824_v22 = vld [vmem:[%s3977_s0 + $0x288] ss:$12 sps:$4 sm:$0xff]  }
  0xd2   :  { %974 = vmatprep.mubr.bf16.mxu0 %v2790_v23  ;;  %2659 = vmatmul.mubr.bf16.gmra.mxu1 %v2801_v24  ;;  %v2828_v24 = vld [vmem:[%s3977_s0 + $0x2a4] ss:$12 sps:$4 sm:$0xff]  }
  0xd3   :  { %2662 = vmatprep.mubr.msk.bf16.mxu1 %vm2833_vm0, %v2832_v2 }
  0xd9   :  { %975 = vmatmul.mubr.bf16.gmra.mxu0 %v2792_v25 }
  0xda   :  { %982 = vmatprep.mubr.bf16.mxu0 %v2794_v26  ;;  %2663 = vmatmul.mubr.bf16.gmra.mxu1 %v2805_v27 }
  0xdb   :  { %2666 = vmatprep.mubr.msk.bf16.mxu1 %vm2833_vm0, %v2832_v2 }
  0xe1   :  { %983 = vmatmul.mubr.bf16.gmra.mxu0 %v2796_v28 }
  0xe2   :  { %990 = vmatprep.mubr.bf16.mxu0 %v2798_v29  ;;  %v1089_v33 = vpop.f32.mrf.mxu1  ;;  %2667 = vmatmul.mubr.bf16.gmra.mxu1 %v2809_v30 }
  0xe3   :  { %2670 = vmatprep.mubr.msk.bf16.mxu1 %vm2833_vm0, %v2832_v2 }
  0xe4   :  { %v2572_v34 = vpop.f32.mrf.mxu1 }
  0xe5   :  { %v2826_v34 = vld [vmem:[%s3977_s0 + $0x2a0] ss:$12 sps:$4 sm:$0xff]  }
  0xe6   :  { %v1092_v35 = vpop.f32.mrf.mxu1 }
  0xe8   :  { %v2573_v39 = vpop.f32.mrf.mxu1 }
  0xe9   :  { %991 = vmatmul.mubr.bf16.gmra.mxu0 %v2800_v31 }
  0xea   :  { %998 = vmatprep.mubr.bf16.mxu0 %v2802_v32  ;;  %v1097_v40 = vpop.f32.mrf.mxu1  ;;  %2671 = vmatmul.mubr.bf16.gmra.mxu1 %v2813_v36 }
  0xeb   :  { %2674 = vmatprep.mubr.msk.bf16.mxu1 %vm2833_vm0, %v2832_v2 }
  0xec   :  { %v2576_v41 = vpop.f32.mrf.mxu1 }
  0xee   :  { %v1100_v42 = vpop.f32.mrf.mxu1 }
  0xf0   :  { %v2577_v46 = vpop.f32.mrf.mxu1 }
  0xf1   :  { %999 = vmatmul.mubr.bf16.gmra.mxu0 %v2804_v37 }
  0xf2   :  { %1006 = vmatprep.mubr.bf16.mxu0 %v2806_v38  ;;  %v1105_v47 = vpop.f32.mrf.mxu1  ;;  %2675 = vmatmul.mubr.bf16.gmra.mxu1 %v2817_v43 }
  0xf3   :  { %2678 = vmatprep.mubr.msk.bf16.mxu1 %vm2833_vm0, %v2832_v2 }
  0xf4   :  { %v2580_v48 = vpop.f32.mrf.mxu1 }
  0xf6   :  { %v1108_v49 = vpop.f32.mrf.mxu1 }
  0xf8   :  { %v2581_v53 = vpop.f32.mrf.mxu1 }
  0xf9   :  { %1007 = vmatmul.mubr.bf16.gmra.mxu0 %v2808_v44 }
  0xfa   :  { %1014 = vmatprep.mubr.bf16.mxu0 %v2810_v45  ;;  %v1113_v54 = vpop.f32.mrf.mxu1  ;;  %2679 = vmatmul.mubr.bf16.gmra.mxu1 %v2821_v50 }
  0xfb   :  { %2682 = vmatprep.mubr.msk.bf16.mxu1 %vm2833_vm0, %v2832_v2  ;;  %v2818_v2 = vld [vmem:[%s3977_s0 + $0x274] ss:$12 sps:$4 sm:$0xff]  }
  0xfc   :  { %v2584_v57 = vpop.f32.mrf.mxu1 }
  0xfe   :  { %v1116_v59 = vpop.f32.mrf.mxu1 }
 0x100   :  { %v2585_v0 = vpop.f32.mrf.mxu1 }
 0x101   :  { %v824_v55 = vpop.f32.mrf.mxu0  ;;  %1015 = vmatmul.mubr.bf16.gmra.mxu0 %v2812_v51 }
 0x102   :  { %v3250_v56 = vadd.f32 %v1089_v33, %v824_v55  ;;  %1022 = vmatprep.mubr.bf16.mxu0 %v2814_v52  ;;  %v1121_v3 = vpop.f32.mrf.mxu1  ;;  %2683 = vmatmul.mubr.bf16.gmra.mxu1 %v2825_v60 }
 0x103   :  { %v826_v58 = vpop.f32.mrf.mxu0 }
 0x104   :  { %v2588_v6 = vpop.f32.mrf.mxu1 }
 0x105   :  { %v827_v61 = vpop.f32.mrf.mxu0 }
 0x106   :  { %v3258_v63 = vadd.f32 %v1092_v35, %v827_v61  ;;  %v1124_v8 = vpop.f32.mrf.mxu1 }
 0x107   :  { %v829_v1 = vpop.f32.mrf.mxu0 }
 0x108   :  { %v2589_v13 = vpop.f32.mrf.mxu1 }
 0x109   :  { %v832_v4 = vpop.f32.mrf.mxu0  ;;  %1023 = vmatmul.mubr.bf16.gmra.mxu0 %v2816_v62 }
 0x10a   :  { %v3263_v5 = vadd.f32 %v1097_v40, %v832_v4  ;;  %1030 = vmatprep.mubr.bf16.mxu0 %v2818_v2  ;;  %v1129_v15 = vpop.f32.mrf.mxu1 }
 0x10b   :  { %v834_v7 = vpop.f32.mrf.mxu0 }
 0x10c   :  { %v2592_v18 = vpop.f32.mrf.mxu1 }
 0x10d   :  { %v835_v9 = vpop.f32.mrf.mxu0 }
 0x10e   :  { %v3268_v11 = vadd.f32 %v1100_v42, %v835_v9  ;;  %v1132_v20 = vpop.f32.mrf.mxu1 }
 0x10f   :  { %v837_v14 = vpop.f32.mrf.mxu0 }
 0x110   :  { %v2593_v25 = vpop.f32.mrf.mxu1 }
 0x111   :  { %v840_v16 = vpop.f32.mrf.mxu0  ;;  %1031 = vmatmul.mubr.bf16.gmra.mxu0 %v2820_v10 }
 0x112   :  { %v3273_v17 = vadd.f32 %v1105_v47, %v840_v16  ;;  %1038 = vmatprep.mubr.bf16.mxu0 %v2822_v12  ;;  %v1137_v27 = vpop.f32.mrf.mxu1 }
 0x113   :  { %v842_v19 = vpop.f32.mrf.mxu0 }
 0x114   :  { %v2596_v30 = vpop.f32.mrf.mxu1 }
 0x115   :  { %v843_v21 = vpop.f32.mrf.mxu0 }
 0x116   :  { %v3278_v23 = vadd.f32 %v1108_v49, %v843_v21  ;;  %v1140_v32 = vpop.f32.mrf.mxu1 }
 0x117   :  { %v845_v26 = vpop.f32.mrf.mxu0 }
 0x118   :  { %v2597_v36 = vpop.f32.mrf.mxu1 }
 0x119   :  { %v848_v28 = vpop.f32.mrf.mxu0  ;;  %1039 = vmatmul.mubr.bf16.gmra.mxu0 %v2824_v22 }
 0x11a   :  { %v3283_v29 = vadd.f32 %v1113_v54, %v848_v28  ;;  %1046 = vmatprep.mubr.bf16.mxu0 %v2828_v24  ;;  %v1145_v38 = vpop.f32.mrf.mxu1 }
 0x11b   :  { %v850_v31 = vpop.f32.mrf.mxu0 }
 0x11c   :  { %v2600_v41 = vpop.f32.mrf.mxu1 }
 0x11d   :  { %v851_v33 = vpop.f32.mrf.mxu0 }
 0x11e   :  { %v3288_v35 = vadd.f32 %v1116_v59, %v851_v33  ;;  %v1148_v43 = vpop.f32.mrf.mxu1 }
 0x11f   :  { %v853_v37 = vpop.f32.mrf.mxu0 }
 0x120   :  { %v2601_v46 = vpop.f32.mrf.mxu1 }
 0x121   :  { %v856_v39 = vpop.f32.mrf.mxu0  ;;  %1047 = vmatmul.mubr.bf16.gmra.mxu0 %v2826_v34 }
 0x122   :  { %v3290_v40 = vadd.f32 %v1121_v3, %v856_v39  ;;  %v1153_v48 = vpop.f32.mrf.mxu1 }
 0x123   :  { %v858_v42 = vpop.f32.mrf.mxu0 }
 0x124   :  { %v2604_v51 = vpop.f32.mrf.mxu1 }
 0x125   :  { %v859_v44 = vpop.f32.mrf.mxu0 }
 0x126   :  { %v3292_v45 = vadd.f32 %v1124_v8, %v859_v44  ;;  %v1156_v53 = vpop.f32.mrf.mxu1 }
 0x127   :  { %v861_v47 = vpop.f32.mrf.mxu0 }
 0x128   :  { %v2605_v57 = vpop.f32.mrf.mxu1 }
 0x129   :  { %v864_v49 = vpop.f32.mrf.mxu0 }
 0x12a   :  { %v3294_v50 = vadd.f32 %v1129_v15, %v864_v49  ;;  %v1161_v59 = vpop.f32.mrf.mxu1 }
 0x12b   :  { %v866_v52 = vpop.f32.mrf.mxu0 }
 0x12c   :  { %v2608_v62 = vpop.f32.mrf.mxu1 }
 0x12d   :  { %v867_v54 = vpop.f32.mrf.mxu0 }
 0x12e   :  { %v3296_v55 = vadd.f32 %v1132_v20, %v867_v54  ;;  %v1164_v0 = vpop.f32.mrf.mxu1 }
 0x12f   :  { %v869_v58 = vpop.f32.mrf.mxu0 }
 0x130   :  { %v2609_v4 = vpop.f32.mrf.mxu1 }
 0x131   :  { %v872_v60 = vpop.f32.mrf.mxu0 }
 0x132   :  { %v3298_v61 = vadd.f32 %v1137_v27, %v872_v60  ;;  %v1169_v7 = vpop.f32.mrf.mxu1 }
 0x133   :  { %v874_v2 = vpop.f32.mrf.mxu0 }
 0x134   :  { %v2612_v10 = vpop.f32.mrf.mxu1 }
 0x135   :  { %v875_v1 = vpop.f32.mrf.mxu0 }
 0x136   :  { %v3300_v3 = vadd.f32 %v1140_v32, %v875_v1  ;;  %v1172_v13 = vpop.f32.mrf.mxu1 }
 0x137   :  { %v877_v6 = vpop.f32.mrf.mxu0 }
 0x138   :  { %v2613_v16 = vpop.f32.mrf.mxu1 }
 0x139   :  { %v880_v8 = vpop.f32.mrf.mxu0 }
 0x13a   :  { %v3302_v9 = vadd.f32 %v1145_v38, %v880_v8  ;;  %v1177_v19 = vpop.f32.mrf.mxu1 }
 0x13b   :  { %v882_v12 = vpop.f32.mrf.mxu0 }
 0x13c   :  { %v2616_v22 = vpop.f32.mrf.mxu1 }
 0x13d   :  { %v883_v14 = vpop.f32.mrf.mxu0  ;;  %v1506_v22 = vmul.f32 %v3258_v63, %v3258_v63 }
 0x13e   :  { %v3304_v15 = vadd.f32 %v1148_v43, %v883_v14  ;;  %v1180_v25 = vpop.f32.mrf.mxu1 }
 0x13f   :  { %v885_v18 = vpop.f32.mrf.mxu0 }
 0x140   :  { %v2617_v28 = vpop.f32.mrf.mxu1 }
 0x141   :  { %v888_v20 = vpop.f32.mrf.mxu0  ;;  %v1442_v28 = vadd.f32 %v3258_v63, %v3250_v56 }
 0x142   :  { %v3306_v21 = vadd.f32 %v1153_v48, %v888_v20  ;;  %v1185_v31 = vpop.f32.mrf.mxu1 }
 0x143   :  { %v890_v24 = vpop.f32.mrf.mxu0 }
 0x144   :  { %v2620_v34 = vpop.f32.mrf.mxu1 }
 0x145   :  { %v891_v26 = vpop.f32.mrf.mxu0 }
 0x146   :  { %v3308_v27 = vadd.f32 %v1156_v53, %v891_v26  ;;  %v1188_v37 = vpop.f32.mrf.mxu1  ;;  %v1505_v26 = vmul.f32 %v3250_v56, %v3250_v56 }
 0x147   :  { %v893_v30 = vpop.f32.mrf.mxu0 }
 0x148   :  { %v2621_v41 = vpop.f32.mrf.mxu1  ;;  %v1507_v30 = vmul.f32 %v3263_v5, %v3263_v5 }
 0x149   :  { %v896_v32 = vpop.f32.mrf.mxu0 }
 0x14a   :  { %v3310_v33 = vadd.f32 %v1161_v59, %v896_v32  ;;  %v1193_v43 = vpop.f32.mrf.mxu1 }
 0x14b   :  { %v898_v36 = vpop.f32.mrf.mxu0 }
 0x14c   :  { %v2624_v47 = vpop.f32.mrf.mxu1  ;;  %v1563_v36 = vadd.f32 %v1506_v22, %v1505_v26 }
 0x14d   :  { %v899_v38 = vpop.f32.mrf.mxu0 }
 0x14e   :  { %v3312_v39 = vadd.f32 %v1164_v0, %v899_v38  ;;  %v1196_v49 = vpop.f32.mrf.mxu1  ;;  %v1508_v38 = vmul.f32 %v3268_v11, %v3268_v11 }
 0x14f   :  { %v901_v42 = vpop.f32.mrf.mxu0 }
 0x150   :  { %v2625_v53 = vpop.f32.mrf.mxu1 }
 0x151   :  { %v904_v44 = vpop.f32.mrf.mxu0 }
 0x152   :  { %v3314_v46 = vadd.f32 %v1169_v7, %v904_v44  ;;  %v1201_v57 = vpop.f32.mrf.mxu1  ;;  %v1564_v44 = vadd.f32 %v1563_v36, %v1507_v30  ;;  %v1513_v30 = vmul.f32 %v3290_v40, %v3290_v40 }
 0x153   :  { %v906_v48 = vpop.f32.mrf.mxu0 }
 0x154   :  { %v2628_v60 = vpop.f32.mrf.mxu1  ;;  %v1509_v48 = vmul.f32 %v3273_v17, %v3273_v17 }
 0x155   :  { %v907_v51 = vpop.f32.mrf.mxu0  ;;  %v1510_v60 = vmul.f32 %v3278_v23, %v3278_v23 }
 0x156   :  { %v3316_v52 = vadd.f32 %v1172_v13, %v907_v51  ;;  %v1204_v2 = vpop.f32.mrf.mxu1 }
 0x157   :  { %v909_v54 = vpop.f32.mrf.mxu0 }
 0x158   :  { %v2629_v4 = vpop.f32.mrf.mxu1  ;;  %v1565_v54 = vadd.f32 %v1564_v44, %v1508_v38  ;;  %v1514_v38 = vmul.f32 %v3292_v45, %v3292_v45 }
 0x159   :  { %v912_v58 = vpop.f32.mrf.mxu0 }
 0x15a   :  { %v3318_v59 = vadd.f32 %v1177_v19, %v912_v58  ;;  %v1209_v7 = vpop.f32.mrf.mxu1  ;;  %v1566_v4 = vadd.f32 %v1565_v54, %v1509_v48 }
 0x15b   :  { %v914_v62 = vpop.f32.mrf.mxu0 }
 0x15c   :  { %v2632_v12 = vpop.f32.mrf.mxu1 }
 0x15d   :  { %v915_v0 = vpop.f32.mrf.mxu0 }
 0x15e   :  { %v3320_v1 = vadd.f32 %v1180_v25, %v915_v0  ;;  %v3324_v14 = vpop.f32.mrf.mxu1 }
 0x15f   :  { %v917_v6 = vpop.f32.mrf.mxu0 }
 0x160   :  { %v2633_v19 = vpop.f32.mrf.mxu1 }
 0x161   :  { %v920_v8 = vpop.f32.mrf.mxu0 }
 0x162   :  { %v3322_v10 = vadd.f32 %v1185_v31, %v920_v8  ;;  %v3330_v24 = vpop.f32.mrf.mxu1  ;;  %v1511_v8 = vmul.f32 %v3283_v29, %v3283_v29 }
 0x163   :  { %v922_v13 = vpop.f32.mrf.mxu0 }
 0x164   :  { %v2636_v32 = vpop.f32.mrf.mxu1 }
 0x165   :  { %v923_v16 = vpop.f32.mrf.mxu0 }
 0x166   :  { %v3326_v18 = vadd.f32 %v1188_v37, %v923_v16  ;;  %v1443_v37 = vadd.f32 %v1442_v28, %v3263_v5  ;;  %v3343_v41 = vpop.f32.mrf.mxu1  ;;  %v1567_v16 = vadd.f32 %v1566_v4, %v1510_v60 }
 0x167   :  { %v925_v20 = vpop.f32.mrf.mxu0 }
 0x168   :  { %v1444_v47 = vadd.f32 %v1443_v37, %v3268_v11  ;;  %v1512_v20 = vmul.f32 %v3288_v35, %v3288_v35  ;;  %v1568_v26 = vadd.f32 %v1567_v16, %v1511_v8 }
 0x169   :  { %v928_v25 = vpop.f32.mrf.mxu0 }
 0x16a   :  { %v3338_v31 = vadd.f32 %v1193_v43, %v928_v25  ;;  %v2637_v43 = vpop.f32.mrf.mxu1  ;;  %v1445_v58 = vadd.f32 %v1444_v47, %v3273_v17  ;;  %v1569_v36 = vadd.f32 %v1568_v26, %v1512_v20  ;;  %v1518_v26 = vmul.f32 %v3300_v3, %v3300_v3 }
 0x16b   :  { %v930_v34 = vpop.f32.mrf.mxu0  ;;  %v1515_v43 = vmul.f32 %v3294_v50, %v3294_v50 }
 0x16c   :  { %v3353_v62 = vpop.f32.mrf.mxu1  ;;  %v1446_v6 = vadd.f32 %v1445_v58, %v3278_v23  ;;  %v1570_v47 = vadd.f32 %v1569_v36, %v1513_v30  ;;  %v1519_v36 = vmul.f32 %v3302_v9, %v3302_v9 }
 0x16d   :  { %v931_v42 = vpop.f32.mrf.mxu0 }
 0x16e   :  { %v3348_v51 = vadd.f32 %v1196_v49, %v931_v42  ;;  %v2640_v49 = vpop.f32.mrf.mxu1  ;;  %v1447_v19 = vadd.f32 %v1446_v6, %v3283_v29  ;;  %v1571_v58 = vadd.f32 %v1570_v47, %v1514_v38 }
 0x16f   :  { %v933_v53 = vpop.f32.mrf.mxu0 }
 0x170   :  { %v3363_v22 = vpop.f32.mrf.mxu1  ;;  %v1448_v28 = vadd.f32 %v1447_v19, %v3288_v35  ;;  %v1572_v8 = vadd.f32 %v1571_v58, %v1515_v43 }
 0x171   :  { %v936_v0 = vpop.f32.mrf.mxu0 }
 0x172   :  { %v3358_v12 = vadd.f32 %v1201_v57, %v936_v0  ;;  %v2641_v57 = vpop.f32.mrf.mxu1  ;;  %v1449_v37 = vadd.f32 %v1448_v28, %v3290_v40  ;;  %v1516_v0 = vmul.f32 %v3296_v55, %v3296_v55 }
 0x173   :  { %v938_v13 = vpop.f32.mrf.mxu0 }
 0x174   :  { %v3373_v42 = vpop.f32.mrf.mxu1  ;;  %v1450_v48 = vadd.f32 %v1449_v37, %v3292_v45  ;;  %v1517_v13 = vmul.f32 %v3298_v61, %v3298_v61  ;;  %v1573_v20 = vadd.f32 %v1572_v8, %v1516_v0 }
 0x175   :  { %v939_v25 = vpop.f32.mrf.mxu0 }
 0x176   :  { %v3368_v32 = vadd.f32 %v1204_v2, %v939_v25  ;;  %v2644_v2 = vpop.f32.mrf.mxu1  ;;  %v1451_v60 = vadd.f32 %v1450_v48, %v3294_v50  ;;  %v1574_v57 = vadd.f32 %v1573_v20, %v1517_v13  ;;  %v1520_v48 = vmul.f32 %v3304_v15, %v3304_v15 }
 0x177   :  { %v941_v34 = vpop.f32.mrf.mxu0  ;;  %v1522_v13 = vmul.f32 %v3308_v27, %v3308_v27 }
 0x178   :  { %v3383_v4 = vpop.f32.mrf.mxu1  ;;  %v1452_v49 = vadd.f32 %v1451_v60, %v3296_v55  ;;  %v1521_v60 = vmul.f32 %v3306_v21, %v3306_v21 }
 0x179   :  { %v944_v44 = vpop.f32.mrf.mxu0 }
 0x17a   :  { %v3378_v53 = vadd.f32 %v1209_v7, %v944_v44  ;;  %v2645_v16 = vpop.f32.mrf.mxu1  ;;  %v1453_v25 = vadd.f32 %v1452_v49, %v3298_v61  ;;  %v1575_v44 = vadd.f32 %v1574_v57, %v1518_v26  ;;  %v1523_v26 = vmul.f32 %v3310_v33, %v3310_v33 }
 0x17b   :  { %v946_v54 = vpop.f32.mrf.mxu0 }
 0x17c   :  { %v3394_v28 = vpop.f32.mrf.mxu1  ;;  %v1454_v34 = vadd.f32 %v1453_v25, %v3300_v3  ;;  %v1576_v54 = vadd.f32 %v1575_v44, %v1519_v36 }
 0x17d   :  { %v947_v6 = vpop.f32.mrf.mxu0 }
 0x17e   :  { %v3389_v7 = vadd.f32 %v3324_v14, %v947_v6  ;;  %v2648_v37 = vpop.f32.mrf.mxu1  ;;  %v1455_v47 = vadd.f32 %v1454_v34, %v3302_v9  ;;  %v1577_v8 = vadd.f32 %v1576_v54, %v1520_v48 }
 0x17f   :  { %v949_v19 = vpop.f32.mrf.mxu0  ;;  %v1524_v37 = vmul.f32 %v3312_v39, %v3312_v39 }
 0x180   :  { %v3405_v43 = vpop.f32.mrf.mxu1  ;;  %v1456_v58 = vadd.f32 %v1455_v47, %v3304_v15  ;;  %v1578_v20 = vadd.f32 %v1577_v8, %v1521_v60 }
 0x181   :  { %v952_v30 = vpop.f32.mrf.mxu0 }
 0x182   :  { %v3400_v14 = vadd.f32 %v3330_v24, %v952_v30  ;;  %v2649_v0 = vpop.f32.mrf.mxu1  ;;  %v1457_v49 = vadd.f32 %v1456_v58, %v3306_v21  ;;  %v1579_v34 = vadd.f32 %v1578_v20, %v1522_v13  ;;  %v1527_v20 = vmul.f32 %v3318_v59, %v3318_v59 }
 0x183   :  { %v954_v38 = vpop.f32.mrf.mxu0 }
 0x184   :  { %3998 = vst [vmem:[#allocation3_spill] sm:$0xff] %v3400_v14  ;;  %v3416_v16 = vpop.f32.mrf.mxu1  ;;  %v1458_v25 = vadd.f32 %v1457_v49, %v3308_v27  ;;  %v1580_v47 = vadd.f32 %v1579_v34, %v1523_v26  ;;  %v1528_v34 = vmul.f32 %v3320_v1, %v3320_v1 }
 0x185   :  { %v955_v2 = vpop.f32.mrf.mxu0 }
 0x186   :  { %v3411_v24 = vadd.f32 %v3343_v41, %v955_v2  ;;  %v2652_v30 = vpop.f32.mrf.mxu1  ;;  %v1459_v36 = vadd.f32 %v1458_v25, %v3310_v33  ;;  %v1525_v2 = vmul.f32 %v3314_v46, %v3314_v46  ;;  %v1581_v60 = vadd.f32 %v1580_v47, %v1524_v37 }
 0x187   :  { %v957_v6 = vpop.f32.mrf.mxu0 }
 0x188   :  { %v3427_v38 = vpop.f32.mrf.mxu1  ;;  %v1460_v48 = vadd.f32 %v1459_v36, %v3312_v39  ;;  %v1526_v6 = vmul.f32 %v3316_v52, %v3316_v52  ;;  %v1582_v13 = vadd.f32 %v1581_v60, %v1525_v2 }
 0x189   :  { %v960_v19 = vpop.f32.mrf.mxu0 }
 0x18a   :  { %v3422_v41 = vadd.f32 %v3353_v62, %v960_v19  ;;  %v2653_v54 = vpop.f32.mrf.mxu1  ;;  %v1461_v0 = vadd.f32 %v1460_v48, %v3314_v46  ;;  %v1583_v30 = vadd.f32 %v1582_v13, %v1526_v6  ;;  %v1529_v48 = vmul.f32 %v3322_v10, %v3322_v10 }
 0x18b   :  { %v962_v57 = vpop.f32.mrf.mxu0 }
 0x18c   :  { %3999 = vst [vmem:[#allocation4_spill] sm:$0xff] %v3422_v41  ;;  %v3438_v8 = vpop.f32.mrf.mxu1  ;;  %v1462_v19 = vadd.f32 %v1461_v0, %v3316_v52  ;;  %v1530_v0 = vmul.f32 %v3326_v18, %v3326_v18 }
 0x18d   :  { %v963_v44 = vpop.f32.mrf.mxu0 }
 0x18e   :  { %v3433_v62 = vadd.f32 %v3363_v22, %v963_v44  ;;  %v2656_v25 = vpop.f32.mrf.mxu1  ;;  %v1463_v57 = vadd.f32 %v1462_v19, %v3318_v59  ;;  %v1584_v44 = vadd.f32 %v1583_v30, %v1527_v20  ;;  %v1531_v20 = vmul.f32 %v3338_v31, %v3338_v31 }
 0x18f   :  { %v965_v58 = vpop.f32.mrf.mxu0 }
 0x190   :  { %4000 = vst [vmem:[#allocation5_spill] sm:$0xff] %v3433_v62  ;;  %v3449_v36 = vpop.f32.mrf.mxu1  ;;  %v1464_v47 = vadd.f32 %v1463_v57, %v3320_v1  ;;  %v1585_v58 = vadd.f32 %v1584_v44, %v1528_v34  ;;  %v1532_v34 = vmul.f32 %v3348_v51, %v3348_v51 }
 0x191   :  { %v968_v49 = vpop.f32.mrf.mxu0 }
 0x192   :  { %v3444_v22 = vadd.f32 %v3373_v42, %v968_v49  ;;  %v2657_v2 = vpop.f32.mrf.mxu1  ;;  %v1465_v60 = vadd.f32 %v1464_v47, %v3322_v10  ;;  %v1586_v13 = vadd.f32 %v1585_v58, %v1529_v48 }
 0x193   :  { %v970_v26 = vpop.f32.mrf.mxu0  ;;  %v1533_v2 = vmul.f32 %v3358_v12, %v3358_v12 }
 0x194   :  { %4001 = vst [vmem:[#allocation6_spill] sm:$0xff] %v3444_v22  ;;  %v3460_v6 = vpop.f32.mrf.mxu1  ;;  %v1466_v19 = vadd.f32 %v1465_v60, %v3326_v18  ;;  %v1587_v30 = vadd.f32 %v1586_v13, %v1530_v0 }
 0x195   :  { %v971_v37 = vpop.f32.mrf.mxu0 }
 0x196   :  { %v3455_v42 = vadd.f32 %v3383_v4, %v971_v37  ;;  %v2660_v25 = vpop.f32.mrf.mxu1  ;;  %v1467_v57 = vadd.f32 %v1466_v19, %v3338_v31  ;;  %v1588_v47 = vadd.f32 %v1587_v30, %v1531_v20 }
 0x197   :  { %v973_v54 = vpop.f32.mrf.mxu0 }
 0x198   :  { %4002 = vst [vmem:[#allocation7_spill] sm:$0xff] %v3455_v42  ;;  %v3471_v37 = vpop.f32.mrf.mxu1  ;;  %v1468_v48 = vadd.f32 %v1467_v57, %v3348_v51  ;;  %v1589_v60 = vadd.f32 %v1588_v47, %v1532_v34  ;;  %v1536_v47 = vmul.f32 %v3389_v7, %v3389_v7 }
 0x199   :  { %v976_v49 = vpop.f32.mrf.mxu0 }
 0x19a   :  { %v3466_v4 = vadd.f32 %v3394_v28, %v976_v49  ;;  %v2661_v54 = vpop.f32.mrf.mxu1  ;;  %v1469_v0 = vadd.f32 %v1468_v48, %v3358_v12  ;;  %v1534_v49 = vmul.f32 %v3368_v32, %v3368_v32  ;;  %v1590_v20 = vadd.f32 %v1589_v60, %v1533_v2 }
 0x19b   :  { %v978_v26 = vpop.f32.mrf.mxu0  ;;  %v1537_v60 = vmul.f32 %v3400_v14, %v3400_v14 }
 0x19c   :  { %4003 = vst [vmem:[#allocation8_spill] sm:$0xff] %v3466_v4  ;;  %v3482_v13 = vpop.f32.mrf.mxu1  ;;  %v1470_v25 = vadd.f32 %v1469_v0, %v3368_v32  ;;  %v1535_v26 = vmul.f32 %v3378_v53, %v3378_v53  ;;  %v1591_v34 = vadd.f32 %v1590_v20, %v1534_v49 }
 0x19d   :  { %v979_v44 = vpop.f32.mrf.mxu0 }
 0x19e   :  { %v3477_v28 = vadd.f32 %v3405_v43, %v979_v44  ;;  %v2664_v30 = vpop.f32.mrf.mxu1  ;;  %v1471_v44 = vadd.f32 %v1470_v25, %v3378_v53  ;;  %v1592_v2 = vadd.f32 %v1591_v34, %v1535_v26  ;;  %v1538_v25 = vmul.f32 %v3411_v24, %v3411_v24 }
 0x19f   :  { %v981_v58 = vpop.f32.mrf.mxu0 }
 0x1a0   :  { %v3493_v48 = vpop.f32.mrf.mxu1  ;;  %v1472_v58 = vadd.f32 %v1471_v44, %v3389_v7  ;;  %v1593_v49 = vadd.f32 %v1592_v2, %v1536_v47  ;;  %v1539_v44 = vmul.f32 %v3422_v41, %v3422_v41 }
 0x1a1   :  { %v984_v19 = vpop.f32.mrf.mxu0 }
 0x1a2   :  { %v3488_v43 = vadd.f32 %v3416_v16, %v984_v19  ;;  %v2665_v0 = vpop.f32.mrf.mxu1  ;;  %v1473_v20 = vadd.f32 %v1472_v58, %v3400_v14  ;;  %v1594_v26 = vadd.f32 %v1593_v49, %v1537_v60  ;;  %v1540_v58 = vmul.f32 %v3433_v62, %v3433_v62 }
 0x1a3   :  { %v986_v57 = vpop.f32.mrf.mxu0 }
 0x1a4   :  { %v3504_v30 = vpop.f32.mrf.mxu1  ;;  %v1474_v34 = vadd.f32 %v1473_v20, %v3411_v24  ;;  %v1595_v47 = vadd.f32 %v1594_v26, %v1538_v25  ;;  %v1541_v20 = vmul.f32 %v3444_v22, %v3444_v22 }
 0x1a5   :  { %v987_v54 = vpop.f32.mrf.mxu0 }
 0x1a6   :  { %v3499_v16 = vadd.f32 %v3427_v38, %v987_v54  ;;  %v2668_v54 = vpop.f32.mrf.mxu1  ;;  %v1475_v2 = vadd.f32 %v1474_v34, %v3422_v41  ;;  %v1596_v60 = vadd.f32 %v1595_v47, %v1539_v44  ;;  %v1542_v34 = vmul.f32 %v3455_v42, %v3455_v42 }
 0x1a7   :  { %v989_v19 = vpop.f32.mrf.mxu0 }
 0x1a8   :  { %4004 = vst [vmem:[#allocation9_spill] sm:$0xff] %v3499_v16  ;;  %v3515_v19 = vpop.f32.mrf.mxu1  ;;  %v1476_v49 = vadd.f32 %v1475_v2, %v3433_v62  ;;  %v1597_v25 = vadd.f32 %v1596_v60, %v1540_v58  ;;  %v1543_v2 = vmul.f32 %v3466_v4, %v3466_v4  ;;  %v1544_v58 = vmul.f32 %v3477_v28, %v3477_v28 }
 0x1a9   :  { %v992_v57 = vpop.f32.mrf.mxu0 }
 0x1aa   :  { %v3510_v38 = vadd.f32 %v3438_v8, %v992_v57  ;;  %v2669_v57 = vpop.f32.mrf.mxu1  ;;  %v1477_v26 = vadd.f32 %v1476_v49, %v3444_v22  ;;  %v1598_v44 = vadd.f32 %v1597_v25, %v1541_v20  ;;  %v1545_v20 = vmul.f32 %v3488_v43, %v3488_v43 }
 0x1ab   :  { %v994_v0 = vpop.f32.mrf.mxu0 }
 0x1ac   :  { %v3526_v0 = vpop.f32.mrf.mxu1  ;;  %v1478_v47 = vadd.f32 %v1477_v26, %v3455_v42 }
 0x1ad   :  { %v995_v14 = vpop.f32.mrf.mxu0 }
 0x1ae   :  { %v3521_v8 = vadd.f32 %v3449_v36, %v995_v14  ;;  %v2672_v62 = vpop.f32.mrf.mxu1  ;;  %v1599_v36 = vadd.f32 %v1598_v44, %v1542_v34  ;;  %v1479_v57 = vadd.f32 %v1478_v47, %v3466_v4  ;;  %v1546_v34 = vmul.f32 %v3499_v16, %v3499_v16 }
 0x1af   :  { %v997_v54 = vpop.f32.mrf.mxu0 }
 0x1b0   :  { %v3534_v60 = vpop.f32.mrf.mxu1  ;;  %v1600_v54 = vadd.f32 %v1599_v36, %v1543_v2  ;;  %v1480_v22 = vadd.f32 %v1479_v57, %v3477_v28  ;;  %v1547_v2 = vmul.f32 %v3510_v38, %v3510_v38 }
 0x1b1   :  { %v1000_v41 = vpop.f32.mrf.mxu0 }
 0x1b2   :  { %v2673_v25 = vpop.f32.mrf.mxu1  ;;  %v1601_v42 = vadd.f32 %v1600_v54, %v1544_v58  ;;  %v1481_v62 = vadd.f32 %v1480_v22, %v3488_v43  ;;  %v3548_v36 = vadd.f32 %v3460_v6, %v1000_v41  ;;  %v1548_v54 = vmul.f32 %v3521_v8, %v3521_v8 }
 0x1b3   :  { %v1002_v14 = vpop.f32.mrf.mxu0 }
 0x1b4   :  { %v3542_v44 = vpop.f32.mrf.mxu1  ;;  %v1602_v14 = vadd.f32 %v1601_v42, %v1545_v20  ;;  %v1482_v4 = vadd.f32 %v1481_v62, %v3499_v16  ;;  %4005 = vst [vmem:[#allocation10_spill] sm:$0xff] %v3548_v36  ;;  %v1549_v41 = vmul.f32 %v3548_v36, %v3548_v36 }
 0x1b5   :  { %v1003_v49 = vpop.f32.mrf.mxu0 }
 0x1b6   :  { %v2676_v57 = vpop.f32.mrf.mxu1  ;;  %v1603_v58 = vadd.f32 %v1602_v14, %v1546_v34  ;;  %v1483_v22 = vadd.f32 %v1482_v4, %v3510_v38 }
 0x1b7   :  { %v1005_v26 = vpop.f32.mrf.mxu0 }
 0x1b8   :  { %v3554_v26 = vadd.f32 %v3471_v37, %v1003_v49  ;;  %v1300_v42 = vpop.f32.mrf.mxu1  ;;  %v1604_v62 = vadd.f32 %v1603_v58, %v1547_v2  ;;  %v1484_v16 = vadd.f32 %v1483_v22, %v3521_v8 }
 0x1b9   :  { %v1008_v47 = vpop.f32.mrf.mxu0 }
 0x1ba   :  { %4006 = vst [vmem:[#allocation11_spill] sm:$0xff] %v3554_v26  ;;  %v3560_v6 = vadd.f32 %v3482_v13, %v1008_v47  ;;  %v2677_v34 = vpop.f32.mrf.mxu1  ;;  %v1605_v4 = vadd.f32 %v1604_v62, %v1548_v54  ;;  %v1485_v57 = vadd.f32 %v1484_v16, %v3548_v36  ;;  %v1550_v37 = vmul.f32 %v3554_v26, %v3554_v26 }
 0x1bb   :  { %v1010_v25 = vpop.f32.mrf.mxu0 }
 0x1bc   :  { %4007 = vst [vmem:[#allocation12_spill] sm:$0xff] %v3560_v6  ;;  %v1305_v2 = vpop.f32.mrf.mxu1  ;;  %v1606_v58 = vadd.f32 %v1605_v4, %v1549_v41  ;;  %v1486_v22 = vadd.f32 %v1485_v57, %v3554_v26  ;;  %v1551_v13 = vmul.f32 %v3560_v6, %v3560_v6 }
 0x1bd   :  { %v1011_v20 = vpop.f32.mrf.mxu0 }
 0x1be   :  { %v3566_v49 = vadd.f32 %v3493_v48, %v1011_v20  ;;  %v2680_v54 = vpop.f32.mrf.mxu1  ;;  %v1607_v16 = vadd.f32 %v1606_v58, %v1550_v37  ;;  %v1487_v34 = vadd.f32 %v1486_v22, %v3560_v6 }
 0x1bf   :  { %v1013_v14 = vpop.f32.mrf.mxu0 }
 0x1c0   :  { %4008 = vst [vmem:[#allocation13_spill] sm:$0xff] %v3566_v49  ;;  %v1552_v48 = vmul.f32 %v3566_v49, %v3566_v49  ;;  %v1308_v20 = vpop.f32.mrf.mxu1  ;;  %v1608_v36 = vadd.f32 %v1607_v16, %v1551_v13  ;;  %v1488_v41 = vadd.f32 %v1487_v34, %v3566_v49 }
 0x1c1   :  { %v1016_v25 = vpop.f32.mrf.mxu0 }
 0x1c2   :  { %v3572_v47 = vadd.f32 %v3504_v30, %v1016_v25  ;;  %v2681_v30 = vpop.f32.mrf.mxu1  ;;  %v1609_v54 = vadd.f32 %v1608_v36, %v1552_v48 }
 0x1c3   :  { %v1018_v62 = vpop.f32.mrf.mxu0 }
 0x1c4   :  { %4009 = vst [vmem:[#allocation14_spill] sm:$0xff] %v3572_v47  ;;  %v1553_v4 = vmul.f32 %v3572_v47, %v3572_v47  ;;  %v1489_v37 = vadd.f32 %v1488_v41, %v3572_v47  ;;  %v1313_v22 = vpop.f32.mrf.mxu1 }
 0x1c5   :  { %v1019_v14 = vpop.f32.mrf.mxu0 }
 0x1c6   :  { %v3581_v57 = vadd.f32 %v3515_v19, %v1019_v14  ;;  %v1610_v6 = vadd.f32 %v1609_v54, %v1553_v4  ;;  %v2684_v34 = vpop.f32.mrf.mxu1 }
 0x1c7   :  { %v1021_v25 = vpop.f32.mrf.mxu0 }
 0x1c8   :  { %v1554_v58 = vmul.f32 %v3581_v57, %v3581_v57  ;;  %v1490_v13 = vadd.f32 %v1489_v37, %v3581_v57  ;;  %v1316_v48 = vpop.f32.mrf.mxu1 }
 0x1c9   :  { %v1024_v62 = vpop.f32.mrf.mxu0 }
 0x1ca   :  { %v3588_v16 = vadd.f32 %v3526_v0, %v1024_v62  ;;  %v1611_v19 = vadd.f32 %v1610_v6, %v1554_v58  ;;  %v2685_v4 = vpop.f32.mrf.mxu1 }
 0x1cb   :  { %v1026_v49 = vpop.f32.mrf.mxu0 }
 0x1cc   :  { %v1491_v14 = vadd.f32 %v1490_v13, %v3588_v16  ;;  %v1555_v36 = vmul.f32 %v3588_v16, %v3588_v16 }
 0x1cd   :  { %v1027_v41 = vpop.f32.mrf.mxu0 }
 0x1ce   :  { %v1612_v30 = vadd.f32 %v1611_v19, %v1555_v36  ;;  %v3594_v25 = vadd.f32 %v3534_v60, %v1027_v41 }
 0x1cf   :  { %v1029_v54 = vpop.f32.mrf.mxu0 }
 0x1d0   :  { %v1492_v37 = vadd.f32 %v1491_v14, %v3594_v25  ;;  %v1556_v0 = vmul.f32 %v3594_v25, %v3594_v25 }
 0x1d1   :  { %v1032_v49 = vpop.f32.mrf.mxu0 }
 0x1d2   :  { %v1613_v6 = vadd.f32 %v1612_v30, %v1556_v0  ;;  %v3600_v58 = vadd.f32 %v3542_v44, %v1032_v49 }
 0x1d3   :  { %v1034_v62 = vpop.f32.mrf.mxu0 }
 0x1d4   :  { %v1493_v13 = vadd.f32 %v1492_v37, %v3600_v58  ;;  %v1557_v34 = vmul.f32 %v3600_v58, %v3600_v58 }
 0x1d5   :  { %v1035_v60 = vpop.f32.mrf.mxu0 }
 0x1d6   :  { %v1614_v19 = vadd.f32 %v1613_v6, %v1557_v34  ;;  %v3605_v36 = vadd.f32 %v1300_v42, %v1035_v60 }
 0x1d7   :  { %v1037_v41 = vpop.f32.mrf.mxu0 }
 0x1d8   :  { %4010 = vst [vmem:[#allocation15_spill] sm:$0xff] %v3605_v36  ;;  %v1494_v14 = vadd.f32 %v1493_v13, %v3605_v36  ;;  %v1558_v4 = vmul.f32 %v3605_v36, %v3605_v36 }
 0x1d9   :  { %v1040_v30 = vpop.f32.mrf.mxu0 }
 0x1da   :  { %v1615_v54 = vadd.f32 %v1614_v19, %v1558_v4  ;;  %v3610_v44 = vadd.f32 %v1305_v2, %v1040_v30 }
 0x1db   :  { %v1042_v0 = vpop.f32.mrf.mxu0 }
 0x1dc   :  { %4011 = vst [vmem:[#allocation16_spill] sm:$0xff] %v3610_v44  ;;  %v1495_v37 = vadd.f32 %v1494_v14, %v3610_v44  ;;  %v1559_v49 = vmul.f32 %v3610_v44, %v3610_v44 }
 0x1dd   :  { %v1043_v62 = vpop.f32.mrf.mxu0 }
 0x1de   :  { %v1616_v6 = vadd.f32 %v1615_v54, %v1559_v49  ;;  %v3615_v42 = vadd.f32 %v1308_v20, %v1043_v62 }
 0x1df   :  { %v1045_v34 = vpop.f32.mrf.mxu0 }
 0x1e0   :  { %4012 = vst [vmem:[#allocation17_spill] sm:$0xff] %v3615_v42  ;;  %v1496_v13 = vadd.f32 %v1495_v37, %v3615_v42  ;;  %v1560_v60 = vmul.f32 %v3615_v42, %v3615_v42 }
 0x1e1   :  { %v1048_v41 = vpop.f32.mrf.mxu0 }
 0x1e2   :  { %v1617_v19 = vadd.f32 %v1616_v6, %v1560_v60  ;;  %v3620_v2 = vadd.f32 %v1313_v22, %v1048_v41 }
 0x1e3   :  { %v1050_v4 = vpop.f32.mrf.mxu0 }
 0x1e4   :  { %4013 = vst [vmem:[#allocation18_spill] sm:$0xff] %v3620_v2  ;;  %v1497_v14 = vadd.f32 %v1496_v13, %v3620_v2  ;;  %v1561_v30 = vmul.f32 %v3620_v2, %v3620_v2 }
 0x1e5   :  { %v1051_v0 = vpop.f32.mrf.mxu0 }
 0x1e6   :  { %v1618_v54 = vadd.f32 %v1617_v19, %v1561_v30  ;;  %v3625_v20 = vadd.f32 %v1316_v48, %v1051_v0 }
 0x1e7   :  { %v1053_v49 = vpop.f32.mrf.mxu0 }
 0x1e8   :  { %4014 = vst [vmem:[#allocation19_spill] sm:$0xff] %v3625_v20  ;;  %v1498_v37 = vadd.f32 %v1497_v14, %v3625_v20  ;;  %v1562_v62 = vmul.f32 %v3625_v20, %v3625_v20  ;;  %v1638_v20 = vlaneseq }
 0x1ea   :  { %v1499_v34 = vrot.slane %v1498_v37, 4  ;;  %v1619_v6 = vadd.f32 %v1618_v54, %v1562_v62  ;;  %v3630_v36 = vshrl.u32 %v1638_v20, 7  ;;  %v1630_v54 = vld [vmem:[%s3978_s2] sm:$0x1] }
 0x1ec   :  { %v1500_v22 = vadd.f32 %v1499_v34, %v1498_v37  ;;  %v1620_v60 = vrot.slane %v1619_v6, 4  ;;  %v1640_v37 = vsub.s32 0, %v3630_v36 }
 0x1ee   :  { %v1501_v41 = vrot.slane %v1500_v22, 2  ;;  %v1621_v4 = vadd.f32 %v1620_v60, %v1619_v6 }
 0x1f0   :  { %v1502_v13 = vadd.f32 %v1501_v41, %v1500_v22  ;;  %v1622_v47 = vrot.slane %v1621_v4, 2 }
 0x1f2   :  { %v1503_v42 = vrot.slane %v1502_v13, 1  ;;  %v1623_v2 = vadd.f32 %v1622_v47, %v1621_v4 }
 0x1f4   :  { %v1504_v26 = vadd.f32 %v1503_v42, %v1502_v13  ;;  %v1624_v19 = vrot.slane %v1623_v2, 1 }
 0x1f6   :  { %v1625_v48 = vadd.f32 %v1624_v19, %v1623_v2  ;;  %v1626_v30 = vmul.f32 0.0022222223, %v1504_v26  ;;  %v1634_v26 = vld [vmem:[%s3979_s3] sm:$0x1] }
 0x1f8   :  { %v1627_v0 = vmul.f32 0.0022222223, %v1625_v48  ;;  %v1628_v49 = vmul.f32 %v1626_v30, %v1626_v30  ;;  %v4015_v48 = vld [vmem:[#allocation3_spill] sm:$0xff] }
 0x1fa   :  { %v1629_v14 = vsub.f32 %v1627_v0, %v1628_v49  ;;  %v4017_v0 = vld [vmem:[#allocation5_spill] sm:$0xff]  ;;  %v4018_v49 = vld [vmem:[#allocation6_spill] sm:$0xff] }
 0x1fc   :  { %v1631_v44 = vadd.f32 1e-05, %v1629_v14  ;;  %v4019_v14 = vld [vmem:[#allocation7_spill] sm:$0xff] }
 0x1fe   :  { %2829 = vrsqrt.f32 %v1631_v44 }
 0x20b   :  { %v2830_v62 = vpop.eup %2829 }
 0x20c   :  { %v1633_v47 = vmul.f32 %v2830_v62, %v1630_v54  ;;  %v4020_v54 = vld [vmem:[#allocation8_spill] sm:$0xff]  ;;  %v4021_v62 = vld [vmem:[#allocation9_spill] sm:$0xff] }
 0x20e   :  { %v1635_v42 = vmul.f32 %v1633_v47, %v1626_v30  ;;  %v1641_v2 = vrot.slane %v1633_v47, %v1640_v37  ;;  %v4016_v30 = vld [vmem:[#allocation4_spill] sm:$0xff] }
 0x210   :  { %v1636_v34 = vsub.f32 %v1634_v26, %v1635_v42  ;;  %v1643_v44 = vmul.f32 %v1641_v2, %v3250_v56  ;;  %v1644_v20 = vmul.f32 %v1641_v2, %v3258_v63  ;;  %v1645_v6 = vmul.f32 %v1641_v2, %v3263_v5  ;;  %v4022_v26 = vld [vmem:[#allocation10_spill] sm:$0xff] }
 0x211   :  { %v1646_v22 = vmul.f32 %v1641_v2, %v3268_v11  ;;  %v1647_v60 = vmul.f32 %v1641_v2, %v3273_v17  ;;  %v1648_v36 = vmul.f32 %v1641_v2, %v3278_v23  ;;  %v1649_v41 = vmul.f32 %v1641_v2, %v3283_v29 }
 0x212   :  { %v1650_v4 = vmul.f32 %v1641_v2, %v3288_v35  ;;  %v1651_v13 = vmul.f32 %v1641_v2, %v3290_v40  ;;  %v1652_v19 = vmul.f32 %v1641_v2, %v3292_v45  ;;  %v1653_v56 = vmul.f32 %v1641_v2, %v3294_v50 }
 0x213   :  { %v1654_v63 = vmul.f32 %v1641_v2, %v3296_v55  ;;  %v1655_v5 = vmul.f32 %v1641_v2, %v3298_v61  ;;  %v1656_v11 = vmul.f32 %v1641_v2, %v3300_v3  ;;  %v1657_v17 = vmul.f32 %v1641_v2, %v3302_v9 }
 0x214   :  { %v1658_v23 = vmul.f32 %v1641_v2, %v3304_v15  ;;  %v1659_v29 = vmul.f32 %v1641_v2, %v3306_v21  ;;  %v1660_v35 = vmul.f32 %v1641_v2, %v3308_v27  ;;  %v1661_v40 = vmul.f32 %v1641_v2, %v3310_v33 }
 0x215   :  { %v1662_v45 = vmul.f32 %v1641_v2, %v3312_v39  ;;  %v1663_v50 = vmul.f32 %v1641_v2, %v3314_v46  ;;  %v1664_v55 = vmul.f32 %v1641_v2, %v3316_v52  ;;  %v1665_v61 = vmul.f32 %v1641_v2, %v3318_v59 }
 0x216   :  { %v1666_v3 = vmul.f32 %v1641_v2, %v3320_v1  ;;  %v1667_v9 = vmul.f32 %v1641_v2, %v3322_v10  ;;  %v1668_v15 = vmul.f32 %v1641_v2, %v3326_v18  ;;  %v1669_v21 = vmul.f32 %v1641_v2, %v3338_v31 }
 0x217   :  { %v1670_v27 = vmul.f32 %v1641_v2, %v3348_v51  ;;  %v1671_v33 = vmul.f32 %v1641_v2, %v3358_v12  ;;  %v1672_v39 = vmul.f32 %v1641_v2, %v3368_v32  ;;  %v1673_v46 = vmul.f32 %v1641_v2, %v3378_v53 }
 0x218   :  { %v1674_v52 = vmul.f32 %v1641_v2, %v3389_v7  ;;  %v1675_v59 = vmul.f32 %v1641_v2, %v4015_v48  ;;  %v1676_v1 = vmul.f32 %v1641_v2, %v3411_v24  ;;  %v1677_v10 = vmul.f32 %v1641_v2, %v4016_v30 }
 0x219   :  { %v1678_v18 = vmul.f32 %v1641_v2, %v4017_v0  ;;  %v1679_v31 = vmul.f32 %v1641_v2, %v4018_v49  ;;  %v1680_v51 = vmul.f32 %v1641_v2, %v4019_v14  ;;  %v1681_v12 = vmul.f32 %v1641_v2, %v4020_v54 }
 0x21a   :  { %v1682_v32 = vmul.f32 %v1641_v2, %v3477_v28  ;;  %v1683_v53 = vmul.f32 %v1641_v2, %v3488_v43  ;;  %v1684_v7 = vmul.f32 %v1641_v2, %v4021_v62  ;;  %v1685_v47 = vmul.f32 %v1641_v2, %v3510_v38  ;;  %v4027_v43 = vld [vmem:[#allocation15_spill] sm:$0xff]  ;;  %v4029_v38 = vld [vmem:[#allocation16_spill] sm:$0xff]  ;;  %v4032_v62 = vld [vmem:[#allocation17_spill] sm:$0xff] }
 0x21b   :  { %v1686_v24 = vmul.f32 %v1641_v2, %v3521_v8  ;;  %v1687_v42 = vmul.f32 %v1641_v2, %v4022_v26  ;;  %v3685_v48 = vmul.f32 %v1641_v2, %v3581_v57  ;;  %v3688_v30 = vmul.f32 %v1641_v2, %v3588_v16  ;;  %v4031_v8 = vld [vmem:[#allocation11_spill] sm:$0xff]  ;;  %v4033_v26 = vld [vmem:[#allocation18_spill] sm:$0xff] }
 0x21c   :  { %v3691_v0 = vmul.f32 %v1641_v2, %v3594_v25  ;;  %v3694_v28 = vmul.f32 %v1641_v2, %v3600_v58  ;;  %v3697_v49 = vmul.f32 %v1641_v2, %v4027_v43  ;;  %v3700_v14 = vmul.f32 %v1641_v2, %v4029_v38 }
 0x21d   :  { %4023 = vst [vmem:[#allocation3_spill] sm:$0xff] %v3685_v48  ;;  %4024 = vst [vmem:[#allocation4_spill] sm:$0xff] %v3688_v30  ;;  %v1688_v54 = vmul.f32 %v1641_v2, %v4031_v8  ;;  %v1698_v57 = vmul.f32 %v1641_v2, %v4032_v62  ;;  %v1699_v48 = vmul.f32 %v1641_v2, %v4033_v26  ;;  %v4034_v30 = vld [vmem:[#allocation12_spill] sm:$0xff] }
 0x21e   :  { %4025 = vst [vmem:[#allocation5_spill] sm:$0xff] %v3691_v0  ;;  %4026 = vst [vmem:[#allocation6_spill] sm:$0xff] %v3694_v28  ;;  %v1705_v16 = vrot.slane %v1636_v34, %v1640_v37  ;;  %v1689_v25 = vmul.f32 %v1641_v2, %v4034_v30  ;;  %v4035_v0 = vld [vmem:[#allocation13_spill] sm:$0xff]  ;;  %v4036_v28 = vld [vmem:[#allocation14_spill] sm:$0xff] }
 0x21f   :  { %4028 = vst [vmem:[#allocation7_spill] sm:$0xff] %v3697_v49  ;;  %4030 = vst [vmem:[#allocation8_spill] sm:$0xff] %v3700_v14  ;;  %v1690_v58 = vmul.f32 %v1641_v2, %v4035_v0  ;;  %v1691_v43 = vmul.f32 %v1641_v2, %v4036_v28  ;;  %v4037_v49 = vld [vmem:[#allocation19_spill] sm:$0xff] }
 0x220   :  { %v1700_v38 = vmul.f32 %v1641_v2, %v4037_v49  ;;  %v3709_v14 = vadd.f32 %v1705_v16, %v1643_v44  ;;  %v3711_v8 = vadd.f32 %v1705_v16, %v1644_v20  ;;  %v3713_v62 = vadd.f32 %v1705_v16, %v1645_v6 }
 0x221   :  { %v3715_v26 = vadd.f32 %v1705_v16, %v1646_v22  ;;  %v3717_v34 = vadd.f32 %v1705_v16, %v1647_v60  ;;  %v3719_v37 = vadd.f32 %v1705_v16, %v1648_v36  ;;  %v3721_v30 = vadd.f32 %v1705_v16, %v1649_v41 }
 0x222   :  { %v3723_v0 = vadd.f32 %v1705_v16, %v1650_v4  ;;  %v3725_v28 = vadd.f32 %v1705_v16, %v1651_v13  ;;  %v3727_v2 = vadd.f32 %v1705_v16, %v1652_v19  ;;  %v3729_v44 = vadd.f32 %v1705_v16, %v1653_v56 }
 0x223   :  { %v3731_v20 = vadd.f32 %v1705_v16, %v1654_v63  ;;  %v3733_v6 = vadd.f32 %v1705_v16, %v1655_v5  ;;  %v3735_v22 = vadd.f32 %v1705_v16, %v1656_v11  ;;  %v3737_v60 = vadd.f32 %v1705_v16, %v1657_v17 }
 0x224   :  { %v3739_v36 = vadd.f32 %v1705_v16, %v1658_v23  ;;  %v3741_v41 = vadd.f32 %v1705_v16, %v1659_v29  ;;  %v3743_v4 = vadd.f32 %v1705_v16, %v1660_v35  ;;  %v3745_v13 = vadd.f32 %v1705_v16, %v1661_v40 }
 0x225   :  { %v3747_v19 = vadd.f32 %v1705_v16, %v1662_v45  ;;  %v3749_v56 = vadd.f32 %v1705_v16, %v1663_v50  ;;  %v3751_v63 = vadd.f32 %v1705_v16, %v1664_v55  ;;  %v3753_v5 = vadd.f32 %v1705_v16, %v1665_v61 }
 0x226   :  { %v3755_v11 = vadd.f32 %v1705_v16, %v1666_v3  ;;  %v3757_v17 = vadd.f32 %v1705_v16, %v1667_v9  ;;  %v3759_v23 = vadd.f32 %v1705_v16, %v1668_v15  ;;  %v3761_v29 = vadd.f32 %v1705_v16, %v1669_v21 }
 0x227   :  { %v3763_v35 = vadd.f32 %v1705_v16, %v1670_v27  ;;  %v3765_v40 = vadd.f32 %v1705_v16, %v1671_v33  ;;  %v3767_v45 = vadd.f32 %v1705_v16, %v1672_v39  ;;  %v3769_v50 = vadd.f32 %v1705_v16, %v1673_v46 }
 0x228   :  { %v3771_v55 = vadd.f32 %v1705_v16, %v1674_v52  ;;  %v3773_v61 = vadd.f32 %v1705_v16, %v1675_v59  ;;  %v3775_v3 = vadd.f32 %v1705_v16, %v1676_v1  ;;  %v3777_v9 = vadd.f32 %v1705_v16, %v1677_v10 }
 0x229   :  { %v3779_v15 = vadd.f32 %v1705_v16, %v1678_v18  ;;  %v3781_v21 = vadd.f32 %v1705_v16, %v1679_v31  ;;  %v3783_v27 = vadd.f32 %v1705_v16, %v1680_v51  ;;  %v3785_v33 = vadd.f32 %v1705_v16, %v1681_v12 }
 0x22a   :  { %v3787_v39 = vadd.f32 %v1705_v16, %v1682_v32  ;;  %v3789_v46 = vadd.f32 %v1705_v16, %v1683_v53  ;;  %v3791_v52 = vadd.f32 %v1705_v16, %v1684_v7  ;;  %v3793_v59 = vadd.f32 %v1705_v16, %v1685_v47  ;;  %v4041_v32 = vld [vmem:[#allocation3_spill] sm:$0xff]  ;;  %v4042_v53 = vld [vmem:[#allocation4_spill] sm:$0xff]  ;;  %v4043_v47 = vld [vmem:[#allocation5_spill] sm:$0xff] }
 0x22b   :  { %v3795_v1 = vadd.f32 %v1705_v16, %v1686_v24  ;;  %v3797_v10 = vadd.f32 %v1705_v16, %v1687_v42  ;;  %v3799_v18 = vadd.f32 %v1705_v16, %v1688_v54  ;;  %v3801_v31 = vadd.f32 %v1705_v16, %v1689_v25  ;;  %v4045_v24 = vld [vmem:[#allocation6_spill] sm:$0xff]  ;;  %v4046_v54 = vld [vmem:[#allocation7_spill] sm:$0xff]  ;;  %v4048_v25 = vld [vmem:[#allocation8_spill] sm:$0xff] }
 0x22c   :  { %4038 = vst [vmem:[#allocation9_spill] sm:$0xff] %v3793_v59  ;;  %v3803_v51 = vadd.f32 %v1705_v16, %v1690_v58  ;;  %v3805_v12 = vadd.f32 %v1705_v16, %v1691_v43  ;;  %v3808_v49 = vadd.f32 %v1705_v16, %v4041_v32  ;;  %v3811_v7 = vadd.f32 %v1705_v16, %v4042_v53 }
 0x22d   :  { %4039 = vst [vmem:[#allocation10_spill] sm:$0xff] %v3799_v18  ;;  %v3814_v59 = vadd.f32 %v1705_v16, %v4043_v47  ;;  %v3817_v42 = vadd.f32 %v1705_v16, %v4045_v24  ;;  %v3820_v18 = vadd.f32 %v1705_v16, %v4046_v54  ;;  %v3823_v58 = vadd.f32 %v1705_v16, %v4048_v25 }
 0x22e   :  { %4040 = vst [vmem:[#allocation15_spill] sm:$0xff] %v3805_v12  ;;  %v3825_v43 = vadd.f32 %v1705_v16, %v1698_v57  ;;  %v3827_v12 = vadd.f32 %v1705_v16, %v1699_v48  ;;  %v3829_v32 = vadd.f32 %v1705_v16, %v1700_v38  ;;  %v1765_v53 = vmax.f32 %v3709_v14, 0.0 }
 0x22f   :  { %4044 = vst [vmem:[#allocation16_spill] sm:$0xff] %v3814_v59  ;;  %4047 = vst [vmem:[#allocation11_spill] sm:$0xff] %v3820_v18  ;;  %v1766_v47 = vmax.f32 %v3711_v8, 0.0  ;;  %v1767_v59 = vmax.f32 %v3713_v62, 0.0  ;;  %v1768_v24 = vmax.f32 %v3715_v26, 0.0  ;;  %v1769_v54 = vmax.f32 %v3717_v34, 0.0 }
 0x230   :  { %4049 = vst [vmem:[#allocation17_spill] sm:$0xff] %v3823_v58  ;;  %4050 = vst [vmem:[#allocation18_spill] sm:$0xff] %v3825_v43  ;;  %v1770_v18 = vmax.f32 %v3719_v37, 0.0  ;;  %v1771_v25 = vmax.f32 %v3721_v30, 0.0  ;;  %v1772_v57 = vmax.f32 %v3723_v0, 0.0  ;;  %v1773_v48 = vmax.f32 %v3725_v28, 0.0 }
 0x231   :  { %4051 = vst [vmem:[#allocation12_spill] sm:$0xff] %v3827_v12  ;;  %4052 = vst [vmem:[#allocation13_spill] sm:$0xff] %v3829_v32  ;;  %v1774_v16 = vmax.f32 %v3727_v2, 0.0  ;;  %v1775_v14 = vmax.f32 %v3729_v44, 0.0  ;;  %v1776_v38 = vmax.f32 %v3731_v20, 0.0  ;;  %v1777_v8 = vmax.f32 %v3733_v6, 0.0 }
 0x232   :  { %v1778_v62 = vmax.f32 %v3735_v22, 0.0  ;;  %v1779_v26 = vmax.f32 %v3737_v60, 0.0  ;;  %v1780_v34 = vmax.f32 %v3739_v36, 0.0  ;;  %v1781_v37 = vmax.f32 %v3741_v41, 0.0 }
 0x233   :  { %v1782_v30 = vmax.f32 %v3743_v4, 0.0  ;;  %v1783_v0 = vmax.f32 %v3745_v13, 0.0  ;;  %v1784_v28 = vmax.f32 %v3747_v19, 0.0  ;;  %v1785_v2 = vmax.f32 %v3749_v56, 0.0 }
 0x234   :  { %v1786_v44 = vmax.f32 %v3751_v63, 0.0  ;;  %v1787_v20 = vmax.f32 %v3753_v5, 0.0  ;;  %v1788_v6 = vmax.f32 %v3755_v11, 0.0  ;;  %v1789_v22 = vmax.f32 %v3757_v17, 0.0  ;;  %v4054_v32 = vld [vmem:[#allocation10_spill] sm:$0xff] }
 0x235   :  { %v1790_v60 = vmax.f32 %v3759_v23, 0.0  ;;  %v1791_v36 = vmax.f32 %v3761_v29, 0.0  ;;  %v1792_v41 = vmax.f32 %v3763_v35, 0.0  ;;  %v1793_v4 = vmax.f32 %v3765_v40, 0.0  ;;  %v4055_v12 = vld [vmem:[#allocation15_spill] sm:$0xff] }
 0x236   :  { %v1794_v13 = vmax.f32 %v3767_v45, 0.0  ;;  %v1795_v19 = vmax.f32 %v3769_v50, 0.0  ;;  %v1796_v56 = vmax.f32 %v3771_v55, 0.0  ;;  %v1797_v63 = vmax.f32 %v3773_v61, 0.0  ;;  %v4053_v55 = vld [vmem:[#allocation9_spill] sm:$0xff]  ;;  %v4056_v43 = vld [vmem:[#allocation16_spill] sm:$0xff] }
 0x237   :  { %v1798_v5 = vmax.f32 %v3775_v3, 0.0  ;;  %v1799_v11 = vmax.f32 %v3777_v9, 0.0  ;;  %v1800_v17 = vmax.f32 %v3779_v15, 0.0  ;;  %v1801_v23 = vmax.f32 %v3781_v21, 0.0  ;;  %v4057_v58 = vld [vmem:[#allocation11_spill] sm:$0xff] }
 0x238   :  { %v1802_v29 = vmax.f32 %v3783_v27, 0.0  ;;  %v1803_v35 = vmax.f32 %v3785_v33, 0.0  ;;  %v1804_v40 = vmax.f32 %v3787_v39, 0.0  ;;  %v1805_v45 = vmax.f32 %v3789_v46, 0.0 }
 0x239   :  { %v1806_v50 = vmax.f32 %v3791_v52, 0.0  ;;  %v1807_v61 = vmax.f32 %v4053_v55, 0.0  ;;  %v1808_v3 = vmax.f32 %v3795_v1, 0.0  ;;  %v1809_v9 = vmax.f32 %v3797_v10, 0.0  ;;  %v4058_v10 = vld [vmem:[#allocation17_spill] sm:$0xff] }
 0x23a   :  { %v1810_v15 = vmax.f32 %v4054_v32, 0.0  ;;  %v1811_v21 = vmax.f32 %v3801_v31, 0.0  ;;  %v1812_v27 = vmax.f32 %v3803_v51, 0.0  ;;  %v1813_v33 = vmax.f32 %v4055_v12, 0.0  ;;  %v4059_v31 = vld [vmem:[#allocation18_spill] sm:$0xff]  ;;  %v4060_v12 = vld [vmem:[#allocation12_spill] sm:$0xff] }
 0x23b   :  { %v1814_v39 = vmax.f32 %v3808_v49, 0.0  ;;  %v1815_v46 = vmax.f32 %v3811_v7, 0.0  ;;  %v1816_v52 = vmax.f32 %v4056_v43, 0.0  ;;  %v1817_v55 = vmax.f32 %v3817_v42, 0.0  ;;  %v4061_v7 = vld [vmem:[#allocation13_spill] sm:$0xff] }
 0x23c   :  { %v1818_v1 = vmax.f32 %v4057_v58, 0.0  ;;  %v1819_v32 = vmax.f32 %v4058_v10, 0.0  ;;  %v1820_v51 = vmax.f32 %v4059_v31, 0.0  ;;  %v1821_v49 = vmax.f32 %v4060_v12, 0.0 }
 0x23d   :  { %v1822_v43 = vmax.f32 %v4061_v7, 0.0  ;;  %v2347_v42 = vpack.c.bf16 %v1766_v47, %v1765_v53  ;;  %v2352_v58 = vpack.c.bf16 %v1768_v24, %v1767_v59  ;;  %v2357_v10 = vpack.c.bf16 %v1770_v18, %v1769_v54 }
 0x23e   :  { %v2362_v31 = vpack.c.bf16 %v1772_v57, %v1771_v25  ;;  %v2367_v12 = vpack.c.bf16 %v1774_v16, %v1773_v48  ;;  %v2372_v7 = vpack.c.bf16 %v1776_v38, %v1775_v14  ;;  %v2377_v47 = vpack.c.bf16 %v1778_v62, %v1777_v8 }
 0x23f   :  { %v2382_v53 = vpack.c.bf16 %v1780_v34, %v1779_v26  ;;  %2348 = vst [vmem:[%s3980_s4] sm:$0xff] %v2347_v42   ;;  %2489 = vst [vmem:[%s3980_s4 + $0x8] sm:$0xff] %v2352_v58   ;;  %v2387_v59 = vpack.c.bf16 %v1782_v30, %v1781_v37  ;;  %v2392_v18 = vpack.c.bf16 %v1784_v28, %v1783_v0 }
 0x240   :  { %2490 = vst [vmem:[%s3980_s4 + $0x10] sm:$0xff] %v2357_v10   ;;  %2491 = vst [vmem:[%s3980_s4 + $0x18] sm:$0xff] %v2362_v31   ;;  %v2397_v24 = vpack.c.bf16 %v1786_v44, %v1785_v2  ;;  %v2402_v54 = vpack.c.bf16 %v1788_v6, %v1787_v20  ;;  %v2407_v25 = vpack.c.bf16 %v1790_v60, %v1789_v22 }
 0x241   :  { %2492 = vst [vmem:[%s3980_s4 + $0x20] sm:$0xff] %v2367_v12   ;;  %2493 = vst [vmem:[%s3980_s4 + $0x28] sm:$0xff] %v2372_v7   ;;  %v2412_v57 = vpack.c.bf16 %v1792_v41, %v1791_v36  ;;  %v2417_v48 = vpack.c.bf16 %v1794_v13, %v1793_v4  ;;  %v2422_v16 = vpack.c.bf16 %v1796_v56, %v1795_v19 }
 0x242   :  { %2494 = vst [vmem:[%s3980_s4 + $0x30] sm:$0xff] %v2377_v47   ;;  %2495 = vst [vmem:[%s3980_s4 + $0x38] sm:$0xff] %v2382_v53   ;;  %v2427_v14 = vpack.c.bf16 %v1798_v5, %v1797_v63  ;;  %v2432_v38 = vpack.c.bf16 %v1800_v17, %v1799_v11  ;;  %v2437_v8 = vpack.c.bf16 %v1802_v29, %v1801_v23 }
 0x243   :  { %2496 = vst [vmem:[%s3980_s4 + $0x40] sm:$0xff] %v2387_v59   ;;  %2497 = vst [vmem:[%s3980_s4 + $0x48] sm:$0xff] %v2392_v18   ;;  %v2442_v62 = vpack.c.bf16 %v1804_v40, %v1803_v35  ;;  %v2447_v26 = vpack.c.bf16 %v1806_v50, %v1805_v45  ;;  %v2452_v34 = vpack.c.bf16 %v1808_v3, %v1807_v61 }
 0x244   :  { %2498 = vst [vmem:[%s3980_s4 + $0x50] sm:$0xff] %v2397_v24   ;;  %2499 = vst [vmem:[%s3980_s4 + $0x58] sm:$0xff] %v2402_v54   ;;  %v2457_v37 = vpack.c.bf16 %v1810_v15, %v1809_v9  ;;  %v2462_v30 = vpack.c.bf16 %v1812_v27, %v1811_v21  ;;  %v2467_v0 = vpack.c.bf16 %v1814_v39, %v1813_v33 }
 0x245   :  { %2500 = vst [vmem:[%s3980_s4 + $0x60] sm:$0xff] %v2407_v25   ;;  %2501 = vst [vmem:[%s3980_s4 + $0x68] sm:$0xff] %v2412_v57   ;;  %v2472_v28 = vpack.c.bf16 %v1816_v52, %v1815_v46  ;;  %v2477_v2 = vpack.c.bf16 %v1818_v1, %v1817_v55  ;;  %v2482_v44 = vpack.c.bf16 %v1820_v51, %v1819_v32 }
 0x246   :  { %2502 = vst [vmem:[%s3980_s4 + $0x70] sm:$0xff] %v2417_v48   ;;  %2503 = vst [vmem:[%s3980_s4 + $0x78] sm:$0xff] %v2422_v16   ;;  %v2487_v20 = vpack.c.bf16 %v1822_v43, %v1821_v49 }
 0x247   :  { %2504 = vst [vmem:[%s3980_s4 + $0x80] sm:$0xff] %v2427_v14   ;;  %2505 = vst [vmem:[%s3980_s4 + $0x88] sm:$0xff] %v2432_v38  }
 0x248   :  { %2506 = vst [vmem:[%s3980_s4 + $0x90] sm:$0xff] %v2437_v8   ;;  %2507 = vst [vmem:[%s3980_s4 + $0x98] sm:$0xff] %v2442_v62  }
 0x249   :  { %2508 = vst [vmem:[%s3980_s4 + $0xa0] sm:$0xff] %v2447_v26   ;;  %2509 = vst [vmem:[%s3980_s4 + $0xa8] sm:$0xff] %v2452_v34  }
 0x24a   :  { %2510 = vst [vmem:[%s3980_s4 + $0xb0] sm:$0xff] %v2457_v37   ;;  %2511 = vst [vmem:[%s3980_s4 + $0xb8] sm:$0xff] %v2462_v30  }
 0x24b   :  { %2512 = vst [vmem:[%s3980_s4 + $0xc0] sm:$0xff] %v2467_v0   ;;  %2513 = vst [vmem:[%s3980_s4 + $0xc8] sm:$0xff] %v2472_v28  }
 0x24c   :  { %2514 = vst [vmem:[%s3980_s4 + $0xd0] sm:$0xff] %v2477_v2   ;;  %2515 = vst [vmem:[%s3980_s4 + $0xd8] sm:$0xff] %v2482_v44  }
 0x24d   :  { %2516 = vst [vmem:[%s3980_s4 + $0xe0] sm:$0xff] %v2487_v20  }

// kernel: stem_forward.15
= control target key start
LH: loop header
LB: loop body
LE: loop exit
PB: predicated region body
PF: predicated region fallthrough
CT: control target
= control target key end

     0   :  { %vm423_vm0 = vcmask 519168   ;;  %vm436_vm1 = vcmask 516096   ;;  %s1087_s0 = inlined_call_operand.vmem [shape: bf16[98,64], index: 0, kind: input, shape index: {}]   ;;  %s1088_s1 = inlined_call_operand.vmem [shape: bf16[98,64], index: 1, kind: input, shape index: {}]   ;;  %s1089_s2 = inlined_call_operand.vmem [shape: bf16[98,64], index: 2, kind: input, shape index: {}]   ;;  %s1090_s3 = inlined_call_operand.vmem [shape: bf16[98,64], index: 3, kind: input, shape index: {}]   ;;  %s1091_s4 = inlined_call_operand.vmem [shape: bf16[98,64], index: 4, kind: input, shape index: {}]   ;;  %s1092_s5 = inlined_call_operand.vmem [shape: bf16[98,64], index: 5, kind: input, shape index: {}]   ;;  %s1093_s6 = inlined_call_operand.vmem [shape: bf16[98,64], index: 6, kind: input, shape index: {}]   ;;  %s1094_s7 = inlined_call_operand.vmem [shape: bf16[98,64], index: 7, kind: input, shape index: {}]   ;;  %s1095_s8 = inlined_call_operand.vmem [shape: bf16[98,64], index: 8, kind: input, shape index: {}]   ;;  %s1096_s9 = inlined_call_operand.vmem [shape: bf16[98,64], index: 9, kind: output, shape index: {}]  }
   0x1   :  { %v469_v0 = vld [vmem:[%s1087_s0] sm:$0xff]   ;;  %v684_v17 = vld [vmem:[%s1087_s0 + $0x8] sm:$0xff]   ;;  %v685_v54 = vld [vmem:[%s1087_s0 + $0x10] sm:$0xff]  }
   0x2   :  { %v493_v1 = vld [vmem:[%s1088_s1] sm:$0xff]   ;;  %v470_v3 = vunpack.c.l.bf16 %v469_v0  ;;  %v471_v9 = vunpack.c.h.bf16 %v469_v0  ;;  %v689_v18 = vld [vmem:[%s1088_s1 + $0x8] sm:$0xff]   ;;  %v474_v31 = vunpack.c.l.bf16 %v684_v17  ;;  %v475_v48 = vunpack.c.h.bf16 %v684_v17  ;;  %v690_v59 = vld [vmem:[%s1088_s1 + $0x10] sm:$0xff]  }
   0x3   :  { %v517_v2 = vld [vmem:[%s1089_s2] sm:$0xff]   ;;  %v494_v4 = vunpack.c.l.bf16 %v493_v1  ;;  %v495_v13 = vunpack.c.h.bf16 %v493_v1  ;;  %v694_v23 = vld [vmem:[%s1089_s2 + $0x8] sm:$0xff]   ;;  %v498_v32 = vunpack.c.l.bf16 %v689_v18  ;;  %v499_v52 = vunpack.c.h.bf16 %v689_v18  ;;  %v695_v0 = vld [vmem:[%s1089_s2 + $0x10] sm:$0xff]  }
   0x4   :  { %v518_v5 = vunpack.c.l.bf16 %v517_v2  ;;  %v541_v6 = vld [vmem:[%s1090_s3] sm:$0xff]   ;;  %v519_v21 = vunpack.c.h.bf16 %v517_v2  ;;  %v699_v28 = vld [vmem:[%s1090_s3 + $0x8] sm:$0xff]   ;;  %v522_v37 = vunpack.c.l.bf16 %v694_v23  ;;  %v523_v53 = vunpack.c.h.bf16 %v694_v23  ;;  %v700_v1 = vld [vmem:[%s1090_s3 + $0x10] sm:$0xff]  }
   0x5   :  { %v565_v7 = vld [vmem:[%s1091_s4] sm:$0xff]   ;;  %v84_v14 = vmax.f32 %v470_v3, %v494_v4  ;;  %v542_v15 = vunpack.c.l.bf16 %v541_v6  ;;  %v85_v20 = vmax.f32 %v471_v9, %v495_v13  ;;  %v543_v22 = vunpack.c.h.bf16 %v541_v6  ;;  %v704_v33 = vld [vmem:[%s1091_s4 + $0x8] sm:$0xff]  }
   0x6   :  { %v589_v8 = vld [vmem:[%s1092_s5] sm:$0xff]   ;;  %v566_v16 = vunpack.c.l.bf16 %v565_v7  ;;  %v567_v30 = vunpack.c.h.bf16 %v565_v7  ;;  %v86_v40 = vmax.f32 %v474_v31, %v498_v32  ;;  %v546_v41 = vunpack.c.l.bf16 %v699_v28  ;;  %v709_v42 = vld [vmem:[%s1092_s5 + $0x8] sm:$0xff]   ;;  %v876_v31 = vld [vmem:[%s1093_s6 + $0x10] sm:$0xff]  }
   0x7   :  { %v613_v10 = vld [vmem:[%s1093_s6] sm:$0xff]   ;;  %v590_v19 = vunpack.c.l.bf16 %v589_v8  ;;  %v123_v24 = vmax.f32 %v84_v14, %v518_v5  ;;  %v124_v29 = vmax.f32 %v85_v20, %v519_v21  ;;  %v591_v35 = vunpack.c.h.bf16 %v589_v8  ;;  %v834_v43 = vld [vmem:[%s1093_s6 + $0x8] sm:$0xff]  }
   0x8   :  { %v803_v11 = vld [vmem:[%s1094_s7] sm:$0xff]   ;;  %v614_v25 = vunpack.c.l.bf16 %v613_v10  ;;  %v615_v36 = vunpack.c.h.bf16 %v613_v10  ;;  %v839_v44 = vld [vmem:[%s1094_s7 + $0x8] sm:$0xff]   ;;  %v570_v47 = vunpack.c.l.bf16 %v704_v33  ;;  %v125_v50 = vmax.f32 %v86_v40, %v522_v37  ;;  %v705_v10 = vld [vmem:[%s1091_s4 + $0x10] sm:$0xff]  }
   0x9   :  { %v808_v12 = vld [vmem:[%s1095_s8] sm:$0xff]   ;;  %v638_v26 = vunpack.c.l.bf16 %v803_v11  ;;  %v162_v34 = vmax.f32 %v123_v24, %v542_v15  ;;  %v163_v38 = vmax.f32 %v124_v29, %v543_v22  ;;  %v639_v39 = vunpack.c.h.bf16 %v803_v11  ;;  %v845_v51 = vld [vmem:[%s1095_s8 + $0x8] sm:$0xff]   ;;  %v881_v37 = vld [vmem:[%s1094_s7 + $0x10] sm:$0xff]  }
   0xa   :  { %v662_v27 = vunpack.c.l.bf16 %v808_v12  ;;  %v663_v46 = vunpack.c.h.bf16 %v808_v12  ;;  %v594_v56 = vunpack.c.l.bf16 %v709_v42  ;;  %v618_v57 = vunpack.c.l.bf16 %v834_v43 }
   0xb   :  { %v201_v45 = vmax.f32 %v162_v34, %v566_v16  ;;  %v202_v49 = vmax.f32 %v163_v38, %v567_v30  ;;  %v642_v58 = vunpack.c.l.bf16 %v839_v44  ;;  %v164_v61 = vmax.f32 %v125_v50, %v546_v41  ;;  %v725_v50 = vld [vmem:[%s1095_s8 + $0x10] sm:$0xff]  }
   0xc   :  { %v87_v62 = vmax.f32 %v475_v48, %v499_v52  ;;  %v547_v63 = vunpack.c.h.bf16 %v699_v28  ;;  %v666_v3 = vunpack.c.l.bf16 %v845_v51  ;;  %v571_v4 = vunpack.c.h.bf16 %v704_v33  ;;  %v696_v48 = vld [vmem:[%s1089_s2 + $0x18] sm:$0xff]  }
   0xd   :  { %v240_v55 = vmax.f32 %v201_v45, %v590_v19  ;;  %v241_v60 = vmax.f32 %v202_v49, %v591_v35  ;;  %v478_v5 = vunpack.c.l.bf16 %v685_v54  ;;  %v203_v7 = vmax.f32 %v164_v61, %v570_v47  ;;  %v868_v19 = vld [vmem:[%s1092_s5 + $0x10] sm:$0xff]   ;;  %v691_v47 = vld [vmem:[%s1088_s1 + $0x18] sm:$0xff]  }
   0xe   :  { %v126_v8 = vmax.f32 %v87_v62, %v523_v53  ;;  %v502_v9 = vunpack.c.l.bf16 %v690_v59  ;;  %v595_v12 = vunpack.c.h.bf16 %v709_v42  ;;  %v526_v13 = vunpack.c.l.bf16 %v695_v0  ;;  %v686_v42 = vld [vmem:[%s1087_s0 + $0x18] sm:$0xff]  }
   0xf   :  { %v279_v2 = vmax.f32 %v240_v55, %v614_v25  ;;  %v280_v6 = vmax.f32 %v241_v60, %v615_v36  ;;  %v550_v14 = vunpack.c.l.bf16 %v700_v1  ;;  %v242_v16 = vmax.f32 %v203_v7, %v594_v56  ;;  %v706_v62 = vld [vmem:[%s1091_s4 + $0x18] sm:$0xff]  }
  0x10   :  { %v165_v17 = vmax.f32 %v126_v8, %v547_v63  ;;  %v88_v18 = vmax.f32 %v478_v5, %v502_v9  ;;  %v619_v21 = vunpack.c.h.bf16 %v834_v43  ;;  %v643_v22 = vunpack.c.h.bf16 %v839_v44  ;;  %v922_v7 = vld [vmem:[%s1092_s5 + $0x18] sm:$0xff]  }
  0x11   :  { %v318_v11 = vmax.f32 %v279_v2, %v638_v26  ;;  %v319_v15 = vmax.f32 %v280_v6, %v639_v39  ;;  %v574_v23 = vunpack.c.l.bf16 %v705_v10  ;;  %v281_v25 = vmax.f32 %v242_v16, %v618_v57  ;;  %v701_v57 = vld [vmem:[%s1090_s3 + $0x18] sm:$0xff]  }
  0x12   :  { %v204_v26 = vmax.f32 %v165_v17, %v571_v4  ;;  %v127_v28 = vmax.f32 %v88_v18, %v526_v13  ;;  %v598_v30 = vunpack.c.l.bf16 %v868_v19  ;;  %v479_v32 = vunpack.c.h.bf16 %v685_v54  ;;  %v927_v8 = vld [vmem:[%s1093_s6 + $0x18] sm:$0xff]   ;;  %v687_v18 = vld [vmem:[%s1087_s0 + $0x20] sm:$0xff]  }
  0x13   :  { %v357_v20 = vmax.f32 %v318_v11, %v662_v27  ;;  %v358_v24 = vmax.f32 %v319_v15, %v663_v46  ;;  %v503_v33 = vunpack.c.h.bf16 %v690_v59  ;;  %v320_v34 = vmax.f32 %v281_v25, %v642_v58  ;;  %v932_v15 = vld [vmem:[%s1094_s7 + $0x18] sm:$0xff]  }
  0x14   :  { %v243_v35 = vmax.f32 %v204_v26, %v595_v12  ;;  %v166_v36 = vmax.f32 %v127_v28, %v550_v14  ;;  %v667_v38 = vunpack.c.h.bf16 %v845_v51  ;;  %v527_v40 = vunpack.c.h.bf16 %v695_v0  ;;  %v949_v26 = vld [vmem:[%s1095_s8 + $0x18] sm:$0xff]  }
  0x15   :  { %v455_v29 = vpack.c.bf16 %v357_v20, %v357_v20  ;;  %v456_v27 = vpack.c.bf16 %v358_v24, %v358_v24  ;;  %v89_v39 = vmax.f32 %v479_v32, %v503_v33  ;;  %v551_v41 = vunpack.c.h.bf16 %v700_v1 }
  0x16   :  { %v359_v43 = vmax.f32 %v320_v34, %v666_v3  ;;  %v282_v44 = vmax.f32 %v243_v35, %v619_v21  ;;  %v205_v45 = vmax.f32 %v166_v36, %v574_v23  ;;  %v622_v46 = vunpack.c.l.bf16 %v876_v31  ;;  %v692_v23 = vld [vmem:[%s1088_s1 + $0x20] sm:$0xff]  }
  0x17   :  { %424 = vst.msk [vmem:[%s1096_s9] sm:$0xf] %vm423_vm0, %v455_v29  ;;  %425 = vst.msk [vmem:[%s1096_s9 + $0x4] sm:$0xf] %vm423_vm0, %v456_v27  ;;  %v646_v49 = vunpack.c.l.bf16 %v881_v37  ;;  %v128_v51 = vmax.f32 %v89_v39, %v527_v40  ;;  %v575_v52 = vunpack.c.h.bf16 %v705_v10  ;;  %v482_v56 = vunpack.c.l.bf16 %v686_v42  ;;  %v961_v39 = vld [vmem:[%s1091_s4 + $0x20] sm:$0xff]  }
  0x18   :  { %v457_v53 = vpack.c.bf16 %v359_v43, %v359_v43  ;;  %v321_v54 = vmax.f32 %v282_v44, %v643_v22  ;;  %v244_v55 = vmax.f32 %v205_v45, %v598_v30  ;;  %v599_v59 = vunpack.c.h.bf16 %v868_v19  ;;  %v697_v30 = vld [vmem:[%s1089_s2 + $0x20] sm:$0xff]  }
  0x19   :  { %v167_v58 = vmax.f32 %v128_v51, %v551_v41  ;;  %v506_v60 = vunpack.c.l.bf16 %v691_v47  ;;  %v530_v61 = vunpack.c.l.bf16 %v696_v48  ;;  %v670_v1 = vunpack.c.l.bf16 %v725_v50 }
  0x1a   :  { %426 = vst.msk [vmem:[%s1096_s9 + $0x8] sm:$0xf] %vm423_vm0, %v457_v53  ;;  %v360_v63 = vmax.f32 %v321_v54, %v667_v38  ;;  %v283_v0 = vmax.f32 %v244_v55, %v622_v46  ;;  %v623_v2 = vunpack.c.h.bf16 %v876_v31  ;;  %v647_v4 = vunpack.c.h.bf16 %v881_v37  ;;  %v702_v31 = vld [vmem:[%s1090_s3 + $0x20] sm:$0xff]  }
  0x1b   :  { %v206_v3 = vmax.f32 %v167_v58, %v575_v52  ;;  %v90_v5 = vmax.f32 %v482_v56, %v506_v60  ;;  %v554_v6 = vunpack.c.l.bf16 %v701_v57  ;;  %v578_v11 = vunpack.c.l.bf16 %v706_v62  ;;  %v980_v52 = vld [vmem:[%s1093_s6 + $0x20] sm:$0xff]  }
  0x1c   :  { %v458_v9 = vpack.c.bf16 %v360_v63, %v360_v63  ;;  %v322_v10 = vmax.f32 %v283_v0, %v646_v49  ;;  %v483_v12 = vunpack.c.h.bf16 %v686_v42  ;;  %v507_v16 = vunpack.c.h.bf16 %v691_v47  ;;  %v985_v58 = vld [vmem:[%s1094_s7 + $0x20] sm:$0xff]   ;;  %v688_v0 = vld [vmem:[%s1087_s0 + $0x28] sm:$0xff]  }
  0x1d   :  { %v245_v13 = vmax.f32 %v206_v3, %v599_v59  ;;  %v129_v14 = vmax.f32 %v90_v5, %v530_v61  ;;  %v531_v17 = vunpack.c.h.bf16 %v696_v48  ;;  %v671_v20 = vunpack.c.h.bf16 %v725_v50  ;;  %v972_v48 = vld [vmem:[%s1092_s5 + $0x20] sm:$0xff]   ;;  %v693_v5 = vld [vmem:[%s1088_s1 + $0x28] sm:$0xff]  }
  0x1e   :  { %427 = vst.msk [vmem:[%s1096_s9 + $0xc] sm:$0xf] %vm423_vm0, %v458_v9  ;;  %v361_v19 = vmax.f32 %v322_v10, %v670_v1  ;;  %v602_v21 = vunpack.c.l.bf16 %v922_v7  ;;  %v626_v22 = vunpack.c.l.bf16 %v927_v8  ;;  %v91_v28 = vmax.f32 %v483_v12, %v507_v16  ;;  %v990_v59 = vld [vmem:[%s1095_s8 + $0x20] sm:$0xff]  }
  0x1f   :  { %v284_v24 = vmax.f32 %v245_v13, %v623_v2  ;;  %v168_v25 = vmax.f32 %v129_v14, %v554_v6  ;;  %v555_v29 = vunpack.c.h.bf16 %v701_v57  ;;  %v650_v33 = vunpack.c.l.bf16 %v932_v15  ;;  %v698_v6 = vld [vmem:[%s1089_s2 + $0x28] sm:$0xff]  }
  0x20   :  { %v459_v32 = vpack.c.bf16 %v361_v19, %v361_v19  ;;  %v579_v27 = vunpack.c.h.bf16 %v706_v62  ;;  %v486_v34 = vunpack.c.l.bf16 %v687_v18  ;;  %v130_v37 = vmax.f32 %v91_v28, %v531_v17 }
  0x21   :  { %v323_v35 = vmax.f32 %v284_v24, %v647_v4  ;;  %v207_v36 = vmax.f32 %v168_v25, %v578_v11  ;;  %v510_v38 = vunpack.c.l.bf16 %v692_v23  ;;  %v674_v40 = vunpack.c.l.bf16 %v949_v26 }
  0x22   :  { %428 = vst.msk [vmem:[%s1096_s9 + $0x10] sm:$0xf] %vm423_vm0, %v459_v32  ;;  %v603_v41 = vunpack.c.h.bf16 %v922_v7  ;;  %v534_v42 = vunpack.c.l.bf16 %v697_v30  ;;  %v558_v43 = vunpack.c.l.bf16 %v702_v31  ;;  %v169_v46 = vmax.f32 %v130_v37, %v555_v29  ;;  %v723_v37 = vld [vmem:[%s1094_s7 + $0x28] sm:$0xff]  }
  0x23   :  { %v362_v44 = vmax.f32 %v323_v35, %v671_v20  ;;  %v246_v45 = vmax.f32 %v207_v36, %v602_v21  ;;  %v92_v47 = vmax.f32 %v486_v34, %v510_v38  ;;  %v627_v49 = vunpack.c.h.bf16 %v927_v8  ;;  %v708_v20 = vld [vmem:[%s1091_s4 + $0x28] sm:$0xff]  }
  0x24   :  { %v651_v50 = vunpack.c.h.bf16 %v932_v15  ;;  %v582_v51 = vunpack.c.l.bf16 %v961_v39  ;;  %v487_v53 = vunpack.c.h.bf16 %v687_v18  ;;  %v208_v56 = vmax.f32 %v169_v46, %v579_v27  ;;  %v703_v15 = vld [vmem:[%s1090_s3 + $0x28] sm:$0xff]  }
  0x25   :  { %v460_v54 = vpack.c.bf16 %v362_v44, %v362_v44  ;;  %v285_v55 = vmax.f32 %v246_v45, %v626_v22  ;;  %v131_v57 = vmax.f32 %v92_v47, %v534_v42  ;;  %v675_v60 = vunpack.c.h.bf16 %v949_v26  ;;  %v718_v36 = vld [vmem:[%s1093_s6 + $0x28] sm:$0xff]  }
  0x26   :  { %v606_v61 = vunpack.c.l.bf16 %v972_v48  ;;  %v511_v62 = vunpack.c.h.bf16 %v692_v23  ;;  %v535_v63 = vunpack.c.h.bf16 %v697_v30  ;;  %v247_v2 = vmax.f32 %v208_v56, %v603_v41  ;;  %v713_v30 = vld [vmem:[%s1092_s5 + $0x28] sm:$0xff]  }
  0x27   :  { %429 = vst.msk [vmem:[%s1096_s9 + $0x14] sm:$0xf] %vm423_vm0, %v460_v54  ;;  %v324_v1 = vmax.f32 %v285_v55, %v650_v33  ;;  %v170_v3 = vmax.f32 %v131_v57, %v558_v43  ;;  %v630_v4 = vunpack.c.l.bf16 %v980_v52  ;;  %v654_v7 = vunpack.c.l.bf16 %v985_v58  ;;  %v728_v57 = vld [vmem:[%s1095_s8 + $0x28] sm:$0xff]  }
  0x28   :  { %v678_v8 = vunpack.c.l.bf16 %v990_v59  ;;  %v93_v9 = vmax.f32 %v487_v53, %v511_v62  ;;  %v559_v10 = vunpack.c.h.bf16 %v702_v31  ;;  %v286_v12 = vmax.f32 %v247_v2, %v627_v49  ;;  %v70_v49 = vld [vmem:[%s1088_s1 + $0x30] sm:$0x1] }
  0x29   :  { %v363_v11 = vmax.f32 %v324_v1, %v674_v40  ;;  %v209_v13 = vmax.f32 %v170_v3, %v582_v51  ;;  %v490_v14 = vunpack.c.l.bf16 %v688_v0  ;;  %v583_v17 = vunpack.c.h.bf16 %v961_v39 }
  0x2a   :  { %v132_v16 = vmax.f32 %v93_v9, %v535_v63  ;;  %v514_v18 = vunpack.c.l.bf16 %v693_v5  ;;  %v538_v19 = vunpack.c.l.bf16 %v698_v6  ;;  %v325_v22 = vmax.f32 %v286_v12, %v651_v50  ;;  %v109_v50 = vld [vmem:[%s1089_s2 + $0x30] sm:$0x1] }
  0x2b   :  { %v461_v21 = vpack.c.bf16 %v363_v11, %v363_v11  ;;  %v248_v23 = vmax.f32 %v209_v13, %v606_v61  ;;  %v607_v24 = vunpack.c.h.bf16 %v972_v48  ;;  %v631_v26 = vunpack.c.h.bf16 %v980_v52  ;;  %v44_v48 = vld [vmem:[%s1087_s0 + $0x30] sm:$0x1] }
  0x2c   :  { %v171_v25 = vmax.f32 %v132_v16, %v559_v10  ;;  %v94_v28 = vmax.f32 %v490_v14, %v514_v18  ;;  %v562_v29 = vunpack.c.l.bf16 %v703_v15  ;;  %v364_v31 = vmax.f32 %v325_v22, %v675_v60  ;;  %v148_v61 = vld [vmem:[%s1090_s3 + $0x30] sm:$0x1] }
  0x2d   :  { %430 = vst.msk [vmem:[%s1096_s9 + $0x18] sm:$0xf] %vm423_vm0, %v461_v21  ;;  %v287_v32 = vmax.f32 %v248_v23, %v630_v4  ;;  %v655_v33 = vunpack.c.h.bf16 %v985_v58  ;;  %v586_v27 = vunpack.c.l.bf16 %v708_v20  ;;  %v491_v38 = vunpack.c.h.bf16 %v688_v0  ;;  %v226_v13 = vld [vmem:[%s1092_s5 + $0x30] sm:$0x1] }
  0x2e   :  { %v210_v34 = vmax.f32 %v171_v25, %v583_v17  ;;  %v133_v35 = vmax.f32 %v94_v28, %v538_v19  ;;  %v515_v39 = vunpack.c.h.bf16 %v693_v5  ;;  %v462_v40 = vpack.c.bf16 %v364_v31, %v364_v31  ;;  %v187_v5 = vld [vmem:[%s1091_s4 + $0x30] sm:$0x1] }
  0x2f   :  { %v326_v41 = vmax.f32 %v287_v32, %v654_v7  ;;  %v610_v42 = vunpack.c.l.bf16 %v713_v30  ;;  %v539_v43 = vunpack.c.h.bf16 %v698_v6  ;;  %v563_v47 = vunpack.c.h.bf16 %v703_v15  ;;  %v343_v32 = vld [vmem:[%s1095_s8 + $0x30] sm:$0x1] }
  0x30   :  { %v249_v44 = vmax.f32 %v210_v34, %v607_v24  ;;  %v172_v45 = vmax.f32 %v133_v35, %v562_v29  ;;  %v95_v46 = vmax.f32 %v491_v38, %v515_v39  ;;  %431 = vst.msk [vmem:[%s1096_s9 + $0x1c] sm:$0xf] %vm423_vm0, %v462_v40  ;;  %v679_v52 = vunpack.c.h.bf16 %v990_v59 }
  0x31   :  { %v365_v51 = vmax.f32 %v326_v41, %v678_v8  ;;  %v634_v53 = vunpack.c.l.bf16 %v718_v36  ;;  %v658_v54 = vunpack.c.l.bf16 %v723_v37  ;;  %v587_v60 = vunpack.c.h.bf16 %v708_v20  ;;  %v265_v20 = vld [vmem:[%s1093_s6 + $0x30] sm:$0x1] }
  0x32   :  { %v288_v55 = vmax.f32 %v249_v44, %v631_v26  ;;  %v211_v56 = vmax.f32 %v172_v45, %v586_v27  ;;  %v134_v58 = vmax.f32 %v95_v46, %v539_v43  ;;  %v57_v63 = vunpack.c.l.bf16 %v44_v48  ;;  %v304_v26 = vld [vmem:[%s1094_s7 + $0x30] sm:$0x1] }
  0x33   :  { %v463_v62 = vpack.c.bf16 %v365_v51, %v365_v51  ;;  %v83_v0 = vunpack.c.l.bf16 %v70_v49  ;;  %v122_v1 = vunpack.c.l.bf16 %v109_v50  ;;  %v611_v4 = vunpack.c.h.bf16 %v713_v30 }
  0x34   :  { %v327_v2 = vmax.f32 %v288_v55, %v655_v33  ;;  %v250_v59 = vmax.f32 %v211_v56, %v610_v42  ;;  %v173_v3 = vmax.f32 %v134_v58, %v563_v47  ;;  %v682_v6 = vunpack.c.l.bf16 %v728_v57 }
  0x35   :  { %432 = vst.msk [vmem:[%s1096_s9 + $0x20] sm:$0xf] %vm423_vm0, %v463_v62  ;;  %v96_v7 = vmax.f32 %v57_v63, %v83_v0  ;;  %v161_v8 = vunpack.c.l.bf16 %v148_v61  ;;  %v635_v12 = vunpack.c.h.bf16 %v718_v36  ;;  %v200_v15 = vunpack.c.l.bf16 %v187_v5 }
  0x36   :  { %v366_v9 = vmax.f32 %v327_v2, %v679_v52  ;;  %v289_v10 = vmax.f32 %v250_v59, %v634_v53  ;;  %v212_v11 = vmax.f32 %v173_v3, %v587_v60  ;;  %v659_v19 = vunpack.c.h.bf16 %v723_v37 }
  0x37   :  { %v135_v14 = vmax.f32 %v96_v7, %v122_v1  ;;  %v239_v22 = vunpack.c.l.bf16 %v226_v13  ;;  %v683_v25 = vunpack.c.h.bf16 %v728_v57  ;;  %v278_v29 = vunpack.c.l.bf16 %v265_v20 }
  0x38   :  { %v464_v16 = vpack.c.bf16 %v366_v9, %v366_v9  ;;  %v328_v17 = vmax.f32 %v289_v10, %v658_v54  ;;  %v251_v18 = vmax.f32 %v212_v11, %v611_v4  ;;  %v317_v27 = vunpack.c.l.bf16 %v304_v26 }
  0x39   :  { %v174_v21 = vmax.f32 %v135_v14, %v161_v8  ;;  %v356_v36 = vunpack.c.l.bf16 %v343_v32 }
  0x3a   :  { %433 = vst.msk [vmem:[%s1096_s9 + $0x24] sm:$0xf] %vm423_vm0, %v464_v16  ;;  %v367_v23 = vmax.f32 %v328_v17, %v682_v6  ;;  %v290_v24 = vmax.f32 %v251_v18, %v635_v12 }
  0x3b   :  { %v213_v28 = vmax.f32 %v174_v21, %v200_v15 }
  0x3c   :  { %v465_v30 = vpack.c.bf16 %v367_v23, %v367_v23  ;;  %v329_v31 = vmax.f32 %v290_v24, %v659_v19 }
  0x3d   :  { %v252_v33 = vmax.f32 %v213_v28, %v239_v22 }
  0x3e   :  { %434 = vst.msk [vmem:[%s1096_s9 + $0x28] sm:$0xf] %vm423_vm0, %v465_v30  ;;  %v368_v34 = vmax.f32 %v329_v31, %v683_v25 }
  0x3f   :  { %v291_v35 = vmax.f32 %v252_v33, %v278_v29 }
  0x40   :  { %v466_v37 = vpack.c.bf16 %v368_v34, %v368_v34 }
  0x41   :  { %v330_v38 = vmax.f32 %v291_v35, %v317_v27 }
  0x42   :  { %435 = vst.msk [vmem:[%s1096_s9 + $0x2c] sm:$0xf] %vm423_vm0, %v466_v37 }
  0x43   :  { %v369_v39 = vmax.f32 %v330_v38, %v356_v36 }
  0x45   :  { %v467_v40 = vpack.c.bf16 %v369_v39, %v369_v39 }
  0x47   :  { %437 = vst.msk [vmem:[%s1096_s9 + $0x30] sm:$0x1] %vm436_vm1, %v467_v40 }

// kernel: stem_forward.17
= control target key start
LH: loop header
LB: loop body
LE: loop exit
PB: predicated region body
PF: predicated region fallthrough
CT: control target
= control target key end

     0   :  { %s964_s1 = inlined_call_operand.vmem [shape: bf16[256,128], index: 1, kind: input, shape index: {}]   ;;  %s965_s0 = inlined_call_operand.vmem [shape: bf16[112,256], index: 0, kind: input, shape index: {}]   ;;  %s966_s2 = inlined_call_operand.vmem [shape: f32[1,128], index: 2, kind: input, shape index: {}]   ;;  %s967_s3 = inlined_call_operand.vmem [shape: f32[1,128], index: 3, kind: input, shape index: {}]   ;;  %s968_s4 = inlined_call_operand.vmem [shape: bf16[112,128], index: 4, kind: output, shape index: {}]  }
   0x1   :  { %v717_v0 = vld [vmem:[%s964_s1 + $0x78] sm:$0xff]   ;;  %v719_v2 = vld [vmem:[%s964_s1 + $0x70] sm:$0xff]   ;;  %v721_v4 = vld [vmem:[%s964_s1 + $0x68] sm:$0xff]  }
   0x2   :  { %v718_v1 = vld [vmem:[%s964_s1 + $0x38] sm:$0xff]   ;;  %643 = vmatprep.subr.bf16.mxu0 %v717_v0  ;;  %701 = vmatprep.subr.bf16.mxu1 %v717_v0  ;;  %v720_v3 = vld [vmem:[%s964_s1 + $0x30] sm:$0xff]   ;;  %v722_v5 = vld [vmem:[%s964_s1 + $0x28] sm:$0xff]  }
   0x3   :  { %644 = vmatpush3.bf16.msra.mxu0 %v718_v1  ;;  %709 = vmatpush3.bf16.msra.mxu1 %v718_v1  ;;  %v723_v6 = vld [vmem:[%s964_s1 + $0x60] sm:$0xff]   ;;  %v725_v8 = vld [vmem:[%s964_s1 + $0x58] sm:$0xff]   ;;  %v727_v10 = vld [vmem:[%s964_s1 + $0x50] sm:$0xff]  }
   0x4   :  { %645 = vmatprep.subr.bf16.mxu0 %v719_v2  ;;  %702 = vmatprep.subr.bf16.mxu1 %v719_v2  ;;  %v724_v7 = vld [vmem:[%s964_s1 + $0x20] sm:$0xff]   ;;  %v726_v9 = vld [vmem:[%s964_s1 + $0x18] sm:$0xff]   ;;  %v728_v12 = vld [vmem:[%s964_s1 + $0x10] sm:$0xff]  }
   0x5   :  { %v735_v11 = vld [vmem:[%s965_s0 + $0x4] ss:$8 sps:$4 sm:$0xff]   ;;  %v733_v18 = vld [vmem:[%s965_s0] ss:$8 sps:$4 sm:$0xff]   ;;  %v736_v20 = vld [vmem:[%s965_s0 + $0x14] ss:$8 sps:$4 sm:$0xff]  }
   0x6   :  { %v741_v13 = vld [vmem:[%s965_s0 + $0x44] ss:$8 sps:$4 sm:$0xff]   ;;  %262 = vmatprep.mubr.bf16.mxu0 %v735_v11  ;;  %v739_v19 = vld [vmem:[%s965_s0 + $0x40] ss:$8 sps:$4 sm:$0xff]   ;;  %v745_v21 = vld [vmem:[%s965_s0 + $0x54] ss:$8 sps:$4 sm:$0xff]  }
   0x7   :  { %646 = vmatpush3.bf16.msra.mxu0 %v720_v3  ;;  %710 = vmatpush3.bf16.msra.mxu1 %v720_v3  ;;  %v729_v14 = vld [vmem:[%s964_s1 + $0x48] sm:$0xff]   ;;  %v731_v16 = vld [vmem:[%s964_s1 + $0x40] sm:$0xff]   ;;  %v738_v22 = vld [vmem:[%s965_s0 + $0x10] ss:$8 sps:$4 sm:$0xff]  }
   0x8   :  { %647 = vmatprep.subr.bf16.mxu0 %v721_v4  ;;  %703 = vmatprep.subr.bf16.mxu1 %v721_v4  ;;  %v730_v15 = vld [vmem:[%s964_s1 + $0x8] sm:$0xff]   ;;  %v732_v17 = vld [vmem:[%s964_s1] sm:$0xff]   ;;  %v747_v23 = vld [vmem:[%s965_s0 + $0x50] ss:$8 sps:$4 sm:$0xff]  }
   0x9   :  { %294 = vmatprep.mubr.bf16.mxu1 %v741_v13  ;;  %v742_v24 = vld [vmem:[%s965_s0 + $0x24] ss:$8 sps:$4 sm:$0xff]   ;;  %v744_v26 = vld [vmem:[%s965_s0 + $0x20] ss:$8 sps:$4 sm:$0xff]   ;;  %v748_v28 = vld [vmem:[%s965_s0 + $0x34] ss:$8 sps:$4 sm:$0xff]  }
   0xa   :  { %v751_v25 = vld [vmem:[%s965_s0 + $0x64] ss:$8 sps:$4 sm:$0xff]   ;;  %v753_v27 = vld [vmem:[%s965_s0 + $0x60] ss:$8 sps:$4 sm:$0xff]   ;;  %v750_v29 = vld [vmem:[%s965_s0 + $0x30] ss:$8 sps:$4 sm:$0xff]  }
   0xb   :  { %648 = vmatpush3.bf16.msra.mxu0 %v722_v5  ;;  %711 = vmatpush3.bf16.msra.mxu1 %v722_v5 }
   0xc   :  { %649 = vmatprep.subr.bf16.mxu0 %v723_v6  ;;  %704 = vmatprep.subr.bf16.mxu1 %v723_v6 }
   0xf   :  { %650 = vmatpush3.bf16.msra.mxu0 %v724_v7  ;;  %712 = vmatpush3.bf16.msra.mxu1 %v724_v7 }
  0x10   :  { %651 = vmatprep.subr.bf16.mxu0 %v725_v8  ;;  %705 = vmatprep.subr.bf16.mxu1 %v725_v8 }
  0x13   :  { %652 = vmatpush3.bf16.msra.mxu0 %v726_v9  ;;  %713 = vmatpush3.bf16.msra.mxu1 %v726_v9 }
  0x14   :  { %653 = vmatprep.subr.bf16.mxu0 %v727_v10  ;;  %706 = vmatprep.subr.bf16.mxu1 %v727_v10 }
  0x17   :  { %654 = vmatpush3.bf16.msra.mxu0 %v728_v12  ;;  %714 = vmatpush3.bf16.msra.mxu1 %v728_v12 }
  0x18   :  { %655 = vmatprep.subr.bf16.mxu0 %v729_v14  ;;  %707 = vmatprep.subr.bf16.mxu1 %v729_v14 }
  0x1b   :  { %656 = vmatpush3.bf16.msra.mxu0 %v730_v15  ;;  %715 = vmatpush3.bf16.msra.mxu1 %v730_v15 }
  0x1c   :  { %657 = vmatprep.subr.bf16.mxu0 %v731_v16  ;;  %708 = vmatprep.subr.bf16.mxu1 %v731_v16 }
  0x1f   :  { %658 = vmatpush3.bf16.msra.mxu0 %v732_v17  ;;  %716 = vmatpush3.bf16.msra.mxu1 %v732_v17 }
  0x22   :  { %263 = vmatmul.mubr.bf16.vlgmr.msra.gmra.mxu0 %v733_v18  ;;  %295 = vmatmul.mubr.bf16.vlgmr.msra.gmra.mxu1 %v739_v19 }
  0x23   :  { %270 = vmatprep.mubr.bf16.mxu0 %v736_v20  ;;  %302 = vmatprep.mubr.bf16.mxu1 %v745_v21 }
  0x2a   :  { %271 = vmatmul.mubr.bf16.gmra.mxu0 %v738_v22  ;;  %303 = vmatmul.mubr.bf16.gmra.mxu1 %v747_v23 }
  0x2b   :  { %278 = vmatprep.mubr.bf16.mxu0 %v742_v24  ;;  %310 = vmatprep.mubr.bf16.mxu1 %v751_v25 }
  0x32   :  { %279 = vmatmul.mubr.bf16.gmra.mxu0 %v744_v26  ;;  %311 = vmatmul.mubr.bf16.gmra.mxu1 %v753_v27 }
  0x33   :  { %286 = vmatprep.mubr.bf16.mxu0 %v748_v28 }
  0x3a   :  { %287 = vmatmul.mubr.bf16.gmra.mxu0 %v750_v29 }
  0xe2   :  { %v659_v30 = vpop.f32.mrf.mxu0  ;;  %v683_v31 = vpop.f32.mrf.mxu1 }
  0xe4   :  { %v660_v32 = vpop.f32.mrf.mxu0  ;;  %v684_v33 = vpop.f32.mrf.mxu1 }
  0xe5   :  { %v873_v46 = vadd.f32 %v660_v32, %v659_v30  ;;  %v905_v15 = vadd.f32 %v684_v33, %v683_v31 }
  0xe6   :  { %v662_v34 = vpop.f32.mrf.mxu0  ;;  %v686_v35 = vpop.f32.mrf.mxu1 }
  0xe7   :  { %v372_v53 = vmul.f32 %v873_v46, %v873_v46  ;;  %v380_v24 = vmul.f32 %v905_v15, %v905_v15 }
  0xe8   :  { %v663_v36 = vpop.f32.mrf.mxu0  ;;  %v687_v37 = vpop.f32.mrf.mxu1 }
  0xe9   :  { %v871_v44 = vadd.f32 %v663_v36, %v662_v34  ;;  %v910_v19 = vadd.f32 %v687_v37, %v686_v35 }
  0xea   :  { %v665_v38 = vpop.f32.mrf.mxu0  ;;  %v689_v40 = vpop.f32.mrf.mxu1 }
  0xeb   :  { %v373_v50 = vmul.f32 %v871_v44, %v871_v44  ;;  %v353_v54 = vadd.f32 %v871_v44, %v873_v46  ;;  %v381_v28 = vmul.f32 %v910_v19, %v910_v19 }
  0xec   :  { %v666_v39 = vpop.f32.mrf.mxu0  ;;  %v690_v43 = vpop.f32.mrf.mxu1 }
  0xed   :  { %v875_v47 = vadd.f32 %v666_v39, %v665_v38  ;;  %v386_v59 = vadd.f32 %v373_v50, %v372_v53  ;;  %v917_v25 = vadd.f32 %v690_v43, %v689_v40 }
  0xee   :  { %v668_v41 = vpop.f32.mrf.mxu0  ;;  %v692_v49 = vpop.f32.mrf.mxu1 }
  0xef   :  { %v374_v55 = vmul.f32 %v875_v47, %v875_v47  ;;  %v354_v60 = vadd.f32 %v875_v47, %v353_v54  ;;  %v382_v33 = vmul.f32 %v917_v25, %v917_v25 }
  0xf0   :  { %v669_v42 = vpop.f32.mrf.mxu0  ;;  %v693_v58 = vpop.f32.mrf.mxu1 }
  0xf1   :  { %v879_v51 = vadd.f32 %v669_v42, %v668_v41  ;;  %v387_v0 = vadd.f32 %v386_v59, %v374_v55  ;;  %v694_v29 = vadd.f32 %v693_v58, %v692_v49 }
  0xf2   :  { %v671_v45 = vpop.f32.mrf.mxu0  ;;  %v695_v4 = vpop.f32.mrf.mxu1 }
  0xf3   :  { %v375_v61 = vmul.f32 %v879_v51, %v879_v51  ;;  %v355_v1 = vadd.f32 %v879_v51, %v354_v60  ;;  %v383_v37 = vmul.f32 %v694_v29, %v694_v29 }
  0xf4   :  { %v672_v48 = vpop.f32.mrf.mxu0  ;;  %v696_v14 = vpop.f32.mrf.mxu1 }
  0xf5   :  { %v887_v56 = vadd.f32 %v672_v48, %v671_v45  ;;  %v388_v5 = vadd.f32 %v387_v0, %v375_v61  ;;  %v697_v35 = vadd.f32 %v696_v14, %v695_v4  ;;  %v413_v14 = vld [vmem:[%s967_s3] sm:$0x1] }
  0xf6   :  { %v674_v52 = vpop.f32.mrf.mxu0  ;;  %v698_v23 = vpop.f32.mrf.mxu1 }
  0xf7   :  { %v376_v2 = vmul.f32 %v887_v56, %v887_v56  ;;  %v356_v6 = vadd.f32 %v887_v56, %v355_v1  ;;  %v384_v42 = vmul.f32 %v697_v35, %v697_v35 }
  0xf8   :  { %v675_v57 = vpop.f32.mrf.mxu0  ;;  %v699_v32 = vpop.f32.mrf.mxu1 }
  0xf9   :  { %v892_v62 = vadd.f32 %v675_v57, %v674_v52  ;;  %v389_v10 = vadd.f32 %v388_v5, %v376_v2  ;;  %v700_v40 = vadd.f32 %v699_v32, %v698_v23 }
  0xfa   :  { %v677_v63 = vpop.f32.mrf.mxu0 }
  0xfb   :  { %v377_v7 = vmul.f32 %v892_v62, %v892_v62  ;;  %v357_v11 = vadd.f32 %v892_v62, %v356_v6  ;;  %v385_v49 = vmul.f32 %v700_v40, %v700_v40 }
  0xfc   :  { %v678_v3 = vpop.f32.mrf.mxu0 }
  0xfd   :  { %v900_v8 = vadd.f32 %v678_v3, %v677_v63  ;;  %v390_v16 = vadd.f32 %v389_v10, %v377_v7  ;;  %v417_v7 = vlaneseq  ;;  %v409_v10 = vld [vmem:[%s966_s2] sm:$0x1] }
  0xfe   :  { %v680_v9 = vpop.f32.mrf.mxu0 }
  0xff   :  { %v378_v12 = vmul.f32 %v900_v8, %v900_v8  ;;  %v358_v17 = vadd.f32 %v900_v8, %v357_v11 }
 0x100   :  { %v681_v13 = vpop.f32.mrf.mxu0 }
 0x101   :  { %v908_v18 = vadd.f32 %v681_v13, %v680_v9  ;;  %v391_v20 = vadd.f32 %v390_v16, %v378_v12  ;;  %v418_v9 = vshrl.u32 %v417_v7, 7 }
 0x103   :  { %v359_v21 = vadd.f32 %v908_v18, %v358_v17  ;;  %v379_v22 = vmul.f32 %v908_v18, %v908_v18  ;;  %v419_v11 = vsub.s32 0, %v418_v9 }
 0x105   :  { %v360_v26 = vadd.f32 %v905_v15, %v359_v21  ;;  %v392_v27 = vadd.f32 %v391_v20, %v379_v22 }
 0x107   :  { %v361_v30 = vadd.f32 %v910_v19, %v360_v26  ;;  %v393_v31 = vadd.f32 %v392_v27, %v380_v24 }
 0x109   :  { %v394_v34 = vadd.f32 %v393_v31, %v381_v28  ;;  %v362_v36 = vadd.f32 %v917_v25, %v361_v30 }
 0x10b   :  { %v363_v38 = vadd.f32 %v694_v29, %v362_v36  ;;  %v395_v39 = vadd.f32 %v394_v34, %v382_v33 }
 0x10d   :  { %v364_v41 = vadd.f32 %v697_v35, %v363_v38  ;;  %v396_v43 = vadd.f32 %v395_v39, %v383_v37 }
 0x10f   :  { %v397_v45 = vadd.f32 %v396_v43, %v384_v42  ;;  %v365_v48 = vadd.f32 %v700_v40, %v364_v41 }
 0x111   :  { %v366_v50 = vrot.slane %v365_v48, 4  ;;  %v398_v52 = vadd.f32 %v397_v45, %v385_v49 }
 0x113   :  { %v367_v53 = vadd.f32 %v366_v50, %v365_v48  ;;  %v399_v54 = vrot.slane %v398_v52, 4 }
 0x115   :  { %v368_v55 = vrot.slane %v367_v53, 2  ;;  %v400_v57 = vadd.f32 %v399_v54, %v398_v52 }
 0x117   :  { %v369_v58 = vadd.f32 %v368_v55, %v367_v53  ;;  %v401_v59 = vrot.slane %v400_v57, 2 }
 0x119   :  { %v370_v60 = vrot.slane %v369_v58, 1  ;;  %v402_v61 = vadd.f32 %v401_v59, %v400_v57 }
 0x11b   :  { %v371_v63 = vadd.f32 %v370_v60, %v369_v58  ;;  %v403_v0 = vrot.slane %v402_v61, 1 }
 0x11d   :  { %v404_v1 = vadd.f32 %v403_v0, %v402_v61  ;;  %v405_v2 = vmul.f32 0.010204081, %v371_v63 }
 0x11f   :  { %v406_v3 = vmul.f32 0.010204081, %v404_v1  ;;  %v407_v4 = vmul.f32 %v405_v2, %v405_v2 }
 0x121   :  { %v408_v5 = vsub.f32 %v406_v3, %v407_v4 }
 0x123   :  { %v410_v6 = vadd.f32 1e-05, %v408_v5 }
 0x125   :  { %754 = vrsqrt.f32 %v410_v6 }
 0x132   :  { %v755_v12 = vpop.eup %754 }
 0x133   :  { %v412_v13 = vmul.f32 %v755_v12, %v409_v10 }
 0x135   :  { %v414_v16 = vmul.f32 %v412_v13, %v405_v2  ;;  %v420_v17 = vrot.slane %v412_v13, %v419_v11 }
 0x137   :  { %v415_v20 = vsub.f32 %v413_v14, %v414_v16  ;;  %v422_v21 = vmul.f32 %v873_v46, %v420_v17  ;;  %v423_v22 = vmul.f32 %v871_v44, %v420_v17  ;;  %v424_v23 = vmul.f32 %v875_v47, %v420_v17 }
 0x138   :  { %v425_v24 = vmul.f32 %v879_v51, %v420_v17  ;;  %v426_v26 = vmul.f32 %v887_v56, %v420_v17  ;;  %v427_v27 = vmul.f32 %v892_v62, %v420_v17  ;;  %v428_v28 = vmul.f32 %v900_v8, %v420_v17 }
 0x139   :  { %v429_v30 = vmul.f32 %v908_v18, %v420_v17  ;;  %v430_v31 = vmul.f32 %v905_v15, %v420_v17  ;;  %v431_v32 = vmul.f32 %v910_v19, %v420_v17  ;;  %v440_v33 = vrot.slane %v415_v20, %v419_v11 }
 0x13a   :  { %v432_v46 = vmul.f32 %v917_v25, %v420_v17  ;;  %v433_v44 = vmul.f32 %v694_v29, %v420_v17  ;;  %v434_v34 = vmul.f32 %v697_v35, %v420_v17  ;;  %v435_v47 = vmul.f32 %v700_v40, %v420_v17 }
 0x13b   :  { %v442_v36 = vadd.f32 %v440_v33, %v422_v21  ;;  %v443_v51 = vadd.f32 %v440_v33, %v423_v22  ;;  %v444_v37 = vadd.f32 %v440_v33, %v424_v23  ;;  %v445_v56 = vadd.f32 %v440_v33, %v425_v24 }
 0x13c   :  { %v446_v38 = vadd.f32 %v440_v33, %v426_v26  ;;  %v447_v62 = vadd.f32 %v440_v33, %v427_v27  ;;  %v448_v39 = vadd.f32 %v440_v33, %v428_v28  ;;  %v449_v8 = vadd.f32 %v440_v33, %v429_v30 }
 0x13d   :  { %v450_v41 = vadd.f32 %v440_v33, %v430_v31  ;;  %v451_v18 = vadd.f32 %v440_v33, %v431_v32  ;;  %v452_v42 = vadd.f32 %v440_v33, %v432_v46  ;;  %v453_v15 = vadd.f32 %v440_v33, %v433_v44 }
 0x13e   :  { %v454_v43 = vadd.f32 %v440_v33, %v434_v34  ;;  %v455_v19 = vadd.f32 %v440_v33, %v435_v47  ;;  %v456_v45 = vmax.f32 %v442_v36, 0.0  ;;  %v457_v48 = vmax.f32 %v443_v51, 0.0 }
 0x13f   :  { %v458_v25 = vmax.f32 %v444_v37, 0.0  ;;  %v459_v29 = vmax.f32 %v445_v56, 0.0  ;;  %v460_v35 = vmax.f32 %v446_v38, 0.0  ;;  %v461_v40 = vmax.f32 %v447_v62, 0.0 }
 0x140   :  { %v462_v49 = vmax.f32 %v448_v39, 0.0  ;;  %v463_v50 = vmax.f32 %v449_v8, 0.0  ;;  %v464_v52 = vmax.f32 %v450_v41, 0.0  ;;  %v465_v53 = vmax.f32 %v451_v18, 0.0 }
 0x141   :  { %v466_v54 = vmax.f32 %v452_v42, 0.0  ;;  %v467_v55 = vmax.f32 %v453_v15, 0.0  ;;  %v468_v57 = vmax.f32 %v454_v43, 0.0  ;;  %v469_v58 = vmax.f32 %v455_v19, 0.0 }
 0x142   :  { %v605_v59 = vpack.c.bf16 %v457_v48, %v456_v45  ;;  %v610_v60 = vpack.c.bf16 %v459_v29, %v458_v25  ;;  %v615_v61 = vpack.c.bf16 %v461_v40, %v460_v35  ;;  %v620_v63 = vpack.c.bf16 %v463_v50, %v462_v49 }
 0x143   :  { %v625_v0 = vpack.c.bf16 %v465_v53, %v464_v52  ;;  %v630_v1 = vpack.c.bf16 %v467_v55, %v466_v54  ;;  %v635_v2 = vpack.c.bf16 %v469_v58, %v468_v57 }
 0x144   :  { %606 = vst [vmem:[%s968_s4] sm:$0xff] %v605_v59   ;;  %637 = vst [vmem:[%s968_s4 + $0x8] sm:$0xff] %v610_v60  }
 0x145   :  { %638 = vst [vmem:[%s968_s4 + $0x10] sm:$0xff] %v615_v61   ;;  %639 = vst [vmem:[%s968_s4 + $0x18] sm:$0xff] %v620_v63  }
 0x146   :  { %640 = vst [vmem:[%s968_s4 + $0x20] sm:$0xff] %v625_v0   ;;  %641 = vst [vmem:[%s968_s4 + $0x28] sm:$0xff] %v630_v1  }
 0x147   :  { %642 = vst [vmem:[%s968_s4 + $0x30] sm:$0xff] %v635_v2  }

// kernel: stem_forward.16
= control target key start
LH: loop header
LB: loop body
LE: loop exit
PB: predicated region body
PF: predicated region fallthrough
CT: control target
= control target key end

     0   :  { %v1482_v24 = vmov 0.0   ;;  %vm1483_vm0 = vmmov 0   ;;  %s1891_s1 = inlined_call_operand.vmem [shape: bf16[640,128], index: 1, kind: input, shape index: {}]   ;;  %s1892_s0 = inlined_call_operand.vmem [shape: bf16[112,640], index: 0, kind: input, shape index: {}]   ;;  %s1893_s2 = inlined_call_operand.vmem [shape: f32[1,128], index: 2, kind: input, shape index: {}]   ;;  %s1894_s3 = inlined_call_operand.vmem [shape: f32[1,128], index: 3, kind: input, shape index: {}]   ;;  %s1895_s4 = inlined_call_operand.vmem [shape: bf16[112,128], index: 4, kind: output, shape index: {}]  }
   0x1   :  { %v1391_v0 = vld [vmem:[%s1891_s1 + $0x78] sm:$0xff]   ;;  %v1393_v2 = vld [vmem:[%s1891_s1 + $0x70] sm:$0xff]   ;;  %v1395_v4 = vld [vmem:[%s1891_s1 + $0x68] sm:$0xff]  }
   0x2   :  { %v1392_v1 = vld [vmem:[%s1891_s1 + $0x38] sm:$0xff]   ;;  %1198 = vmatprep.subr.bf16.mxu0 %v1391_v0  ;;  %1373 = vmatprep.subr.bf16.mxu1 %v1391_v0  ;;  %v1394_v3 = vld [vmem:[%s1891_s1 + $0x30] sm:$0xff]   ;;  %v1396_v5 = vld [vmem:[%s1891_s1 + $0x28] sm:$0xff]  }
   0x3   :  { %1199 = vmatpush3.bf16.msra.mxu0 %v1392_v1  ;;  %1381 = vmatpush3.bf16.msra.mxu1 %v1392_v1  ;;  %v1397_v6 = vld [vmem:[%s1891_s1 + $0x60] sm:$0xff]   ;;  %v1399_v8 = vld [vmem:[%s1891_s1 + $0x58] sm:$0xff]   ;;  %v1401_v10 = vld [vmem:[%s1891_s1 + $0x50] sm:$0xff]  }
   0x4   :  { %1200 = vmatprep.subr.bf16.mxu0 %v1393_v2  ;;  %1374 = vmatprep.subr.bf16.mxu1 %v1393_v2  ;;  %v1398_v7 = vld [vmem:[%s1891_s1 + $0x20] sm:$0xff]   ;;  %v1400_v9 = vld [vmem:[%s1891_s1 + $0x18] sm:$0xff]   ;;  %v1402_v13 = vld [vmem:[%s1891_s1 + $0x10] sm:$0xff]  }
   0x5   :  { %v1409_v11 = vld [vmem:[%s1892_s0 + $0x4] ss:$20 sps:$4 sm:$0xff]   ;;  %v1403_v14 = vld [vmem:[%s1891_s1 + $0x48] sm:$0xff]   ;;  %v1407_v18 = vld [vmem:[%s1892_s0] ss:$20 sps:$4 sm:$0xff]  }
   0x6   :  { %v1412_v12 = vld [vmem:[%s1892_s0 + $0xa4] ss:$20 sps:$4 sm:$0xff]   ;;  %594 = vmatprep.mubr.bf16.mxu0 %v1409_v11  ;;  %v1404_v15 = vld [vmem:[%s1891_s1 + $0x8] sm:$0xff]   ;;  %v1410_v19 = vld [vmem:[%s1892_s0 + $0xa0] ss:$20 sps:$4 sm:$0xff]  }
   0x7   :  { %1201 = vmatpush3.bf16.msra.mxu0 %v1394_v3  ;;  %1382 = vmatpush3.bf16.msra.mxu1 %v1394_v3  ;;  %v1405_v16 = vld [vmem:[%s1891_s1 + $0x40] sm:$0xff]   ;;  %v1413_v20 = vld [vmem:[%s1891_s1 + $0xf8] sm:$0xff]   ;;  %v1416_v23 = vld [vmem:[%s1891_s1 + $0xf0] sm:$0xff]  }
   0x8   :  { %1202 = vmatprep.subr.bf16.mxu0 %v1395_v4  ;;  %1375 = vmatprep.subr.bf16.mxu1 %v1395_v4  ;;  %v1406_v17 = vld [vmem:[%s1891_s1] sm:$0xff]   ;;  %v1414_v21 = vld [vmem:[%s1891_s1 + $0xb8] sm:$0xff]   ;;  %v1417_v27 = vld [vmem:[%s1891_s1 + $0xb0] sm:$0xff]  }
   0x9   :  { %626 = vmatprep.mubr.bf16.mxu1 %v1412_v12  ;;  %v1415_v22 = vld [vmem:[%s1891_s1 + $0x138] sm:$0xff]   ;;  %v1419_v25 = vld [vmem:[%s1892_s0 + $0x2c] ss:$20 sps:$4 sm:$0xff]   ;;  %v1418_v28 = vld [vmem:[%s1891_s1 + $0x130] sm:$0xff]  }
   0xa   :  { %v1423_v26 = vld [vmem:[%s1892_s0 + $0xcc] ss:$20 sps:$4 sm:$0xff]   ;;  %v1421_v29 = vld [vmem:[%s1892_s0 + $0x28] ss:$20 sps:$4 sm:$0xff]   ;;  %v1433_v39 = vld [vmem:[%s1892_s0 + $0x50] ss:$20 sps:$4 sm:$0xff]  }
   0xb   :  { %1203 = vmatpush3.bf16.msra.mxu0 %v1396_v5  ;;  %1383 = vmatpush3.bf16.msra.mxu1 %v1396_v5  ;;  %v1422_v30 = vld [vmem:[%s1891_s1 + $0xe8] sm:$0xff]   ;;  %v1428_v34 = vld [vmem:[%s1891_s1 + $0xe0] sm:$0xff]   ;;  %v1434_v40 = vld [vmem:[%s1891_s1 + $0xd8] sm:$0xff]  }
   0xc   :  { %1204 = vmatprep.subr.bf16.mxu0 %v1397_v6  ;;  %1376 = vmatprep.subr.bf16.mxu1 %v1397_v6  ;;  %v1425_v31 = vld [vmem:[%s1891_s1 + $0xa8] sm:$0xff]   ;;  %v1429_v37 = vld [vmem:[%s1891_s1 + $0xa0] sm:$0xff]   ;;  %v1437_v41 = vld [vmem:[%s1891_s1 + $0x98] sm:$0xff]  }
   0xd   :  { %v1426_v32 = vld [vmem:[%s1891_s1 + $0x128] sm:$0xff]   ;;  %v1430_v38 = vld [vmem:[%s1891_s1 + $0x120] sm:$0xff]   ;;  %v1438_v43 = vld [vmem:[%s1891_s1 + $0x118] sm:$0xff]  }
   0xe   :  { %v1427_v33 = vld [vmem:[%s1892_s0 + $0xc8] ss:$20 sps:$4 sm:$0xff]   ;;  %v1439_v42 = vld [vmem:[%s1892_s0 + $0xf0] ss:$20 sps:$4 sm:$0xff]   ;;  %v1454_v47 = vld [vmem:[%s1892_s0 + $0xc] ss:$20 sps:$4 sm:$0xff]  }
   0xf   :  { %1205 = vmatpush3.bf16.msra.mxu0 %v1398_v7  ;;  %1384 = vmatpush3.bf16.msra.mxu1 %v1398_v7  ;;  %v1431_v35 = vld [vmem:[%s1892_s0 + $0x54] ss:$20 sps:$4 sm:$0xff]   ;;  %v1443_v45 = vld [vmem:[%s1892_s0 + $0x7c] ss:$20 sps:$4 sm:$0xff]   ;;  %v1445_v50 = vld [vmem:[%s1892_s0 + $0x78] ss:$20 sps:$4 sm:$0xff]  }
  0x10   :  { %1206 = vmatprep.subr.bf16.mxu0 %v1399_v8  ;;  %1377 = vmatprep.subr.bf16.mxu1 %v1399_v8  ;;  %v1435_v36 = vld [vmem:[%s1892_s0 + $0xf4] ss:$20 sps:$4 sm:$0xff]   ;;  %v1449_v53 = vld [vmem:[%s1891_s1 + $0xc0] sm:$0xff]   ;;  %v1459_v60 = vld [vmem:[%s1892_s0 + $0x38] ss:$20 sps:$4 sm:$0xff]  }
  0x11   :  { %v1440_v44 = vld [vmem:[%s1891_s1 + $0xd0] sm:$0xff]   ;;  %v1446_v49 = vld [vmem:[%s1891_s1 + $0xc8] sm:$0xff]   ;;  %v1450_v54 = vld [vmem:[%s1891_s1 + $0x80] sm:$0xff]  }
  0x12   :  { %v1441_v46 = vld [vmem:[%s1891_s1 + $0x90] sm:$0xff]   ;;  %v1447_v51 = vld [vmem:[%s1891_s1 + $0x88] sm:$0xff]   ;;  %v1451_v55 = vld [vmem:[%s1891_s1 + $0x100] sm:$0xff]  }
  0x13   :  { %1207 = vmatpush3.bf16.msra.mxu0 %v1400_v9  ;;  %1385 = vmatpush3.bf16.msra.mxu1 %v1400_v9  ;;  %v1442_v48 = vld [vmem:[%s1891_s1 + $0x110] sm:$0xff]   ;;  %v1448_v52 = vld [vmem:[%s1891_s1 + $0x108] sm:$0xff]   ;;  %v1464_v0 = vld [vmem:[%s1892_s0 + $0x84] ss:$20 sps:$4 sm:$0xff]  }
  0x14   :  { %1208 = vmatprep.subr.bf16.mxu0 %v1401_v10  ;;  %1378 = vmatprep.subr.bf16.mxu1 %v1401_v10  ;;  %v1452_v56 = vld [vmem:[%s1892_s0 + $0x8] ss:$20 sps:$4 sm:$0xff]   ;;  %v1455_v57 = vld [vmem:[%s1892_s0 + $0x10] ss:$20 sps:$4 sm:$0xff]   ;;  %v1462_v62 = vld [vmem:[%s1892_s0 + $0x58] ss:$20 sps:$4 sm:$0xff]  }
  0x15   :  { %v1456_v58 = vld [vmem:[%s1892_s0 + $0x34] ss:$20 sps:$4 sm:$0xff]   ;;  %v1458_v59 = vld [vmem:[%s1892_s0 + $0x30] ss:$20 sps:$4 sm:$0xff]   ;;  %v1468_v3 = vld [vmem:[%s1892_s0 + $0xac] ss:$20 sps:$4 sm:$0xff]  }
  0x16   :  { %v1460_v61 = vld [vmem:[%s1892_s0 + $0x5c] ss:$20 sps:$4 sm:$0xff]   ;;  %v1463_v63 = vld [vmem:[%s1892_s0 + $0x60] ss:$20 sps:$4 sm:$0xff]   ;;  %v1475_v8 = vld [vmem:[%s1892_s0 + $0xd8] ss:$20 sps:$4 sm:$0xff]  }
  0x17   :  { %1209 = vmatpush3.bf16.msra.mxu0 %v1402_v13  ;;  %1386 = vmatpush3.bf16.msra.mxu1 %v1402_v13  ;;  %v1466_v1 = vld [vmem:[%s1892_s0 + $0x80] ss:$20 sps:$4 sm:$0xff]   ;;  %v1467_v2 = vld [vmem:[%s1892_s0 + $0x88] ss:$20 sps:$4 sm:$0xff]   ;;  %v1471_v5 = vld [vmem:[%s1892_s0 + $0xb0] ss:$20 sps:$4 sm:$0xff]  }
  0x18   :  { %1210 = vmatprep.subr.bf16.mxu0 %v1403_v14  ;;  %1379 = vmatprep.subr.bf16.mxu1 %v1403_v14  ;;  %v1470_v4 = vld [vmem:[%s1892_s0 + $0xa8] ss:$20 sps:$4 sm:$0xff]   ;;  %v1474_v7 = vld [vmem:[%s1892_s0 + $0xd0] ss:$20 sps:$4 sm:$0xff]   ;;  %v1478_v10 = vld [vmem:[%s1892_s0 + $0xf8] ss:$20 sps:$4 sm:$0xff]  }
  0x19   :  { %v1472_v6 = vld [vmem:[%s1892_s0 + $0xd4] ss:$20 sps:$4 sm:$0xff]   ;;  %v1476_v9 = vld [vmem:[%s1892_s0 + $0xfc] ss:$20 sps:$4 sm:$0xff]  }
  0x1a   :  { %v1479_v11 = vld [vmem:[%s1892_s0 + $0x100] ss:$20 sps:$4 sm:$0xff]  }
  0x1b   :  { %1211 = vmatpush3.bf16.msra.mxu0 %v1404_v15  ;;  %1387 = vmatpush3.bf16.msra.mxu1 %v1404_v15 }
  0x1c   :  { %1212 = vmatprep.subr.bf16.mxu0 %v1405_v16  ;;  %1380 = vmatprep.subr.bf16.mxu1 %v1405_v16 }
  0x1f   :  { %1213 = vmatpush3.bf16.msra.mxu0 %v1406_v17  ;;  %1388 = vmatpush3.bf16.msra.mxu1 %v1406_v17 }
  0x20   :  { %1256 = vmatprep.subr.bf16.mxu1 %v1413_v20  ;;  %1329 = vmatprep.subr.bf16.mxu0 %v1482_v24 }
  0x22   :  { %595 = vmatmul.mubr.bf16.vlgmr.msra.gmra.mxu0 %v1407_v18  ;;  %627 = vmatmul.mubr.bf16.vlgmr.msra.gmra.mxu1 %v1410_v19 }
  0x23   :  { %1257 = vmatpush3.bf16.msra.mxu1 %v1414_v21  ;;  %1330 = vmatpush3.bf16.msra.mxu0 %v1415_v22 }
  0x24   :  { %1258 = vmatprep.subr.bf16.mxu1 %v1416_v23  ;;  %1331 = vmatprep.subr.bf16.mxu0 %v1482_v24 }
  0x25   :  { %602 = vmatprep.mubr.bf16.mxu0 %v1419_v25  ;;  %634 = vmatprep.mubr.bf16.mxu1 %v1423_v26 }
  0x27   :  { %1259 = vmatpush3.bf16.msra.mxu1 %v1417_v27  ;;  %1332 = vmatpush3.bf16.msra.mxu0 %v1418_v28 }
  0x28   :  { %1260 = vmatprep.subr.bf16.mxu1 %v1422_v30  ;;  %1333 = vmatprep.subr.bf16.mxu0 %v1482_v24 }
  0x2a   :  { %603 = vmatmul.mubr.bf16.gmra.mxu0 %v1421_v29  ;;  %635 = vmatmul.mubr.bf16.gmra.mxu1 %v1427_v33 }
  0x2b   :  { %1261 = vmatpush3.bf16.msra.mxu1 %v1425_v31  ;;  %1334 = vmatpush3.bf16.msra.mxu0 %v1426_v32 }
  0x2c   :  { %1262 = vmatprep.subr.bf16.mxu1 %v1428_v34  ;;  %1335 = vmatprep.subr.bf16.mxu0 %v1482_v24 }
  0x2d   :  { %610 = vmatprep.mubr.bf16.mxu0 %v1431_v35  ;;  %642 = vmatprep.mubr.bf16.mxu1 %v1435_v36 }
  0x2f   :  { %1263 = vmatpush3.bf16.msra.mxu1 %v1429_v37  ;;  %1336 = vmatpush3.bf16.msra.mxu0 %v1430_v38 }
  0x30   :  { %1264 = vmatprep.subr.bf16.mxu1 %v1434_v40  ;;  %1337 = vmatprep.subr.bf16.mxu0 %v1482_v24 }
  0x32   :  { %611 = vmatmul.mubr.bf16.gmra.mxu0 %v1433_v39  ;;  %643 = vmatmul.mubr.bf16.gmra.mxu1 %v1439_v42 }
  0x33   :  { %1265 = vmatpush3.bf16.msra.mxu1 %v1437_v41  ;;  %1338 = vmatpush3.bf16.msra.mxu0 %v1438_v43 }
  0x34   :  { %1266 = vmatprep.subr.bf16.mxu1 %v1440_v44  ;;  %1339 = vmatprep.subr.bf16.mxu0 %v1482_v24 }
  0x35   :  { %618 = vmatprep.mubr.bf16.mxu0 %v1443_v45  ;;  %683 = vmatprep.mubr.bf16.mxu1 %v1454_v47 }
  0x37   :  { %1267 = vmatpush3.bf16.msra.mxu1 %v1441_v46  ;;  %1340 = vmatpush3.bf16.msra.mxu0 %v1442_v48 }
  0x38   :  { %1268 = vmatprep.subr.bf16.mxu1 %v1446_v49  ;;  %1341 = vmatprep.subr.bf16.mxu0 %v1482_v24 }
  0x3a   :  { %619 = vmatmul.mubr.bf16.gmra.mxu0 %v1445_v50 }
  0x3b   :  { %1269 = vmatpush3.bf16.msra.mxu1 %v1447_v51  ;;  %1342 = vmatpush3.bf16.msra.mxu0 %v1448_v52 }
  0x3c   :  { %1270 = vmatprep.subr.bf16.mxu1 %v1449_v53  ;;  %1343 = vmatprep.subr.bf16.mxu0 %v1482_v24 }
  0x3d   :  { %1345 = vmatprep.mubr.msk.bf16.mxu0 %vm1483_vm0, %v1482_v24 }
  0x3f   :  { %1271 = vmatpush3.bf16.msra.mxu1 %v1450_v54  ;;  %1344 = vmatpush3.bf16.msra.mxu0 %v1451_v55 }
  0x42   :  { %684 = vmatmul.mubr.bf16.vlgmr.msra.gmra.mxu1 %v1452_v56  ;;  %1346 = vmatmul.mubr.bf16.vlgmr.msra.gmra.mxu0 %v1455_v57 }
  0x43   :  { %691 = vmatprep.mubr.bf16.mxu1 %v1456_v58  ;;  %1349 = vmatprep.mubr.msk.bf16.mxu0 %vm1483_vm0, %v1482_v24 }
  0x4a   :  { %692 = vmatmul.mubr.bf16.gmra.mxu1 %v1458_v59  ;;  %1350 = vmatmul.mubr.bf16.gmra.mxu0 %v1459_v60 }
  0x4b   :  { %699 = vmatprep.mubr.bf16.mxu1 %v1460_v61  ;;  %1353 = vmatprep.mubr.msk.bf16.mxu0 %vm1483_vm0, %v1482_v24 }
  0x52   :  { %700 = vmatmul.mubr.bf16.gmra.mxu1 %v1462_v62  ;;  %1354 = vmatmul.mubr.bf16.gmra.mxu0 %v1463_v63 }
  0x53   :  { %707 = vmatprep.mubr.bf16.mxu1 %v1464_v0  ;;  %1357 = vmatprep.mubr.msk.bf16.mxu0 %vm1483_vm0, %v1482_v24 }
  0x5a   :  { %708 = vmatmul.mubr.bf16.gmra.mxu1 %v1466_v1  ;;  %1358 = vmatmul.mubr.bf16.gmra.mxu0 %v1467_v2 }
  0x5b   :  { %715 = vmatprep.mubr.bf16.mxu1 %v1468_v3  ;;  %1361 = vmatprep.mubr.msk.bf16.mxu0 %vm1483_vm0, %v1482_v24 }
  0x62   :  { %716 = vmatmul.mubr.bf16.gmra.mxu1 %v1470_v4  ;;  %1362 = vmatmul.mubr.bf16.gmra.mxu0 %v1471_v5 }
  0x63   :  { %723 = vmatprep.mubr.bf16.mxu1 %v1472_v6  ;;  %1365 = vmatprep.mubr.msk.bf16.mxu0 %vm1483_vm0, %v1482_v24 }
  0x6a   :  { %724 = vmatmul.mubr.bf16.gmra.mxu1 %v1474_v7  ;;  %1366 = vmatmul.mubr.bf16.gmra.mxu0 %v1475_v8 }
  0x6b   :  { %731 = vmatprep.mubr.bf16.mxu1 %v1476_v9  ;;  %1369 = vmatprep.mubr.msk.bf16.mxu0 %vm1483_vm0, %v1482_v24 }
  0x72   :  { %732 = vmatmul.mubr.bf16.gmra.mxu1 %v1478_v10  ;;  %1370 = vmatmul.mubr.bf16.gmra.mxu0 %v1479_v11 }
  0xe2   :  { %v1214_v12 = vpop.f32.mrf.mxu0  ;;  %v1238_v13 = vpop.f32.mrf.mxu1 }
  0xe4   :  { %v1215_v14 = vpop.f32.mrf.mxu0  ;;  %v1239_v15 = vpop.f32.mrf.mxu1 }
  0xe5   :  { %v1216_v16 = vadd.f32 %v1215_v14, %v1214_v12  ;;  %v1756_v17 = vadd.f32 %v1239_v15, %v1238_v13 }
  0xe6   :  { %v1217_v18 = vpop.f32.mrf.mxu0  ;;  %v1241_v19 = vpop.f32.mrf.mxu1 }
  0xe8   :  { %v1218_v20 = vpop.f32.mrf.mxu0  ;;  %v1242_v21 = vpop.f32.mrf.mxu1 }
  0xe9   :  { %v1758_v22 = vadd.f32 %v1242_v21, %v1241_v19  ;;  %v1219_v60 = vadd.f32 %v1218_v20, %v1217_v18 }
  0xea   :  { %v1220_v23 = vpop.f32.mrf.mxu0  ;;  %v1760_v24 = vpop.f32.mrf.mxu1 }
  0xec   :  { %v1221_v25 = vpop.f32.mrf.mxu0  ;;  %v1762_v26 = vpop.f32.mrf.mxu1 }
  0xed   :  { %v1222_v1 = vadd.f32 %v1221_v25, %v1220_v23 }
  0xee   :  { %v1223_v27 = vpop.f32.mrf.mxu0  ;;  %v1764_v28 = vpop.f32.mrf.mxu1 }
  0xf0   :  { %v1224_v29 = vpop.f32.mrf.mxu0  ;;  %v1766_v30 = vpop.f32.mrf.mxu1 }
  0xf1   :  { %v1225_v6 = vadd.f32 %v1224_v29, %v1223_v27 }
  0xf2   :  { %v1226_v31 = vpop.f32.mrf.mxu0  ;;  %v1768_v33 = vpop.f32.mrf.mxu1 }
  0xf4   :  { %v1227_v32 = vpop.f32.mrf.mxu0  ;;  %v1770_v35 = vpop.f32.mrf.mxu1 }
  0xf5   :  { %v1228_v12 = vadd.f32 %v1227_v32, %v1226_v31 }
  0xf6   :  { %v1229_v34 = vpop.f32.mrf.mxu0  ;;  %v1772_v38 = vpop.f32.mrf.mxu1 }
  0xf8   :  { %v1230_v36 = vpop.f32.mrf.mxu0  ;;  %v1776_v41 = vpop.f32.mrf.mxu1 }
  0xf9   :  { %v1231_v20 = vadd.f32 %v1230_v36, %v1229_v34 }
  0xfa   :  { %v1232_v37 = vpop.f32.mrf.mxu0 }
  0xfc   :  { %v1233_v39 = vpop.f32.mrf.mxu0 }
  0xfe   :  { %v1774_v40 = vpop.f32.mrf.mxu0 }
 0x100   :  { %v1778_v42 = vpop.f32.mrf.mxu0 }
 0x102   :  { %v1272_v43 = vpop.f32.mrf.mxu1  ;;  %v774_v44 = vpop.f32.mrf.mxu0 }
 0x104   :  { %v1273_v45 = vpop.f32.mrf.mxu1  ;;  %v1347_v46 = vpop.f32.mrf.mxu0 }
 0x105   :  { %v1274_v61 = vadd.f32 %v1273_v45, %v1272_v43  ;;  %v1234_v46 = vadd.f32 %v1233_v39, %v1232_v37 }
 0x106   :  { %v1275_v47 = vpop.f32.mrf.mxu1  ;;  %v777_v48 = vpop.f32.mrf.mxu0 }
 0x107   :  { %v686_v7 = vadd.f32 %v1274_v61, %v1216_v16 }
 0x108   :  { %v1276_v49 = vpop.f32.mrf.mxu1  ;;  %v1348_v50 = vpop.f32.mrf.mxu0 }
 0x109   :  { %v1277_v57 = vadd.f32 %v1276_v49, %v1275_v47  ;;  %v1782_v21 = vadd.f32 %v774_v44, %v686_v7 }
 0x10a   :  { %v1278_v51 = vpop.f32.mrf.mxu1  ;;  %v782_v52 = vpop.f32.mrf.mxu0 }
 0x10b   :  { %v689_v2 = vadd.f32 %v1277_v57, %v1219_v60  ;;  %v882_v34 = vmul.f32 %v1782_v21, %v1782_v21 }
 0x10c   :  { %v1279_v53 = vpop.f32.mrf.mxu1  ;;  %v1351_v54 = vpop.f32.mrf.mxu0 }
 0x10d   :  { %v1280_v62 = vadd.f32 %v1279_v53, %v1278_v51  ;;  %v1780_v13 = vadd.f32 %v777_v48, %v689_v2 }
 0x10e   :  { %v1281_v55 = vpop.f32.mrf.mxu1  ;;  %v785_v56 = vpop.f32.mrf.mxu0 }
 0x10f   :  { %v694_v8 = vadd.f32 %v1280_v62, %v1222_v1  ;;  %v883_v16 = vmul.f32 %v1780_v13, %v1780_v13  ;;  %v863_v50 = vadd.f32 %v1780_v13, %v1782_v21 }
 0x110   :  { %v1282_v58 = vpop.f32.mrf.mxu1  ;;  %v1352_v59 = vpop.f32.mrf.mxu0 }
 0x111   :  { %v1283_v3 = vadd.f32 %v1282_v58, %v1281_v55  ;;  %v1784_v23 = vadd.f32 %v782_v52, %v694_v8  ;;  %v896_v52 = vadd.f32 %v883_v16, %v882_v34  ;;  %v1237_v55 = vadd.f32 %v1778_v42, %v1774_v40 }
 0x112   :  { %v1284_v63 = vpop.f32.mrf.mxu1  ;;  %v790_v0 = vpop.f32.mrf.mxu0 }
 0x113   :  { %v697_v14 = vadd.f32 %v1283_v3, %v1225_v6  ;;  %v884_v36 = vmul.f32 %v1784_v23, %v1784_v23 }
 0x114   :  { %v1285_v4 = vpop.f32.mrf.mxu1  ;;  %v1355_v5 = vpop.f32.mrf.mxu0 }
 0x115   :  { %v1286_v9 = vadd.f32 %v1285_v4, %v1284_v63  ;;  %v1788_v29 = vadd.f32 %v785_v56, %v697_v14  ;;  %v864_v56 = vadd.f32 %v863_v50, %v1784_v23  ;;  %v897_v58 = vadd.f32 %v896_v52, %v884_v36 }
 0x116   :  { %v1287_v10 = vpop.f32.mrf.mxu1  ;;  %v793_v11 = vpop.f32.mrf.mxu0 }
 0x117   :  { %v702_v25 = vadd.f32 %v1286_v9, %v1228_v12  ;;  %v885_v53 = vmul.f32 %v1788_v29, %v1788_v29  ;;  %v865_v62 = vadd.f32 %v864_v56, %v1788_v29 }
 0x118   :  { %v1288_v15 = vpop.f32.mrf.mxu1  ;;  %v1356_v18 = vpop.f32.mrf.mxu0 }
 0x119   :  { %v1289_v19 = vadd.f32 %v1288_v15, %v1287_v10  ;;  %v1794_v44 = vadd.f32 %v790_v0, %v702_v25  ;;  %v898_v1 = vadd.f32 %v897_v58, %v885_v53 }
 0x11a   :  { %v1290_v43 = vpop.f32.mrf.mxu1  ;;  %v798_v27 = vpop.f32.mrf.mxu0 }
 0x11b   :  { %v705_v31 = vadd.f32 %v1289_v19, %v1231_v20  ;;  %v886_v59 = vmul.f32 %v1794_v44, %v1794_v44  ;;  %v866_v42 = vadd.f32 %v865_v62, %v1794_v44 }
 0x11c   :  { %v1291_v32 = vpop.f32.mrf.mxu1  ;;  %v1359_v45 = vpop.f32.mrf.mxu0 }
 0x11d   :  { %v1292_v47 = vadd.f32 %v1291_v32, %v1290_v43  ;;  %v1800_v37 = vadd.f32 %v793_v11, %v705_v31  ;;  %v899_v6 = vadd.f32 %v898_v1, %v886_v59  ;;  %v1246_v45 = vadd.f32 %v1762_v26, %v1760_v24 }
 0x11e   :  { %v1293_v48 = vpop.f32.mrf.mxu1  ;;  %v801_v49 = vpop.f32.mrf.mxu0  ;;  %v1249_v24 = vadd.f32 %v1766_v30, %v1764_v28 }
 0x11f   :  { %v710_v51 = vadd.f32 %v1292_v47, %v1234_v46  ;;  %v887_v2 = vmul.f32 %v1800_v37, %v1800_v37  ;;  %v867_v9 = vadd.f32 %v866_v42, %v1800_v37 }
 0x120   :  { %v1294_v39 = vpop.f32.mrf.mxu1  ;;  %v1360_v54 = vpop.f32.mrf.mxu0 }
 0x121   :  { %v1295_v57 = vadd.f32 %v1294_v39, %v1293_v48  ;;  %v1808_v63 = vadd.f32 %v798_v27, %v710_v51  ;;  %v900_v12 = vadd.f32 %v899_v6, %v887_v2  ;;  %v1252_v2 = vadd.f32 %v1770_v35, %v1768_v33 }
 0x122   :  { %v1296_v60 = vpop.f32.mrf.mxu1  ;;  %v806_v61 = vpop.f32.mrf.mxu0 }
 0x123   :  { %v713_v0 = vadd.f32 %v1295_v57, %v1237_v55  ;;  %v888_v10 = vmul.f32 %v1808_v63, %v1808_v63  ;;  %v868_v18 = vadd.f32 %v867_v9, %v1808_v63 }
 0x124   :  { %v1297_v3 = vpop.f32.mrf.mxu1  ;;  %v1363_v40 = vpop.f32.mrf.mxu0 }
 0x125   :  { %v1813_v4 = vadd.f32 %v801_v49, %v713_v0  ;;  %v1298_v5 = vadd.f32 %v1297_v3, %v1296_v60  ;;  %v901_v16 = vadd.f32 %v900_v12, %v888_v10 }
 0x126   :  { %v1299_v7 = vpop.f32.mrf.mxu1  ;;  %v809_v8 = vpop.f32.mrf.mxu0 }
 0x127   :  { %v718_v11 = vadd.f32 %v1298_v5, %v1756_v17  ;;  %v889_v19 = vmul.f32 %v1813_v4, %v1813_v4  ;;  %v869_v31 = vadd.f32 %v868_v18, %v1813_v4 }
 0x128   :  { %v1300_v14 = vpop.f32.mrf.mxu1  ;;  %v1364_v15 = vpop.f32.mrf.mxu0 }
 0x129   :  { %v1822_v20 = vadd.f32 %v806_v61, %v718_v11  ;;  %v1301_v25 = vadd.f32 %v1300_v14, %v1299_v7  ;;  %v902_v34 = vadd.f32 %v901_v16, %v889_v19 }
 0x12a   :  { %v1302_v43 = vpop.f32.mrf.mxu1  ;;  %v814_v27 = vpop.f32.mrf.mxu0 }
 0x12b   :  { %v890_v32 = vmul.f32 %v1822_v20, %v1822_v20  ;;  %v721_v17 = vadd.f32 %v1301_v25, %v1758_v22  ;;  %v870_v36 = vadd.f32 %v869_v31, %v1822_v20 }
 0x12c   :  { %v1303_v46 = vpop.f32.mrf.mxu1  ;;  %v1367_v47 = vpop.f32.mrf.mxu0 }
 0x12d   :  { %v1831_v48 = vadd.f32 %v809_v8, %v721_v17  ;;  %v1304_v49 = vadd.f32 %v1303_v46, %v1302_v43  ;;  %v903_v52 = vadd.f32 %v902_v34, %v890_v32  ;;  %v1255_v8 = vadd.f32 %v1776_v41, %v1772_v38 }
 0x12e   :  { %v1305_v50 = vpop.f32.mrf.mxu1  ;;  %v817_v51 = vpop.f32.mrf.mxu0 }
 0x12f   :  { %v871_v53 = vadd.f32 %v870_v36, %v1831_v48  ;;  %v891_v39 = vmul.f32 %v1831_v48, %v1831_v48  ;;  %v726_v22 = vadd.f32 %v1304_v49, %v1246_v45 }
 0x130   :  { %v1306_v54 = vpop.f32.mrf.mxu1  ;;  %v1368_v55 = vpop.f32.mrf.mxu0 }
 0x131   :  { %v904_v26 = vadd.f32 %v903_v52, %v891_v39  ;;  %v1838_v56 = vadd.f32 %v814_v27, %v726_v22  ;;  %v1307_v57 = vadd.f32 %v1306_v54, %v1305_v50  ;;  %v927_v22 = vlaneseq  ;;  %v919_v55 = vld [vmem:[%s1893_s2] sm:$0x1] }
 0x132   :  { %v1308_v58 = vpop.f32.mrf.mxu1  ;;  %v822_v59 = vpop.f32.mrf.mxu0 }
 0x133   :  { %v872_v60 = vadd.f32 %v871_v53, %v1838_v56  ;;  %v892_v61 = vmul.f32 %v1838_v56, %v1838_v56  ;;  %v729_v62 = vadd.f32 %v1307_v57, %v1249_v24  ;;  %v928_v54 = vshrl.u32 %v927_v22, 7 }
 0x134   :  { %v1309_v0 = vpop.f32.mrf.mxu1  ;;  %v1371_v1 = vpop.f32.mrf.mxu0 }
 0x135   :  { %v905_v3 = vadd.f32 %v904_v26, %v892_v61  ;;  %v1845_v40 = vadd.f32 %v817_v51, %v729_v62  ;;  %v1310_v28 = vadd.f32 %v1309_v0, %v1308_v58  ;;  %v929_v24 = vsub.s32 0, %v928_v54  ;;  %v923_v58 = vld [vmem:[%s1894_s3] sm:$0x1] }
 0x136   :  { %v1311_v30 = vpop.f32.mrf.mxu1  ;;  %v825_v42 = vpop.f32.mrf.mxu0 }
 0x137   :  { %v734_v5 = vadd.f32 %v1310_v28, %v1252_v2  ;;  %v893_v9 = vmul.f32 %v1845_v40, %v1845_v40  ;;  %v873_v12 = vadd.f32 %v872_v60, %v1845_v40 }
 0x138   :  { %v1312_v6 = vpop.f32.mrf.mxu1  ;;  %v1372_v7 = vpop.f32.mrf.mxu0 }
 0x139   :  { %v823_v10 = vadd.f32 %v822_v59, %v734_v5  ;;  %v1313_v11 = vadd.f32 %v1312_v6, %v1311_v30  ;;  %v906_v14 = vadd.f32 %v905_v3, %v893_v9 }
 0x13b   :  { %v894_v33 = vmul.f32 %v823_v10, %v823_v10  ;;  %v737_v35 = vadd.f32 %v1313_v11, %v1255_v8  ;;  %v874_v15 = vadd.f32 %v873_v12, %v823_v10 }
 0x13d   :  { %v826_v18 = vadd.f32 %v825_v42, %v737_v35  ;;  %v907_v19 = vadd.f32 %v906_v14, %v894_v33 }
 0x13f   :  { %v875_v25 = vadd.f32 %v874_v15, %v826_v18  ;;  %v895_v43 = vmul.f32 %v826_v18, %v826_v18 }
 0x141   :  { %v876_v27 = vrot.slane %v875_v25, 4  ;;  %v908_v16 = vadd.f32 %v907_v19, %v895_v43 }
 0x143   :  { %v877_v31 = vadd.f32 %v876_v27, %v875_v25  ;;  %v909_v32 = vrot.slane %v908_v16, 4 }
 0x145   :  { %v878_v38 = vrot.slane %v877_v31, 2  ;;  %v910_v41 = vadd.f32 %v909_v32, %v908_v16 }
 0x147   :  { %v879_v17 = vadd.f32 %v878_v38, %v877_v31  ;;  %v911_v45 = vrot.slane %v910_v41, 2 }
 0x149   :  { %v880_v46 = vrot.slane %v879_v17, 1  ;;  %v912_v47 = vadd.f32 %v911_v45, %v910_v41 }
 0x14b   :  { %v881_v34 = vadd.f32 %v880_v46, %v879_v17  ;;  %v913_v36 = vrot.slane %v912_v47, 1 }
 0x14d   :  { %v914_v49 = vadd.f32 %v913_v36, %v912_v47  ;;  %v915_v50 = vmul.f32 0.010204081, %v881_v34 }
 0x14f   :  { %v916_v51 = vmul.f32 0.010204081, %v914_v49  ;;  %v917_v52 = vmul.f32 %v915_v50, %v915_v50 }
 0x151   :  { %v918_v53 = vsub.f32 %v916_v51, %v917_v52 }
 0x153   :  { %v920_v39 = vadd.f32 1e-05, %v918_v53 }
 0x155   :  { %1480 = vrsqrt.f32 %v920_v39 }
 0x162   :  { %v1481_v26 = vpop.eup %1480 }
 0x163   :  { %v922_v57 = vmul.f32 %v1481_v26, %v919_v55 }
 0x165   :  { %v924_v59 = vmul.f32 %v922_v57, %v915_v50  ;;  %v930_v60 = vrot.slane %v922_v57, %v929_v24 }
 0x167   :  { %v925_v61 = vsub.f32 %v923_v58, %v924_v59  ;;  %v934_v62 = vmul.f32 %v930_v60, %v1784_v23  ;;  %v932_v0 = vmul.f32 %v930_v60, %v1782_v21  ;;  %v933_v1 = vmul.f32 %v930_v60, %v1780_v13 }
 0x168   :  { %v935_v2 = vmul.f32 %v930_v60, %v1788_v29  ;;  %v940_v3 = vmul.f32 %v930_v60, %v1822_v20  ;;  %v941_v28 = vmul.f32 %v930_v60, %v1831_v48  ;;  %v942_v30 = vmul.f32 %v930_v60, %v1838_v56 }
 0x169   :  { %v936_v42 = vmul.f32 %v930_v60, %v1794_v44  ;;  %v937_v5 = vmul.f32 %v930_v60, %v1800_v37  ;;  %v938_v6 = vmul.f32 %v930_v60, %v1808_v63  ;;  %v950_v7 = vrot.slane %v925_v61, %v929_v24 }
 0x16a   :  { %v939_v23 = vmul.f32 %v930_v60, %v1813_v4  ;;  %v943_v21 = vmul.f32 %v930_v60, %v1845_v40  ;;  %v944_v13 = vmul.f32 %v930_v60, %v823_v10  ;;  %v945_v8 = vmul.f32 %v930_v60, %v826_v18 }
 0x16b   :  { %v952_v29 = vadd.f32 %v950_v7, %v932_v0  ;;  %v953_v9 = vadd.f32 %v950_v7, %v933_v1  ;;  %v954_v20 = vadd.f32 %v950_v7, %v934_v62  ;;  %v955_v11 = vadd.f32 %v950_v7, %v935_v2 }
 0x16c   :  { %v956_v48 = vadd.f32 %v950_v7, %v936_v42  ;;  %v957_v12 = vadd.f32 %v950_v7, %v937_v5  ;;  %v958_v56 = vadd.f32 %v950_v7, %v938_v6  ;;  %v959_v33 = vadd.f32 %v950_v7, %v939_v23 }
 0x16d   :  { %v960_v44 = vadd.f32 %v950_v7, %v940_v3  ;;  %v961_v35 = vadd.f32 %v950_v7, %v941_v28  ;;  %v962_v37 = vadd.f32 %v950_v7, %v942_v30  ;;  %v963_v14 = vadd.f32 %v950_v7, %v943_v21 }
 0x16e   :  { %v964_v63 = vadd.f32 %v950_v7, %v944_v13  ;;  %v965_v15 = vadd.f32 %v950_v7, %v945_v8  ;;  %v966_v19 = vmax.f32 %v952_v29, 0.0  ;;  %v967_v4 = vmax.f32 %v953_v9, 0.0 }
 0x16f   :  { %v968_v25 = vmax.f32 %v954_v20, 0.0  ;;  %v969_v40 = vmax.f32 %v955_v11, 0.0  ;;  %v970_v10 = vmax.f32 %v956_v48, 0.0  ;;  %v971_v18 = vmax.f32 %v957_v12, 0.0 }
 0x170   :  { %v972_v43 = vmax.f32 %v958_v56, 0.0  ;;  %v973_v27 = vmax.f32 %v959_v33, 0.0  ;;  %v974_v16 = vmax.f32 %v960_v44, 0.0  ;;  %v975_v31 = vmax.f32 %v961_v35, 0.0 }
 0x171   :  { %v976_v32 = vmax.f32 %v962_v37, 0.0  ;;  %v977_v38 = vmax.f32 %v963_v14, 0.0  ;;  %v978_v41 = vmax.f32 %v964_v63, 0.0  ;;  %v979_v17 = vmax.f32 %v965_v15, 0.0 }
 0x172   :  { %v1160_v45 = vpack.c.bf16 %v967_v4, %v966_v19  ;;  %v1165_v46 = vpack.c.bf16 %v969_v40, %v968_v25  ;;  %v1170_v47 = vpack.c.bf16 %v971_v18, %v970_v10  ;;  %v1175_v34 = vpack.c.bf16 %v973_v27, %v972_v43 }
 0x173   :  { %v1180_v36 = vpack.c.bf16 %v975_v31, %v974_v16  ;;  %v1185_v49 = vpack.c.bf16 %v977_v38, %v976_v32  ;;  %v1190_v50 = vpack.c.bf16 %v979_v17, %v978_v41 }
 0x174   :  { %1161 = vst [vmem:[%s1895_s4] sm:$0xff] %v1160_v45   ;;  %1192 = vst [vmem:[%s1895_s4 + $0x8] sm:$0xff] %v1165_v46  }
 0x175   :  { %1193 = vst [vmem:[%s1895_s4 + $0x10] sm:$0xff] %v1170_v47   ;;  %1194 = vst [vmem:[%s1895_s4 + $0x18] sm:$0xff] %v1175_v34  }
 0x176   :  { %1195 = vst [vmem:[%s1895_s4 + $0x20] sm:$0xff] %v1180_v36   ;;  %1196 = vst [vmem:[%s1895_s4 + $0x28] sm:$0xff] %v1185_v49  }
 0x177   :  { %1197 = vst [vmem:[%s1895_s4 + $0x30] sm:$0xff] %v1190_v50  }

// kernel: stem_forward.18
= control target key start
LH: loop header
LB: loop body
LE: loop exit
PB: predicated region body
PF: predicated region fallthrough
CT: control target
= control target key end

     0   :  { %s1356_s1 = inlined_call_operand.vmem [shape: bf16[640,128], index: 1, kind: input, shape index: {}]   ;;  %s1357_s0 = inlined_call_operand.vmem [shape: bf16[64,640], index: 0, kind: input, shape index: {}]   ;;  %s1358_s2 = inlined_call_operand.vmem [shape: f32[1,128], index: 2, kind: input, shape index: {}]   ;;  %s1359_s3 = inlined_call_operand.vmem [shape: f32[1,128], index: 3, kind: input, shape index: {}]   ;;  %s1360_s4 = inlined_call_operand.vmem [shape: bf16[64,128], index: 4, kind: output, shape index: {}]  }
   0x1   :  { %v1039_v0 = vld [vmem:[%s1356_s1 + $0x78] sm:$0xff]   ;;  %v1043_v4 = vld [vmem:[%s1356_s1 + $0x70] sm:$0xff]   ;;  %v1047_v8 = vld [vmem:[%s1356_s1 + $0x68] sm:$0xff]  }
   0x2   :  { %v1040_v1 = vld [vmem:[%s1356_s1 + $0xf8] sm:$0xff]   ;;  %907 = vmatprep.subr.bf16.mxu0 %v1039_v0  ;;  %v1044_v5 = vld [vmem:[%s1356_s1 + $0xf0] sm:$0xff]   ;;  %v1048_v9 = vld [vmem:[%s1356_s1 + $0xe8] sm:$0xff]  }
   0x3   :  { %v1041_v2 = vld [vmem:[%s1356_s1 + $0x38] sm:$0xff]   ;;  %947 = vmatprep.subr.bf16.mxu1 %v1040_v1  ;;  %v1045_v6 = vld [vmem:[%s1356_s1 + $0x30] sm:$0xff]   ;;  %v1049_v10 = vld [vmem:[%s1356_s1 + $0x28] sm:$0xff]  }
   0x4   :  { %v1042_v3 = vld [vmem:[%s1356_s1 + $0xb8] sm:$0xff]   ;;  %908 = vmatpush3.bf16.msra.mxu0 %v1041_v2  ;;  %v1046_v7 = vld [vmem:[%s1356_s1 + $0xb0] sm:$0xff]   ;;  %v1050_v11 = vld [vmem:[%s1356_s1 + $0xa8] sm:$0xff]  }
   0x5   :  { %948 = vmatpush3.bf16.msra.mxu1 %v1042_v3  ;;  %909 = vmatprep.subr.bf16.mxu0 %v1043_v4  ;;  %v1051_v12 = vld [vmem:[%s1356_s1 + $0x60] sm:$0xff]   ;;  %v1055_v16 = vld [vmem:[%s1356_s1 + $0x58] sm:$0xff]   ;;  %v1059_v20 = vld [vmem:[%s1356_s1 + $0x50] sm:$0xff]  }
   0x6   :  { %949 = vmatprep.subr.bf16.mxu1 %v1044_v5  ;;  %v1052_v13 = vld [vmem:[%s1356_s1 + $0xe0] sm:$0xff]   ;;  %v1056_v17 = vld [vmem:[%s1356_s1 + $0xd8] sm:$0xff]   ;;  %v1060_v21 = vld [vmem:[%s1356_s1 + $0xd0] sm:$0xff]  }
   0x7   :  { %v1053_v14 = vld [vmem:[%s1356_s1 + $0x20] sm:$0xff]   ;;  %v1057_v18 = vld [vmem:[%s1356_s1 + $0x18] sm:$0xff]   ;;  %v1061_v22 = vld [vmem:[%s1356_s1 + $0x10] sm:$0xff]  }
   0x8   :  { %910 = vmatpush3.bf16.msra.mxu0 %v1045_v6  ;;  %v1054_v15 = vld [vmem:[%s1356_s1 + $0xa0] sm:$0xff]   ;;  %v1058_v19 = vld [vmem:[%s1356_s1 + $0x98] sm:$0xff]   ;;  %v1062_v23 = vld [vmem:[%s1356_s1 + $0x90] sm:$0xff]  }
   0x9   :  { %950 = vmatpush3.bf16.msra.mxu1 %v1046_v7  ;;  %911 = vmatprep.subr.bf16.mxu0 %v1047_v8  ;;  %v1063_v24 = vld [vmem:[%s1356_s1 + $0x48] sm:$0xff]   ;;  %v1067_v28 = vld [vmem:[%s1356_s1 + $0x40] sm:$0xff]   ;;  %v1077_v36 = vld [vmem:[%s1356_s1 + $0x138] sm:$0xff]  }
   0xa   :  { %951 = vmatprep.subr.bf16.mxu1 %v1048_v9  ;;  %v1064_v25 = vld [vmem:[%s1356_s1 + $0xc8] sm:$0xff]   ;;  %v1068_v29 = vld [vmem:[%s1356_s1 + $0xc0] sm:$0xff]   ;;  %v1078_v37 = vld [vmem:[%s1356_s1 + $0x130] sm:$0xff]  }
   0xb   :  { %v1065_v26 = vld [vmem:[%s1356_s1 + $0x8] sm:$0xff]   ;;  %v1069_v30 = vld [vmem:[%s1356_s1] sm:$0xff]   ;;  %v1089_v45 = vld [vmem:[%s1357_s0 + $0x5c] ss:$20 sps:$4 sm:$0xff]  }
   0xc   :  { %912 = vmatpush3.bf16.msra.mxu0 %v1049_v10  ;;  %v1066_v27 = vld [vmem:[%s1356_s1 + $0x88] sm:$0xff]   ;;  %v1070_v31 = vld [vmem:[%s1356_s1 + $0x80] sm:$0xff]   ;;  %v1093_v46 = vld [vmem:[%s1356_s1 + $0x118] sm:$0xff]  }
   0xd   :  { %952 = vmatpush3.bf16.msra.mxu1 %v1050_v11  ;;  %913 = vmatprep.subr.bf16.mxu0 %v1051_v12  ;;  %v1071_v32 = vld [vmem:[%s1357_s0] ss:$20 sps:$4 sm:$0xff]   ;;  %v1073_v33 = vld [vmem:[%s1357_s0 + $0x4] ss:$20 sps:$4 sm:$0xff]   ;;  %v1074_v34 = vld [vmem:[%s1357_s0 + $0x8] ss:$20 sps:$4 sm:$0xff]  }
   0xe   :  { %953 = vmatprep.subr.bf16.mxu1 %v1052_v13  ;;  %v1076_v35 = vld [vmem:[%s1357_s0 + $0xc] ss:$20 sps:$4 sm:$0xff]   ;;  %498 = vmatprep.mubr.bf16.mxu0 %v1073_v33  ;;  %v1081_v39 = vld [vmem:[%s1357_s0 + $0x34] ss:$20 sps:$4 sm:$0xff]   ;;  %v1084_v42 = vld [vmem:[%s1357_s0 + $0x30] ss:$20 sps:$4 sm:$0xff]  }
   0xf   :  { %563 = vmatprep.mubr.bf16.mxu1 %v1076_v35  ;;  %v1079_v38 = vld [vmem:[%s1357_s0 + $0x2c] ss:$20 sps:$4 sm:$0xff]   ;;  %v1083_v40 = vld [vmem:[%s1357_s0 + $0x28] ss:$20 sps:$4 sm:$0xff]   ;;  %v1091_v47 = vld [vmem:[%s1357_s0 + $0x50] ss:$20 sps:$4 sm:$0xff]  }
  0x10   :  { %914 = vmatpush3.bf16.msra.mxu0 %v1053_v14  ;;  %v1085_v41 = vld [vmem:[%s1356_s1 + $0x128] sm:$0xff]   ;;  %v1086_v44 = vld [vmem:[%s1356_s1 + $0x120] sm:$0xff]   ;;  %v1095_v49 = vld [vmem:[%s1357_s0 + $0x7c] ss:$20 sps:$4 sm:$0xff]  }
  0x11   :  { %954 = vmatpush3.bf16.msra.mxu1 %v1054_v15  ;;  %915 = vmatprep.subr.bf16.mxu0 %v1055_v16  ;;  %v1087_v43 = vld [vmem:[%s1357_s0 + $0x54] ss:$20 sps:$4 sm:$0xff]   ;;  %v1092_v48 = vld [vmem:[%s1357_s0 + $0x58] ss:$20 sps:$4 sm:$0xff]   ;;  %v1103_v55 = vld [vmem:[%s1357_s0 + $0x10] ss:$20 sps:$4 sm:$0xff]  }
  0x12   :  { %955 = vmatprep.subr.bf16.mxu1 %v1056_v17  ;;  %v1097_v50 = vld [vmem:[%s1357_s0 + $0x84] ss:$20 sps:$4 sm:$0xff]   ;;  %v1094_v51 = vld [vmem:[%s1356_s1 + $0x110] sm:$0xff]   ;;  %v1101_v52 = vld [vmem:[%s1356_s1 + $0x108] sm:$0xff]  }
  0x13   :  { %v1099_v53 = vld [vmem:[%s1357_s0 + $0x78] ss:$20 sps:$4 sm:$0xff]   ;;  %v1100_v54 = vld [vmem:[%s1357_s0 + $0x80] ss:$20 sps:$4 sm:$0xff]   ;;  %v1106_v59 = vld [vmem:[%s1357_s0 + $0x88] ss:$20 sps:$4 sm:$0xff]  }
  0x14   :  { %916 = vmatpush3.bf16.msra.mxu0 %v1057_v18  ;;  %v1104_v56 = vld [vmem:[%s1357_s0 + $0x60] ss:$20 sps:$4 sm:$0xff]   ;;  %v1105_v58 = vld [vmem:[%s1357_s0 + $0x38] ss:$20 sps:$4 sm:$0xff]  }
  0x15   :  { %956 = vmatpush3.bf16.msra.mxu1 %v1058_v19  ;;  %917 = vmatprep.subr.bf16.mxu0 %v1059_v20  ;;  %v1102_v57 = vld [vmem:[%s1356_s1 + $0x100] sm:$0xff]  }
  0x16   :  { %957 = vmatprep.subr.bf16.mxu1 %v1060_v21 }
  0x18   :  { %918 = vmatpush3.bf16.msra.mxu0 %v1061_v22 }
  0x19   :  { %958 = vmatpush3.bf16.msra.mxu1 %v1062_v23  ;;  %919 = vmatprep.subr.bf16.mxu0 %v1063_v24 }
  0x1a   :  { %959 = vmatprep.subr.bf16.mxu1 %v1064_v25 }
  0x1c   :  { %920 = vmatpush3.bf16.msra.mxu0 %v1065_v26 }
  0x1d   :  { %960 = vmatpush3.bf16.msra.mxu1 %v1066_v27  ;;  %921 = vmatprep.subr.bf16.mxu0 %v1067_v28 }
  0x1e   :  { %961 = vmatprep.subr.bf16.mxu1 %v1068_v29 }
  0x20   :  { %922 = vmatpush3.bf16.msra.mxu0 %v1069_v30 }
  0x21   :  { %962 = vmatpush3.bf16.msra.mxu1 %v1070_v31  ;;  %999 = vmatprep.subr.bf16.mxu0 %v1077_v36 }
  0x22   :  { %1023 = vmatprep.subr.bf16.mxu1 %v1077_v36 }
  0x23   :  { %499 = vmatmul.mubr.bf16.vlgmr.msra.gmra.mxu0 %v1071_v32 }
  0x24   :  { %564 = vmatmul.mubr.bf16.vlgmr.msra.gmra.mxu1 %v1074_v34  ;;  %1000 = vmatpush3.bf16.msra.mxu0 %v1077_v36 }
  0x25   :  { %1031 = vmatpush3.bf16.msra.mxu1 %v1077_v36  ;;  %1001 = vmatprep.subr.bf16.mxu0 %v1078_v37 }
  0x26   :  { %1024 = vmatprep.subr.bf16.mxu1 %v1078_v37  ;;  %506 = vmatprep.mubr.bf16.mxu0 %v1079_v38 }
  0x27   :  { %571 = vmatprep.mubr.bf16.mxu1 %v1081_v39 }
  0x28   :  { %1002 = vmatpush3.bf16.msra.mxu0 %v1078_v37 }
  0x29   :  { %1032 = vmatpush3.bf16.msra.mxu1 %v1078_v37  ;;  %1003 = vmatprep.subr.bf16.mxu0 %v1085_v41 }
  0x2a   :  { %1025 = vmatprep.subr.bf16.mxu1 %v1085_v41 }
  0x2b   :  { %507 = vmatmul.mubr.bf16.gmra.mxu0 %v1083_v40 }
  0x2c   :  { %572 = vmatmul.mubr.bf16.gmra.mxu1 %v1084_v42  ;;  %514 = vmatprep.mubr.bf16.mxu0 %v1087_v43 }
  0x2d   :  { %1004 = vmatpush3.bf16.msra.mxu0 %v1085_v41  ;;  %579 = vmatprep.mubr.bf16.mxu1 %v1089_v45 }
  0x2e   :  { %1033 = vmatpush3.bf16.msra.mxu1 %v1085_v41  ;;  %1005 = vmatprep.subr.bf16.mxu0 %v1086_v44 }
  0x2f   :  { %1026 = vmatprep.subr.bf16.mxu1 %v1086_v44 }
  0x31   :  { %1006 = vmatpush3.bf16.msra.mxu0 %v1086_v44 }
  0x32   :  { %1034 = vmatpush3.bf16.msra.mxu1 %v1086_v44  ;;  %1007 = vmatprep.subr.bf16.mxu0 %v1093_v46 }
  0x33   :  { %515 = vmatmul.mubr.bf16.gmra.mxu0 %v1091_v47  ;;  %1027 = vmatprep.subr.bf16.mxu1 %v1093_v46 }
  0x34   :  { %580 = vmatmul.mubr.bf16.gmra.mxu1 %v1092_v48  ;;  %522 = vmatprep.mubr.bf16.mxu0 %v1095_v49 }
  0x35   :  { %1008 = vmatpush3.bf16.msra.mxu0 %v1093_v46  ;;  %587 = vmatprep.mubr.bf16.mxu1 %v1097_v50 }
  0x36   :  { %1035 = vmatpush3.bf16.msra.mxu1 %v1093_v46  ;;  %1009 = vmatprep.subr.bf16.mxu0 %v1094_v51 }
  0x37   :  { %1028 = vmatprep.subr.bf16.mxu1 %v1094_v51 }
  0x39   :  { %1010 = vmatpush3.bf16.msra.mxu0 %v1094_v51 }
  0x3a   :  { %1036 = vmatpush3.bf16.msra.mxu1 %v1094_v51  ;;  %1011 = vmatprep.subr.bf16.mxu0 %v1101_v52 }
  0x3b   :  { %523 = vmatmul.mubr.bf16.gmra.mxu0 %v1099_v53  ;;  %1029 = vmatprep.subr.bf16.mxu1 %v1101_v52 }
  0x3c   :  { %588 = vmatmul.mubr.bf16.gmra.mxu1 %v1100_v54  ;;  %1015 = vmatprep.mubr.bf16.mxu0 %v1103_v55 }
  0x3d   :  { %1012 = vmatpush3.bf16.msra.mxu0 %v1101_v52  ;;  %1019 = vmatprep.mubr.bf16.mxu1 %v1104_v56 }
  0x3e   :  { %1037 = vmatpush3.bf16.msra.mxu1 %v1101_v52  ;;  %1013 = vmatprep.subr.bf16.mxu0 %v1102_v57 }
  0x3f   :  { %1030 = vmatprep.subr.bf16.mxu1 %v1102_v57 }
  0x41   :  { %1014 = vmatpush3.bf16.msra.mxu0 %v1102_v57 }
  0x42   :  { %1038 = vmatpush3.bf16.msra.mxu1 %v1102_v57 }
  0x44   :  { %1016 = vmatmul.mubr.bf16.vlgmr.msra.gmra.mxu0 %v1105_v58 }
  0x45   :  { %1020 = vmatmul.mubr.bf16.vlgmr.msra.gmra.mxu1 %v1106_v59 }
  0xe3   :  { %v923_v60 = vpop.f32.mrf.mxu0 }
  0xe4   :  { %v963_v61 = vpop.f32.mrf.mxu1 }
  0xe5   :  { %v924_v62 = vpop.f32.mrf.mxu0 }
  0xe6   :  { %v964_v63 = vpop.f32.mrf.mxu1  ;;  %v925_v28 = vadd.f32 %v924_v62, %v923_v60 }
  0xe7   :  { %v926_v0 = vpop.f32.mrf.mxu0  ;;  %v965_v29 = vadd.f32 %v964_v63, %v963_v61 }
  0xe8   :  { %v966_v1 = vpop.f32.mrf.mxu1 }
  0xe9   :  { %v927_v2 = vpop.f32.mrf.mxu0  ;;  %v566_v39 = vadd.f32 %v965_v29, %v925_v28 }
  0xea   :  { %v967_v3 = vpop.f32.mrf.mxu1  ;;  %v928_v31 = vadd.f32 %v927_v2, %v926_v0 }
  0xeb   :  { %v929_v4 = vpop.f32.mrf.mxu0  ;;  %v968_v32 = vadd.f32 %v967_v3, %v966_v1 }
  0xec   :  { %v969_v5 = vpop.f32.mrf.mxu1 }
  0xed   :  { %v930_v6 = vpop.f32.mrf.mxu0  ;;  %v569_v46 = vadd.f32 %v968_v32, %v928_v31 }
  0xee   :  { %v970_v7 = vpop.f32.mrf.mxu1  ;;  %v931_v33 = vadd.f32 %v930_v6, %v929_v4 }
  0xef   :  { %v932_v8 = vpop.f32.mrf.mxu0  ;;  %v971_v34 = vadd.f32 %v970_v7, %v969_v5 }
  0xf0   :  { %v972_v9 = vpop.f32.mrf.mxu1 }
  0xf1   :  { %v933_v10 = vpop.f32.mrf.mxu0  ;;  %v574_v44 = vadd.f32 %v971_v34, %v931_v33 }
  0xf2   :  { %v973_v11 = vpop.f32.mrf.mxu1  ;;  %v934_v37 = vadd.f32 %v933_v10, %v932_v8 }
  0xf3   :  { %v935_v12 = vpop.f32.mrf.mxu0  ;;  %v974_v38 = vadd.f32 %v973_v11, %v972_v9 }
  0xf4   :  { %v975_v13 = vpop.f32.mrf.mxu1 }
  0xf5   :  { %v936_v14 = vpop.f32.mrf.mxu0  ;;  %v577_v52 = vadd.f32 %v974_v38, %v934_v37 }
  0xf6   :  { %v976_v15 = vpop.f32.mrf.mxu1  ;;  %v937_v41 = vadd.f32 %v936_v14, %v935_v12 }
  0xf7   :  { %v938_v16 = vpop.f32.mrf.mxu0  ;;  %v977_v42 = vadd.f32 %v976_v15, %v975_v13 }
  0xf8   :  { %v978_v17 = vpop.f32.mrf.mxu1 }
  0xf9   :  { %v939_v18 = vpop.f32.mrf.mxu0  ;;  %v582_v56 = vadd.f32 %v977_v42, %v937_v41 }
  0xfa   :  { %v979_v19 = vpop.f32.mrf.mxu1  ;;  %v940_v47 = vadd.f32 %v939_v18, %v938_v16 }
  0xfb   :  { %v941_v20 = vpop.f32.mrf.mxu0  ;;  %v980_v48 = vadd.f32 %v979_v19, %v978_v17 }
  0xfc   :  { %v981_v21 = vpop.f32.mrf.mxu1 }
  0xfd   :  { %v942_v22 = vpop.f32.mrf.mxu0  ;;  %v585_v63 = vadd.f32 %v980_v48, %v940_v47 }
  0xfe   :  { %v982_v23 = vpop.f32.mrf.mxu1  ;;  %v943_v54 = vadd.f32 %v942_v22, %v941_v20 }
  0xff   :  { %v944_v24 = vpop.f32.mrf.mxu0  ;;  %v983_v55 = vadd.f32 %v982_v23, %v981_v21 }
 0x100   :  { %v984_v25 = vpop.f32.mrf.mxu1 }
 0x101   :  { %v945_v26 = vpop.f32.mrf.mxu0  ;;  %v590_v5 = vadd.f32 %v983_v55, %v943_v54 }
 0x102   :  { %v985_v27 = vpop.f32.mrf.mxu1  ;;  %v946_v61 = vadd.f32 %v945_v26, %v944_v24 }
 0x103   :  { %v986_v62 = vadd.f32 %v985_v27, %v984_v25 }
 0x104   :  { %v1017_v30 = vpop.f32.mrf.mxu0 }
 0x105   :  { %v1021_v35 = vpop.f32.mrf.mxu1  ;;  %v1316_v51 = vadd.f32 %v1017_v30, %v574_v44  ;;  %v593_v10 = vadd.f32 %v986_v62, %v946_v61 }
 0x106   :  { %v630_v36 = vpop.f32.mrf.mxu0  ;;  %v655_v11 = vadd.f32 %v1021_v35, %v590_v5 }
 0x107   :  { %v646_v40 = vpop.f32.mrf.mxu1  ;;  %v1314_v45 = vadd.f32 %v630_v36, %v566_v39  ;;  %v698_v1 = vmul.f32 %v1316_v51, %v1316_v51 }
 0x108   :  { %v1018_v43 = vpop.f32.mrf.mxu0  ;;  %v647_v2 = vadd.f32 %v646_v40, %v582_v56  ;;  %v702_v19 = vmul.f32 %v655_v11, %v655_v11 }
 0x109   :  { %v1022_v49 = vpop.f32.mrf.mxu1  ;;  %v696_v57 = vmul.f32 %v1314_v45, %v1314_v45  ;;  %v1322_v58 = vadd.f32 %v1018_v43, %v577_v52  ;;  %v729_v43 = vlaneseq }
 0x10a   :  { %v633_v50 = vpop.f32.mrf.mxu0  ;;  %v700_v12 = vmul.f32 %v647_v2, %v647_v2  ;;  %v658_v15 = vadd.f32 %v1022_v49, %v593_v10 }
 0x10b   :  { %v1318_v53 = vadd.f32 %v633_v50, %v569_v46  ;;  %v649_v0 = vpop.f32.mrf.mxu1  ;;  %v699_v6 = vmul.f32 %v1322_v58, %v1322_v58  ;;  %v730_v44 = vshrl.u32 %v729_v43, 7  ;;  %v721_v46 = vld [vmem:[%s1358_s2] sm:$0x1] }
 0x10c   :  { %v650_v8 = vadd.f32 %v649_v0, %v585_v63  ;;  %v703_v22 = vmul.f32 %v658_v15, %v658_v15  ;;  %v725_v50 = vld [vmem:[%s1359_s3] sm:$0x1] }
 0x10d   :  { %v683_v59 = vadd.f32 %v1318_v53, %v1314_v45  ;;  %v697_v60 = vmul.f32 %v1318_v53, %v1318_v53  ;;  %v731_v47 = vsub.s32 0, %v730_v44 }
 0x10e   :  { %v701_v17 = vmul.f32 %v650_v8, %v650_v8 }
 0x10f   :  { %v684_v3 = vadd.f32 %v683_v59, %v1316_v51  ;;  %v704_v4 = vadd.f32 %v697_v60, %v696_v57 }
 0x111   :  { %v705_v7 = vadd.f32 %v704_v4, %v698_v1  ;;  %v685_v9 = vadd.f32 %v684_v3, %v1322_v58 }
 0x113   :  { %v686_v13 = vadd.f32 %v685_v9, %v647_v2  ;;  %v706_v14 = vadd.f32 %v705_v7, %v699_v6 }
 0x115   :  { %v687_v16 = vadd.f32 %v686_v13, %v650_v8  ;;  %v707_v18 = vadd.f32 %v706_v14, %v700_v12 }
 0x117   :  { %v688_v20 = vadd.f32 %v687_v16, %v655_v11  ;;  %v708_v21 = vadd.f32 %v707_v18, %v701_v17 }
 0x119   :  { %v689_v23 = vadd.f32 %v688_v20, %v658_v15  ;;  %v709_v24 = vadd.f32 %v708_v21, %v702_v19 }
 0x11b   :  { %v690_v25 = vrot.slane %v689_v23, 4  ;;  %v710_v26 = vadd.f32 %v709_v24, %v703_v22 }
 0x11d   :  { %v691_v27 = vadd.f32 %v690_v25, %v689_v23  ;;  %v711_v28 = vrot.slane %v710_v26, 4 }
 0x11f   :  { %v692_v29 = vrot.slane %v691_v27, 2  ;;  %v712_v30 = vadd.f32 %v711_v28, %v710_v26 }
 0x121   :  { %v693_v31 = vadd.f32 %v692_v29, %v691_v27  ;;  %v713_v32 = vrot.slane %v712_v30, 2 }
 0x123   :  { %v694_v33 = vrot.slane %v693_v31, 1  ;;  %v714_v34 = vadd.f32 %v713_v32, %v712_v30 }
 0x125   :  { %v695_v35 = vadd.f32 %v694_v33, %v693_v31  ;;  %v715_v36 = vrot.slane %v714_v34, 1 }
 0x127   :  { %v716_v37 = vadd.f32 %v715_v36, %v714_v34  ;;  %v717_v38 = vmul.f32 0.02, %v695_v35 }
 0x129   :  { %v718_v39 = vmul.f32 0.02, %v716_v37  ;;  %v719_v40 = vmul.f32 %v717_v38, %v717_v38 }
 0x12b   :  { %v720_v41 = vsub.f32 %v718_v39, %v719_v40 }
 0x12d   :  { %v722_v42 = vadd.f32 1e-05, %v720_v41 }
 0x12f   :  { %1107 = vrsqrt.f32 %v722_v42 }
 0x13c   :  { %v1108_v48 = vpop.eup %1107 }
 0x13d   :  { %v724_v49 = vmul.f32 %v1108_v48, %v721_v46 }
 0x13f   :  { %v726_v52 = vmul.f32 %v724_v49, %v717_v38  ;;  %v732_v54 = vrot.slane %v724_v49, %v731_v47 }
 0x141   :  { %v727_v55 = vsub.f32 %v725_v50, %v726_v52  ;;  %v734_v56 = vmul.f32 %v732_v54, %v1314_v45  ;;  %v735_v57 = vmul.f32 %v732_v54, %v1318_v53  ;;  %v736_v59 = vmul.f32 %v732_v54, %v1316_v51 }
 0x142   :  { %v737_v60 = vmul.f32 %v732_v54, %v1322_v58  ;;  %v738_v62 = vmul.f32 %v732_v54, %v647_v2  ;;  %v739_v63 = vmul.f32 %v732_v54, %v650_v8  ;;  %v740_v0 = vmul.f32 %v732_v54, %v655_v11 }
 0x143   :  { %v746_v61 = vrot.slane %v727_v55, %v731_v47  ;;  %v741_v1 = vmul.f32 %v732_v54, %v658_v15 }
 0x145   :  { %v748_v3 = vadd.f32 %v746_v61, %v734_v56  ;;  %v749_v4 = vadd.f32 %v746_v61, %v735_v57  ;;  %v750_v5 = vadd.f32 %v746_v61, %v736_v59  ;;  %v751_v6 = vadd.f32 %v746_v61, %v737_v60 }
 0x146   :  { %v752_v7 = vadd.f32 %v746_v61, %v738_v62  ;;  %v753_v9 = vadd.f32 %v746_v61, %v739_v63  ;;  %v754_v10 = vadd.f32 %v746_v61, %v740_v0  ;;  %v755_v12 = vadd.f32 %v746_v61, %v741_v1 }
 0x147   :  { %v756_v45 = vmax.f32 %v748_v3, 0.0  ;;  %v757_v13 = vmax.f32 %v749_v4, 0.0  ;;  %v758_v53 = vmax.f32 %v750_v5, 0.0  ;;  %v759_v14 = vmax.f32 %v751_v6, 0.0 }
 0x148   :  { %v760_v51 = vmax.f32 %v752_v7, 0.0  ;;  %v761_v16 = vmax.f32 %v753_v9, 0.0  ;;  %v762_v58 = vmax.f32 %v754_v10, 0.0  ;;  %v763_v17 = vmax.f32 %v755_v12, 0.0 }
 0x149   :  { %v887_v2 = vpack.c.bf16 %v757_v13, %v756_v45  ;;  %v892_v8 = vpack.c.bf16 %v759_v14, %v758_v53 }
 0x14a   :  { %v897_v11 = vpack.c.bf16 %v761_v16, %v760_v51  ;;  %v902_v15 = vpack.c.bf16 %v763_v17, %v762_v58 }
 0x14b   :  { %888 = vst [vmem:[%s1360_s4] sm:$0xff] %v887_v2   ;;  %904 = vst [vmem:[%s1360_s4 + $0x8] sm:$0xff] %v892_v8  }
 0x14c   :  { %905 = vst [vmem:[%s1360_s4 + $0x10] sm:$0xff] %v897_v11   ;;  %906 = vst [vmem:[%s1360_s4 + $0x18] sm:$0xff] %v902_v15  }

// kernel: stem_forward.19
= control target key start
LH: loop header
LB: loop body
LE: loop exit
PB: predicated region body
PF: predicated region fallthrough
CT: control target
= control target key end

     0   :  { %s1470_s1 = inlined_call_operand.vmem [shape: bf16[512,128], index: 1, kind: input, shape index: {}]   ;;  %s1471_s0 = inlined_call_operand.vmem [shape: bf16[112,512], index: 0, kind: input, shape index: {}]   ;;  %s1472_s2 = inlined_call_operand.vmem [shape: f32[1,128], index: 2, kind: input, shape index: {}]   ;;  %s1473_s3 = inlined_call_operand.vmem [shape: f32[1,128], index: 3, kind: input, shape index: {}]   ;;  %s1474_s4 = inlined_call_operand.vmem [shape: bf16[112,128], index: 4, kind: output, shape index: {}]  }
   0x1   :  { %v1090_v0 = vld [vmem:[%s1470_s1 + $0x78] sm:$0xff]   ;;  %v1094_v4 = vld [vmem:[%s1470_s1 + $0x70] sm:$0xff]   ;;  %v1098_v8 = vld [vmem:[%s1470_s1 + $0x68] sm:$0xff]  }
   0x2   :  { %v1091_v1 = vld [vmem:[%s1470_s1 + $0xf8] sm:$0xff]   ;;  %974 = vmatprep.subr.bf16.mxu0 %v1090_v0  ;;  %v1095_v5 = vld [vmem:[%s1470_s1 + $0xf0] sm:$0xff]   ;;  %v1099_v9 = vld [vmem:[%s1470_s1 + $0xe8] sm:$0xff]  }
   0x3   :  { %v1092_v2 = vld [vmem:[%s1470_s1 + $0x38] sm:$0xff]   ;;  %1032 = vmatprep.subr.bf16.mxu1 %v1091_v1  ;;  %v1096_v6 = vld [vmem:[%s1470_s1 + $0x30] sm:$0xff]   ;;  %v1100_v10 = vld [vmem:[%s1470_s1 + $0x28] sm:$0xff]  }
   0x4   :  { %v1093_v3 = vld [vmem:[%s1470_s1 + $0xb8] sm:$0xff]   ;;  %975 = vmatpush3.bf16.msra.mxu0 %v1092_v2  ;;  %v1097_v7 = vld [vmem:[%s1470_s1 + $0xb0] sm:$0xff]   ;;  %v1101_v11 = vld [vmem:[%s1470_s1 + $0xa8] sm:$0xff]  }
   0x5   :  { %1033 = vmatpush3.bf16.msra.mxu1 %v1093_v3  ;;  %976 = vmatprep.subr.bf16.mxu0 %v1094_v4  ;;  %v1102_v12 = vld [vmem:[%s1470_s1 + $0x60] sm:$0xff]   ;;  %v1106_v16 = vld [vmem:[%s1470_s1 + $0x58] sm:$0xff]   ;;  %v1110_v20 = vld [vmem:[%s1470_s1 + $0x50] sm:$0xff]  }
   0x6   :  { %1034 = vmatprep.subr.bf16.mxu1 %v1095_v5  ;;  %v1103_v13 = vld [vmem:[%s1470_s1 + $0xe0] sm:$0xff]   ;;  %v1107_v17 = vld [vmem:[%s1470_s1 + $0xd8] sm:$0xff]   ;;  %v1111_v21 = vld [vmem:[%s1470_s1 + $0xd0] sm:$0xff]  }
   0x7   :  { %v1104_v14 = vld [vmem:[%s1470_s1 + $0x20] sm:$0xff]   ;;  %v1108_v18 = vld [vmem:[%s1470_s1 + $0x18] sm:$0xff]   ;;  %v1112_v22 = vld [vmem:[%s1470_s1 + $0x10] sm:$0xff]  }
   0x8   :  { %977 = vmatpush3.bf16.msra.mxu0 %v1096_v6  ;;  %v1105_v15 = vld [vmem:[%s1470_s1 + $0xa0] sm:$0xff]   ;;  %v1109_v19 = vld [vmem:[%s1470_s1 + $0x98] sm:$0xff]   ;;  %v1113_v23 = vld [vmem:[%s1470_s1 + $0x90] sm:$0xff]  }
   0x9   :  { %1035 = vmatpush3.bf16.msra.mxu1 %v1097_v7  ;;  %978 = vmatprep.subr.bf16.mxu0 %v1098_v8  ;;  %v1114_v24 = vld [vmem:[%s1470_s1 + $0x48] sm:$0xff]   ;;  %v1118_v28 = vld [vmem:[%s1470_s1 + $0x40] sm:$0xff]  }
   0xa   :  { %1036 = vmatprep.subr.bf16.mxu1 %v1099_v9  ;;  %v1115_v25 = vld [vmem:[%s1470_s1 + $0xc8] sm:$0xff]   ;;  %v1119_v29 = vld [vmem:[%s1470_s1 + $0xc0] sm:$0xff]  }
   0xb   :  { %v1116_v26 = vld [vmem:[%s1470_s1 + $0x8] sm:$0xff]   ;;  %v1120_v30 = vld [vmem:[%s1470_s1] sm:$0xff]  }
   0xc   :  { %979 = vmatpush3.bf16.msra.mxu0 %v1100_v10  ;;  %v1117_v27 = vld [vmem:[%s1470_s1 + $0x88] sm:$0xff]   ;;  %v1121_v31 = vld [vmem:[%s1470_s1 + $0x80] sm:$0xff]  }
   0xd   :  { %1037 = vmatpush3.bf16.msra.mxu1 %v1101_v11  ;;  %980 = vmatprep.subr.bf16.mxu0 %v1102_v12  ;;  %v1122_v32 = vld [vmem:[%s1471_s0] ss:$16 sps:$4 sm:$0xff]   ;;  %v1124_v33 = vld [vmem:[%s1471_s0 + $0x4] ss:$16 sps:$4 sm:$0xff]   ;;  %v1125_v34 = vld [vmem:[%s1471_s0 + $0x8] ss:$16 sps:$4 sm:$0xff]  }
   0xe   :  { %1038 = vmatprep.subr.bf16.mxu1 %v1103_v13  ;;  %v1127_v35 = vld [vmem:[%s1471_s0 + $0xc] ss:$16 sps:$4 sm:$0xff]   ;;  %474 = vmatprep.mubr.bf16.mxu0 %v1124_v33  ;;  %v1128_v36 = vld [vmem:[%s1471_s0 + $0x24] ss:$16 sps:$4 sm:$0xff]   ;;  %v1132_v38 = vld [vmem:[%s1471_s0 + $0x20] ss:$16 sps:$4 sm:$0xff]  }
   0xf   :  { %563 = vmatprep.mubr.bf16.mxu1 %v1127_v35  ;;  %v1130_v37 = vld [vmem:[%s1471_s0 + $0x2c] ss:$16 sps:$4 sm:$0xff]   ;;  %v1133_v39 = vld [vmem:[%s1471_s0 + $0x28] ss:$16 sps:$4 sm:$0xff]   ;;  %v1134_v40 = vld [vmem:[%s1471_s0 + $0x44] ss:$16 sps:$4 sm:$0xff]  }
  0x10   :  { %981 = vmatpush3.bf16.msra.mxu0 %v1104_v14  ;;  %v1136_v41 = vld [vmem:[%s1471_s0 + $0x4c] ss:$16 sps:$4 sm:$0xff]   ;;  %v1138_v42 = vld [vmem:[%s1471_s0 + $0x40] ss:$16 sps:$4 sm:$0xff]   ;;  %v1139_v43 = vld [vmem:[%s1471_s0 + $0x48] ss:$16 sps:$4 sm:$0xff]  }
  0x11   :  { %1039 = vmatpush3.bf16.msra.mxu1 %v1105_v15  ;;  %982 = vmatprep.subr.bf16.mxu0 %v1106_v16  ;;  %v1140_v44 = vld [vmem:[%s1471_s0 + $0x64] ss:$16 sps:$4 sm:$0xff]   ;;  %v1142_v45 = vld [vmem:[%s1471_s0 + $0x6c] ss:$16 sps:$4 sm:$0xff]   ;;  %v1144_v46 = vld [vmem:[%s1471_s0 + $0x60] ss:$16 sps:$4 sm:$0xff]  }
  0x12   :  { %1040 = vmatprep.subr.bf16.mxu1 %v1107_v17  ;;  %v1145_v47 = vld [vmem:[%s1471_s0 + $0x68] ss:$16 sps:$4 sm:$0xff]   ;;  %v1146_v48 = vld [vmem:[%s1471_s0 + $0x84] ss:$16 sps:$4 sm:$0xff]   ;;  %v1148_v49 = vld [vmem:[%s1471_s0 + $0x8c] ss:$16 sps:$4 sm:$0xff]  }
  0x13   :  { %v1150_v50 = vld [vmem:[%s1471_s0 + $0x80] ss:$16 sps:$4 sm:$0xff]   ;;  %v1151_v51 = vld [vmem:[%s1471_s0 + $0x88] ss:$16 sps:$4 sm:$0xff]   ;;  %v1152_v52 = vld [vmem:[%s1471_s0 + $0xa4] ss:$16 sps:$4 sm:$0xff]  }
  0x14   :  { %983 = vmatpush3.bf16.msra.mxu0 %v1108_v18  ;;  %v1154_v53 = vld [vmem:[%s1471_s0 + $0xac] ss:$16 sps:$4 sm:$0xff]   ;;  %v1156_v54 = vld [vmem:[%s1471_s0 + $0xa0] ss:$16 sps:$4 sm:$0xff]   ;;  %v1157_v55 = vld [vmem:[%s1471_s0 + $0xa8] ss:$16 sps:$4 sm:$0xff]  }
  0x15   :  { %1041 = vmatpush3.bf16.msra.mxu1 %v1109_v19  ;;  %984 = vmatprep.subr.bf16.mxu0 %v1110_v20  ;;  %v1158_v56 = vld [vmem:[%s1471_s0 + $0xc4] ss:$16 sps:$4 sm:$0xff]   ;;  %v1160_v57 = vld [vmem:[%s1471_s0 + $0xcc] ss:$16 sps:$4 sm:$0xff]   ;;  %v1162_v58 = vld [vmem:[%s1471_s0 + $0xc0] ss:$16 sps:$4 sm:$0xff]  }
  0x16   :  { %1042 = vmatprep.subr.bf16.mxu1 %v1111_v21  ;;  %v1163_v59 = vld [vmem:[%s1471_s0 + $0xc8] ss:$16 sps:$4 sm:$0xff]  }
  0x18   :  { %985 = vmatpush3.bf16.msra.mxu0 %v1112_v22 }
  0x19   :  { %1043 = vmatpush3.bf16.msra.mxu1 %v1113_v23  ;;  %986 = vmatprep.subr.bf16.mxu0 %v1114_v24 }
  0x1a   :  { %1044 = vmatprep.subr.bf16.mxu1 %v1115_v25 }
  0x1c   :  { %987 = vmatpush3.bf16.msra.mxu0 %v1116_v26 }
  0x1d   :  { %1045 = vmatpush3.bf16.msra.mxu1 %v1117_v27  ;;  %988 = vmatprep.subr.bf16.mxu0 %v1118_v28 }
  0x1e   :  { %1046 = vmatprep.subr.bf16.mxu1 %v1119_v29 }
  0x20   :  { %989 = vmatpush3.bf16.msra.mxu0 %v1120_v30 }
  0x21   :  { %1047 = vmatpush3.bf16.msra.mxu1 %v1121_v31 }
  0x23   :  { %475 = vmatmul.mubr.bf16.vlgmr.msra.gmra.mxu0 %v1122_v32 }
  0x24   :  { %564 = vmatmul.mubr.bf16.vlgmr.msra.gmra.mxu1 %v1125_v34  ;;  %482 = vmatprep.mubr.bf16.mxu0 %v1128_v36 }
  0x25   :  { %571 = vmatprep.mubr.bf16.mxu1 %v1130_v37 }
  0x2b   :  { %483 = vmatmul.mubr.bf16.gmra.mxu0 %v1132_v38 }
  0x2c   :  { %572 = vmatmul.mubr.bf16.gmra.mxu1 %v1133_v39  ;;  %490 = vmatprep.mubr.bf16.mxu0 %v1134_v40 }
  0x2d   :  { %579 = vmatprep.mubr.bf16.mxu1 %v1136_v41 }
  0x33   :  { %491 = vmatmul.mubr.bf16.gmra.mxu0 %v1138_v42 }
  0x34   :  { %580 = vmatmul.mubr.bf16.gmra.mxu1 %v1139_v43  ;;  %498 = vmatprep.mubr.bf16.mxu0 %v1140_v44 }
  0x35   :  { %587 = vmatprep.mubr.bf16.mxu1 %v1142_v45 }
  0x3b   :  { %499 = vmatmul.mubr.bf16.gmra.mxu0 %v1144_v46 }
  0x3c   :  { %588 = vmatmul.mubr.bf16.gmra.mxu1 %v1145_v47  ;;  %506 = vmatprep.mubr.bf16.mxu0 %v1146_v48 }
  0x3d   :  { %595 = vmatprep.mubr.bf16.mxu1 %v1148_v49 }
  0x43   :  { %507 = vmatmul.mubr.bf16.gmra.mxu0 %v1150_v50 }
  0x44   :  { %596 = vmatmul.mubr.bf16.gmra.mxu1 %v1151_v51  ;;  %514 = vmatprep.mubr.bf16.mxu0 %v1152_v52 }
  0x45   :  { %603 = vmatprep.mubr.bf16.mxu1 %v1154_v53 }
  0x4b   :  { %515 = vmatmul.mubr.bf16.gmra.mxu0 %v1156_v54 }
  0x4c   :  { %604 = vmatmul.mubr.bf16.gmra.mxu1 %v1157_v55  ;;  %522 = vmatprep.mubr.bf16.mxu0 %v1158_v56 }
  0x4d   :  { %611 = vmatprep.mubr.bf16.mxu1 %v1160_v57 }
  0x53   :  { %523 = vmatmul.mubr.bf16.gmra.mxu0 %v1162_v58 }
  0x54   :  { %612 = vmatmul.mubr.bf16.gmra.mxu1 %v1163_v59 }
  0xe3   :  { %v990_v60 = vpop.f32.mrf.mxu0 }
  0xe4   :  { %v1048_v61 = vpop.f32.mrf.mxu1 }
  0xe5   :  { %v991_v62 = vpop.f32.mrf.mxu0 }
  0xe6   :  { %v1049_v63 = vpop.f32.mrf.mxu1  ;;  %v992_v24 = vadd.f32 %v991_v62, %v990_v60 }
  0xe7   :  { %v993_v0 = vpop.f32.mrf.mxu0  ;;  %v1050_v25 = vadd.f32 %v1049_v63, %v1048_v61 }
  0xe8   :  { %v1051_v1 = vpop.f32.mrf.mxu1 }
  0xe9   :  { %v994_v2 = vpop.f32.mrf.mxu0  ;;  %v1373_v35 = vadd.f32 %v1050_v25, %v992_v24 }
  0xea   :  { %v1052_v3 = vpop.f32.mrf.mxu1  ;;  %v995_v21 = vadd.f32 %v994_v2, %v993_v0 }
  0xeb   :  { %v996_v4 = vpop.f32.mrf.mxu0  ;;  %v1053_v22 = vadd.f32 %v1052_v3, %v1051_v1  ;;  %v673_v47 = vmul.f32 %v1373_v35, %v1373_v35 }
  0xec   :  { %v1054_v5 = vpop.f32.mrf.mxu1 }
  0xed   :  { %v997_v6 = vpop.f32.mrf.mxu0  ;;  %v1371_v31 = vadd.f32 %v1053_v22, %v995_v21 }
  0xee   :  { %v1055_v7 = vpop.f32.mrf.mxu1  ;;  %v998_v27 = vadd.f32 %v997_v6, %v996_v4 }
  0xef   :  { %v999_v8 = vpop.f32.mrf.mxu0  ;;  %v1056_v28 = vadd.f32 %v1055_v7, %v1054_v5  ;;  %v674_v42 = vmul.f32 %v1371_v31, %v1371_v31  ;;  %v654_v54 = vadd.f32 %v1371_v31, %v1373_v35 }
  0xf0   :  { %v1057_v9 = vpop.f32.mrf.mxu1 }
  0xf1   :  { %v1000_v10 = vpop.f32.mrf.mxu0  ;;  %v1375_v37 = vadd.f32 %v1056_v28, %v998_v27  ;;  %v687_v56 = vadd.f32 %v674_v42, %v673_v47 }
  0xf2   :  { %v1058_v11 = vpop.f32.mrf.mxu1  ;;  %v1001_v32 = vadd.f32 %v1000_v10, %v999_v8 }
  0xf3   :  { %v1002_v12 = vpop.f32.mrf.mxu0  ;;  %v1059_v33 = vadd.f32 %v1058_v11, %v1057_v9  ;;  %v675_v49 = vmul.f32 %v1375_v37, %v1375_v37  ;;  %v655_v60 = vadd.f32 %v654_v54, %v1375_v37 }
  0xf4   :  { %v1060_v13 = vpop.f32.mrf.mxu1 }
  0xf5   :  { %v1003_v14 = vpop.f32.mrf.mxu0  ;;  %v1379_v43 = vadd.f32 %v1059_v33, %v1001_v32  ;;  %v688_v0 = vadd.f32 %v687_v56, %v675_v49 }
  0xf6   :  { %v1061_v15 = vpop.f32.mrf.mxu1  ;;  %v1004_v38 = vadd.f32 %v1003_v14, %v1002_v12 }
  0xf7   :  { %v1005_v16 = vpop.f32.mrf.mxu0  ;;  %v1062_v39 = vadd.f32 %v1061_v15, %v1060_v13  ;;  %v676_v57 = vmul.f32 %v1379_v43, %v1379_v43  ;;  %v656_v4 = vadd.f32 %v655_v60, %v1379_v43 }
  0xf8   :  { %v1063_v17 = vpop.f32.mrf.mxu1 }
  0xf9   :  { %v1006_v18 = vpop.f32.mrf.mxu0  ;;  %v1385_v50 = vadd.f32 %v1062_v39, %v1004_v38  ;;  %v689_v8 = vadd.f32 %v688_v0, %v676_v57 }
  0xfa   :  { %v1064_v19 = vpop.f32.mrf.mxu1  ;;  %v1007_v44 = vadd.f32 %v1006_v18, %v1005_v16 }
  0xfb   :  { %v1008_v20 = vpop.f32.mrf.mxu0  ;;  %v1065_v45 = vadd.f32 %v1064_v19, %v1063_v17  ;;  %v677_v1 = vmul.f32 %v1385_v50, %v1385_v50  ;;  %v657_v11 = vadd.f32 %v656_v4, %v1385_v50 }
  0xfc   :  { %v1066_v23 = vpop.f32.mrf.mxu1 }
  0xfd   :  { %v1009_v26 = vpop.f32.mrf.mxu0  ;;  %v1391_v58 = vadd.f32 %v1065_v45, %v1007_v44  ;;  %v690_v16 = vadd.f32 %v689_v8, %v677_v1 }
  0xfe   :  { %v1067_v29 = vpop.f32.mrf.mxu1  ;;  %v1010_v51 = vadd.f32 %v1009_v26, %v1008_v20 }
  0xff   :  { %v1011_v30 = vpop.f32.mrf.mxu0  ;;  %v1068_v52 = vadd.f32 %v1067_v29, %v1066_v23  ;;  %v678_v9 = vmul.f32 %v1391_v58, %v1391_v58  ;;  %v658_v19 = vadd.f32 %v657_v11, %v1391_v58 }
 0x100   :  { %v1069_v34 = vpop.f32.mrf.mxu1 }
 0x101   :  { %v1012_v36 = vpop.f32.mrf.mxu0  ;;  %v1396_v2 = vadd.f32 %v1068_v52, %v1010_v51  ;;  %v691_v24 = vadd.f32 %v690_v16, %v678_v9 }
 0x102   :  { %v1070_v40 = vpop.f32.mrf.mxu1  ;;  %v1013_v61 = vadd.f32 %v1012_v36, %v1011_v30 }
 0x103   :  { %v1014_v41 = vpop.f32.mrf.mxu0  ;;  %v1071_v62 = vadd.f32 %v1070_v40, %v1069_v34  ;;  %v679_v17 = vmul.f32 %v1396_v2, %v1396_v2  ;;  %v659_v26 = vadd.f32 %v658_v19, %v1396_v2 }
 0x104   :  { %v1072_v46 = vpop.f32.mrf.mxu1 }
 0x105   :  { %v1015_v48 = vpop.f32.mrf.mxu0  ;;  %v1402_v12 = vadd.f32 %v1071_v62, %v1013_v61  ;;  %v692_v30 = vadd.f32 %v691_v24, %v679_v17 }
 0x106   :  { %v1073_v53 = vpop.f32.mrf.mxu1  ;;  %v1016_v5 = vadd.f32 %v1015_v48, %v1014_v41 }
 0x107   :  { %v1017_v55 = vpop.f32.mrf.mxu0  ;;  %v1074_v6 = vadd.f32 %v1073_v53, %v1072_v46  ;;  %v680_v27 = vmul.f32 %v1402_v12, %v1402_v12  ;;  %v660_v34 = vadd.f32 %v659_v26, %v1402_v12 }
 0x108   :  { %v1075_v59 = vpop.f32.mrf.mxu1 }
 0x109   :  { %v1018_v63 = vpop.f32.mrf.mxu0  ;;  %v1407_v20 = vadd.f32 %v1074_v6, %v1016_v5  ;;  %v693_v42 = vadd.f32 %v692_v30, %v680_v27 }
 0x10a   :  { %v1076_v3 = vpop.f32.mrf.mxu1  ;;  %v1019_v13 = vadd.f32 %v1018_v63, %v1017_v55 }
 0x10b   :  { %v1020_v7 = vpop.f32.mrf.mxu0  ;;  %v1077_v14 = vadd.f32 %v1076_v3, %v1075_v59  ;;  %v681_v36 = vmul.f32 %v1407_v20, %v1407_v20  ;;  %v661_v44 = vadd.f32 %v660_v34, %v1407_v20  ;;  %v718_v34 = vlaneseq }
 0x10c   :  { %v1078_v10 = vpop.f32.mrf.mxu1 }
 0x10d   :  { %v1021_v15 = vpop.f32.mrf.mxu0  ;;  %v1412_v28 = vadd.f32 %v1077_v14, %v1019_v13  ;;  %v694_v51 = vadd.f32 %v693_v42, %v681_v36  ;;  %v719_v36 = vshrl.u32 %v718_v34, 7 }
 0x10e   :  { %v1079_v18 = vpop.f32.mrf.mxu1  ;;  %v1022_v21 = vadd.f32 %v1021_v15, %v1020_v7 }
 0x10f   :  { %v1080_v22 = vadd.f32 %v1079_v18, %v1078_v10  ;;  %v1023_v23 = vpop.f32.mrf.mxu0  ;;  %v682_v45 = vmul.f32 %v1412_v28, %v1412_v28  ;;  %v662_v52 = vadd.f32 %v661_v44, %v1412_v28  ;;  %v714_v44 = vld [vmem:[%s1473_s3] sm:$0x1] }
 0x110   :  { %v1081_v25 = vpop.f32.mrf.mxu1 }
 0x111   :  { %v1024_v29 = vpop.f32.mrf.mxu0  ;;  %v1417_v38 = vadd.f32 %v1080_v22, %v1022_v21  ;;  %v695_v57 = vadd.f32 %v694_v51, %v682_v45 }
 0x112   :  { %v1025_v32 = vadd.f32 %v1024_v29, %v1023_v23  ;;  %v1082_v33 = vpop.f32.mrf.mxu1 }
 0x113   :  { %v1083_v39 = vadd.f32 %v1082_v33, %v1081_v25  ;;  %v1026_v40 = vpop.f32.mrf.mxu0  ;;  %v683_v53 = vmul.f32 %v1417_v38, %v1417_v38  ;;  %v663_v59 = vadd.f32 %v662_v52, %v1417_v38 }
 0x114   :  { %v1084_v41 = vpop.f32.mrf.mxu1 }
 0x115   :  { %v1422_v46 = vadd.f32 %v1083_v39, %v1025_v32  ;;  %v1027_v47 = vpop.f32.mrf.mxu0  ;;  %v696_v1 = vadd.f32 %v695_v57, %v683_v53  ;;  %v710_v39 = vld [vmem:[%s1472_s2] sm:$0x1] }
 0x116   :  { %v1028_v48 = vadd.f32 %v1027_v47, %v1026_v40  ;;  %v1085_v49 = vpop.f32.mrf.mxu1  ;;  %v720_v40 = vsub.s32 0, %v719_v36 }
 0x117   :  { %v1086_v54 = vadd.f32 %v1085_v49, %v1084_v41  ;;  %v1029_v55 = vpop.f32.mrf.mxu0  ;;  %v684_v60 = vmul.f32 %v1422_v46, %v1422_v46  ;;  %v664_v3 = vadd.f32 %v663_v59, %v1422_v46 }
 0x118   :  { %v1087_v56 = vpop.f32.mrf.mxu1 }
 0x119   :  { %v614_v61 = vadd.f32 %v1086_v54, %v1028_v48  ;;  %v1030_v62 = vpop.f32.mrf.mxu0  ;;  %v697_v6 = vadd.f32 %v696_v1, %v684_v60 }
 0x11a   :  { %v1031_v63 = vadd.f32 %v1030_v62, %v1029_v55  ;;  %v1088_v0 = vpop.f32.mrf.mxu1 }
 0x11b   :  { %v685_v4 = vmul.f32 %v614_v61, %v614_v61  ;;  %v1089_v5 = vadd.f32 %v1088_v0, %v1087_v56  ;;  %v665_v7 = vadd.f32 %v664_v3, %v614_v61 }
 0x11d   :  { %v617_v8 = vadd.f32 %v1089_v5, %v1031_v63  ;;  %v698_v9 = vadd.f32 %v697_v6, %v685_v4 }
 0x11f   :  { %v666_v10 = vadd.f32 %v665_v7, %v617_v8  ;;  %v686_v11 = vmul.f32 %v617_v8, %v617_v8 }
 0x121   :  { %v667_v13 = vrot.slane %v666_v10, 4  ;;  %v699_v14 = vadd.f32 %v698_v9, %v686_v11 }
 0x123   :  { %v668_v15 = vadd.f32 %v667_v13, %v666_v10  ;;  %v700_v16 = vrot.slane %v699_v14, 4 }
 0x125   :  { %v669_v17 = vrot.slane %v668_v15, 2  ;;  %v701_v18 = vadd.f32 %v700_v16, %v699_v14 }
 0x127   :  { %v670_v19 = vadd.f32 %v669_v17, %v668_v15  ;;  %v702_v21 = vrot.slane %v701_v18, 2 }
 0x129   :  { %v671_v22 = vrot.slane %v670_v19, 1  ;;  %v703_v23 = vadd.f32 %v702_v21, %v701_v18 }
 0x12b   :  { %v672_v24 = vadd.f32 %v671_v22, %v670_v19  ;;  %v704_v25 = vrot.slane %v703_v23, 1 }
 0x12d   :  { %v705_v26 = vadd.f32 %v704_v25, %v703_v23  ;;  %v706_v27 = vmul.f32 0.010204081, %v672_v24 }
 0x12f   :  { %v707_v29 = vmul.f32 0.010204081, %v705_v26  ;;  %v708_v30 = vmul.f32 %v706_v27, %v706_v27 }
 0x131   :  { %v709_v32 = vsub.f32 %v707_v29, %v708_v30 }
 0x133   :  { %v711_v33 = vadd.f32 1e-05, %v709_v32 }
 0x135   :  { %1164 = vrsqrt.f32 %v711_v33 }
 0x142   :  { %v1165_v41 = vpop.eup %1164 }
 0x143   :  { %v713_v42 = vmul.f32 %v1165_v41, %v710_v39 }
 0x145   :  { %v715_v45 = vmul.f32 %v713_v42, %v706_v27  ;;  %v721_v47 = vrot.slane %v713_v42, %v720_v40 }
 0x147   :  { %v716_v48 = vsub.f32 %v714_v44, %v715_v45  ;;  %v723_v49 = vmul.f32 %v721_v47, %v1373_v35  ;;  %v724_v51 = vmul.f32 %v721_v47, %v1371_v31  ;;  %v725_v52 = vmul.f32 %v721_v47, %v1375_v37 }
 0x148   :  { %v726_v53 = vmul.f32 %v721_v47, %v1379_v43  ;;  %v727_v54 = vmul.f32 %v721_v47, %v1385_v50  ;;  %v728_v55 = vmul.f32 %v721_v47, %v1391_v58  ;;  %v729_v56 = vmul.f32 %v721_v47, %v1396_v2 }
 0x149   :  { %v730_v57 = vmul.f32 %v721_v47, %v1402_v12  ;;  %v731_v59 = vmul.f32 %v721_v47, %v1407_v20  ;;  %v732_v60 = vmul.f32 %v721_v47, %v1412_v28  ;;  %v741_v62 = vrot.slane %v716_v48, %v720_v40 }
 0x14a   :  { %v733_v35 = vmul.f32 %v721_v47, %v1417_v38  ;;  %v734_v31 = vmul.f32 %v721_v47, %v1422_v46  ;;  %v735_v37 = vmul.f32 %v721_v47, %v614_v61  ;;  %v736_v63 = vmul.f32 %v721_v47, %v617_v8 }
 0x14b   :  { %v743_v43 = vadd.f32 %v741_v62, %v723_v49  ;;  %v744_v0 = vadd.f32 %v741_v62, %v724_v51  ;;  %v745_v50 = vadd.f32 %v741_v62, %v725_v52  ;;  %v746_v1 = vadd.f32 %v741_v62, %v726_v53 }
 0x14c   :  { %v747_v58 = vadd.f32 %v741_v62, %v727_v54  ;;  %v748_v3 = vadd.f32 %v741_v62, %v728_v55  ;;  %v749_v2 = vadd.f32 %v741_v62, %v729_v56  ;;  %v750_v4 = vadd.f32 %v741_v62, %v730_v57 }
 0x14d   :  { %v751_v12 = vadd.f32 %v741_v62, %v731_v59  ;;  %v752_v5 = vadd.f32 %v741_v62, %v732_v60  ;;  %v753_v20 = vadd.f32 %v741_v62, %v733_v35  ;;  %v754_v6 = vadd.f32 %v741_v62, %v734_v31 }
 0x14e   :  { %v755_v28 = vadd.f32 %v741_v62, %v735_v37  ;;  %v756_v7 = vadd.f32 %v741_v62, %v736_v63  ;;  %v757_v9 = vmax.f32 %v743_v43, 0.0  ;;  %v758_v38 = vmax.f32 %v744_v0, 0.0 }
 0x14f   :  { %v759_v10 = vmax.f32 %v745_v50, 0.0  ;;  %v760_v46 = vmax.f32 %v746_v1, 0.0  ;;  %v761_v61 = vmax.f32 %v747_v58, 0.0  ;;  %v762_v8 = vmax.f32 %v748_v3, 0.0 }
 0x150   :  { %v763_v11 = vmax.f32 %v749_v2, 0.0  ;;  %v764_v13 = vmax.f32 %v750_v4, 0.0  ;;  %v765_v14 = vmax.f32 %v751_v12, 0.0  ;;  %v766_v15 = vmax.f32 %v752_v5, 0.0 }
 0x151   :  { %v767_v16 = vmax.f32 %v753_v20, 0.0  ;;  %v768_v17 = vmax.f32 %v754_v6, 0.0  ;;  %v769_v18 = vmax.f32 %v755_v28, 0.0  ;;  %v770_v19 = vmax.f32 %v756_v7, 0.0 }
 0x152   :  { %v936_v21 = vpack.c.bf16 %v758_v38, %v757_v9  ;;  %v941_v22 = vpack.c.bf16 %v760_v46, %v759_v10  ;;  %v946_v23 = vpack.c.bf16 %v762_v8, %v761_v61  ;;  %v951_v24 = vpack.c.bf16 %v764_v13, %v763_v11 }
 0x153   :  { %v956_v25 = vpack.c.bf16 %v766_v15, %v765_v14  ;;  %v961_v26 = vpack.c.bf16 %v768_v17, %v767_v16  ;;  %v966_v27 = vpack.c.bf16 %v770_v19, %v769_v18 }
 0x154   :  { %937 = vst [vmem:[%s1474_s4] sm:$0xff] %v936_v21   ;;  %968 = vst [vmem:[%s1474_s4 + $0x8] sm:$0xff] %v941_v22  }
 0x155   :  { %969 = vst [vmem:[%s1474_s4 + $0x10] sm:$0xff] %v946_v23   ;;  %970 = vst [vmem:[%s1474_s4 + $0x18] sm:$0xff] %v951_v24  }
 0x156   :  { %971 = vst [vmem:[%s1474_s4 + $0x20] sm:$0xff] %v956_v25   ;;  %972 = vst [vmem:[%s1474_s4 + $0x28] sm:$0xff] %v961_v26  }
 0x157   :  { %973 = vst [vmem:[%s1474_s4 + $0x30] sm:$0xff] %v966_v27  }

// kernel: stem_forward.23
= control target key start
LH: loop header
LB: loop body
LE: loop exit
PB: predicated region body
PF: predicated region fallthrough
CT: control target
= control target key end

     0   :  { %vm83_vm0 = vcmask 1043456   ;;  %vm84_vm1 = vcmask 523268   ;;  %s173_s0 = inlined_call_operand.vmem [shape: bf16[8,192], index: 0, kind: input, shape index: {}]   ;;  %s174_s1 = inlined_call_operand.vmem [shape: bf16[8,192], index: 1, kind: input, shape index: {}]   ;;  %s175_s2 = inlined_call_operand.vmem [shape: bf16[8,192], index: 2, kind: input, shape index: {}]   ;;  %s176_s3 = inlined_call_operand.vmem [shape: bf16[8,192], index: 3, kind: input, shape index: {}]   ;;  %s177_s4 = inlined_call_operand.vmem [shape: bf16[8,192], index: 4, kind: input, shape index: {}]   ;;  %s178_s5 = inlined_call_operand.vmem [shape: bf16[8,192], index: 5, kind: input, shape index: {}]   ;;  %s179_s6 = inlined_call_operand.vmem [shape: bf16[8,192], index: 6, kind: input, shape index: {}]   ;;  %s180_s7 = inlined_call_operand.vmem [shape: bf16[8,192], index: 7, kind: input, shape index: {}]   ;;  %s181_s8 = inlined_call_operand.vmem [shape: bf16[8,192], index: 8, kind: input, shape index: {}]   ;;  %s182_s9 = inlined_call_operand.vmem [shape: bf16[8,192], index: 9, kind: output, shape index: {}]  }
   0x1   :  { %v32_v0 = vld [vmem:[%s173_s0] sm:$0xff]  ;;  %vm85_vm2 = vmor %vm84_vm1, %vm83_vm0 }
   0x2   :  { %v35_v1 = vld [vmem:[%s174_s1] sm:$0xff]  ;;  %v33_v3 = vunpack.c.l.bf16 %v32_v0  ;;  %v34_v4 = vunpack.c.h.bf16 %v32_v0 }
   0x3   :  { %v40_v2 = vld [vmem:[%s175_s2] sm:$0xff]  ;;  %v36_v5 = vunpack.c.l.bf16 %v35_v1  ;;  %v37_v6 = vunpack.c.h.bf16 %v35_v1 }
   0x4   :  { %v45_v7 = vld [vmem:[%s176_s3] sm:$0xff]  ;;  %v41_v8 = vunpack.c.l.bf16 %v40_v2  ;;  %v42_v9 = vunpack.c.h.bf16 %v40_v2 }
   0x5   :  { %v50_v10 = vld [vmem:[%s177_s4] sm:$0xff]  ;;  %v38_v11 = vmax.f32 %v33_v3, %v36_v5  ;;  %v39_v12 = vmax.f32 %v34_v4, %v37_v6  ;;  %v46_v13 = vunpack.c.l.bf16 %v45_v7  ;;  %v47_v14 = vunpack.c.h.bf16 %v45_v7 }
   0x6   :  { %v55_v15 = vld [vmem:[%s178_s5] sm:$0xff]  ;;  %v51_v18 = vunpack.c.l.bf16 %v50_v10  ;;  %v52_v19 = vunpack.c.h.bf16 %v50_v10 }
   0x7   :  { %v43_v16 = vmax.f32 %v38_v11, %v41_v8  ;;  %v44_v17 = vmax.f32 %v39_v12, %v42_v9  ;;  %v60_v20 = vld [vmem:[%s179_s6] sm:$0xff]  ;;  %v56_v23 = vunpack.c.l.bf16 %v55_v15  ;;  %v57_v24 = vunpack.c.h.bf16 %v55_v15 }
   0x8   :  { %v65_v25 = vld [vmem:[%s180_s7] sm:$0xff]  ;;  %v61_v28 = vunpack.c.l.bf16 %v60_v20  ;;  %v62_v29 = vunpack.c.h.bf16 %v60_v20 }
   0x9   :  { %v48_v21 = vmax.f32 %v43_v16, %v46_v13  ;;  %v49_v22 = vmax.f32 %v44_v17, %v47_v14  ;;  %v70_v30 = vld [vmem:[%s181_s8] sm:$0xff]  ;;  %v66_v33 = vunpack.c.l.bf16 %v65_v25  ;;  %v67_v34 = vunpack.c.h.bf16 %v65_v25 }
   0xa   :  { %v71_v37 = vunpack.c.l.bf16 %v70_v30  ;;  %v72_v38 = vunpack.c.h.bf16 %v70_v30 }
   0xb   :  { %v53_v26 = vmax.f32 %v48_v21, %v51_v18  ;;  %v54_v27 = vmax.f32 %v49_v22, %v52_v19 }
   0xd   :  { %v58_v31 = vmax.f32 %v53_v26, %v56_v23  ;;  %v59_v32 = vmax.f32 %v54_v27, %v57_v24 }
   0xf   :  { %v63_v35 = vmax.f32 %v58_v31, %v61_v28  ;;  %v64_v36 = vmax.f32 %v59_v32, %v62_v29 }
  0x11   :  { %v68_v39 = vmax.f32 %v63_v35, %v66_v33  ;;  %v69_v40 = vmax.f32 %v64_v36, %v67_v34 }
  0x13   :  { %v73_v41 = vmax.f32 %v68_v39, %v71_v37  ;;  %v74_v42 = vmax.f32 %v69_v40, %v72_v38 }
  0x15   :  { %v92_v43 = vpack.c.bf16 %v74_v42, %v73_v41 }
  0x17   :  { %86 = vst.msk [vmem:[%s182_s9] sm:$0xff] %vm85_vm2, %v92_v43 }

// kernel: stem_forward.22
= control target key start
LH: loop header
LB: loop body
LE: loop exit
PB: predicated region body
PF: predicated region fallthrough
CT: control target
= control target key end

     0   :  { %s3284_s1 = inlined_call_operand.vmem [shape: bf16[1792,256], index: 1, kind: input, shape index: {}]   ;;  %s3285_s0 = inlined_call_operand.vmem [shape: bf16[16,1792], index: 0, kind: input, shape index: {}]   ;;  %s3286_s2 = inlined_call_operand.vmem [shape: f32[1,256], index: 2, kind: input, shape index: {}]   ;;  %s3287_s3 = inlined_call_operand.vmem [shape: f32[1,256], index: 3, kind: input, shape index: {}]   ;;  %s3288_s4 = inlined_call_operand.vmem [shape: bf16[16,256], index: 4, kind: output, shape index: {}]  }
   0x1   :  { %v2147_v0 = vld [vmem:[%s3284_s1 + $0x74] ss:$8 sps:$4 sm:$0xff]   ;;  %v2151_v2 = vld [vmem:[%s3284_s1 + $0x70] ss:$8 sps:$4 sm:$0xff]   ;;  %v2153_v4 = vld [vmem:[%s3284_s1 + $0x64] ss:$8 sps:$4 sm:$0xff]  }
   0x2   :  { %v2149_v1 = vld [vmem:[%s3284_s1 + $0x174] ss:$8 sps:$4 sm:$0xff]   ;;  %1445 = vmatprep.subr.bf16.mxu0 %v2147_v0  ;;  %v2152_v3 = vld [vmem:[%s3284_s1 + $0x170] ss:$8 sps:$4 sm:$0xff]   ;;  %v2155_v5 = vld [vmem:[%s3284_s1 + $0x164] ss:$8 sps:$4 sm:$0xff]  }
   0x3   :  { %1488 = vmatprep.subr.bf16.mxu1 %v2149_v1  ;;  %1446 = vmatpush1.bf16.msra.mxu0 %v2151_v2  ;;  %v2157_v6 = vld [vmem:[%s3284_s1 + $0x60] ss:$8 sps:$4 sm:$0xff]   ;;  %v2159_v8 = vld [vmem:[%s3284_s1 + $0x54] ss:$8 sps:$4 sm:$0xff]   ;;  %v2163_v10 = vld [vmem:[%s3284_s1 + $0x50] ss:$8 sps:$4 sm:$0xff]  }
   0x4   :  { %1489 = vmatpush1.bf16.msra.mxu1 %v2152_v3  ;;  %1447 = vmatprep.subr.bf16.mxu0 %v2153_v4  ;;  %v2158_v7 = vld [vmem:[%s3284_s1 + $0x160] ss:$8 sps:$4 sm:$0xff]   ;;  %v2161_v9 = vld [vmem:[%s3284_s1 + $0x154] ss:$8 sps:$4 sm:$0xff]   ;;  %v2164_v11 = vld [vmem:[%s3284_s1 + $0x150] ss:$8 sps:$4 sm:$0xff]  }
   0x5   :  { %1490 = vmatprep.subr.bf16.mxu1 %v2155_v5  ;;  %v2165_v12 = vld [vmem:[%s3284_s1 + $0x44] ss:$8 sps:$4 sm:$0xff]   ;;  %v2169_v14 = vld [vmem:[%s3284_s1 + $0x40] ss:$8 sps:$4 sm:$0xff]   ;;  %v2171_v16 = vld [vmem:[%s3284_s1 + $0x34] ss:$8 sps:$4 sm:$0xff]  }
   0x6   :  { %v2167_v13 = vld [vmem:[%s3284_s1 + $0x144] ss:$8 sps:$4 sm:$0xff]   ;;  %v2170_v15 = vld [vmem:[%s3284_s1 + $0x140] ss:$8 sps:$4 sm:$0xff]   ;;  %v2173_v17 = vld [vmem:[%s3284_s1 + $0x134] ss:$8 sps:$4 sm:$0xff]  }
   0x7   :  { %1448 = vmatpush1.bf16.msra.mxu0 %v2157_v6  ;;  %v2175_v18 = vld [vmem:[%s3284_s1 + $0x30] ss:$8 sps:$4 sm:$0xff]   ;;  %v2177_v20 = vld [vmem:[%s3284_s1 + $0x24] ss:$8 sps:$4 sm:$0xff]   ;;  %v2181_v22 = vld [vmem:[%s3284_s1 + $0x20] ss:$8 sps:$4 sm:$0xff]  }
   0x8   :  { %1491 = vmatpush1.bf16.msra.mxu1 %v2158_v7  ;;  %1449 = vmatprep.subr.bf16.mxu0 %v2159_v8  ;;  %v2176_v19 = vld [vmem:[%s3284_s1 + $0x130] ss:$8 sps:$4 sm:$0xff]   ;;  %v2179_v21 = vld [vmem:[%s3284_s1 + $0x124] ss:$8 sps:$4 sm:$0xff]   ;;  %v2182_v23 = vld [vmem:[%s3284_s1 + $0x120] ss:$8 sps:$4 sm:$0xff]  }
   0x9   :  { %1492 = vmatprep.subr.bf16.mxu1 %v2161_v9  ;;  %v2183_v24 = vld [vmem:[%s3284_s1 + $0x14] ss:$8 sps:$4 sm:$0xff]   ;;  %v2187_v26 = vld [vmem:[%s3284_s1 + $0x10] ss:$8 sps:$4 sm:$0xff]   ;;  %v2189_v28 = vld [vmem:[%s3284_s1 + $0x4] ss:$8 sps:$4 sm:$0xff]  }
   0xa   :  { %v2185_v25 = vld [vmem:[%s3284_s1 + $0x114] ss:$8 sps:$4 sm:$0xff]   ;;  %v2188_v27 = vld [vmem:[%s3284_s1 + $0x110] ss:$8 sps:$4 sm:$0xff]   ;;  %v2191_v29 = vld [vmem:[%s3284_s1 + $0x104] ss:$8 sps:$4 sm:$0xff]  }
   0xb   :  { %1450 = vmatpush1.bf16.msra.mxu0 %v2163_v10  ;;  %v2193_v30 = vld [vmem:[%s3284_s1] ss:$8 sps:$4 sm:$0xff]   ;;  %v2195_v32 = vld [vmem:[%s3284_s1 + $0xf4] ss:$8 sps:$4 sm:$0xff]   ;;  %v2199_v34 = vld [vmem:[%s3284_s1 + $0xf0] ss:$8 sps:$4 sm:$0xff]  }
   0xc   :  { %1493 = vmatpush1.bf16.msra.mxu1 %v2164_v11  ;;  %1451 = vmatprep.subr.bf16.mxu0 %v2165_v12  ;;  %v2194_v31 = vld [vmem:[%s3284_s1 + $0x100] ss:$8 sps:$4 sm:$0xff]   ;;  %v2197_v33 = vld [vmem:[%s3284_s1 + $0x1f4] ss:$8 sps:$4 sm:$0xff]   ;;  %v2200_v35 = vld [vmem:[%s3284_s1 + $0x1f0] ss:$8 sps:$4 sm:$0xff]  }
   0xd   :  { %1494 = vmatprep.subr.bf16.mxu1 %v2167_v13  ;;  %v2201_v36 = vld [vmem:[%s3284_s1 + $0xe4] ss:$8 sps:$4 sm:$0xff]   ;;  %v2205_v38 = vld [vmem:[%s3284_s1 + $0xe0] ss:$8 sps:$4 sm:$0xff]   ;;  %v2207_v40 = vld [vmem:[%s3284_s1 + $0xd4] ss:$8 sps:$4 sm:$0xff]  }
   0xe   :  { %v2203_v37 = vld [vmem:[%s3284_s1 + $0x1e4] ss:$8 sps:$4 sm:$0xff]   ;;  %v2206_v39 = vld [vmem:[%s3284_s1 + $0x1e0] ss:$8 sps:$4 sm:$0xff]   ;;  %v2209_v41 = vld [vmem:[%s3284_s1 + $0x1d4] ss:$8 sps:$4 sm:$0xff]  }
   0xf   :  { %1452 = vmatpush1.bf16.msra.mxu0 %v2169_v14  ;;  %v2211_v42 = vld [vmem:[%s3284_s1 + $0xd0] ss:$8 sps:$4 sm:$0xff]   ;;  %v2213_v44 = vld [vmem:[%s3284_s1 + $0xc4] ss:$8 sps:$4 sm:$0xff]   ;;  %v2217_v46 = vld [vmem:[%s3284_s1 + $0xc0] ss:$8 sps:$4 sm:$0xff]  }
  0x10   :  { %1495 = vmatpush1.bf16.msra.mxu1 %v2170_v15  ;;  %1453 = vmatprep.subr.bf16.mxu0 %v2171_v16  ;;  %v2212_v43 = vld [vmem:[%s3284_s1 + $0x1d0] ss:$8 sps:$4 sm:$0xff]   ;;  %v2215_v45 = vld [vmem:[%s3284_s1 + $0x1c4] ss:$8 sps:$4 sm:$0xff]   ;;  %v2218_v47 = vld [vmem:[%s3284_s1 + $0x1c0] ss:$8 sps:$4 sm:$0xff]  }
  0x11   :  { %1496 = vmatprep.subr.bf16.mxu1 %v2173_v17  ;;  %v2219_v48 = vld [vmem:[%s3284_s1 + $0xb4] ss:$8 sps:$4 sm:$0xff]   ;;  %v2248_v51 = vld [vmem:[%s3285_s0 + $0xc] ss:$56 sps:$4 sm:$0xff]   ;;  %v2223_v52 = vld [vmem:[%s3284_s1 + $0xb0] ss:$8 sps:$4 sm:$0xff]  }
  0x12   :  { %v2245_v49 = vld [vmem:[%s3285_s0 + $0x4] ss:$56 sps:$4 sm:$0xff]   ;;  %v2224_v53 = vld [vmem:[%s3284_s1 + $0x1b0] ss:$8 sps:$4 sm:$0xff]   ;;  %1520 = vmatprep.mubr.bf16.mxu1 %v2248_v51  ;;  %v2229_v56 = vld [vmem:[%s3284_s1 + $0xa0] ss:$8 sps:$4 sm:$0xff]  }
  0x13   :  { %1454 = vmatpush1.bf16.msra.mxu0 %v2175_v18  ;;  %v2221_v50 = vld [vmem:[%s3284_s1 + $0x1b4] ss:$8 sps:$4 sm:$0xff]   ;;  %1477 = vmatprep.mubr.bf16.mxu0 %v2245_v49  ;;  %v2225_v54 = vld [vmem:[%s3284_s1 + $0xa4] ss:$8 sps:$4 sm:$0xff]   ;;  %v2230_v57 = vld [vmem:[%s3284_s1 + $0x1a0] ss:$8 sps:$4 sm:$0xff]  }
  0x14   :  { %1497 = vmatpush1.bf16.msra.mxu1 %v2176_v19  ;;  %1455 = vmatprep.subr.bf16.mxu0 %v2177_v20  ;;  %v2227_v55 = vld [vmem:[%s3284_s1 + $0x1a4] ss:$8 sps:$4 sm:$0xff]   ;;  %v2231_v58 = vld [vmem:[%s3284_s1 + $0x94] ss:$8 sps:$4 sm:$0xff]   ;;  %v2235_v60 = vld [vmem:[%s3284_s1 + $0x90] ss:$8 sps:$4 sm:$0xff]  }
  0x15   :  { %1498 = vmatprep.subr.bf16.mxu1 %v2179_v21  ;;  %v2233_v59 = vld [vmem:[%s3284_s1 + $0x194] ss:$8 sps:$4 sm:$0xff]   ;;  %v2236_v61 = vld [vmem:[%s3284_s1 + $0x190] ss:$8 sps:$4 sm:$0xff]   ;;  %v2237_v62 = vld [vmem:[%s3284_s1 + $0x84] ss:$8 sps:$4 sm:$0xff]  }
  0x16   :  { %v2239_v63 = vld [vmem:[%s3284_s1 + $0x184] ss:$8 sps:$4 sm:$0xff]   ;;  %v2241_v0 = vld [vmem:[%s3284_s1 + $0x80] ss:$8 sps:$4 sm:$0xff]   ;;  %v2251_v2 = vld [vmem:[%s3284_s1 + $0x274] ss:$8 sps:$4 sm:$0xff]  }
  0x17   :  { %1456 = vmatpush1.bf16.msra.mxu0 %v2181_v22  ;;  %v2242_v1 = vld [vmem:[%s3284_s1 + $0x180] ss:$8 sps:$4 sm:$0xff]   ;;  %v2254_v3 = vld [vmem:[%s3284_s1 + $0x374] ss:$8 sps:$4 sm:$0xff]   ;;  %v2249_v6 = vld [vmem:[%s3284_s1 + $0x270] ss:$8 sps:$4 sm:$0xff]  }
  0x18   :  { %1499 = vmatpush1.bf16.msra.mxu1 %v2182_v23  ;;  %1457 = vmatprep.subr.bf16.mxu0 %v2183_v24  ;;  %v2243_v4 = vld [vmem:[%s3285_s0] ss:$56 sps:$4 sm:$0xff]   ;;  %v2257_v8 = vld [vmem:[%s3284_s1 + $0x264] ss:$8 sps:$4 sm:$0xff]   ;;  %v2263_v12 = vld [vmem:[%s3284_s1 + $0x254] ss:$8 sps:$4 sm:$0xff]  }
  0x19   :  { %1500 = vmatprep.subr.bf16.mxu1 %v2185_v25  ;;  %v2246_v5 = vld [vmem:[%s3285_s0 + $0x8] ss:$56 sps:$4 sm:$0xff]   ;;  %v2252_v7 = vld [vmem:[%s3284_s1 + $0x370] ss:$8 sps:$4 sm:$0xff]   ;;  %v2260_v9 = vld [vmem:[%s3284_s1 + $0x364] ss:$8 sps:$4 sm:$0xff]  }
  0x1a   :  { %v2255_v10 = vld [vmem:[%s3284_s1 + $0x260] ss:$8 sps:$4 sm:$0xff]   ;;  %v2266_v13 = vld [vmem:[%s3284_s1 + $0x354] ss:$8 sps:$4 sm:$0xff]   ;;  %v2261_v14 = vld [vmem:[%s3284_s1 + $0x250] ss:$8 sps:$4 sm:$0xff]  }
  0x1b   :  { %1458 = vmatpush1.bf16.msra.mxu0 %v2187_v26  ;;  %v2258_v11 = vld [vmem:[%s3284_s1 + $0x360] ss:$8 sps:$4 sm:$0xff]   ;;  %v2264_v15 = vld [vmem:[%s3284_s1 + $0x350] ss:$8 sps:$4 sm:$0xff]   ;;  %v2269_v16 = vld [vmem:[%s3284_s1 + $0x244] ss:$8 sps:$4 sm:$0xff]  }
  0x1c   :  { %1501 = vmatpush1.bf16.msra.mxu1 %v2188_v27  ;;  %1459 = vmatprep.subr.bf16.mxu0 %v2189_v28  ;;  %v2272_v17 = vld [vmem:[%s3284_s1 + $0x344] ss:$8 sps:$4 sm:$0xff]   ;;  %v2267_v18 = vld [vmem:[%s3284_s1 + $0x240] ss:$8 sps:$4 sm:$0xff]   ;;  %v2275_v20 = vld [vmem:[%s3284_s1 + $0x234] ss:$8 sps:$4 sm:$0xff]  }
  0x1d   :  { %1502 = vmatprep.subr.bf16.mxu1 %v2191_v29  ;;  %v2270_v19 = vld [vmem:[%s3284_s1 + $0x340] ss:$8 sps:$4 sm:$0xff]   ;;  %v2278_v21 = vld [vmem:[%s3284_s1 + $0x334] ss:$8 sps:$4 sm:$0xff]   ;;  %v2273_v22 = vld [vmem:[%s3284_s1 + $0x230] ss:$8 sps:$4 sm:$0xff]  }
  0x1e   :  { %v2276_v23 = vld [vmem:[%s3284_s1 + $0x330] ss:$8 sps:$4 sm:$0xff]   ;;  %v2281_v24 = vld [vmem:[%s3284_s1 + $0x224] ss:$8 sps:$4 sm:$0xff]   ;;  %v2279_v26 = vld [vmem:[%s3284_s1 + $0x220] ss:$8 sps:$4 sm:$0xff]  }
  0x1f   :  { %1460 = vmatpush1.bf16.msra.mxu0 %v2193_v30  ;;  %v2284_v25 = vld [vmem:[%s3284_s1 + $0x324] ss:$8 sps:$4 sm:$0xff]   ;;  %v2282_v27 = vld [vmem:[%s3284_s1 + $0x320] ss:$8 sps:$4 sm:$0xff]   ;;  %v2287_v28 = vld [vmem:[%s3284_s1 + $0x214] ss:$8 sps:$4 sm:$0xff]  }
  0x20   :  { %1503 = vmatpush1.bf16.msra.mxu1 %v2194_v31  ;;  %1461 = vmatprep.subr.bf16.mxu0 %v2195_v32  ;;  %v2290_v29 = vld [vmem:[%s3284_s1 + $0x314] ss:$8 sps:$4 sm:$0xff]   ;;  %v2285_v30 = vld [vmem:[%s3284_s1 + $0x210] ss:$8 sps:$4 sm:$0xff]   ;;  %v2293_v32 = vld [vmem:[%s3284_s1 + $0x204] ss:$8 sps:$4 sm:$0xff]  }
  0x21   :  { %1504 = vmatprep.subr.bf16.mxu1 %v2197_v33  ;;  %v2288_v31 = vld [vmem:[%s3284_s1 + $0x310] ss:$8 sps:$4 sm:$0xff]   ;;  %v2296_v33 = vld [vmem:[%s3284_s1 + $0x304] ss:$8 sps:$4 sm:$0xff]  }
  0x22   :  { %v2312_v49 = vld [vmem:[%s3284_s1 + $0x3d0] ss:$8 sps:$4 sm:$0xff]   ;;  %v2320_v51 = vld [vmem:[%s3284_s1 + $0x3c4] ss:$8 sps:$4 sm:$0xff]  }
  0x23   :  { %1462 = vmatpush2.bf16.msra.mxu0 %v2199_v34  ;;  %v2347_v34 = vld [vmem:[%s3285_s0 + $0x14] ss:$56 sps:$4 sm:$0xff]  }
  0x24   :  { %1505 = vmatpush2.bf16.msra.mxu1 %v2200_v35  ;;  %1463 = vmatprep.subr.bf16.mxu0 %v2201_v36  ;;  %v2291_v35 = vld [vmem:[%s3284_s1 + $0x200] ss:$8 sps:$4 sm:$0xff]  }
  0x25   :  { %1506 = vmatprep.subr.bf16.mxu1 %v2203_v37  ;;  %v2294_v36 = vld [vmem:[%s3284_s1 + $0x300] ss:$8 sps:$4 sm:$0xff]   ;;  %v2353_v37 = vld [vmem:[%s3285_s0 + $0x1c] ss:$56 sps:$4 sm:$0xff]  }
  0x27   :  { %1464 = vmatpush2.bf16.msra.mxu0 %v2205_v38  ;;  %v2299_v38 = vld [vmem:[%s3284_s1 + $0x2f4] ss:$8 sps:$4 sm:$0xff]  }
  0x28   :  { %1507 = vmatpush2.bf16.msra.mxu1 %v2206_v39  ;;  %1465 = vmatprep.subr.bf16.mxu0 %v2207_v40  ;;  %v2302_v39 = vld [vmem:[%s3284_s1 + $0x3f4] ss:$8 sps:$4 sm:$0xff]   ;;  %v2297_v40 = vld [vmem:[%s3284_s1 + $0x2f0] ss:$8 sps:$4 sm:$0xff]  }
  0x29   :  { %1508 = vmatprep.subr.bf16.mxu1 %v2209_v41  ;;  %v2300_v41 = vld [vmem:[%s3284_s1 + $0x3f0] ss:$8 sps:$4 sm:$0xff]  }
  0x2b   :  { %1466 = vmatpush2.bf16.msra.mxu0 %v2211_v42  ;;  %v2305_v42 = vld [vmem:[%s3284_s1 + $0x2e4] ss:$8 sps:$4 sm:$0xff]  }
  0x2c   :  { %1509 = vmatpush2.bf16.msra.mxu1 %v2212_v43  ;;  %1467 = vmatprep.subr.bf16.mxu0 %v2213_v44  ;;  %v2308_v43 = vld [vmem:[%s3284_s1 + $0x3e4] ss:$8 sps:$4 sm:$0xff]   ;;  %v2303_v44 = vld [vmem:[%s3284_s1 + $0x2e0] ss:$8 sps:$4 sm:$0xff]  }
  0x2d   :  { %1510 = vmatprep.subr.bf16.mxu1 %v2215_v45  ;;  %v2306_v45 = vld [vmem:[%s3284_s1 + $0x3e0] ss:$8 sps:$4 sm:$0xff]  }
  0x2f   :  { %1468 = vmatpush2.bf16.msra.mxu0 %v2217_v46  ;;  %v2311_v46 = vld [vmem:[%s3284_s1 + $0x2d4] ss:$8 sps:$4 sm:$0xff]  }
  0x30   :  { %1511 = vmatpush2.bf16.msra.mxu1 %v2218_v47  ;;  %1469 = vmatprep.subr.bf16.mxu0 %v2219_v48  ;;  %v2314_v47 = vld [vmem:[%s3284_s1 + $0x3d4] ss:$8 sps:$4 sm:$0xff]   ;;  %v2309_v48 = vld [vmem:[%s3284_s1 + $0x2d0] ss:$8 sps:$4 sm:$0xff]  }
  0x31   :  { %1512 = vmatprep.subr.bf16.mxu1 %v2221_v50  ;;  %v2317_v50 = vld [vmem:[%s3284_s1 + $0x2c4] ss:$8 sps:$4 sm:$0xff]  }
  0x33   :  { %1470 = vmatpush2.bf16.msra.mxu0 %v2223_v52  ;;  %v2315_v52 = vld [vmem:[%s3284_s1 + $0x2c0] ss:$8 sps:$4 sm:$0xff]  }
  0x34   :  { %1513 = vmatpush2.bf16.msra.mxu1 %v2224_v53  ;;  %1471 = vmatprep.subr.bf16.mxu0 %v2225_v54  ;;  %v2318_v53 = vld [vmem:[%s3284_s1 + $0x3c0] ss:$8 sps:$4 sm:$0xff]   ;;  %v2323_v54 = vld [vmem:[%s3284_s1 + $0x2b4] ss:$8 sps:$4 sm:$0xff]  }
  0x35   :  { %1514 = vmatprep.subr.bf16.mxu1 %v2227_v55  ;;  %v2326_v55 = vld [vmem:[%s3284_s1 + $0x3b4] ss:$8 sps:$4 sm:$0xff]  }
  0x37   :  { %1472 = vmatpush2.bf16.msra.mxu0 %v2229_v56  ;;  %v2321_v56 = vld [vmem:[%s3284_s1 + $0x2b0] ss:$8 sps:$4 sm:$0xff]  }
  0x38   :  { %1515 = vmatpush2.bf16.msra.mxu1 %v2230_v57  ;;  %1473 = vmatprep.subr.bf16.mxu0 %v2231_v58  ;;  %v2324_v57 = vld [vmem:[%s3284_s1 + $0x3b0] ss:$8 sps:$4 sm:$0xff]   ;;  %v2329_v58 = vld [vmem:[%s3284_s1 + $0x2a4] ss:$8 sps:$4 sm:$0xff]  }
  0x39   :  { %1516 = vmatprep.subr.bf16.mxu1 %v2233_v59  ;;  %v2332_v59 = vld [vmem:[%s3284_s1 + $0x3a4] ss:$8 sps:$4 sm:$0xff]  }
  0x3b   :  { %1474 = vmatpush2.bf16.msra.mxu0 %v2235_v60  ;;  %v2327_v60 = vld [vmem:[%s3284_s1 + $0x2a0] ss:$8 sps:$4 sm:$0xff]  }
  0x3c   :  { %1517 = vmatpush2.bf16.msra.mxu1 %v2236_v61  ;;  %1475 = vmatprep.subr.bf16.mxu0 %v2237_v62  ;;  %v2330_v61 = vld [vmem:[%s3284_s1 + $0x3a0] ss:$8 sps:$4 sm:$0xff]   ;;  %v2335_v62 = vld [vmem:[%s3284_s1 + $0x294] ss:$8 sps:$4 sm:$0xff]  }
  0x3d   :  { %1518 = vmatprep.subr.bf16.mxu1 %v2239_v63  ;;  %v2338_v63 = vld [vmem:[%s3284_s1 + $0x394] ss:$8 sps:$4 sm:$0xff]  }
  0x3f   :  { %1476 = vmatpush2.bf16.msra.mxu0 %v2241_v0  ;;  %v2333_v0 = vld [vmem:[%s3284_s1 + $0x290] ss:$8 sps:$4 sm:$0xff]  }
  0x40   :  { %1519 = vmatpush2.bf16.msra.mxu1 %v2242_v1  ;;  %1531 = vmatprep.subr.bf16.mxu0 %v2251_v2  ;;  %v2336_v1 = vld [vmem:[%s3284_s1 + $0x390] ss:$8 sps:$4 sm:$0xff]   ;;  %v2341_v2 = vld [vmem:[%s3284_s1 + $0x284] ss:$8 sps:$4 sm:$0xff]  }
  0x41   :  { %1574 = vmatprep.subr.bf16.mxu1 %v2254_v3  ;;  %v2344_v3 = vld [vmem:[%s3284_s1 + $0x384] ss:$8 sps:$4 sm:$0xff]  }
  0x42   :  { %1478 = vmatmul.mubr.bf16.vlgmr.msra.gmra.mxu0 %v2243_v4  ;;  %v2339_v4 = vld [vmem:[%s3284_s1 + $0x280] ss:$8 sps:$4 sm:$0xff]  }
  0x43   :  { %1521 = vmatmul.mubr.bf16.vlgmr.msra.gmra.mxu1 %v2246_v5  ;;  %1532 = vmatpush1.bf16.msra.mxu0 %v2249_v6  ;;  %v2342_v5 = vld [vmem:[%s3284_s1 + $0x380] ss:$8 sps:$4 sm:$0xff]   ;;  %v2350_v6 = vld [vmem:[%s3284_s1 + $0x474] ss:$8 sps:$4 sm:$0xff]  }
  0x44   :  { %1575 = vmatpush1.bf16.msra.mxu1 %v2252_v7  ;;  %1533 = vmatprep.subr.bf16.mxu0 %v2257_v8  ;;  %v2356_v7 = vld [vmem:[%s3284_s1 + $0x574] ss:$8 sps:$4 sm:$0xff]   ;;  %v2345_v8 = vld [vmem:[%s3285_s0 + $0x10] ss:$56 sps:$4 sm:$0xff]  }
  0x45   :  { %1576 = vmatprep.subr.bf16.mxu1 %v2260_v9  ;;  %1563 = vmatprep.mubr.bf16.mxu0 %v2347_v34  ;;  %v2348_v9 = vld [vmem:[%s3284_s1 + $0x470] ss:$8 sps:$4 sm:$0xff]   ;;  %v2389_v34 = vld [vmem:[%s3284_s1 + $0x414] ss:$8 sps:$4 sm:$0xff]  }
  0x46   :  { %1606 = vmatprep.mubr.bf16.mxu1 %v2353_v37  ;;  %v2390_v37 = vld [vmem:[%s3284_s1 + $0x510] ss:$8 sps:$4 sm:$0xff]  }
  0x47   :  { %1534 = vmatpush1.bf16.msra.mxu0 %v2255_v10  ;;  %v2351_v10 = vld [vmem:[%s3285_s0 + $0x18] ss:$56 sps:$4 sm:$0xff]  }
  0x48   :  { %1577 = vmatpush1.bf16.msra.mxu1 %v2258_v11  ;;  %1535 = vmatprep.subr.bf16.mxu0 %v2263_v12  ;;  %v2354_v11 = vld [vmem:[%s3284_s1 + $0x570] ss:$8 sps:$4 sm:$0xff]   ;;  %v2359_v12 = vld [vmem:[%s3284_s1 + $0x464] ss:$8 sps:$4 sm:$0xff]  }
  0x49   :  { %1578 = vmatprep.subr.bf16.mxu1 %v2266_v13  ;;  %v2362_v13 = vld [vmem:[%s3284_s1 + $0x564] ss:$8 sps:$4 sm:$0xff]  }
  0x4b   :  { %1536 = vmatpush1.bf16.msra.mxu0 %v2261_v14  ;;  %v2357_v14 = vld [vmem:[%s3284_s1 + $0x460] ss:$8 sps:$4 sm:$0xff]  }
  0x4c   :  { %1579 = vmatpush1.bf16.msra.mxu1 %v2264_v15  ;;  %1537 = vmatprep.subr.bf16.mxu0 %v2269_v16  ;;  %v2360_v15 = vld [vmem:[%s3284_s1 + $0x560] ss:$8 sps:$4 sm:$0xff]   ;;  %v2365_v16 = vld [vmem:[%s3284_s1 + $0x454] ss:$8 sps:$4 sm:$0xff]  }
  0x4d   :  { %1580 = vmatprep.subr.bf16.mxu1 %v2272_v17  ;;  %v2368_v17 = vld [vmem:[%s3284_s1 + $0x554] ss:$8 sps:$4 sm:$0xff]  }
  0x4f   :  { %1538 = vmatpush1.bf16.msra.mxu0 %v2267_v18  ;;  %v2363_v18 = vld [vmem:[%s3284_s1 + $0x450] ss:$8 sps:$4 sm:$0xff]  }
  0x50   :  { %1581 = vmatpush1.bf16.msra.mxu1 %v2270_v19  ;;  %1539 = vmatprep.subr.bf16.mxu0 %v2275_v20  ;;  %v2449_v19 = vld [vmem:[%s3285_s0 + $0x24] ss:$56 sps:$4 sm:$0xff]   ;;  %v2366_v20 = vld [vmem:[%s3284_s1 + $0x550] ss:$8 sps:$4 sm:$0xff]  }
  0x51   :  { %1582 = vmatprep.subr.bf16.mxu1 %v2278_v21  ;;  %v2371_v21 = vld [vmem:[%s3284_s1 + $0x444] ss:$8 sps:$4 sm:$0xff]  }
  0x53   :  { %1540 = vmatpush1.bf16.msra.mxu0 %v2273_v22  ;;  %v2374_v22 = vld [vmem:[%s3284_s1 + $0x544] ss:$8 sps:$4 sm:$0xff]  }
  0x54   :  { %1583 = vmatpush1.bf16.msra.mxu1 %v2276_v23  ;;  %1541 = vmatprep.subr.bf16.mxu0 %v2281_v24  ;;  %v2455_v23 = vld [vmem:[%s3285_s0 + $0x2c] ss:$56 sps:$4 sm:$0xff]   ;;  %v2369_v24 = vld [vmem:[%s3284_s1 + $0x440] ss:$8 sps:$4 sm:$0xff]  }
  0x55   :  { %1584 = vmatprep.subr.bf16.mxu1 %v2284_v25  ;;  %v2372_v25 = vld [vmem:[%s3284_s1 + $0x540] ss:$8 sps:$4 sm:$0xff]  }
  0x57   :  { %1542 = vmatpush1.bf16.msra.mxu0 %v2279_v26  ;;  %v2377_v26 = vld [vmem:[%s3284_s1 + $0x434] ss:$8 sps:$4 sm:$0xff]  }
  0x58   :  { %1585 = vmatpush1.bf16.msra.mxu1 %v2282_v27  ;;  %1543 = vmatprep.subr.bf16.mxu0 %v2287_v28  ;;  %v2380_v27 = vld [vmem:[%s3284_s1 + $0x534] ss:$8 sps:$4 sm:$0xff]   ;;  %v2375_v28 = vld [vmem:[%s3284_s1 + $0x430] ss:$8 sps:$4 sm:$0xff]  }
  0x59   :  { %1586 = vmatprep.subr.bf16.mxu1 %v2290_v29  ;;  %v2378_v29 = vld [vmem:[%s3284_s1 + $0x530] ss:$8 sps:$4 sm:$0xff]  }
  0x5b   :  { %1544 = vmatpush1.bf16.msra.mxu0 %v2285_v30  ;;  %v2383_v30 = vld [vmem:[%s3284_s1 + $0x424] ss:$8 sps:$4 sm:$0xff]  }
  0x5c   :  { %1587 = vmatpush1.bf16.msra.mxu1 %v2288_v31  ;;  %1545 = vmatprep.subr.bf16.mxu0 %v2293_v32  ;;  %v2386_v31 = vld [vmem:[%s3284_s1 + $0x524] ss:$8 sps:$4 sm:$0xff]   ;;  %v2381_v32 = vld [vmem:[%s3284_s1 + $0x420] ss:$8 sps:$4 sm:$0xff]  }
  0x5d   :  { %1588 = vmatprep.subr.bf16.mxu1 %v2296_v33  ;;  %v2384_v33 = vld [vmem:[%s3284_s1 + $0x520] ss:$8 sps:$4 sm:$0xff]  }
  0x5f   :  { %1546 = vmatpush1.bf16.msra.mxu0 %v2291_v35  ;;  %v2392_v35 = vld [vmem:[%s3284_s1 + $0x514] ss:$8 sps:$4 sm:$0xff]  }
  0x60   :  { %1589 = vmatpush1.bf16.msra.mxu1 %v2294_v36  ;;  %1547 = vmatprep.subr.bf16.mxu0 %v2299_v38  ;;  %v2387_v36 = vld [vmem:[%s3284_s1 + $0x410] ss:$8 sps:$4 sm:$0xff]   ;;  %v2395_v38 = vld [vmem:[%s3284_s1 + $0x404] ss:$8 sps:$4 sm:$0xff]  }
  0x61   :  { %1590 = vmatprep.subr.bf16.mxu1 %v2302_v39  ;;  %v2398_v39 = vld [vmem:[%s3284_s1 + $0x504] ss:$8 sps:$4 sm:$0xff]  }
  0x63   :  { %1548 = vmatpush2.bf16.msra.mxu0 %v2297_v40  ;;  %v2393_v40 = vld [vmem:[%s3284_s1 + $0x400] ss:$8 sps:$4 sm:$0xff]  }
  0x64   :  { %1591 = vmatpush2.bf16.msra.mxu1 %v2300_v41  ;;  %1549 = vmatprep.subr.bf16.mxu0 %v2305_v42  ;;  %v2396_v41 = vld [vmem:[%s3284_s1 + $0x500] ss:$8 sps:$4 sm:$0xff]   ;;  %v2401_v42 = vld [vmem:[%s3284_s1 + $0x4f4] ss:$8 sps:$4 sm:$0xff]  }
  0x65   :  { %1592 = vmatprep.subr.bf16.mxu1 %v2308_v43  ;;  %v2404_v43 = vld [vmem:[%s3284_s1 + $0x5f4] ss:$8 sps:$4 sm:$0xff]  }
  0x67   :  { %1550 = vmatpush2.bf16.msra.mxu0 %v2303_v44  ;;  %v2399_v44 = vld [vmem:[%s3284_s1 + $0x4f0] ss:$8 sps:$4 sm:$0xff]  }
  0x68   :  { %1593 = vmatpush2.bf16.msra.mxu1 %v2306_v45  ;;  %1551 = vmatprep.subr.bf16.mxu0 %v2311_v46  ;;  %v2402_v45 = vld [vmem:[%s3284_s1 + $0x5f0] ss:$8 sps:$4 sm:$0xff]   ;;  %v2407_v46 = vld [vmem:[%s3284_s1 + $0x4e4] ss:$8 sps:$4 sm:$0xff]  }
  0x69   :  { %1594 = vmatprep.subr.bf16.mxu1 %v2314_v47  ;;  %v2410_v47 = vld [vmem:[%s3284_s1 + $0x5e4] ss:$8 sps:$4 sm:$0xff]  }
  0x6b   :  { %1552 = vmatpush2.bf16.msra.mxu0 %v2309_v48  ;;  %v2405_v48 = vld [vmem:[%s3284_s1 + $0x4e0] ss:$8 sps:$4 sm:$0xff]  }
  0x6c   :  { %1595 = vmatpush2.bf16.msra.mxu1 %v2312_v49  ;;  %1553 = vmatprep.subr.bf16.mxu0 %v2317_v50  ;;  %v2408_v49 = vld [vmem:[%s3284_s1 + $0x5e0] ss:$8 sps:$4 sm:$0xff]   ;;  %v2413_v50 = vld [vmem:[%s3284_s1 + $0x4d4] ss:$8 sps:$4 sm:$0xff]  }
  0x6d   :  { %1596 = vmatprep.subr.bf16.mxu1 %v2320_v51  ;;  %v2416_v51 = vld [vmem:[%s3284_s1 + $0x5d4] ss:$8 sps:$4 sm:$0xff]  }
  0x6f   :  { %1554 = vmatpush2.bf16.msra.mxu0 %v2315_v52  ;;  %v2411_v52 = vld [vmem:[%s3284_s1 + $0x4d0] ss:$8 sps:$4 sm:$0xff]  }
  0x70   :  { %1597 = vmatpush2.bf16.msra.mxu1 %v2318_v53  ;;  %1555 = vmatprep.subr.bf16.mxu0 %v2323_v54  ;;  %v2414_v53 = vld [vmem:[%s3284_s1 + $0x5d0] ss:$8 sps:$4 sm:$0xff]   ;;  %v2419_v54 = vld [vmem:[%s3284_s1 + $0x4c4] ss:$8 sps:$4 sm:$0xff]  }
  0x71   :  { %1598 = vmatprep.subr.bf16.mxu1 %v2326_v55  ;;  %v2422_v55 = vld [vmem:[%s3284_s1 + $0x5c4] ss:$8 sps:$4 sm:$0xff]  }
  0x73   :  { %1556 = vmatpush2.bf16.msra.mxu0 %v2321_v56  ;;  %v2417_v56 = vld [vmem:[%s3284_s1 + $0x4c0] ss:$8 sps:$4 sm:$0xff]  }
  0x74   :  { %1599 = vmatpush2.bf16.msra.mxu1 %v2324_v57  ;;  %1557 = vmatprep.subr.bf16.mxu0 %v2329_v58  ;;  %v2420_v57 = vld [vmem:[%s3284_s1 + $0x5c0] ss:$8 sps:$4 sm:$0xff]   ;;  %v2425_v58 = vld [vmem:[%s3284_s1 + $0x4b4] ss:$8 sps:$4 sm:$0xff]  }
  0x75   :  { %1600 = vmatprep.subr.bf16.mxu1 %v2332_v59  ;;  %v2428_v59 = vld [vmem:[%s3284_s1 + $0x5b4] ss:$8 sps:$4 sm:$0xff]  }
  0x77   :  { %1558 = vmatpush2.bf16.msra.mxu0 %v2327_v60  ;;  %v2423_v60 = vld [vmem:[%s3284_s1 + $0x4b0] ss:$8 sps:$4 sm:$0xff]  }
  0x78   :  { %1601 = vmatpush2.bf16.msra.mxu1 %v2330_v61  ;;  %1559 = vmatprep.subr.bf16.mxu0 %v2335_v62  ;;  %v2426_v61 = vld [vmem:[%s3284_s1 + $0x5b0] ss:$8 sps:$4 sm:$0xff]   ;;  %v2431_v62 = vld [vmem:[%s3284_s1 + $0x4a4] ss:$8 sps:$4 sm:$0xff]  }
  0x79   :  { %1602 = vmatprep.subr.bf16.mxu1 %v2338_v63  ;;  %v2434_v63 = vld [vmem:[%s3284_s1 + $0x5a4] ss:$8 sps:$4 sm:$0xff]  }
  0x7b   :  { %1560 = vmatpush2.bf16.msra.mxu0 %v2333_v0  ;;  %v2429_v0 = vld [vmem:[%s3284_s1 + $0x4a0] ss:$8 sps:$4 sm:$0xff]  }
  0x7c   :  { %1603 = vmatpush2.bf16.msra.mxu1 %v2336_v1  ;;  %1561 = vmatprep.subr.bf16.mxu0 %v2341_v2  ;;  %v2432_v1 = vld [vmem:[%s3284_s1 + $0x5a0] ss:$8 sps:$4 sm:$0xff]   ;;  %v2437_v2 = vld [vmem:[%s3284_s1 + $0x494] ss:$8 sps:$4 sm:$0xff]  }
  0x7d   :  { %1604 = vmatprep.subr.bf16.mxu1 %v2344_v3  ;;  %v2440_v3 = vld [vmem:[%s3284_s1 + $0x594] ss:$8 sps:$4 sm:$0xff]  }
  0x7f   :  { %1562 = vmatpush2.bf16.msra.mxu0 %v2339_v4  ;;  %v2435_v4 = vld [vmem:[%s3284_s1 + $0x490] ss:$8 sps:$4 sm:$0xff]  }
  0x80   :  { %1605 = vmatpush2.bf16.msra.mxu1 %v2342_v5  ;;  %1617 = vmatprep.subr.bf16.mxu0 %v2350_v6  ;;  %v2438_v5 = vld [vmem:[%s3284_s1 + $0x590] ss:$8 sps:$4 sm:$0xff]   ;;  %v2443_v6 = vld [vmem:[%s3284_s1 + $0x484] ss:$8 sps:$4 sm:$0xff]  }
  0x81   :  { %1660 = vmatprep.subr.bf16.mxu1 %v2356_v7  ;;  %v2446_v7 = vld [vmem:[%s3284_s1 + $0x584] ss:$8 sps:$4 sm:$0xff]  }
  0x82   :  { %1564 = vmatmul.mubr.bf16.vlgmr.msra.gmra.mxu0 %v2345_v8  ;;  %v2441_v8 = vld [vmem:[%s3284_s1 + $0x480] ss:$8 sps:$4 sm:$0xff]  }
  0x83   :  { %1607 = vmatmul.mubr.bf16.vlgmr.msra.gmra.mxu1 %v2351_v10  ;;  %1618 = vmatpush1.bf16.msra.mxu0 %v2348_v9  ;;  %v2444_v9 = vld [vmem:[%s3284_s1 + $0x580] ss:$8 sps:$4 sm:$0xff]   ;;  %v2452_v10 = vld [vmem:[%s3284_s1 + $0x674] ss:$8 sps:$4 sm:$0xff]  }
  0x84   :  { %1661 = vmatpush1.bf16.msra.mxu1 %v2354_v11  ;;  %1619 = vmatprep.subr.bf16.mxu0 %v2359_v12  ;;  %v2447_v11 = vld [vmem:[%s3285_s0 + $0x20] ss:$56 sps:$4 sm:$0xff]  }
  0x85   :  { %1662 = vmatprep.subr.bf16.mxu1 %v2362_v13  ;;  %1649 = vmatprep.mubr.bf16.mxu0 %v2449_v19  ;;  %v2453_v12 = vld [vmem:[%s3285_s0 + $0x28] ss:$56 sps:$4 sm:$0xff]   ;;  %v2450_v13 = vld [vmem:[%s3284_s1 + $0x670] ss:$8 sps:$4 sm:$0xff]   ;;  %v2464_v19 = vld [vmem:[%s3284_s1 + $0x644] ss:$8 sps:$4 sm:$0xff]  }
  0x86   :  { %1692 = vmatprep.mubr.bf16.mxu1 %v2455_v23  ;;  %v2470_v23 = vld [vmem:[%s3284_s1 + $0x624] ss:$8 sps:$4 sm:$0xff]  }
  0x87   :  { %1620 = vmatpush1.bf16.msra.mxu0 %v2357_v14  ;;  %v2503_v14 = vld [vmem:[%s3285_s0 + $0x34] ss:$56 sps:$4 sm:$0xff]  }
  0x88   :  { %1663 = vmatpush1.bf16.msra.mxu1 %v2360_v15  ;;  %1621 = vmatprep.subr.bf16.mxu0 %v2365_v16  ;;  %v2458_v15 = vld [vmem:[%s3284_s1 + $0x664] ss:$8 sps:$4 sm:$0xff]   ;;  %v2456_v16 = vld [vmem:[%s3284_s1 + $0x660] ss:$8 sps:$4 sm:$0xff]  }
  0x89   :  { %1664 = vmatprep.subr.bf16.mxu1 %v2368_v17  ;;  %v2461_v17 = vld [vmem:[%s3284_s1 + $0x654] ss:$8 sps:$4 sm:$0xff]  }
  0x8b   :  { %1622 = vmatpush1.bf16.msra.mxu0 %v2363_v18  ;;  %v2459_v18 = vld [vmem:[%s3284_s1 + $0x650] ss:$8 sps:$4 sm:$0xff]  }
  0x8c   :  { %1665 = vmatpush1.bf16.msra.mxu1 %v2366_v20  ;;  %1623 = vmatprep.subr.bf16.mxu0 %v2371_v21  ;;  %v2462_v20 = vld [vmem:[%s3284_s1 + $0x640] ss:$8 sps:$4 sm:$0xff]   ;;  %v2467_v21 = vld [vmem:[%s3284_s1 + $0x634] ss:$8 sps:$4 sm:$0xff]  }
  0x8d   :  { %1666 = vmatprep.subr.bf16.mxu1 %v2374_v22  ;;  %v2465_v22 = vld [vmem:[%s3284_s1 + $0x630] ss:$8 sps:$4 sm:$0xff]  }
  0x8f   :  { %1624 = vmatpush1.bf16.msra.mxu0 %v2369_v24  ;;  %v2468_v24 = vld [vmem:[%s3284_s1 + $0x620] ss:$8 sps:$4 sm:$0xff]  }
  0x90   :  { %1667 = vmatpush1.bf16.msra.mxu1 %v2372_v25  ;;  %1625 = vmatprep.subr.bf16.mxu0 %v2377_v26  ;;  %v2473_v25 = vld [vmem:[%s3284_s1 + $0x614] ss:$8 sps:$4 sm:$0xff]   ;;  %v2471_v26 = vld [vmem:[%s3284_s1 + $0x610] ss:$8 sps:$4 sm:$0xff]  }
  0x91   :  { %1668 = vmatprep.subr.bf16.mxu1 %v2380_v27  ;;  %v2476_v27 = vld [vmem:[%s3284_s1 + $0x604] ss:$8 sps:$4 sm:$0xff]  }
  0x93   :  { %1626 = vmatpush1.bf16.msra.mxu0 %v2375_v28  ;;  %v2474_v28 = vld [vmem:[%s3284_s1 + $0x600] ss:$8 sps:$4 sm:$0xff]  }
  0x94   :  { %1669 = vmatpush1.bf16.msra.mxu1 %v2378_v29  ;;  %1627 = vmatprep.subr.bf16.mxu0 %v2383_v30  ;;  %v2479_v29 = vld [vmem:[%s3284_s1 + $0x6f4] ss:$8 sps:$4 sm:$0xff]   ;;  %v2477_v30 = vld [vmem:[%s3284_s1 + $0x6f0] ss:$8 sps:$4 sm:$0xff]  }
  0x95   :  { %1670 = vmatprep.subr.bf16.mxu1 %v2386_v31  ;;  %v2482_v31 = vld [vmem:[%s3284_s1 + $0x6e4] ss:$8 sps:$4 sm:$0xff]  }
  0x97   :  { %1628 = vmatpush1.bf16.msra.mxu0 %v2381_v32  ;;  %v2480_v32 = vld [vmem:[%s3284_s1 + $0x6e0] ss:$8 sps:$4 sm:$0xff]  }
  0x98   :  { %1671 = vmatpush1.bf16.msra.mxu1 %v2384_v33  ;;  %1629 = vmatprep.subr.bf16.mxu0 %v2389_v34  ;;  %v2485_v33 = vld [vmem:[%s3284_s1 + $0x6d4] ss:$8 sps:$4 sm:$0xff]   ;;  %v2483_v34 = vld [vmem:[%s3284_s1 + $0x6d0] ss:$8 sps:$4 sm:$0xff]  }
  0x99   :  { %1672 = vmatprep.subr.bf16.mxu1 %v2392_v35  ;;  %v2488_v35 = vld [vmem:[%s3284_s1 + $0x6c4] ss:$8 sps:$4 sm:$0xff]  }
  0x9b   :  { %1630 = vmatpush1.bf16.msra.mxu0 %v2387_v36  ;;  %v2486_v36 = vld [vmem:[%s3284_s1 + $0x6c0] ss:$8 sps:$4 sm:$0xff]  }
  0x9c   :  { %1673 = vmatpush1.bf16.msra.mxu1 %v2390_v37  ;;  %1631 = vmatprep.subr.bf16.mxu0 %v2395_v38  ;;  %v2491_v37 = vld [vmem:[%s3284_s1 + $0x6b4] ss:$8 sps:$4 sm:$0xff]   ;;  %v2489_v38 = vld [vmem:[%s3284_s1 + $0x6b0] ss:$8 sps:$4 sm:$0xff]  }
  0x9d   :  { %1674 = vmatprep.subr.bf16.mxu1 %v2398_v39  ;;  %v2494_v39 = vld [vmem:[%s3284_s1 + $0x6a4] ss:$8 sps:$4 sm:$0xff]  }
  0x9f   :  { %1632 = vmatpush1.bf16.msra.mxu0 %v2393_v40  ;;  %v2492_v40 = vld [vmem:[%s3284_s1 + $0x6a0] ss:$8 sps:$4 sm:$0xff]  }
  0xa0   :  { %1675 = vmatpush1.bf16.msra.mxu1 %v2396_v41  ;;  %1633 = vmatprep.subr.bf16.mxu0 %v2401_v42  ;;  %v2497_v41 = vld [vmem:[%s3284_s1 + $0x694] ss:$8 sps:$4 sm:$0xff]   ;;  %v2495_v42 = vld [vmem:[%s3284_s1 + $0x690] ss:$8 sps:$4 sm:$0xff]  }
  0xa1   :  { %1676 = vmatprep.subr.bf16.mxu1 %v2404_v43  ;;  %v2500_v43 = vld [vmem:[%s3284_s1 + $0x684] ss:$8 sps:$4 sm:$0xff]  }
  0xa3   :  { %1634 = vmatpush2.bf16.msra.mxu0 %v2399_v44  ;;  %v2498_v44 = vld [vmem:[%s3284_s1 + $0x680] ss:$8 sps:$4 sm:$0xff]  }
  0xa4   :  { %1677 = vmatpush2.bf16.msra.mxu1 %v2402_v45  ;;  %1635 = vmatprep.subr.bf16.mxu0 %v2407_v46  ;;  %v2501_v45 = vld [vmem:[%s3285_s0 + $0x30] ss:$56 sps:$4 sm:$0xff]  }
  0xa5   :  { %1678 = vmatprep.subr.bf16.mxu1 %v2410_v47 }
  0xa7   :  { %1636 = vmatpush2.bf16.msra.mxu0 %v2405_v48 }
  0xa8   :  { %1679 = vmatpush2.bf16.msra.mxu1 %v2408_v49  ;;  %1637 = vmatprep.subr.bf16.mxu0 %v2413_v50 }
  0xa9   :  { %1680 = vmatprep.subr.bf16.mxu1 %v2416_v51 }
  0xab   :  { %1638 = vmatpush2.bf16.msra.mxu0 %v2411_v52 }
  0xac   :  { %1681 = vmatpush2.bf16.msra.mxu1 %v2414_v53  ;;  %1639 = vmatprep.subr.bf16.mxu0 %v2419_v54 }
  0xad   :  { %1682 = vmatprep.subr.bf16.mxu1 %v2422_v55 }
  0xaf   :  { %1640 = vmatpush2.bf16.msra.mxu0 %v2417_v56 }
  0xb0   :  { %1683 = vmatpush2.bf16.msra.mxu1 %v2420_v57  ;;  %1641 = vmatprep.subr.bf16.mxu0 %v2425_v58 }
  0xb1   :  { %1684 = vmatprep.subr.bf16.mxu1 %v2428_v59 }
  0xb3   :  { %1642 = vmatpush2.bf16.msra.mxu0 %v2423_v60 }
  0xb4   :  { %1685 = vmatpush2.bf16.msra.mxu1 %v2426_v61  ;;  %1643 = vmatprep.subr.bf16.mxu0 %v2431_v62 }
  0xb5   :  { %1686 = vmatprep.subr.bf16.mxu1 %v2434_v63 }
  0xb7   :  { %1644 = vmatpush2.bf16.msra.mxu0 %v2429_v0 }
  0xb8   :  { %1687 = vmatpush2.bf16.msra.mxu1 %v2432_v1  ;;  %1645 = vmatprep.subr.bf16.mxu0 %v2437_v2 }
  0xb9   :  { %1688 = vmatprep.subr.bf16.mxu1 %v2440_v3 }
  0xbb   :  { %1646 = vmatpush2.bf16.msra.mxu0 %v2435_v4 }
  0xbc   :  { %1689 = vmatpush2.bf16.msra.mxu1 %v2438_v5  ;;  %1647 = vmatprep.subr.bf16.mxu0 %v2443_v6 }
  0xbd   :  { %1690 = vmatprep.subr.bf16.mxu1 %v2446_v7 }
  0xbf   :  { %1648 = vmatpush2.bf16.msra.mxu0 %v2441_v8 }
  0xc0   :  { %1691 = vmatpush2.bf16.msra.mxu1 %v2444_v9  ;;  %1703 = vmatprep.subr.bf16.mxu0 %v2452_v10 }
  0xc2   :  { %1650 = vmatmul.mubr.bf16.vlgmr.msra.gmra.mxu0 %v2447_v11 }
  0xc3   :  { %1693 = vmatmul.mubr.bf16.vlgmr.msra.gmra.mxu1 %v2453_v12  ;;  %1704 = vmatpush1.bf16.msra.mxu0 %v2450_v13 }
  0xc4   :  { %1735 = vmatprep.mubr.bf16.mxu0 %v2503_v14  ;;  %1705 = vmatprep.subr.bf16.mxu0 %v2458_v15 }
  0xc7   :  { %1706 = vmatpush1.bf16.msra.mxu0 %v2456_v16 }
  0xc8   :  { %1707 = vmatprep.subr.bf16.mxu0 %v2461_v17 }
  0xcb   :  { %1708 = vmatpush1.bf16.msra.mxu0 %v2459_v18 }
  0xcc   :  { %1709 = vmatprep.subr.bf16.mxu0 %v2464_v19 }
  0xcf   :  { %1710 = vmatpush1.bf16.msra.mxu0 %v2462_v20 }
  0xd0   :  { %1711 = vmatprep.subr.bf16.mxu0 %v2467_v21 }
  0xd3   :  { %1712 = vmatpush1.bf16.msra.mxu0 %v2465_v22 }
  0xd4   :  { %1713 = vmatprep.subr.bf16.mxu0 %v2470_v23 }
  0xd7   :  { %1714 = vmatpush1.bf16.msra.mxu0 %v2468_v24 }
  0xd8   :  { %1715 = vmatprep.subr.bf16.mxu0 %v2473_v25 }
  0xdb   :  { %1716 = vmatpush1.bf16.msra.mxu0 %v2471_v26 }
  0xdc   :  { %1717 = vmatprep.subr.bf16.mxu0 %v2476_v27 }
  0xdf   :  { %1718 = vmatpush1.bf16.msra.mxu0 %v2474_v28 }
  0xe0   :  { %1719 = vmatprep.subr.bf16.mxu0 %v2479_v29 }
  0xe3   :  { %1720 = vmatpush2.bf16.msra.mxu0 %v2477_v30 }
  0xe4   :  { %1721 = vmatprep.subr.bf16.mxu0 %v2482_v31 }
  0xe7   :  { %1722 = vmatpush2.bf16.msra.mxu0 %v2480_v32 }
  0xe8   :  { %1723 = vmatprep.subr.bf16.mxu0 %v2485_v33 }
  0xeb   :  { %1724 = vmatpush2.bf16.msra.mxu0 %v2483_v34 }
  0xec   :  { %1725 = vmatprep.subr.bf16.mxu0 %v2488_v35 }
  0xef   :  { %1726 = vmatpush2.bf16.msra.mxu0 %v2486_v36 }
  0xf0   :  { %1727 = vmatprep.subr.bf16.mxu0 %v2491_v37 }
  0xf3   :  { %1728 = vmatpush2.bf16.msra.mxu0 %v2489_v38 }
  0xf4   :  { %1729 = vmatprep.subr.bf16.mxu0 %v2494_v39 }
  0xf7   :  { %1730 = vmatpush2.bf16.msra.mxu0 %v2492_v40 }
  0xf8   :  { %1731 = vmatprep.subr.bf16.mxu0 %v2497_v41 }
  0xfb   :  { %1732 = vmatpush2.bf16.msra.mxu0 %v2495_v42 }
  0xfc   :  { %1733 = vmatprep.subr.bf16.mxu0 %v2500_v43 }
  0xff   :  { %1734 = vmatpush2.bf16.msra.mxu0 %v2498_v44 }
 0x102   :  { %1736 = vmatmul.mubr.bf16.vlgmr.msra.gmra.mxu0 %v2501_v45  ;;  %v1479_v46 = vpop.f32.mrf.mxu0 }
 0x103   :  { %v1522_v47 = vpop.f32.mrf.mxu1 }
 0x104   :  { %v1481_v48 = vpop.f32.mrf.mxu0  ;;  %v1523_v63 = vadd.f32 %v1522_v47, %v1479_v46 }
 0x105   :  { %v1524_v49 = vpop.f32.mrf.mxu1 }
 0x106   :  { %v1483_v50 = vpop.f32.mrf.mxu0  ;;  %v1525_v0 = vadd.f32 %v1524_v49, %v1481_v48 }
 0x107   :  { %v1526_v51 = vpop.f32.mrf.mxu1 }
 0x108   :  { %v1485_v52 = vpop.f32.mrf.mxu0  ;;  %v1527_v3 = vadd.f32 %v1526_v51, %v1483_v50 }
 0x109   :  { %v1528_v54 = vpop.f32.mrf.mxu1 }
 0x10a   :  { %v1529_v6 = vadd.f32 %v1528_v54, %v1485_v52 }
 0x142   :  { %v1565_v53 = vpop.f32.mrf.mxu0 }
 0x143   :  { %v1608_v56 = vpop.f32.mrf.mxu1  ;;  %v1566_v4 = vadd.f32 %v1565_v53, %v1523_v63 }
 0x144   :  { %v1567_v55 = vpop.f32.mrf.mxu0 }
 0x145   :  { %v1610_v58 = vpop.f32.mrf.mxu1  ;;  %v1568_v5 = vadd.f32 %v1567_v55, %v1525_v0  ;;  %v1609_v10 = vadd.f32 %v1608_v56, %v1566_v4 }
 0x146   :  { %v1569_v57 = vpop.f32.mrf.mxu0 }
 0x147   :  { %v1612_v60 = vpop.f32.mrf.mxu1  ;;  %v1570_v7 = vadd.f32 %v1569_v57, %v1527_v3  ;;  %v1611_v12 = vadd.f32 %v1610_v58, %v1568_v5 }
 0x148   :  { %v1571_v59 = vpop.f32.mrf.mxu0 }
 0x149   :  { %v1614_v62 = vpop.f32.mrf.mxu1  ;;  %v1572_v11 = vadd.f32 %v1571_v59, %v1529_v6  ;;  %v1613_v13 = vadd.f32 %v1612_v60, %v1570_v7 }
 0x14b   :  { %v1615_v18 = vadd.f32 %v1614_v62, %v1572_v11 }
 0x182   :  { %v1651_v61 = vpop.f32.mrf.mxu0 }
 0x183   :  { %v1694_v2 = vpop.f32.mrf.mxu1  ;;  %v1652_v14 = vadd.f32 %v1651_v61, %v1609_v10 }
 0x184   :  { %v1653_v1 = vpop.f32.mrf.mxu0 }
 0x185   :  { %v1696_v9 = vpop.f32.mrf.mxu1  ;;  %v1654_v15 = vadd.f32 %v1653_v1, %v1611_v12  ;;  %v1695_v21 = vadd.f32 %v1694_v2, %v1652_v14  ;;  %v2508_v12 = vmov 1966171168   ;;  %v1815_v14 = vlaneseq }
 0x186   :  { %v1655_v8 = vpop.f32.mrf.mxu0 }
 0x187   :  { %v1698_v17 = vpop.f32.mrf.mxu1  ;;  %v1656_v19 = vadd.f32 %v1655_v8, %v1613_v13  ;;  %v1697_v23 = vadd.f32 %v1696_v9, %v1654_v15  ;;  %v1813_v13 = vunpack.c.l.s4 %v2508_v12 }
 0x188   :  { %v1657_v16 = vpop.f32.mrf.mxu0 }
 0x189   :  { %v1658_v22 = vadd.f32 %v1657_v16, %v1615_v18  ;;  %v1700_v24 = vpop.f32.mrf.mxu1  ;;  %v1699_v26 = vadd.f32 %v1698_v17, %v1656_v19  ;;  %v1814_v15 = vunpack.c.0.s8 %v1813_v13  ;;  %v1816_v16 = vshrl.u32 %v1815_v14, 7 }
 0x18b   :  { %v1701_v30 = vadd.f32 %v1700_v24, %v1658_v22  ;;  %v1817_v18 = vsub.s32 %v1814_v15, %v1816_v16  ;;  %v1804_v22 = vld [vmem:[%s3286_s2] sm:$0x3]  ;;  %v1832_v24 = vsub.s32 0, %v1816_v16 }
 0x1c2   :  { %v1737_v20 = vpop.f32.mrf.mxu0 }
 0x1c3   :  { %v3248_v27 = vadd.f32 %v1737_v20, %v1695_v21 }
 0x1c4   :  { %v1739_v25 = vpop.f32.mrf.mxu0 }
 0x1c5   :  { %v3250_v28 = vadd.f32 %v1739_v25, %v1697_v23  ;;  %v1778_v33 = vmul.f32 %v3248_v27, %v3248_v27  ;;  %v1836_v25 = vsub.s32 1, %v1816_v16 }
 0x1c6   :  { %v1741_v29 = vpop.f32.mrf.mxu0 }
 0x1c7   :  { %v3252_v31 = vadd.f32 %v1741_v29, %v1699_v26  ;;  %v1779_v37 = vmul.f32 %v3250_v28, %v3250_v28 }
 0x1c8   :  { %v1743_v32 = vpop.f32.mrf.mxu0 }
 0x1c9   :  { %v1764_v34 = vadd.f32 %v3252_v31, %v3248_v27  ;;  %v1780_v35 = vmul.f32 %v3252_v31, %v3252_v31  ;;  %v3260_v36 = vadd.f32 %v1743_v32, %v1701_v30 }
 0x1cb   :  { %v1765_v38 = vrot.slane %v1764_v34, 4  ;;  %v1782_v39 = vadd.f32 %v1780_v35, %v1778_v33  ;;  %v1771_v40 = vadd.f32 %v3260_v36, %v3250_v28  ;;  %v1781_v41 = vmul.f32 %v3260_v36, %v3260_v36 }
 0x1cd   :  { %v1766_v42 = vadd.f32 %v1765_v38, %v1764_v34  ;;  %v1783_v43 = vrot.slane %v1782_v39, 4  ;;  %v1772_v44 = vrot.slane %v1771_v40, 4  ;;  %v1789_v45 = vadd.f32 %v1781_v41, %v1779_v37  ;;  %v1828_v37 = vld [vmem:[%s3287_s3] sm:$0x3] }
 0x1cf   :  { %v1767_v46 = vrot.slane %v1766_v42, 2  ;;  %v1784_v47 = vadd.f32 %v1783_v43, %v1782_v39  ;;  %v1773_v48 = vadd.f32 %v1772_v44, %v1771_v40  ;;  %v1790_v49 = vrot.slane %v1789_v45, 4 }
 0x1d1   :  { %v1768_v50 = vadd.f32 %v1767_v46, %v1766_v42  ;;  %v1785_v51 = vrot.slane %v1784_v47, 2  ;;  %v1774_v52 = vrot.slane %v1773_v48, 2  ;;  %v1791_v53 = vadd.f32 %v1790_v49, %v1789_v45 }
 0x1d3   :  { %v1769_v54 = vrot.slane %v1768_v50, 1  ;;  %v1786_v55 = vadd.f32 %v1785_v51, %v1784_v47  ;;  %v1775_v56 = vadd.f32 %v1774_v52, %v1773_v48  ;;  %v1792_v57 = vrot.slane %v1791_v53, 2 }
 0x1d5   :  { %v1770_v58 = vadd.f32 %v1769_v54, %v1768_v50  ;;  %v1787_v59 = vrot.slane %v1786_v55, 1  ;;  %v1776_v60 = vrot.slane %v1775_v56, 1  ;;  %v1793_v61 = vadd.f32 %v1792_v57, %v1791_v53 }
 0x1d7   :  { %v1788_v62 = vadd.f32 %v1787_v59, %v1786_v55  ;;  %v1796_v63 = vmul.f32 0.125, %v1770_v58  ;;  %v1777_v0 = vadd.f32 %v1776_v60, %v1775_v56  ;;  %v1794_v1 = vrot.slane %v1793_v61, 1 }
 0x1d9   :  { %v1798_v2 = vmul.f32 0.125, %v1788_v62  ;;  %v1800_v3 = vmul.f32 %v1796_v63, %v1796_v63  ;;  %v1795_v4 = vadd.f32 %v1794_v1, %v1793_v61  ;;  %v1797_v5 = vmul.f32 0.125, %v1777_v0 }
 0x1db   :  { %v1802_v6 = vsub.f32 %v1798_v2, %v1800_v3  ;;  %v1799_v7 = vmul.f32 0.125, %v1795_v4  ;;  %v1801_v8 = vmul.f32 %v1797_v5, %v1797_v5 }
 0x1dd   :  { %v1805_v9 = vadd.f32 1e-05, %v1802_v6  ;;  %v1803_v10 = vsub.f32 %v1799_v7, %v1801_v8 }
 0x1df   :  { %v1806_v11 = vadd.f32 1e-05, %v1803_v10  ;;  %2504 = vrsqrt.f32 %v1805_v9 }
 0x1e1   :  { %2506 = vrsqrt.f32 %v1806_v11 }
 0x1ec   :  { %v2505_v17 = vpop.eup %2504 }
 0x1ee   :  { %v2507_v19 = vpop.eup %2506 }
 0x1ef   :  { %v1811_v20 = vcombine.low %v2505_v17, %v2507_v19 }
 0x1f1   :  { %v1818_v21 = vrot.slane %v1811_v20, %v1817_v18 }
 0x1f3   :  { %v1825_v23 = vrot.slane %v1818_v21, %v1817_v18 }
 0x1f5   :  { %v1827_v26 = vmul.f32 %v1825_v23, %v1804_v22 }
 0x1f7   :  { %v1833_v29 = vrot.slane %v1827_v26, %v1832_v24  ;;  %v1837_v30 = vrot.slane %v1827_v26, %v1836_v25 }
 0x1f9   :  { %v1840_v32 = vmul.f32 %v1833_v29, %v1796_v63  ;;  %v1841_v33 = vmul.f32 %v1837_v30, %v1797_v5  ;;  %v1861_v40 = vmul.f32 %v1833_v29, %v3248_v27  ;;  %v1862_v41 = vmul.f32 %v1837_v30, %v3250_v28 }
 0x1fa   :  { %v1863_v42 = vmul.f32 %v1833_v29, %v3252_v31  ;;  %v1864_v43 = vmul.f32 %v1837_v30, %v3260_v36 }
 0x1fb   :  { %v1844_v34 = vcombine.low %v1840_v32, %v1841_v33 }
 0x1fd   :  { %v1851_v35 = vrot.slane %v1844_v34, %v1817_v18 }
 0x1ff   :  { %v1858_v38 = vrot.slane %v1851_v35, %v1817_v18 }
 0x201   :  { %v1860_v39 = vsub.f32 %v1828_v37, %v1858_v38 }
 0x203   :  { %v1869_v44 = vrot.slane %v1860_v39, %v1832_v24  ;;  %v1873_v45 = vrot.slane %v1860_v39, %v1836_v25 }
 0x205   :  { %v1876_v46 = vadd.f32 %v1869_v44, %v1861_v40  ;;  %v1877_v47 = vadd.f32 %v1873_v45, %v1862_v41  ;;  %v1878_v48 = vadd.f32 %v1869_v44, %v1863_v42  ;;  %v1879_v49 = vadd.f32 %v1873_v45, %v1864_v43 }
 0x207   :  { %v1880_v50 = vmax.f32 %v1876_v46, 0.0  ;;  %v1881_v51 = vmax.f32 %v1877_v47, 0.0  ;;  %v1882_v52 = vmax.f32 %v1878_v48, 0.0  ;;  %v1883_v53 = vmax.f32 %v1879_v49, 0.0 }
 0x209   :  { %v2144_v54 = vpack.c.bf16 %v1881_v51, %v1880_v50  ;;  %v2145_v55 = vpack.c.bf16 %v1883_v53, %v1882_v52 }
 0x20b   :  { %1896 = vst [vmem:[%s3288_s4] sm:$0xff] %v2144_v54  ;;  %1897 = vst [vmem:[%s3288_s4 + $0x8] sm:$0xff] %v2145_v55 }

</bundles_post_ra>
